<compile_context>
chip_gen: v6e
topology: v6e:2x2x1
jax: 0.10.0
libtpu: 0.0.40
codegen_flags: <defaults>
</compile_context>

<pallas_src>
import numpy as np
import jax
import jax.numpy as jnp
from jax.experimental import pallas as pl
from jax.experimental.pallas import tpu as pltpu

EPS = 1e-5  # nn.InstanceNorm2d default eps


def _mis_ins_resblock_kernel(
    x_ref, z_ref,
    c1w_ref, c1b_ref, c2w_ref, c2b_ref,
    b1w1x_ref, b1w1z_ref, b1b1_ref, b1w2_ref, b1b2_ref,
    b2w1x_ref, b2w1z_ref, b2b1_ref, b2w2_ref, b2b2_ref,
    o_ref,
    pad_ref, col_ref,
):
    _, H, W, C = x_ref.shape
    HW = H * W
    x3 = x_ref[0].astype(jnp.float32)          # (H, W, C)
    z2 = z_ref[0].astype(jnp.float32)          # (1, dz)

    def conv3x3(t3d, w9_ref, b_ref):
        # --- ReflectionPad2d(1) into VMEM scratch: interior + 4 strips ---
        pad_ref[1:H + 1, 1:W + 1, :] = t3d
        pad_ref[0:1, 1:W + 1, :] = t3d[1:2]                   # top row    <- row 1
        pad_ref[H + 1:H + 2, 1:W + 1, :] = t3d[H - 2:H - 1]   # bottom row <- row H-2
        pad_ref[:, 0:1, :] = pad_ref[:, 2:3, :]               # left col (incl. corners)
        pad_ref[:, W + 1:W + 2, :] = pad_ref[:, W - 1:W, :]   # right col
        # --- im2col: 9 shifted windows laid side by side along lanes ---
        for dy in range(3):
            for dx in range(3):
                t = dy * 3 + dx
                col_ref[:, t * C:(t + 1) * C] = (
                    pad_ref[dy:dy + H, dx:dx + W, :].reshape(HW, C))
        # --- single big-K matmul: (HW, 9*Cin) @ (9*Cin, Cout) ---
        return jnp.dot(col_ref[...], w9_ref[...],
                       preferred_element_type=jnp.float32) + b_ref[...]

    def inorm(t2d):
        # InstanceNorm2d (no affine): one-pass biased stats over spatial dim.
        s = jnp.sum(t2d, axis=0, keepdims=True)
        ss = jnp.sum(t2d * t2d, axis=0, keepdims=True)
        inv_n = 1.0 / HW
        mean = s * inv_n
        var = ss * inv_n - mean * mean
        return (t2d - mean) * jax.lax.rsqrt(var + EPS)

    def blk(t2d, w1x_ref, w1z_ref, b1_ref, w2_ref, b2_ref):
        # cat([t, z_expand], channel) @ W1 == t @ W1[:C] + z @ W1[C:]
        # z part + bias computed once per block (hoisted).
        zrow = jnp.dot(z2, w1z_ref[...],
                       preferred_element_type=jnp.float32) + b1_ref[...]
        h = jnp.dot(t2d, w1x_ref[...], preferred_element_type=jnp.float32)
        h = jnp.maximum(h + zrow, 0.0)
        h = jnp.dot(h, w2_ref[...], preferred_element_type=jnp.float32) + b2_ref[...]
        return jnp.maximum(h, 0.0)             # (H*W, C)

    o1 = inorm(conv3x3(x3, c1w_ref, c1b_ref))
    o2 = blk(o1, b1w1x_ref, b1w1z_ref, b1b1_ref, b1w2_ref, b1b2_ref)
    o3 = inorm(conv3x3(o2.reshape(H, W, C), c2w_ref, c2b_ref))
    o4 = blk(o3, b2w1x_ref, b2w1z_ref, b2b1_ref, b2w2_ref, b2b2_ref)
    out = o4 + x3.reshape(HW, C)               # residual
    o_ref[0] = out.reshape(H, W, C).astype(o_ref.dtype)


def mis_ins_resblock(x_nchw, z, params):
    """x_nchw: (N, dim, H, W), z: (N, dim_extra) -> (N, dim, H, W)."""
    x = jnp.transpose(x_nchw, (0, 2, 3, 1))    # -> NHWC
    N, H, W, C = x.shape
    dz = z.shape[1]
    z3 = z.reshape(N, 1, dz)

    # Pre-reshape / pre-split weights so the kernel hits clean aligned tiles.
    c1w9 = params["c1w"].reshape(9 * C, C)     # HWIO -> (9*Cin, Cout), tap-major
    c2w9 = params["c2w"].reshape(9 * C, C)
    b1w1x, b1w1z = params["b1w1"][:C], params["b1w1"][C:]
    b2w1x, b2w1z = params["b2w1"][:C], params["b2w1"][C:]

    param_list = [
        c1w9, params["c1b"], c2w9, params["c2b"],
        b1w1x, b1w1z, params["b1b1"], params["b1w2"], params["b1b2"],
        b2w1x, b2w1z, params["b2b1"], params["b2w2"], params["b2b2"],
    ]

    in_specs = [
        pl.BlockSpec((1, H, W, C), lambda n: (n, 0, 0, 0)),
        pl.BlockSpec((1, 1, dz), lambda n: (n, 0, 0)),
    ] + [
        pl.BlockSpec(p.shape, lambda n, nd=p.ndim: (0,) * nd) for p in param_list
    ]

    out = pl.pallas_call(
        _mis_ins_resblock_kernel,
        out_shape=jax.ShapeDtypeStruct((N, H, W, C), x.dtype),
        grid_spec=pltpu.PrefetchScalarGridSpec(
            num_scalar_prefetch=0,
            grid=(N,),
            in_specs=in_specs,
            out_specs=pl.BlockSpec((1, H, W, C), lambda n: (n, 0, 0, 0)),
            scratch_shapes=[
                pltpu.VMEM((H + 2, W + 2, C), jnp.float32),   # padded tile
                pltpu.VMEM((H * W, 9 * C), jnp.float32),      # im2col buffer
            ],
        ),
        compiler_params=pltpu.CompilerParams(
            dimension_semantics=("parallel",)),
    )(x, z3, *param_list)
    return jnp.transpose(out, (0, 3, 1, 2))    # back to NCHW


def init_params(key, dim, dim_extra):
    """Deterministic synthetic init (gaussian_weights_init: N(0, 0.02), zero bias)."""
    de = dim + dim_extra
    ks = jax.random.split(key, 6)
    std = 0.02
    return {
        # conv3x3 weights stored HWIO, biases stored (1, Cout)
        "c1w": jax.random.normal(ks[0], (3, 3, dim, dim), jnp.float32) * std,
        "c1b": jnp.zeros((1, dim), jnp.float32),
        "c2w": jax.random.normal(ks[1], (3, 3, dim, dim), jnp.float32) * std,
        "c2b": jnp.zeros((1, dim), jnp.float32),
        # conv1x1 weights stored (Cin, Cout)
        "b1w1": jax.random.normal(ks[2], (de, de), jnp.float32) * std,
        "b1b1": jnp.zeros((1, de), jnp.float32),
        "b1w2": jax.random.normal(ks[3], (de, dim), jnp.float32) * std,
        "b1b2": jnp.zeros((1, dim), jnp.float32),
        "b2w1": jax.random.normal(ks[4], (de, de), jnp.float32) * std,
        "b2b1": jnp.zeros((1, de), jnp.float32),
        "b2w2": jax.random.normal(ks[5], (de, dim), jnp.float32) * std,
        "b2b2": jnp.zeros((1, dim), jnp.float32),
    }


def reference(x_nchw, z, params):
    """Pure-JAX reference mirroring the PyTorch forward pass."""
    x = jnp.transpose(x_nchw, (0, 2, 3, 1))
    N, H, W, _ = x.shape
    dz = z.shape[1]

    def rpad(t):
        return jnp.pad(t, ((0, 0), (1, 1), (1, 1), (0, 0)), mode="reflect")

    def conv3x3(t, w, b):
        y = jax.lax.conv_general_dilated(
            rpad(t), w, (1, 1), "VALID",
            dimension_numbers=("NHWC", "HWIO", "NHWC"))
        return y + b

    def inorm(t):
        m = jnp.mean(t, axis=(1, 2), keepdims=True)
        v = jnp.mean(jnp.square(t - m), axis=(1, 2), keepdims=True)
        return (t - m) * jax.lax.rsqrt(v + EPS)

    def conv1x1(t, w, b):
        return jnp.einsum("nhwc,co->nhwo", t, w) + b

    relu = lambda t: jnp.maximum(t, 0.0)
    zb = jnp.broadcast_to(z[:, None, None, :], (N, H, W, dz))

    o1 = inorm(conv3x3(x, params["c1w"], params["c1b"]))
    o2 = relu(conv1x1(relu(conv1x1(jnp.concatenate([o1, zb], -1),
                                   params["b1w1"], params["b1b1"])),
                      params["b1w2"], params["b1b2"]))
    o3 = inorm(conv3x3(o2, params["c2w"], params["c2b"]))
    o4 = relu(conv1x1(relu(conv1x1(jnp.concatenate([o3, zb], -1),
                                   params["b2w1"], params["b2b1"])),
                      params["b2w2"], params["b2b2"]))
    return jnp.transpose(o4 + x, (0, 3, 1, 2))


if __name__ == "__main__":
    N, dim, dim_extra, H, W = 2, 4, 4, 16, 16
    key = jax.random.PRNGKey(0)
    kx, kz, kp = jax.random.split(key, 3)

    x = jax.random.normal(kx, (N, dim, H, W), jnp.float32)   # NCHW like PyTorch
    z = jax.random.normal(kz, (N, dim_extra), jnp.float32)
    params = init_params(kp, dim, dim_extra)

    out = mis_ins_resblock(x, z, params)
    out = jax.block_until_ready(out)

    ref = reference(x, z, params)
    assert out.shape == (N, dim, H, W)
    np.testing.assert_allclose(np.asarray(out), np.asarray(ref),
                               atol=1e-4, rtol=1e-4)
    print("KERNEL_OK")
</pallas_src>

<mosaic_0001>
module attributes {stable_mosaic.version = 11 : i64} {
  func.func @_mis_ins_resblock_kernel(%arg0: i32, %arg1: memref<1x16x16x4xf32, #tpu.memory_space<vmem>>, %arg2: memref<1x1x4xf32, #tpu.memory_space<vmem>>, %arg3: memref<36x4xf32, #tpu.memory_space<vmem>>, %arg4: memref<1x4xf32, #tpu.memory_space<vmem>>, %arg5: memref<36x4xf32, #tpu.memory_space<vmem>>, %arg6: memref<1x4xf32, #tpu.memory_space<vmem>>, %arg7: memref<4x8xf32, #tpu.memory_space<vmem>>, %arg8: memref<4x8xf32, #tpu.memory_space<vmem>>, %arg9: memref<1x8xf32, #tpu.memory_space<vmem>>, %arg10: memref<8x4xf32, #tpu.memory_space<vmem>>, %arg11: memref<1x4xf32, #tpu.memory_space<vmem>>, %arg12: memref<4x8xf32, #tpu.memory_space<vmem>>, %arg13: memref<4x8xf32, #tpu.memory_space<vmem>>, %arg14: memref<1x8xf32, #tpu.memory_space<vmem>>, %arg15: memref<8x4xf32, #tpu.memory_space<vmem>>, %arg16: memref<1x4xf32, #tpu.memory_space<vmem>>, %arg17: memref<1x16x16x4xf32, #tpu.memory_space<vmem>>, %arg18: memref<18x18x4xf32, #tpu.memory_space<vmem>>, %arg19: memref<256x36xf32, #tpu.memory_space<vmem>>) attributes {dimension_semantics = [#tpu.dimension_semantics<parallel>], iteration_bounds = array<i64: 2>, scalar_prefetch = 0 : i64, scratch_operands = 2 : i64, tpu.core_type = #tpu.core_type<tc>, window_params = [{transform_indices = @transform_0, window_bounds = array<i64: 1, 16, 16, 4>}, {transform_indices = @transform_1, window_bounds = array<i64: 1, 1, 4>}, {pipeline_mode = #tpu.pipeline_mode<synchronous>, transform_indices = @transform_2, window_bounds = array<i64: 36, 4>}, {pipeline_mode = #tpu.pipeline_mode<synchronous>, transform_indices = @transform_3, window_bounds = array<i64: 1, 4>}, {pipeline_mode = #tpu.pipeline_mode<synchronous>, transform_indices = @transform_4, window_bounds = array<i64: 36, 4>}, {pipeline_mode = #tpu.pipeline_mode<synchronous>, transform_indices = @transform_5, window_bounds = array<i64: 1, 4>}, {pipeline_mode = #tpu.pipeline_mode<synchronous>, transform_indices = @transform_6, window_bounds = array<i64: 4, 8>}, {pipeline_mode = #tpu.pipeline_mode<synchronous>, transform_indices = @transform_7, window_bounds = array<i64: 4, 8>}, {pipeline_mode = #tpu.pipeline_mode<synchronous>, transform_indices = @transform_8, window_bounds = array<i64: 1, 8>}, {pipeline_mode = #tpu.pipeline_mode<synchronous>, transform_indices = @transform_9, window_bounds = array<i64: 8, 4>}, {pipeline_mode = #tpu.pipeline_mode<synchronous>, transform_indices = @transform_10, window_bounds = array<i64: 1, 4>}, {pipeline_mode = #tpu.pipeline_mode<synchronous>, transform_indices = @transform_11, window_bounds = array<i64: 4, 8>}, {pipeline_mode = #tpu.pipeline_mode<synchronous>, transform_indices = @transform_12, window_bounds = array<i64: 4, 8>}, {pipeline_mode = #tpu.pipeline_mode<synchronous>, transform_indices = @transform_13, window_bounds = array<i64: 1, 8>}, {pipeline_mode = #tpu.pipeline_mode<synchronous>, transform_indices = @transform_14, window_bounds = array<i64: 8, 4>}, {pipeline_mode = #tpu.pipeline_mode<synchronous>, transform_indices = @transform_15, window_bounds = array<i64: 1, 4>}, {transform_indices = @transform_16, window_bounds = array<i64: 1, 16, 16, 4>}]} {
    %c0 = arith.constant 0 : index
    %c0_0 = arith.constant 0 : index
    %c0_1 = arith.constant 0 : index
    %c0_2 = arith.constant 0 : index
    %0 = vector.load %arg1[%c0, %c0_0, %c0_1, %c0_2] : memref<1x16x16x4xf32, #tpu.memory_space<vmem>>, vector<1x16x16x4xf32>
    %1 = vector.shape_cast %0 : vector<1x16x16x4xf32> to vector<16x16x4xf32>
    %c0_3 = arith.constant 0 : index
    %c0_4 = arith.constant 0 : index
    %c0_5 = arith.constant 0 : index
    %2 = vector.load %arg2[%c0_3, %c0_4, %c0_5] : memref<1x1x4xf32, #tpu.memory_space<vmem>>, vector<1x1x4xf32>
    %3 = vector.shape_cast %2 : vector<1x1x4xf32> to vector<1x4xf32>
    %c1 = arith.constant 1 : index
    %c1_6 = arith.constant 1 : index
    %c0_7 = arith.constant 0 : index
    %4 = vector.load %arg18[%c1, %c1_6, %c0_7] : memref<18x18x4xf32, #tpu.memory_space<vmem>>, vector<16x16x4xf32>
    tpu.vector_store %arg18[%c1, %c1_6, %c0_7], %1 {strides = array<i32>} : memref<18x18x4xf32, #tpu.memory_space<vmem>>, vector<16x16x4xf32>,
    %5 = vector.extract_strided_slice %1 {offsets = [1, 0, 0], sizes = [1, 16, 4], strides = [1, 1, 1]} : vector<16x16x4xf32> to vector<1x16x4xf32>
    %c0_8 = arith.constant 0 : index
    %c1_9 = arith.constant 1 : index
    %c0_10 = arith.constant 0 : index
    %6 = vector.load %arg18[%c0_8, %c1_9, %c0_10] : memref<18x18x4xf32, #tpu.memory_space<vmem>>, vector<1x16x4xf32>
    tpu.vector_store %arg18[%c0_8, %c1_9, %c0_10], %5 {strides = array<i32>} : memref<18x18x4xf32, #tpu.memory_space<vmem>>, vector<1x16x4xf32>,
    %7 = vector.extract_strided_slice %1 {offsets = [14, 0, 0], sizes = [1, 16, 4], strides = [1, 1, 1]} : vector<16x16x4xf32> to vector<1x16x4xf32>
    %c17 = arith.constant 17 : index
    %c1_11 = arith.constant 1 : index
    %c0_12 = arith.constant 0 : index
    %8 = vector.load %arg18[%c17, %c1_11, %c0_12] : memref<18x18x4xf32, #tpu.memory_space<vmem>>, vector<1x16x4xf32>
    tpu.vector_store %arg18[%c17, %c1_11, %c0_12], %7 {strides = array<i32>} : memref<18x18x4xf32, #tpu.memory_space<vmem>>, vector<1x16x4xf32>,
    %c0_13 = arith.constant 0 : index
    %c2 = arith.constant 2 : index
    %c0_14 = arith.constant 0 : index
    %9 = vector.load %arg18[%c0_13, %c2, %c0_14] : memref<18x18x4xf32, #tpu.memory_space<vmem>>, vector<18x1x4xf32>
    %c0_15 = arith.constant 0 : index
    %c0_16 = arith.constant 0 : index
    %c0_17 = arith.constant 0 : index
    %10 = vector.load %arg18[%c0_15, %c0_16, %c0_17] : memref<18x18x4xf32, #tpu.memory_space<vmem>>, vector<18x1x4xf32>
    tpu.vector_store %arg18[%c0_15, %c0_16, %c0_17], %9 {strides = array<i32>} : memref<18x18x4xf32, #tpu.memory_space<vmem>>, vector<18x1x4xf32>,
    %c0_18 = arith.constant 0 : index
    %c15 = arith.constant 15 : index
    %c0_19 = arith.constant 0 : index
    %11 = vector.load %arg18[%c0_18, %c15, %c0_19] : memref<18x18x4xf32, #tpu.memory_space<vmem>>, vector<18x1x4xf32>
    %c0_20 = arith.constant 0 : index
    %c17_21 = arith.constant 17 : index
    %c0_22 = arith.constant 0 : index
    %12 = vector.load %arg18[%c0_20, %c17_21, %c0_22] : memref<18x18x4xf32, #tpu.memory_space<vmem>>, vector<18x1x4xf32>
    tpu.vector_store %arg18[%c0_20, %c17_21, %c0_22], %11 {strides = array<i32>} : memref<18x18x4xf32, #tpu.memory_space<vmem>>, vector<18x1x4xf32>,
    %c0_23 = arith.constant 0 : index
    %c0_24 = arith.constant 0 : index
    %c0_25 = arith.constant 0 : index
    %13 = vector.load %arg18[%c0_23, %c0_24, %c0_25] : memref<18x18x4xf32, #tpu.memory_space<vmem>>, vector<16x16x4xf32>
    %14 = vector.shape_cast %13 : vector<16x16x4xf32> to vector<256x4xf32>
    %c0_26 = arith.constant 0 : index
    %c0_27 = arith.constant 0 : index
    %15 = vector.load %arg19[%c0_26, %c0_27] : memref<256x36xf32, #tpu.memory_space<vmem>>, vector<256x4xf32>
    tpu.vector_store %arg19[%c0_26, %c0_27], %14 {strides = array<i32>} : memref<256x36xf32, #tpu.memory_space<vmem>>, vector<256x4xf32>,
    %c0_28 = arith.constant 0 : index
    %c1_29 = arith.constant 1 : index
    %c0_30 = arith.constant 0 : index
    %16 = vector.load %arg18[%c0_28, %c1_29, %c0_30] : memref<18x18x4xf32, #tpu.memory_space<vmem>>, vector<16x16x4xf32>
    %17 = vector.shape_cast %16 : vector<16x16x4xf32> to vector<256x4xf32>
    %c0_31 = arith.constant 0 : index
    %c4 = arith.constant 4 : index
    %18 = vector.load %arg19[%c0_31, %c4] : memref<256x36xf32, #tpu.memory_space<vmem>>, vector<256x4xf32>
    tpu.vector_store %arg19[%c0_31, %c4], %17 {strides = array<i32>} : memref<256x36xf32, #tpu.memory_space<vmem>>, vector<256x4xf32>,
    %c0_32 = arith.constant 0 : index
    %c2_33 = arith.constant 2 : index
    %c0_34 = arith.constant 0 : index
    %19 = vector.load %arg18[%c0_32, %c2_33, %c0_34] : memref<18x18x4xf32, #tpu.memory_space<vmem>>, vector<16x16x4xf32>
    %20 = vector.shape_cast %19 : vector<16x16x4xf32> to vector<256x4xf32>
    %c0_35 = arith.constant 0 : index
    %c8 = arith.constant 8 : index
    %21 = vector.load %arg19[%c0_35, %c8] : memref<256x36xf32, #tpu.memory_space<vmem>>, vector<256x4xf32>
    tpu.vector_store %arg19[%c0_35, %c8], %20 {strides = array<i32>} : memref<256x36xf32, #tpu.memory_space<vmem>>, vector<256x4xf32>,
    %c1_36 = arith.constant 1 : index
    %c0_37 = arith.constant 0 : index
    %c0_38 = arith.constant 0 : index
    %22 = vector.load %arg18[%c1_36, %c0_37, %c0_38] : memref<18x18x4xf32, #tpu.memory_space<vmem>>, vector<16x16x4xf32>
    %23 = vector.shape_cast %22 : vector<16x16x4xf32> to vector<256x4xf32>
    %c0_39 = arith.constant 0 : index
    %c12 = arith.constant 12 : index
    %24 = vector.load %arg19[%c0_39, %c12] : memref<256x36xf32, #tpu.memory_space<vmem>>, vector<256x4xf32>
    tpu.vector_store %arg19[%c0_39, %c12], %23 {strides = array<i32>} : memref<256x36xf32, #tpu.memory_space<vmem>>, vector<256x4xf32>,
    %c1_40 = arith.constant 1 : index
    %c1_41 = arith.constant 1 : index
    %c0_42 = arith.constant 0 : index
    %25 = vector.load %arg18[%c1_40, %c1_41, %c0_42] : memref<18x18x4xf32, #tpu.memory_space<vmem>>, vector<16x16x4xf32>
    %26 = vector.shape_cast %25 : vector<16x16x4xf32> to vector<256x4xf32>
    %c0_43 = arith.constant 0 : index
    %c16 = arith.constant 16 : index
    %27 = vector.load %arg19[%c0_43, %c16] : memref<256x36xf32, #tpu.memory_space<vmem>>, vector<256x4xf32>
    tpu.vector_store %arg19[%c0_43, %c16], %26 {strides = array<i32>} : memref<256x36xf32, #tpu.memory_space<vmem>>, vector<256x4xf32>,
    %c1_44 = arith.constant 1 : index
    %c2_45 = arith.constant 2 : index
    %c0_46 = arith.constant 0 : index
    %28 = vector.load %arg18[%c1_44, %c2_45, %c0_46] : memref<18x18x4xf32, #tpu.memory_space<vmem>>, vector<16x16x4xf32>
    %29 = vector.shape_cast %28 : vector<16x16x4xf32> to vector<256x4xf32>
    %c0_47 = arith.constant 0 : index
    %c20 = arith.constant 20 : index
    %30 = vector.load %arg19[%c0_47, %c20] : memref<256x36xf32, #tpu.memory_space<vmem>>, vector<256x4xf32>
    tpu.vector_store %arg19[%c0_47, %c20], %29 {strides = array<i32>} : memref<256x36xf32, #tpu.memory_space<vmem>>, vector<256x4xf32>,
    %c2_48 = arith.constant 2 : index
    %c0_49 = arith.constant 0 : index
    %c0_50 = arith.constant 0 : index
    %31 = vector.load %arg18[%c2_48, %c0_49, %c0_50] : memref<18x18x4xf32, #tpu.memory_space<vmem>>, vector<16x16x4xf32>
    %32 = vector.shape_cast %31 : vector<16x16x4xf32> to vector<256x4xf32>
    %c0_51 = arith.constant 0 : index
    %c24 = arith.constant 24 : index
    %33 = vector.load %arg19[%c0_51, %c24] : memref<256x36xf32, #tpu.memory_space<vmem>>, vector<256x4xf32>
    tpu.vector_store %arg19[%c0_51, %c24], %32 {strides = array<i32>} : memref<256x36xf32, #tpu.memory_space<vmem>>, vector<256x4xf32>,
    %c2_52 = arith.constant 2 : index
    %c1_53 = arith.constant 1 : index
    %c0_54 = arith.constant 0 : index
    %34 = vector.load %arg18[%c2_52, %c1_53, %c0_54] : memref<18x18x4xf32, #tpu.memory_space<vmem>>, vector<16x16x4xf32>
    %35 = vector.shape_cast %34 : vector<16x16x4xf32> to vector<256x4xf32>
    %c0_55 = arith.constant 0 : index
    %c28 = arith.constant 28 : index
    %36 = vector.load %arg19[%c0_55, %c28] : memref<256x36xf32, #tpu.memory_space<vmem>>, vector<256x4xf32>
    tpu.vector_store %arg19[%c0_55, %c28], %35 {strides = array<i32>} : memref<256x36xf32, #tpu.memory_space<vmem>>, vector<256x4xf32>,
    %c2_56 = arith.constant 2 : index
    %c2_57 = arith.constant 2 : index
    %c0_58 = arith.constant 0 : index
    %37 = vector.load %arg18[%c2_56, %c2_57, %c0_58] : memref<18x18x4xf32, #tpu.memory_space<vmem>>, vector<16x16x4xf32>
    %38 = vector.shape_cast %37 : vector<16x16x4xf32> to vector<256x4xf32>
    %c0_59 = arith.constant 0 : index
    %c32 = arith.constant 32 : index
    %39 = vector.load %arg19[%c0_59, %c32] : memref<256x36xf32, #tpu.memory_space<vmem>>, vector<256x4xf32>
    tpu.vector_store %arg19[%c0_59, %c32], %38 {strides = array<i32>} : memref<256x36xf32, #tpu.memory_space<vmem>>, vector<256x4xf32>,
    %c0_60 = arith.constant 0 : index
    %c0_61 = arith.constant 0 : index
    %40 = vector.load %arg19[%c0_60, %c0_61] : memref<256x36xf32, #tpu.memory_space<vmem>>, vector<256x36xf32>
    %c0_62 = arith.constant 0 : index
    %c0_63 = arith.constant 0 : index
    %41 = vector.load %arg3[%c0_62, %c0_63] : memref<36x4xf32, #tpu.memory_space<vmem>>, vector<36x4xf32>
    %cst = arith.constant dense<0.000000e+00> : vector<256x4xf32>
    %42 = tpu.matmul %40, %41, %cst {dimension_numbers = #tpu.dot_dimension_numbers<[1], [0], [0], [1], [0, 0, 1, 1], [], []>} : vector<256x36xf32>, vector<36x4xf32>, vector<256x4xf32> -> vector<256x4xf32>
    %c0_64 = arith.constant 0 : index
    %c0_65 = arith.constant 0 : index
    %43 = vector.load %arg4[%c0_64, %c0_65] : memref<1x4xf32, #tpu.memory_space<vmem>>, vector<1x4xf32>
    %44 = vector.broadcast %43 : vector<1x4xf32> to vector<256x4xf32>
    %45 = arith.addf %42, %44 : vector<256x4xf32>
    %cst_66 = arith.constant dense<0.000000e+00> : vector<4xf32>
    %46 = vector.multi_reduction <add>, %45, %cst_66 [0] : vector<256x4xf32> to vector<4xf32>
    %47 = vector.shape_cast %46 : vector<4xf32> to vector<1x4xf32>
    %48 = arith.mulf %45, %45 : vector<256x4xf32>
    %cst_67 = arith.constant dense<0.000000e+00> : vector<4xf32>
    %49 = vector.multi_reduction <add>, %48, %cst_67 [0] : vector<256x4xf32> to vector<4xf32>
    %50 = vector.shape_cast %49 : vector<4xf32> to vector<1x4xf32>
    %cst_68 = arith.constant 3.906250e-03 : f32
    %51 = vector.broadcast %cst_68 : f32 to vector<1x4xf32>
    %52 = arith.mulf %47, %51 : vector<1x4xf32>
    %cst_69 = arith.constant 3.906250e-03 : f32
    %53 = vector.broadcast %cst_69 : f32 to vector<1x4xf32>
    %54 = arith.mulf %50, %53 : vector<1x4xf32>
    %55 = arith.mulf %52, %52 : vector<1x4xf32>
    %56 = arith.subf %54, %55 : vector<1x4xf32>
    %57 = vector.broadcast %52 : vector<1x4xf32> to vector<256x4xf32>
    %58 = arith.subf %45, %57 : vector<256x4xf32>
    %cst_70 = arith.constant 9.99999974E-6 : f32
    %59 = vector.broadcast %cst_70 : f32 to vector<1x4xf32>
    %60 = arith.addf %56, %59 : vector<1x4xf32>
    %61 = math.rsqrt %60 : vector<1x4xf32>
    %62 = vector.broadcast %61 : vector<1x4xf32> to vector<256x4xf32>
    %63 = arith.mulf %58, %62 : vector<256x4xf32>
    %c0_71 = arith.constant 0 : index
    %c0_72 = arith.constant 0 : index
    %64 = vector.load %arg8[%c0_71, %c0_72] : memref<4x8xf32, #tpu.memory_space<vmem>>, vector<4x8xf32>
    %cst_73 = arith.constant dense<0.000000e+00> : vector<1x8xf32>
    %65 = tpu.matmul %3, %64, %cst_73 {dimension_numbers = #tpu.dot_dimension_numbers<[1], [0], [0], [1], [0, 0, 1, 1], [], []>} : vector<1x4xf32>, vector<4x8xf32>, vector<1x8xf32> -> vector<1x8xf32>
    %c0_74 = arith.constant 0 : index
    %c0_75 = arith.constant 0 : index
    %66 = vector.load %arg9[%c0_74, %c0_75] : memref<1x8xf32, #tpu.memory_space<vmem>>, vector<1x8xf32>
    %67 = arith.addf %65, %66 : vector<1x8xf32>
    %c0_76 = arith.constant 0 : index
    %c0_77 = arith.constant 0 : index
    %68 = vector.load %arg7[%c0_76, %c0_77] : memref<4x8xf32, #tpu.memory_space<vmem>>, vector<4x8xf32>
    %cst_78 = arith.constant dense<0.000000e+00> : vector<256x8xf32>
    %69 = tpu.matmul %63, %68, %cst_78 {dimension_numbers = #tpu.dot_dimension_numbers<[1], [0], [0], [1], [0, 0, 1, 1], [], []>} : vector<256x4xf32>, vector<4x8xf32>, vector<256x8xf32> -> vector<256x8xf32>
    %70 = vector.broadcast %67 : vector<1x8xf32> to vector<256x8xf32>
    %71 = arith.addf %69, %70 : vector<256x8xf32>
    %cst_79 = arith.constant 0.000000e+00 : f32
    %72 = vector.broadcast %cst_79 : f32 to vector<256x8xf32>
    %73 = arith.maximumf %71, %72 : vector<256x8xf32>
    %c0_80 = arith.constant 0 : index
    %c0_81 = arith.constant 0 : index
    %74 = vector.load %arg10[%c0_80, %c0_81] : memref<8x4xf32, #tpu.memory_space<vmem>>, vector<8x4xf32>
    %cst_82 = arith.constant dense<0.000000e+00> : vector<256x4xf32>
    %75 = tpu.matmul %73, %74, %cst_82 {dimension_numbers = #tpu.dot_dimension_numbers<[1], [0], [0], [1], [0, 0, 1, 1], [], []>} : vector<256x8xf32>, vector<8x4xf32>, vector<256x4xf32> -> vector<256x4xf32>
    %c0_83 = arith.constant 0 : index
    %c0_84 = arith.constant 0 : index
    %76 = vector.load %arg11[%c0_83, %c0_84] : memref<1x4xf32, #tpu.memory_space<vmem>>, vector<1x4xf32>
    %77 = vector.broadcast %76 : vector<1x4xf32> to vector<256x4xf32>
    %78 = arith.addf %75, %77 : vector<256x4xf32>
    %cst_85 = arith.constant 0.000000e+00 : f32
    %79 = vector.broadcast %cst_85 : f32 to vector<256x4xf32>
    %80 = arith.maximumf %78, %79 : vector<256x4xf32>
    %81 = vector.shape_cast %80 : vector<256x4xf32> to vector<16x16x4xf32>
    %c1_86 = arith.constant 1 : index
    %c1_87 = arith.constant 1 : index
    %c0_88 = arith.constant 0 : index
    %82 = vector.load %arg18[%c1_86, %c1_87, %c0_88] : memref<18x18x4xf32, #tpu.memory_space<vmem>>, vector<16x16x4xf32>
    tpu.vector_store %arg18[%c1_86, %c1_87, %c0_88], %81 {strides = array<i32>} : memref<18x18x4xf32, #tpu.memory_space<vmem>>, vector<16x16x4xf32>,
    %83 = vector.extract_strided_slice %81 {offsets = [1, 0, 0], sizes = [1, 16, 4], strides = [1, 1, 1]} : vector<16x16x4xf32> to vector<1x16x4xf32>
    %c0_89 = arith.constant 0 : index
    %c1_90 = arith.constant 1 : index
    %c0_91 = arith.constant 0 : index
    %84 = vector.load %arg18[%c0_89, %c1_90, %c0_91] : memref<18x18x4xf32, #tpu.memory_space<vmem>>, vector<1x16x4xf32>
    tpu.vector_store %arg18[%c0_89, %c1_90, %c0_91], %83 {strides = array<i32>} : memref<18x18x4xf32, #tpu.memory_space<vmem>>, vector<1x16x4xf32>,
    %85 = vector.extract_strided_slice %81 {offsets = [14, 0, 0], sizes = [1, 16, 4], strides = [1, 1, 1]} : vector<16x16x4xf32> to vector<1x16x4xf32>
    %c17_92 = arith.constant 17 : index
    %c1_93 = arith.constant 1 : index
    %c0_94 = arith.constant 0 : index
    %86 = vector.load %arg18[%c17_92, %c1_93, %c0_94] : memref<18x18x4xf32, #tpu.memory_space<vmem>>, vector<1x16x4xf32>
    tpu.vector_store %arg18[%c17_92, %c1_93, %c0_94], %85 {strides = array<i32>} : memref<18x18x4xf32, #tpu.memory_space<vmem>>, vector<1x16x4xf32>,
    %c0_95 = arith.constant 0 : index
    %c2_96 = arith.constant 2 : index
    %c0_97 = arith.constant 0 : index
    %87 = vector.load %arg18[%c0_95, %c2_96, %c0_97] : memref<18x18x4xf32, #tpu.memory_space<vmem>>, vector<18x1x4xf32>
    %c0_98 = arith.constant 0 : index
    %c0_99 = arith.constant 0 : index
    %c0_100 = arith.constant 0 : index
    %88 = vector.load %arg18[%c0_98, %c0_99, %c0_100] : memref<18x18x4xf32, #tpu.memory_space<vmem>>, vector<18x1x4xf32>
    tpu.vector_store %arg18[%c0_98, %c0_99, %c0_100], %87 {strides = array<i32>} : memref<18x18x4xf32, #tpu.memory_space<vmem>>, vector<18x1x4xf32>,
    %c0_101 = arith.constant 0 : index
    %c15_102 = arith.constant 15 : index
    %c0_103 = arith.constant 0 : index
    %89 = vector.load %arg18[%c0_101, %c15_102, %c0_103] : memref<18x18x4xf32, #tpu.memory_space<vmem>>, vector<18x1x4xf32>
    %c0_104 = arith.constant 0 : index
    %c17_105 = arith.constant 17 : index
    %c0_106 = arith.constant 0 : index
    %90 = vector.load %arg18[%c0_104, %c17_105, %c0_106] : memref<18x18x4xf32, #tpu.memory_space<vmem>>, vector<18x1x4xf32>
    tpu.vector_store %arg18[%c0_104, %c17_105, %c0_106], %89 {strides = array<i32>} : memref<18x18x4xf32, #tpu.memory_space<vmem>>, vector<18x1x4xf32>,
    %c0_107 = arith.constant 0 : index
    %c0_108 = arith.constant 0 : index
    %c0_109 = arith.constant 0 : index
    %91 = vector.load %arg18[%c0_107, %c0_108, %c0_109] : memref<18x18x4xf32, #tpu.memory_space<vmem>>, vector<16x16x4xf32>
    %92 = vector.shape_cast %91 : vector<16x16x4xf32> to vector<256x4xf32>
    %c0_110 = arith.constant 0 : index
    %c0_111 = arith.constant 0 : index
    %93 = vector.load %arg19[%c0_110, %c0_111] : memref<256x36xf32, #tpu.memory_space<vmem>>, vector<256x4xf32>
    tpu.vector_store %arg19[%c0_110, %c0_111], %92 {strides = array<i32>} : memref<256x36xf32, #tpu.memory_space<vmem>>, vector<256x4xf32>,
    %c0_112 = arith.constant 0 : index
    %c1_113 = arith.constant 1 : index
    %c0_114 = arith.constant 0 : index
    %94 = vector.load %arg18[%c0_112, %c1_113, %c0_114] : memref<18x18x4xf32, #tpu.memory_space<vmem>>, vector<16x16x4xf32>
    %95 = vector.shape_cast %94 : vector<16x16x4xf32> to vector<256x4xf32>
    %c0_115 = arith.constant 0 : index
    %c4_116 = arith.constant 4 : index
    %96 = vector.load %arg19[%c0_115, %c4_116] : memref<256x36xf32, #tpu.memory_space<vmem>>, vector<256x4xf32>
    tpu.vector_store %arg19[%c0_115, %c4_116], %95 {strides = array<i32>} : memref<256x36xf32, #tpu.memory_space<vmem>>, vector<256x4xf32>,
    %c0_117 = arith.constant 0 : index
    %c2_118 = arith.constant 2 : index
    %c0_119 = arith.constant 0 : index
    %97 = vector.load %arg18[%c0_117, %c2_118, %c0_119] : memref<18x18x4xf32, #tpu.memory_space<vmem>>, vector<16x16x4xf32>
    %98 = vector.shape_cast %97 : vector<16x16x4xf32> to vector<256x4xf32>
    %c0_120 = arith.constant 0 : index
    %c8_121 = arith.constant 8 : index
    %99 = vector.load %arg19[%c0_120, %c8_121] : memref<256x36xf32, #tpu.memory_space<vmem>>, vector<256x4xf32>
    tpu.vector_store %arg19[%c0_120, %c8_121], %98 {strides = array<i32>} : memref<256x36xf32, #tpu.memory_space<vmem>>, vector<256x4xf32>,
    %c1_122 = arith.constant 1 : index
    %c0_123 = arith.constant 0 : index
    %c0_124 = arith.constant 0 : index
    %100 = vector.load %arg18[%c1_122, %c0_123, %c0_124] : memref<18x18x4xf32, #tpu.memory_space<vmem>>, vector<16x16x4xf32>
    %101 = vector.shape_cast %100 : vector<16x16x4xf32> to vector<256x4xf32>
    %c0_125 = arith.constant 0 : index
    %c12_126 = arith.constant 12 : index
    %102 = vector.load %arg19[%c0_125, %c12_126] : memref<256x36xf32, #tpu.memory_space<vmem>>, vector<256x4xf32>
    tpu.vector_store %arg19[%c0_125, %c12_126], %101 {strides = array<i32>} : memref<256x36xf32, #tpu.memory_space<vmem>>, vector<256x4xf32>,
    %c1_127 = arith.constant 1 : index
    %c1_128 = arith.constant 1 : index
    %c0_129 = arith.constant 0 : index
    %103 = vector.load %arg18[%c1_127, %c1_128, %c0_129] : memref<18x18x4xf32, #tpu.memory_space<vmem>>, vector<16x16x4xf32>
    %104 = vector.shape_cast %103 : vector<16x16x4xf32> to vector<256x4xf32>
    %c0_130 = arith.constant 0 : index
    %c16_131 = arith.constant 16 : index
    %105 = vector.load %arg19[%c0_130, %c16_131] : memref<256x36xf32, #tpu.memory_space<vmem>>, vector<256x4xf32>
    tpu.vector_store %arg19[%c0_130, %c16_131], %104 {strides = array<i32>} : memref<256x36xf32, #tpu.memory_space<vmem>>, vector<256x4xf32>,
    %c1_132 = arith.constant 1 : index
    %c2_133 = arith.constant 2 : index
    %c0_134 = arith.constant 0 : index
    %106 = vector.load %arg18[%c1_132, %c2_133, %c0_134] : memref<18x18x4xf32, #tpu.memory_space<vmem>>, vector<16x16x4xf32>
    %107 = vector.shape_cast %106 : vector<16x16x4xf32> to vector<256x4xf32>
    %c0_135 = arith.constant 0 : index
    %c20_136 = arith.constant 20 : index
    %108 = vector.load %arg19[%c0_135, %c20_136] : memref<256x36xf32, #tpu.memory_space<vmem>>, vector<256x4xf32>
    tpu.vector_store %arg19[%c0_135, %c20_136], %107 {strides = array<i32>} : memref<256x36xf32, #tpu.memory_space<vmem>>, vector<256x4xf32>,
    %c2_137 = arith.constant 2 : index
    %c0_138 = arith.constant 0 : index
    %c0_139 = arith.constant 0 : index
    %109 = vector.load %arg18[%c2_137, %c0_138, %c0_139] : memref<18x18x4xf32, #tpu.memory_space<vmem>>, vector<16x16x4xf32>
    %110 = vector.shape_cast %109 : vector<16x16x4xf32> to vector<256x4xf32>
    %c0_140 = arith.constant 0 : index
    %c24_141 = arith.constant 24 : index
    %111 = vector.load %arg19[%c0_140, %c24_141] : memref<256x36xf32, #tpu.memory_space<vmem>>, vector<256x4xf32>
    tpu.vector_store %arg19[%c0_140, %c24_141], %110 {strides = array<i32>} : memref<256x36xf32, #tpu.memory_space<vmem>>, vector<256x4xf32>,
    %c2_142 = arith.constant 2 : index
    %c1_143 = arith.constant 1 : index
    %c0_144 = arith.constant 0 : index
    %112 = vector.load %arg18[%c2_142, %c1_143, %c0_144] : memref<18x18x4xf32, #tpu.memory_space<vmem>>, vector<16x16x4xf32>
    %113 = vector.shape_cast %112 : vector<16x16x4xf32> to vector<256x4xf32>
    %c0_145 = arith.constant 0 : index
    %c28_146 = arith.constant 28 : index
    %114 = vector.load %arg19[%c0_145, %c28_146] : memref<256x36xf32, #tpu.memory_space<vmem>>, vector<256x4xf32>
    tpu.vector_store %arg19[%c0_145, %c28_146], %113 {strides = array<i32>} : memref<256x36xf32, #tpu.memory_space<vmem>>, vector<256x4xf32>,
    %c2_147 = arith.constant 2 : index
    %c2_148 = arith.constant 2 : index
    %c0_149 = arith.constant 0 : index
    %115 = vector.load %arg18[%c2_147, %c2_148, %c0_149] : memref<18x18x4xf32, #tpu.memory_space<vmem>>, vector<16x16x4xf32>
    %116 = vector.shape_cast %115 : vector<16x16x4xf32> to vector<256x4xf32>
    %c0_150 = arith.constant 0 : index
    %c32_151 = arith.constant 32 : index
    %117 = vector.load %arg19[%c0_150, %c32_151] : memref<256x36xf32, #tpu.memory_space<vmem>>, vector<256x4xf32>
    tpu.vector_store %arg19[%c0_150, %c32_151], %116 {strides = array<i32>} : memref<256x36xf32, #tpu.memory_space<vmem>>, vector<256x4xf32>,
    %c0_152 = arith.constant 0 : index
    %c0_153 = arith.constant 0 : index
    %118 = vector.load %arg19[%c0_152, %c0_153] : memref<256x36xf32, #tpu.memory_space<vmem>>, vector<256x36xf32>
    %c0_154 = arith.constant 0 : index
    %c0_155 = arith.constant 0 : index
    %119 = vector.load %arg5[%c0_154, %c0_155] : memref<36x4xf32, #tpu.memory_space<vmem>>, vector<36x4xf32>
    %cst_156 = arith.constant dense<0.000000e+00> : vector<256x4xf32>
    %120 = tpu.matmul %118, %119, %cst_156 {dimension_numbers = #tpu.dot_dimension_numbers<[1], [0], [0], [1], [0, 0, 1, 1], [], []>} : vector<256x36xf32>, vector<36x4xf32>, vector<256x4xf32> -> vector<256x4xf32>
    %c0_157 = arith.constant 0 : index
    %c0_158 = arith.constant 0 : index
    %121 = vector.load %arg6[%c0_157, %c0_158] : memref<1x4xf32, #tpu.memory_space<vmem>>, vector<1x4xf32>
    %122 = vector.broadcast %121 : vector<1x4xf32> to vector<256x4xf32>
    %123 = arith.addf %120, %122 : vector<256x4xf32>
    %cst_159 = arith.constant dense<0.000000e+00> : vector<4xf32>
    %124 = vector.multi_reduction <add>, %123, %cst_159 [0] : vector<256x4xf32> to vector<4xf32>
    %125 = vector.shape_cast %124 : vector<4xf32> to vector<1x4xf32>
    %126 = arith.mulf %123, %123 : vector<256x4xf32>
    %cst_160 = arith.constant dense<0.000000e+00> : vector<4xf32>
    %127 = vector.multi_reduction <add>, %126, %cst_160 [0] : vector<256x4xf32> to vector<4xf32>
    %128 = vector.shape_cast %127 : vector<4xf32> to vector<1x4xf32>
    %cst_161 = arith.constant 3.906250e-03 : f32
    %129 = vector.broadcast %cst_161 : f32 to vector<1x4xf32>
    %130 = arith.mulf %125, %129 : vector<1x4xf32>
    %cst_162 = arith.constant 3.906250e-03 : f32
    %131 = vector.broadcast %cst_162 : f32 to vector<1x4xf32>
    %132 = arith.mulf %128, %131 : vector<1x4xf32>
    %133 = arith.mulf %130, %130 : vector<1x4xf32>
    %134 = arith.subf %132, %133 : vector<1x4xf32>
    %135 = vector.broadcast %130 : vector<1x4xf32> to vector<256x4xf32>
    %136 = arith.subf %123, %135 : vector<256x4xf32>
    %cst_163 = arith.constant 9.99999974E-6 : f32
    %137 = vector.broadcast %cst_163 : f32 to vector<1x4xf32>
    %138 = arith.addf %134, %137 : vector<1x4xf32>
    %139 = math.rsqrt %138 : vector<1x4xf32>
    %140 = vector.broadcast %139 : vector<1x4xf32> to vector<256x4xf32>
    %141 = arith.mulf %136, %140 : vector<256x4xf32>
    %c0_164 = arith.constant 0 : index
    %c0_165 = arith.constant 0 : index
    %142 = vector.load %arg13[%c0_164, %c0_165] : memref<4x8xf32, #tpu.memory_space<vmem>>, vector<4x8xf32>
    %cst_166 = arith.constant dense<0.000000e+00> : vector<1x8xf32>
    %143 = tpu.matmul %3, %142, %cst_166 {dimension_numbers = #tpu.dot_dimension_numbers<[1], [0], [0], [1], [0, 0, 1, 1], [], []>} : vector<1x4xf32>, vector<4x8xf32>, vector<1x8xf32> -> vector<1x8xf32>
    %c0_167 = arith.constant 0 : index
    %c0_168 = arith.constant 0 : index
    %144 = vector.load %arg14[%c0_167, %c0_168] : memref<1x8xf32, #tpu.memory_space<vmem>>, vector<1x8xf32>
    %145 = arith.addf %143, %144 : vector<1x8xf32>
    %c0_169 = arith.constant 0 : index
    %c0_170 = arith.constant 0 : index
    %146 = vector.load %arg12[%c0_169, %c0_170] : memref<4x8xf32, #tpu.memory_space<vmem>>, vector<4x8xf32>
    %cst_171 = arith.constant dense<0.000000e+00> : vector<256x8xf32>
    %147 = tpu.matmul %141, %146, %cst_171 {dimension_numbers = #tpu.dot_dimension_numbers<[1], [0], [0], [1], [0, 0, 1, 1], [], []>} : vector<256x4xf32>, vector<4x8xf32>, vector<256x8xf32> -> vector<256x8xf32>
    %148 = vector.broadcast %145 : vector<1x8xf32> to vector<256x8xf32>
    %149 = arith.addf %147, %148 : vector<256x8xf32>
    %cst_172 = arith.constant 0.000000e+00 : f32
    %150 = vector.broadcast %cst_172 : f32 to vector<256x8xf32>
    %151 = arith.maximumf %149, %150 : vector<256x8xf32>
    %c0_173 = arith.constant 0 : index
    %c0_174 = arith.constant 0 : index
    %152 = vector.load %arg15[%c0_173, %c0_174] : memref<8x4xf32, #tpu.memory_space<vmem>>, vector<8x4xf32>
    %cst_175 = arith.constant dense<0.000000e+00> : vector<256x4xf32>
    %153 = tpu.matmul %151, %152, %cst_175 {dimension_numbers = #tpu.dot_dimension_numbers<[1], [0], [0], [1], [0, 0, 1, 1], [], []>} : vector<256x8xf32>, vector<8x4xf32>, vector<256x4xf32> -> vector<256x4xf32>
    %c0_176 = arith.constant 0 : index
    %c0_177 = arith.constant 0 : index
    %154 = vector.load %arg16[%c0_176, %c0_177] : memref<1x4xf32, #tpu.memory_space<vmem>>, vector<1x4xf32>
    %155 = vector.broadcast %154 : vector<1x4xf32> to vector<256x4xf32>
    %156 = arith.addf %153, %155 : vector<256x4xf32>
    %cst_178 = arith.constant 0.000000e+00 : f32
    %157 = vector.broadcast %cst_178 : f32 to vector<256x4xf32>
    %158 = arith.maximumf %156, %157 : vector<256x4xf32>
    %159 = vector.shape_cast %1 : vector<16x16x4xf32> to vector<256x4xf32>
    %160 = arith.addf %158, %159 : vector<256x4xf32>
    %161 = vector.shape_cast %160 : vector<256x4xf32> to vector<16x16x4xf32>
    %c0_179 = arith.constant 0 : index
    %c0_180 = arith.constant 0 : index
    %c0_181 = arith.constant 0 : index
    %c0_182 = arith.constant 0 : index
    %162 = vector.load %arg17[%c0_179, %c0_180, %c0_181, %c0_182] : memref<1x16x16x4xf32, #tpu.memory_space<vmem>>, vector<1x16x16x4xf32>
    %163 = vector.shape_cast %162 : vector<1x16x16x4xf32> to vector<16x16x4xf32>
    %164 = vector.shape_cast %161 : vector<16x16x4xf32> to vector<1x16x16x4xf32>
    tpu.vector_store %arg17[%c0_179, %c0_180, %c0_181, %c0_182], %164 {strides = array<i32>} : memref<1x16x16x4xf32, #tpu.memory_space<vmem>>, vector<1x16x16x4xf32>,
    return
  }
  func.func @transform_0(%arg0: i32) -> (i32, i32, i32, i32) {
    %c0_i32 = arith.constant 0 : i32
    %c0_i32_0 = arith.constant 0 : i32
    %c0_i32_1 = arith.constant 0 : i32
    %c0_i32_2 = arith.constant 0 : i32
    return %arg0, %c0_i32, %c0_i32_0, %c0_i32_1 : i32, i32, i32, i32
  }
  func.func @transform_1(%arg0: i32) -> (i32, i32, i32) {
    %c0_i32 = arith.constant 0 : i32
    %c0_i32_0 = arith.constant 0 : i32
    %c0_i32_1 = arith.constant 0 : i32
    return %arg0, %c0_i32, %c0_i32_0 : i32, i32, i32
  }
  func.func @transform_2(%arg0: i32) -> (i32, i32) {
    %c0_i32 = arith.constant 0 : i32
    %c0_i32_0 = arith.constant 0 : i32
    %c0_i32_1 = arith.constant 0 : i32
    return %c0_i32, %c0_i32_0 : i32, i32
  }
  func.func @transform_3(%arg0: i32) -> (i32, i32) {
    %c0_i32 = arith.constant 0 : i32
    %c0_i32_0 = arith.constant 0 : i32
    %c0_i32_1 = arith.constant 0 : i32
    return %c0_i32, %c0_i32_0 : i32, i32
  }
  func.func @transform_4(%arg0: i32) -> (i32, i32) {
    %c0_i32 = arith.constant 0 : i32
    %c0_i32_0 = arith.constant 0 : i32
    %c0_i32_1 = arith.constant 0 : i32
    return %c0_i32, %c0_i32_0 : i32, i32
  }
  func.func @transform_5(%arg0: i32) -> (i32, i32) {
    %c0_i32 = arith.constant 0 : i32
    %c0_i32_0 = arith.constant 0 : i32
    %c0_i32_1 = arith.constant 0 : i32
    return %c0_i32, %c0_i32_0 : i32, i32
  }
  func.func @transform_6(%arg0: i32) -> (i32, i32) {
    %c0_i32 = arith.constant 0 : i32
    %c0_i32_0 = arith.constant 0 : i32
    %c0_i32_1 = arith.constant 0 : i32
    return %c0_i32, %c0_i32_0 : i32, i32
  }
  func.func @transform_7(%arg0: i32) -> (i32, i32) {
    %c0_i32 = arith.constant 0 : i32
    %c0_i32_0 = arith.constant 0 : i32
    %c0_i32_1 = arith.constant 0 : i32
    return %c0_i32, %c0_i32_0 : i32, i32
  }
  func.func @transform_8(%arg0: i32) -> (i32, i32) {
    %c0_i32 = arith.constant 0 : i32
    %c0_i32_0 = arith.constant 0 : i32
    %c0_i32_1 = arith.constant 0 : i32
    return %c0_i32, %c0_i32_0 : i32, i32
  }
  func.func @transform_9(%arg0: i32) -> (i32, i32) {
    %c0_i32 = arith.constant 0 : i32
    %c0_i32_0 = arith.constant 0 : i32
    %c0_i32_1 = arith.constant 0 : i32
    return %c0_i32, %c0_i32_0 : i32, i32
  }
  func.func @transform_10(%arg0: i32) -> (i32, i32) {
    %c0_i32 = arith.constant 0 : i32
    %c0_i32_0 = arith.constant 0 : i32
    %c0_i32_1 = arith.constant 0 : i32
    return %c0_i32, %c0_i32_0 : i32, i32
  }
  func.func @transform_11(%arg0: i32) -> (i32, i32) {
    %c0_i32 = arith.constant 0 : i32
    %c0_i32_0 = arith.constant 0 : i32
    %c0_i32_1 = arith.constant 0 : i32
    return %c0_i32, %c0_i32_0 : i32, i32
  }
  func.func @transform_12(%arg0: i32) -> (i32, i32) {
    %c0_i32 = arith.constant 0 : i32
    %c0_i32_0 = arith.constant 0 : i32
    %c0_i32_1 = arith.constant 0 : i32
    return %c0_i32, %c0_i32_0 : i32, i32
  }
  func.func @transform_13(%arg0: i32) -> (i32, i32) {
    %c0_i32 = arith.constant 0 : i32
    %c0_i32_0 = arith.constant 0 : i32
    %c0_i32_1 = arith.constant 0 : i32
    return %c0_i32, %c0_i32_0 : i32, i32
  }
  func.func @transform_14(%arg0: i32) -> (i32, i32) {
    %c0_i32 = arith.constant 0 : i32
    %c0_i32_0 = arith.constant 0 : i32
    %c0_i32_1 = arith.constant 0 : i32
    return %c0_i32, %c0_i32_0 : i32, i32
  }
  func.func @transform_15(%arg0: i32) -> (i32, i32) {
    %c0_i32 = arith.constant 0 : i32
    %c0_i32_0 = arith.constant 0 : i32
    %c0_i32_1 = arith.constant 0 : i32
    return %c0_i32, %c0_i32_0 : i32, i32
  }
  func.func @transform_16(%arg0: i32) -> (i32, i32, i32, i32) {
    %c0_i32 = arith.constant 0 : i32
    %c0_i32_0 = arith.constant 0 : i32
    %c0_i32_1 = arith.constant 0 : i32
    %c0_i32_2 = arith.constant 0 : i32
    return %arg0, %c0_i32, %c0_i32_0, %c0_i32_1 : i32, i32, i32, i32
  }
}

</mosaic_0001>

<bundles_post_ra>
// kernel: tpu_custom_call.1
= control target key start
LH: loop header
LB: loop body
LE: loop exit
PB: predicated region body
PF: predicated region fallthrough
CT: control target
= control target key end

     0   :  { %s7821_s21 = smov 0   ;;  %s10952_s0 = inlined_call_operand.vmem [shape: f32[2,16,16,4], index: 0, kind: input, shape index: {}]   ;;  %s10953_s1 = inlined_call_operand.vmem [shape: f32[2,1,4], index: 1, kind: input, shape index: {}]   ;;  %s10954_s2 = inlined_call_operand.vmem [shape: f32[36,4], index: 2, kind: input, shape index: {}]   ;;  %s10955_s3 = inlined_call_operand.vmem [shape: f32[1,4], index: 3, kind: input, shape index: {}]   ;;  %s10956_s4 = inlined_call_operand.vmem [shape: f32[36,4], index: 4, kind: input, shape index: {}]   ;;  %s10957_s5 = inlined_call_operand.vmem [shape: f32[1,4], index: 5, kind: input, shape index: {}]   ;;  %s10958_s6 = inlined_call_operand.vmem [shape: f32[4,8], index: 6, kind: input, shape index: {}]   ;;  %s10959_s7 = inlined_call_operand.vmem [shape: f32[4,8], index: 7, kind: input, shape index: {}]   ;;  %s10960_s8 = inlined_call_operand.vmem [shape: f32[1,8], index: 8, kind: input, shape index: {}]   ;;  %s10961_s9 = inlined_call_operand.vmem [shape: f32[8,4], index: 9, kind: input, shape index: {}]   ;;  %s10962_s10 = inlined_call_operand.vmem [shape: f32[1,4], index: 10, kind: input, shape index: {}]   ;;  %s10963_s11 = inlined_call_operand.vmem [shape: f32[4,8], index: 11, kind: input, shape index: {}]   ;;  %s10964_s12 = inlined_call_operand.vmem [shape: f32[4,8], index: 12, kind: input, shape index: {}]   ;;  %s10965_s13 = inlined_call_operand.vmem [shape: f32[1,8], index: 13, kind: input, shape index: {}]   ;;  %s10966_s14 = inlined_call_operand.vmem [shape: f32[8,4], index: 14, kind: input, shape index: {}]   ;;  %s10967_s15 = inlined_call_operand.vmem [shape: f32[1,4], index: 15, kind: input, shape index: {}]   ;;  %s10968_s16 = inlined_call_operand.vmem [shape: f32[2,16,16,4], index: 16, kind: output, shape index: {}]  }
   0x1   :  { %11005 = sst [smem:[#allocation28_spill]] %s10952_s0 }
   0x2 LB: > { %s6942_s22 = sadd.s32 4294967295, %s7724_s21   ;;  %p6946_p0 = scmp.ge.s32.totalorder %s7724_s21, 1  ;;  %s7724_s21 = sphi %s7821_s21, %s26_s21  }
   0x3   : > { %p470_p1 = scmp.lt.s32.totalorder %s7724_s21, 3 }
   0x5   : > { %p471_p2 = pnand %p6946_p0, %p470_p1 }
   0x7   : > { %474 = sbr.rel (%p471_p2) target bundleno = 2639 (0xa4f), region = 84 }
   0xc   : > { %p523_p3 = scmp.lt.s32.totalorder %s6942_s22, 1  ;;  %vm570_vm0 = vcmask 31744   ;;  %s11006_s26 = sld [smem:[#allocation28_spill]]  ;;  %vm626_vm1 = vcmask 24576   ;;  %v2326_v48 = vld [vmem:[%s10954_s2 + $0x20] sm:$0xf] }
   0xd   : > { %s11002_s28 = smov 8   ;;  %s7727_s29 = smov 4   ;;  %vm2431_vm2 = vcmask 1043456   ;;  %v2325_v49 = vld [vmem:[%s10954_s2 + $0x18] sm:$0xff]  ;;  %v2324_v50 = vld [vmem:[%s10954_s2 + $0x10] sm:$0xff]  ;;  %v2323_v53 = vld [vmem:[%s10954_s2 + $0x8] sm:$0xff] }
   0xe   : > { %s11063_s22 = smov (!%p523_p3, %s6942_s22), 1  ;;  %s10972_s30 = smov 12   ;;  %7369 = vmatprep.subr.msk.mxu0 %vm2431_vm2, %v2326_v48  ;;  %v2322_v55 = vld [vmem:[%s10954_s2] sm:$0xff]  ;;  %vm905_vm3 = vcmask 64544   ;;  %vm1098_vm4 = vcmask 97344   ;;  %vm1291_vm5 = vcmask 130144  }
   0xf   : > { %s10969_s23 = sshll.u32 %s11063_s22, 8  ;;  %s7729_s0 = smov 16   ;;  %7370 = vmatpush3.msk.msra.mxu0 %vm2431_vm2, %v2326_v48  ;;  %vm1484_vm6 = vcmask 162944   ;;  %vm1677_vm7 = vcmask 195744   ;;  %vm1871_vm8 = vcmask 228544   ;;  %vm2064_vm9 = vcmask 261344  }
  0x10   : > { %s7730_s17 = smov 20   ;;  %s10970_s18 = smov 24   ;;  %7371 = vmatprep.subr.mxu0 %v2325_v49  ;;  %vm2257_vm10 = vcmask 294144   ;;  %vm2334_vm11 = vcmask 293888   ;;  %vm7735_vm12 = vmmov 0   ;;  %vm3347_vm13 = vcmask 64512  }
  0x11   : > { %s7732_s19 = smov 28   ;;  %7372 = vmatpush3.msra.mxu0 %v2325_v49  ;;  %s11000_s25 = smov 32  }
  0x12   : > { %s7837_s27 = scalar_lea.vmem %s11006_s26, %s10969_s23  ;;  %7373 = vmatprep.subr.mxu0 %v2324_v50  ;;  %s11013_s23 = smov 24  }
  0x13   : > { %v7840_v0 = vld [vmem:[%s7837_s27 + $0x10] sm:$0xff]  ;;  %v7843_v1 = vld [vmem:[%s7837_s27 + $0x18] sm:$0xff]  ;;  %v7846_v2 = vld [vmem:[%s7837_s27] sm:$0xff]  ;;  %7374 = vmatpush3.msra.mxu0 %v2324_v50 }
  0x14   : > { %603 = vst.msk [vmem:[#allocation2 + $0x1] sm:$0xff] %vm570_vm0, %v7840_v0  ;;  %604 = vst.msk [vmem:[#allocation2 + $0x9] sm:$0xff] %vm570_vm0, %v7843_v1  ;;  %v7857_v3 = vld [vmem:[%s7837_s27 + $0x8] sm:$0xff]  ;;  %v7862_v4 = vld [vmem:[%s7837_s27 + $0x20] sm:$0xff]  ;;  %7375 = vmatprep.subr.mxu0 %v2323_v53 }
  0x15   : > { %573 = vst.msk [vmem:[#allocation2 + $0x31] sm:$0xff] %vm570_vm0, %v7840_v0  ;;  %574 = vst.msk [vmem:[#allocation2 + $0x39] sm:$0xff] %vm570_vm0, %v7843_v1  ;;  %v7865_v5 = vld [vmem:[%s7837_s27 + $0x28] sm:$0xff]  ;;  %v7874_v6 = vld [vmem:[%s7837_s27 + $0x30] sm:$0xff]  ;;  %7376 = vmatpush3.msra.mxu0 %v2323_v53 }
  0x16   : > { %571 = vst.msk [vmem:[#allocation2 + $0x19] sm:$0xff] %vm570_vm0, %v7846_v2  ;;  %572 = vst.msk [vmem:[#allocation2 + $0x21] sm:$0xff] %vm570_vm0, %v7857_v3  ;;  %v7877_v7 = vld [vmem:[%s7837_s27 + $0x38] sm:$0xff]  ;;  %v7880_v8 = vld [vmem:[%s7837_s27 + $0x40] sm:$0xff]  ;;  %7377 = vmatprep.subr.mxu0 %v2322_v55 }
  0x17   : > { %575 = vst.msk [vmem:[#allocation2 + $0x49] sm:$0xff] %vm570_vm0, %v7862_v4  ;;  %576 = vst.msk [vmem:[#allocation2 + $0x51] sm:$0xff] %vm570_vm0, %v7865_v5  ;;  %v7889_v9 = vld [vmem:[%s7837_s27 + $0x48] sm:$0xff]  ;;  %v7936_v37 = vld [vmem:[%s7837_s27 + $0x50] sm:$0xff]  ;;  %7378 = vmatpush3.msra.mxu0 %v2322_v55 }
  0x18   : > { %11007 = vst [vmem:[#allocation4_spill] sm:$0xff] %v7880_v8  ;;  %577 = vst.msk [vmem:[#allocation2 + $0x61] sm:$0xff] %vm570_vm0, %v7874_v6  ;;  %v7957_v44 = vld [vmem:[%s7837_s27 + $0x58] sm:$0xff]  ;;  %v8000_v56 = vld [vmem:[%s7837_s27 + $0x60] sm:$0xff] }
  0x19   : > { %578 = vst.msk [vmem:[#allocation2 + $0x69] sm:$0xff] %vm570_vm0, %v7877_v7  ;;  %579 = vst.msk [vmem:[#allocation2 + $0x79] sm:$0xff] %vm570_vm0, %v7880_v8  ;;  %v8012_v59 = vld [vmem:[%s7837_s27 + $0x68] sm:$0xff] }
  0x1a   : > { %11008 = vst [vmem:[#allocation5_spill] sm:$0xff] %v7889_v9  ;;  %580 = vst.msk [vmem:[#allocation2 + $0x81] sm:$0xff] %vm570_vm0, %v7889_v9 }
  0x1b   : > { %v938_v10 = vld [vmem:[#allocation2 + $0x2] sm:$0xff]  ;;  %v645_v14 = vld [vmem:[#allocation2 + $0xf] sm:$0x1]  ;;  %11009 = vst [vmem:[#allocation6_spill] sm:$0xff] %v7936_v37  ;;  %581 = vst.msk [vmem:[#allocation2 + $0x91] sm:$0xff] %vm570_vm0, %v7936_v37 }
  0x1c   : > { %v745_v11 = vld [vmem:[#allocation2 + $0x1] sm:$0xff]  ;;  %1002 = vrot.lane.b32.xlu1 %v938_v10, %s11002_s28  ;;  %v746_v13 = vld [vmem:[#allocation2 + $0x9] sm:$0xff]  ;;  %663 = vst.msk [vmem:[#allocation2 + $0x11] sm:$0x1] %vm626_vm1, %v645_v14  ;;  %v610_v16 = vld [vmem:[#allocation2 + $0x32] sm:$0x1] }
  0x1d   : > { %809 = vrot.lane.b32.xlu0 %v745_v11, %s7727_s29  ;;  %v1132_v12 = vld [vmem:[#allocation2 + $0x20] sm:$0xff]  ;;  %v609_v15 = vld [vmem:[#allocation2 + $0x1a] sm:$0x1]  ;;  %629 = vst.msk [vmem:[#allocation2 + $0x30] sm:$0x1] %vm626_vm1, %v610_v16  ;;  %v682_v29 = vld [vmem:[#allocation2 + $0x8] sm:$0xff] }
  0x1e   : > { %716 = vst.msk [vmem:[#allocation3 + $0x18] sm:$0xff] %vm570_vm0, %v1132_v12  ;;  %v646_v17 = vld [vmem:[#allocation2 + $0x27] sm:$0x1]  ;;  %v7900_v18 = vld [vmem:[#allocation2 + $0x38] sm:$0xff]  ;;  %v611_v20 = vld [vmem:[#allocation2 + $0x4a] sm:$0x1] }
  0x1f   : > { %628 = vst.msk [vmem:[#allocation2 + $0x18] sm:$0x1] %vm626_vm1, %v609_v15  ;;  %664 = vst.msk [vmem:[#allocation2 + $0x29] sm:$0x1] %vm626_vm1, %v646_v17  ;;  %v647_v19 = vld [vmem:[#allocation2 + $0x3f] sm:$0x1] }
  0x20   : > { %1197 = vrot.lane.b32.xlu1 %v1132_v12, %s10972_s30  ;;  %718 = vst.msk [vmem:[#allocation3 + $0x28] sm:$0xff] %vm570_vm0, %v7900_v18  ;;  %v1324_v21 = vld [vmem:[#allocation2 + $0x19] sm:$0xff]  ;;  %v7908_v22 = vld [vmem:[#allocation2 + $0x50] sm:$0xff]  ;;  %v612_v24 = vld [vmem:[#allocation2 + $0x62] sm:$0x1] }
  0x21   : > { %811 = vrot.lane.b32.xlu0 %v746_v13, %s7727_s29  ;;  %665 = vst.msk [vmem:[#allocation2 + $0x41] sm:$0x1] %vm626_vm1, %v647_v19  ;;  %630 = vst.msk [vmem:[#allocation2 + $0x48] sm:$0x1] %vm626_vm1, %v611_v20  ;;  %v648_v23 = vld [vmem:[#allocation2 + $0x57] sm:$0x1] }
  0x22   : > { %720 = vst.msk [vmem:[#allocation3 + $0x38] sm:$0xff] %vm570_vm0, %v7908_v22  ;;  %v1325_v25 = vld [vmem:[#allocation2 + $0x21] sm:$0xff]  ;;  %v649_v27 = vld [vmem:[#allocation2 + $0x6f] sm:$0x1]  ;;  %714 = vst.msk [vmem:[#allocation3 + $0x8] sm:$0xff] %vm570_vm0, %v682_v29 }
  0x23   : > { %666 = vst.msk [vmem:[#allocation2 + $0x59] sm:$0x1] %vm626_vm1, %v648_v23  ;;  %631 = vst.msk [vmem:[#allocation2 + $0x60] sm:$0x1] %vm626_vm1, %v612_v24  ;;  %v7914_v26 = vld [vmem:[#allocation2 + $0x68] sm:$0xff]  ;;  %v1517_v30 = vld [vmem:[#allocation2 + $0x1a] sm:$0xff] }
  0x24   : > { %813 = vrot.lane.b32.xlu1 %v1324_v21, %s7727_s29  ;;  %v608_v28 = vld [vmem:[#allocation2 + $0x2] sm:$0x1]  ;;  %722 = vst.msk [vmem:[#allocation3 + $0x48] sm:$0xff] %vm570_vm0, %v7914_v26  ;;  %v613_v32 = vld [vmem:[#allocation2 + $0x7a] sm:$0x1]  ;;  %v1711_v33 = vld [vmem:[#allocation2 + $0x30] sm:$0xff] }
  0x25   : > { %1388 = vrot.lane.b32.xlu0 %v1324_v21, %s7729_s0  ;;  %667 = vst.msk [vmem:[#allocation2 + $0x71] sm:$0x1] %vm626_vm1, %v649_v27  ;;  %627 = vst.msk [vmem:[#allocation2] sm:$0x1] %vm626_vm1, %v608_v28  ;;  %v7925_v34 = vld [vmem:[#allocation2 + $0x80] sm:$0xff]  ;;  %v939_v40 = vld [vmem:[#allocation2 + $0xa] sm:$0xff] }
  0x26   : > { %v1131_v31 = vld [vmem:[#allocation2 + $0x18] sm:$0xff]  ;;  %632 = vst.msk [vmem:[#allocation2 + $0x78] sm:$0x1] %vm626_vm1, %v613_v32  ;;  %v650_v36 = vld [vmem:[#allocation2 + $0x87] sm:$0x1]  ;;  %11010 = vst [vmem:[#allocation7_spill] sm:$0xff] %v7957_v44 }
  0x27   : > { %715 = vst.msk [vmem:[#allocation3 + $0x10] sm:$0xff] %vm570_vm0, %v1131_v31  ;;  %717 = vst.msk [vmem:[#allocation3 + $0x20] sm:$0xff] %vm570_vm0, %v1711_v33  ;;  %v1518_v42 = vld [vmem:[#allocation2 + $0x22] sm:$0xff]  ;;  %v614_v43 = vld [vmem:[#allocation2 + $0x92] sm:$0x1] }
  0x28   : > { %1581 = vrot.lane.b32.xlu1 %v1517_v30, %s7730_s17  ;;  %v7930_v35 = vld [vmem:[#allocation2 + $0x48] sm:$0xff]  ;;  %724 = vst.msk [vmem:[#allocation3 + $0x58] sm:$0xff] %vm570_vm0, %v7925_v34  ;;  %582 = vst.msk [vmem:[#allocation2 + $0x99] sm:$0xff] %vm570_vm0, %v7957_v44  ;;  %v1904_v45 = vld [vmem:[#allocation2 + $0x31] sm:$0xff] }
  0x29   : > { %1390 = vrot.lane.b32.xlu0 %v1325_v25, %s7729_s0  ;;  %668 = vst.msk [vmem:[#allocation2 + $0x89] sm:$0x1] %vm626_vm1, %v650_v36  ;;  %633 = vst.msk [vmem:[#allocation2 + $0x90] sm:$0x1] %vm626_vm1, %v614_v43  ;;  %v2097_v51 = vld [vmem:[#allocation2 + $0x32] sm:$0xff]  ;;  %v2098_v57 = vld [vmem:[#allocation2 + $0x3a] sm:$0xff] }
  0x2a   : > { %719 = vst.msk [vmem:[#allocation3 + $0x30] sm:$0xff] %vm570_vm0, %v7930_v35  ;;  %v7940_v38 = vld [vmem:[#allocation2 + $0x60] sm:$0xff]  ;;  %11011 = vst [vmem:[#allocation8_spill] sm:$0xff] %v8000_v56  ;;  %v1906_v61 = vld [vmem:[#allocation2 + $0x49] sm:$0xff] }
  0x2b   : > { %721 = vst.msk [vmem:[#allocation3 + $0x40] sm:$0xff] %vm570_vm0, %v7940_v38  ;;  %v1905_v52 = vld [vmem:[#allocation2 + $0x39] sm:$0xff]  ;;  %583 = vst.msk [vmem:[#allocation2 + $0xa9] sm:$0xff] %vm570_vm0, %v8000_v56  ;;  %v2099_v63 = vld [vmem:[#allocation2 + $0x4a] sm:$0xff] }
  0x2c   : > { %1006 = vrot.lane.b32.xlu1 %v1517_v30, %s11002_s28  ;;  %v681_v39 = vld [vmem:[#allocation2] sm:$0xff]  ;;  %11012 = vst [vmem:[#allocation9_spill] sm:$0xff] %v8012_v59  ;;  %584 = vst.msk [vmem:[#allocation2 + $0xb1] sm:$0xff] %vm570_vm0, %v8012_v59  ;;  %v1907_v10 = vld [vmem:[#allocation2 + $0x51] sm:$0xff] }
  0x2d   : > { %815 = vrot.lane.b32.xlu0 %v1325_v25, %s7727_s29  ;;  %713 = vst.msk [vmem:[#allocation3] sm:$0xff] %vm570_vm0, %v681_v39  ;;  %v7949_v41 = vld [vmem:[#allocation2 + $0x78] sm:$0xff]  ;;  %v8040_v12 = vld [vmem:[%s7837_s27 + $0x70] sm:$0xff]  ;;  %v1908_v17 = vld [vmem:[#allocation2 + $0x61] sm:$0xff] }
  0x2e   : > { %723 = vst.msk [vmem:[#allocation3 + $0x50] sm:$0xff] %vm570_vm0, %v7949_v41  ;;  %11015 = vst [vmem:[#allocation10_spill] sm:$0xff] %v8040_v12  ;;  %v2100_v13 = vld [vmem:[#allocation2 + $0x52] sm:$0xff]  ;;  %v2101_v19 = vld [vmem:[#allocation2 + $0x62] sm:$0xff] }
  0x2f   : > { %v7969_v47 = vld [vmem:[#allocation2 + $0x98] sm:$0xff]  ;;  %585 = vst.msk [vmem:[#allocation2 + $0xc1] sm:$0xff] %vm570_vm0, %v8040_v12  ;;  %v1909_v20 = vld [vmem:[#allocation2 + $0x69] sm:$0xff] }
  0x30   : > { %1004 = vrot.lane.b32.xlu1 %v939_v40, %s11002_s28  ;;  %v7965_v46 = vld [vmem:[#allocation2 + $0x90] sm:$0xff]  ;;  %726 = vst.msk [vmem:[#allocation3 + $0x68] sm:$0xff] %vm570_vm0, %v7969_v47  ;;  %v651_v54 = vld [vmem:[#allocation2 + $0x9f] sm:$0x1]  ;;  %v8095_v29 = vld [vmem:[%s7837_s27 + $0x88] sm:$0xff] }
  0x31   : > { %1195 = vrot.lane.b32.xlu0 %v1131_v31, %s10972_s30  ;;  %725 = vst.msk [vmem:[#allocation3 + $0x60] sm:$0xff] %vm570_vm0, %v7965_v46  ;;  %v8052_v15 = vld [vmem:[%s7837_s27 + $0x78] sm:$0xff]  ;;  %v2102_v23 = vld [vmem:[#allocation2 + $0x6a] sm:$0xff]  ;;  %11018 = vst [vmem:[#allocation13_spill] sm:$0xff] %v8095_v29 }
  0x32   : > { %669 = vst.msk [vmem:[#allocation2 + $0xa1] sm:$0x1] %vm626_vm1, %v651_v54  ;;  %v615_v58 = vld [vmem:[#allocation2 + $0xaa] sm:$0x1]  ;;  %11016 = vst [vmem:[#allocation11_spill] sm:$0xff] %v8052_v15 }
  0x33   : > { %634 = vst.msk [vmem:[#allocation2 + $0xa8] sm:$0x1] %vm626_vm1, %v615_v58  ;;  %v8026_v62 = vld [vmem:[#allocation2 + $0xb0] sm:$0xff] }
  0x34   : > { %1775 = vrot.lane.b32.xlu1 %v1711_v33, %s10970_s18  ;;  %728 = vst.msk [vmem:[#allocation3 + $0x78] sm:$0xff] %vm570_vm0, %v8026_v62  ;;  %v652_v11 = vld [vmem:[#allocation2 + $0xb7] sm:$0x1]  ;;  %586 = vst.msk [vmem:[#allocation2 + $0xc9] sm:$0xff] %vm570_vm0, %v8052_v15 }
  0x35   : > { %1583 = vrot.lane.b32.xlu0 %v1518_v42, %s7730_s17  ;;  %670 = vst.msk [vmem:[#allocation2 + $0xb9] sm:$0x1] %vm626_vm1, %v652_v11 }
  0x36   : > { %v616_v14 = vld [vmem:[#allocation2 + $0xc2] sm:$0x1]  ;;  %588 = vst.msk [vmem:[#allocation2 + $0xe1] sm:$0xff] %vm570_vm0, %v8095_v29 }
  0x37   : > { %635 = vst.msk [vmem:[#allocation2 + $0xc0] sm:$0x1] %vm626_vm1, %v616_v14  ;;  %v1912_v14 = vld [vmem:[#allocation2 + $0x91] sm:$0xff] }
  0x38   : > { %1199 = vrot.lane.b32.xlu1 %v1711_v33, %s10972_s30  ;;  %v1910_v33 = vld [vmem:[#allocation2 + $0x79] sm:$0xff] }
  0x39   : > { %1008 = vrot.lane.b32.xlu0 %v1518_v42, %s11002_s28  ;;  %v1911_v42 = vld [vmem:[#allocation2 + $0x81] sm:$0xff] }
  0x3a   : > { %v8017_v60 = vld [vmem:[#allocation2 + $0xa8] sm:$0xff] }
  0x3b   : > { %727 = vst.msk [vmem:[#allocation3 + $0x70] sm:$0xff] %vm570_vm0, %v8017_v60  ;;  %v653_v21 = vld [vmem:[#allocation2 + $0xcf] sm:$0x1] }
  0x3c   : > { %1968 = vrot.lane.b32.xlu1 %v1904_v45, %s7732_s19  ;;  %671 = vst.msk [vmem:[#allocation2 + $0xd1] sm:$0x1] %vm626_vm1, %v653_v21 }
  0x3d   : > { %1777 = vrot.lane.b32.xlu0 %v7900_v18, %s10970_s18  ;;  %v654_v48 = vld [vmem:[#allocation2 + $0xe7] sm:$0x1]  ;;  %s8813_s18 = scalar_lea.vmem %s10953_s1, %s11063_s22 }
  0x3e   : > { %v8057_v16 = vld [vmem:[#allocation2 + $0xc0] sm:$0xff]  ;;  %672 = vst.msk [vmem:[#allocation2 + $0xe9] sm:$0x1] %vm626_vm1, %v654_v48  ;;  %v8210_v48 = vld [vmem:[%s7837_s27 + $0xa8] sm:$0xff] }
  0x3f   : > { %729 = vst.msk [vmem:[#allocation3 + $0x80] sm:$0xff] %vm570_vm0, %v8057_v16  ;;  %11022 = vst [vmem:[#allocation17_spill] sm:$0xff] %v8210_v48 }
  0x40   : > { %1392 = vrot.lane.b32.xlu1 %v1904_v45, %s7729_s0  ;;  %592 = vst.msk [vmem:[#allocation2 + $0x111] sm:$0xff] %vm570_vm0, %v8210_v48 }
  0x41   : > { %1201 = vrot.lane.b32.xlu0 %v7900_v18, %s10972_s30  ;;  %s11014_s30 = smov 12   ;;  %v8066_v18 = vld [vmem:[#allocation2 + $0xc8] sm:$0xff] }
  0x42   : > { %730 = vst.msk [vmem:[#allocation3 + $0x88] sm:$0xff] %vm570_vm0, %v8066_v18 }
  0x44   : > { %2161 = vrot.lane.b32.xlu1 %v2097_v51, %s11000_s25 }
  0x45   : > { %1970 = vrot.lane.b32.xlu0 %v1905_v52, %s7732_s19 }
  0x48   : > { %1394 = vrot.lane.b32.xlu1 %v1905_v52, %s7729_s0 }
  0x49   : > { %817 = vrot.lane.b32.xlu0 %v1904_v45, %s7727_s29 }
  0x4c   : > { %2163 = vrot.lane.b32.xlu1 %v2098_v57, %s11000_s25 }
  0x4d   : > { %1585 = vrot.lane.b32.xlu0 %v2097_v51, %s7730_s17 }
  0x50   : > { %1010 = vrot.lane.b32.xlu1 %v2097_v51, %s11002_s28  ;;  %v2104_v51 = vld [vmem:[#allocation2 + $0x82] sm:$0xff] }
  0x51   : > { %819 = vrot.lane.b32.xlu0 %v1905_v52, %s7727_s29 }
  0x54   : > { %1779 = vrot.lane.b32.xlu1 %v7930_v35, %s11013_s23 }
  0x55   : > { %1587 = vrot.lane.b32.xlu0 %v2098_v57, %s7730_s17 }
  0x58   : > { %1203 = vrot.lane.b32.xlu1 %v7930_v35, %s11014_s30 }
  0x59   : > { %1012 = vrot.lane.b32.xlu0 %v2098_v57, %s11002_s28 }
  0x5c   : > { %1972 = vrot.lane.b32.xlu1 %v1906_v61, %s7732_s19 }
  0x5d   : > { %1781 = vrot.lane.b32.xlu0 %v7908_v22, %s11013_s23 }
  0x60   : > { %1396 = vrot.lane.b32.xlu1 %v1906_v61, %s7729_s0 }
  0x61   : > { %1205 = vrot.lane.b32.xlu0 %v7908_v22, %s11014_s30  ;;  %v8080_v22 = vld [vmem:[%s7837_s27 + $0x80] sm:$0xff] }
  0x62   : > { %11017 = vst [vmem:[#allocation12_spill] sm:$0xff] %v8080_v22  ;;  %587 = vst.msk [vmem:[#allocation2 + $0xd9] sm:$0xff] %vm570_vm0, %v8080_v22 }
  0x64   : > { %2165 = vrot.lane.b32.xlu1 %v2099_v63, %s11000_s25 }
  0x65   : > { %1974 = vrot.lane.b32.xlu0 %v1907_v10, %s7732_s19 }
  0x68   : > { %1398 = vrot.lane.b32.xlu1 %v1907_v10, %s7729_s0 }
  0x69   : > { %821 = vrot.lane.b32.xlu0 %v1906_v61, %s7727_s29  ;;  %v617_v24 = vld [vmem:[#allocation2 + $0xda] sm:$0x1] }
  0x6a   : > { %636 = vst.msk [vmem:[#allocation2 + $0xd8] sm:$0x1] %vm626_vm1, %v617_v24  ;;  %v2105_v24 = vld [vmem:[#allocation2 + $0x92] sm:$0xff] }
  0x6c   : > { %2167 = vrot.lane.b32.xlu1 %v2100_v13, %s11000_s25 }
  0x6d   : > { %1589 = vrot.lane.b32.xlu0 %v2099_v63, %s7730_s17 }
  0x70   : > { %1014 = vrot.lane.b32.xlu1 %v2099_v63, %s11002_s28  ;;  %v8152_v63 = vld [vmem:[%s7837_s27 + $0x98] sm:$0xff] }
  0x71   : > { %823 = vrot.lane.b32.xlu0 %v1907_v10, %s7727_s29  ;;  %v8100_v30 = vld [vmem:[#allocation2 + $0xd8] sm:$0xff]  ;;  %11020 = vst [vmem:[#allocation15_spill] sm:$0xff] %v8152_v63  ;;  %590 = vst.msk [vmem:[#allocation2 + $0xf9] sm:$0xff] %vm570_vm0, %v8152_v63 }
  0x72   : > { %731 = vst.msk [vmem:[#allocation3 + $0x90] sm:$0xff] %vm570_vm0, %v8100_v30 }
  0x74   : > { %1783 = vrot.lane.b32.xlu1 %v7940_v38, %s11013_s23 }
  0x75   : > { %1591 = vrot.lane.b32.xlu0 %v2100_v13, %s7730_s17 }
  0x78   : > { %1207 = vrot.lane.b32.xlu1 %v7940_v38, %s11014_s30  ;;  %v8110_v38 = vld [vmem:[#allocation2 + $0xe0] sm:$0xff] }
  0x79   : > { %1016 = vrot.lane.b32.xlu0 %v2100_v13, %s11002_s28  ;;  %732 = vst.msk [vmem:[#allocation3 + $0x98] sm:$0xff] %vm570_vm0, %v8110_v38 }
  0x7c   : > { %1976 = vrot.lane.b32.xlu1 %v1908_v17, %s7732_s19 }
  0x7d   : > { %1785 = vrot.lane.b32.xlu0 %v7914_v26, %s11013_s23 }
  0x80   : > { %1400 = vrot.lane.b32.xlu1 %v1908_v17, %s7729_s0 }
  0x81   : > { %1209 = vrot.lane.b32.xlu0 %v7914_v26, %s11014_s30 }
  0x84   : > { %2169 = vrot.lane.b32.xlu1 %v2101_v19, %s11000_s25 }
  0x85   : > { %1978 = vrot.lane.b32.xlu0 %v1909_v20, %s7732_s19 }
  0x88   : > { %1402 = vrot.lane.b32.xlu1 %v1909_v20, %s7729_s0 }
  0x89   : > { %825 = vrot.lane.b32.xlu0 %v1908_v17, %s7727_s29 }
  0x8c   : > { %2171 = vrot.lane.b32.xlu1 %v2102_v23, %s11000_s25 }
  0x8d   : > { %1593 = vrot.lane.b32.xlu0 %v2101_v19, %s7730_s17 }
  0x8e   : > { %v1003_v25 = vpop.permute.xlu1 %1002 }
  0x8f   : > { %v810_v26 = vpop.permute.xlu0 %809 }
  0x90   : > { %906 = vst.msk [vmem:[#allocation3] sm:$0xff] %vm905_vm3, %v810_v26  ;;  %1018 = vrot.lane.b32.xlu1 %v2101_v19, %s11002_s28 }
  0x91   : > { %827 = vrot.lane.b32.xlu0 %v1909_v20, %s7727_s29  ;;  %1099 = vst.msk [vmem:[#allocation3] sm:$0xff] %vm1098_vm4, %v1003_v25  ;;  %v1913_v25 = vld [vmem:[#allocation2 + $0x99] sm:$0xff] }
  0x92   : > { %v1198_v28 = vpop.permute.xlu1 %1197 }
  0x93   : > { %v812_v27 = vpop.permute.xlu0 %811 }
  0x94   : > { %907 = vst.msk [vmem:[#allocation3 + $0x8] sm:$0xff] %vm905_vm3, %v812_v27  ;;  %1787 = vrot.lane.b32.xlu1 %v7949_v41, %s11013_s23 }
  0x95   : > { %1595 = vrot.lane.b32.xlu0 %v2102_v23, %s7730_s17 }
  0x96   : > { %v814_v32 = vpop.permute.xlu1 %813 }
  0x97   : > { %v1389_v31 = vpop.permute.xlu0 %1388  ;;  %908 = vst.msk [vmem:[#allocation3 + $0x10] sm:$0xff] %vm905_vm3, %v814_v32 }
  0x98   : > { %1211 = vrot.lane.b32.xlu1 %v7949_v41, %s11014_s30  ;;  %v2103_v41 = vld [vmem:[#allocation2 + $0x7a] sm:$0xff] }
  0x99   : > { %1020 = vrot.lane.b32.xlu0 %v2102_v23, %s11002_s28 }
  0x9a   : > { %v1582_v36 = vpop.permute.xlu1 %1581 }
  0x9b   : > { %v1391_v35 = vpop.permute.xlu0 %1390 }
  0x9c   : > { %1980 = vrot.lane.b32.xlu1 %v1910_v33, %s7732_s19 }
  0x9d   : > { %1789 = vrot.lane.b32.xlu0 %v7925_v34, %s11013_s23 }
  0x9e   : > { %v1007_v40 = vpop.permute.xlu1 %1006 }
  0x9f   : > { %v816_v39 = vpop.permute.xlu0 %815  ;;  %1101 = vst.msk [vmem:[#allocation3 + $0x10] sm:$0xff] %vm1098_vm4, %v1007_v40 }
  0xa0   : > { %909 = vst.msk [vmem:[#allocation3 + $0x18] sm:$0xff] %vm905_vm3, %v816_v39  ;;  %1404 = vrot.lane.b32.xlu1 %v1910_v33, %s7729_s0 }
  0xa1   : > { %1213 = vrot.lane.b32.xlu0 %v7925_v34, %s11014_s30  ;;  %v8130_v34 = vld [vmem:[%s7837_s27 + $0x90] sm:$0xff] }
  0xa2   : > { %v1005_v43 = vpop.permute.xlu1 %1004  ;;  %11019 = vst [vmem:[#allocation14_spill] sm:$0xff] %v8130_v34  ;;  %589 = vst.msk [vmem:[#allocation2 + $0xf1] sm:$0xff] %vm570_vm0, %v8130_v34 }
  0xa3   : > { %v1196_v45 = vpop.permute.xlu0 %1195  ;;  %1100 = vst.msk [vmem:[#allocation3 + $0x8] sm:$0xff] %vm1098_vm4, %v1005_v43 }
  0xa4   : > { %1292 = vst.msk [vmem:[#allocation3] sm:$0xff] %vm1291_vm5, %v1196_v45  ;;  %1293 = vst.msk [vmem:[#allocation3 + $0x8] sm:$0xff] %vm1291_vm5, %v1198_v28  ;;  %2173 = vrot.lane.b32.xlu1 %v2103_v41, %s11000_s25  ;;  %v655_v28 = vld [vmem:[#allocation2 + $0xff] sm:$0x1] }
  0xa5   : > { %1485 = vst.msk [vmem:[#allocation3] sm:$0xff] %vm1484_vm6, %v1389_v31  ;;  %1982 = vrot.lane.b32.xlu0 %v1911_v42, %s7732_s19  ;;  %1486 = vst.msk [vmem:[#allocation3 + $0x8] sm:$0xff] %vm1484_vm6, %v1391_v35  ;;  %v8189_v31 = vld [vmem:[%s7837_s27 + $0xa0] sm:$0xff] }
  0xa6   : > { %1678 = vst.msk [vmem:[#allocation3] sm:$0xff] %vm1677_vm7, %v1582_v36  ;;  %v1776_v49 = vpop.permute.xlu1 %1775  ;;  %11021 = vst [vmem:[#allocation16_spill] sm:$0xff] %v8189_v31  ;;  %v2106_v35 = vld [vmem:[#allocation2 + $0x9a] sm:$0xff] }
  0xa7   : > { %v1584_v50 = vpop.permute.xlu0 %1583  ;;  %1872 = vst.msk [vmem:[#allocation3] sm:$0xff] %vm1871_vm8, %v1776_v49 }
  0xa8   : > { %1679 = vst.msk [vmem:[#allocation3 + $0x8] sm:$0xff] %vm1677_vm7, %v1584_v50  ;;  %1406 = vrot.lane.b32.xlu1 %v1911_v42, %s7729_s0 }
  0xa9   : > { %829 = vrot.lane.b32.xlu0 %v1910_v33, %s7727_s29  ;;  %v618_v54 = vld [vmem:[#allocation2 + $0xf2] sm:$0x1]  ;;  %v8170_v20 = vld [vmem:[#allocation2 + $0xf8] sm:$0xff]  ;;  %673 = vst.msk [vmem:[#allocation2 + $0x101] sm:$0x1] %vm626_vm1, %v655_v28 }
  0xaa   : > { %v1200_v52 = vpop.permute.xlu1 %1199  ;;  %637 = vst.msk [vmem:[#allocation2 + $0xf0] sm:$0x1] %vm626_vm1, %v618_v54 }
  0xab   : > { %v1009_v53 = vpop.permute.xlu0 %1008  ;;  %1294 = vst.msk [vmem:[#allocation3 + $0x10] sm:$0xff] %vm1291_vm5, %v1200_v52  ;;  %v1914_v52 = vld [vmem:[#allocation2 + $0xa9] sm:$0xff] }
  0xac   : > { %1102 = vst.msk [vmem:[#allocation3 + $0x18] sm:$0xff] %vm1098_vm4, %v1009_v53  ;;  %2175 = vrot.lane.b32.xlu1 %v2104_v51, %s11000_s25 }
  0xad   : > { %1597 = vrot.lane.b32.xlu0 %v2103_v41, %s7730_s17  ;;  %734 = vst.msk [vmem:[#allocation3 + $0xa8] sm:$0xff] %vm570_vm0, %v8170_v20  ;;  %591 = vst.msk [vmem:[#allocation2 + $0x109] sm:$0xff] %vm570_vm0, %v8189_v31 }
  0xae   : > { %v1969_v55 = vpop.permute.xlu1 %1968 }
  0xaf   : > { %v1778_v57 = vpop.permute.xlu0 %1777  ;;  %2065 = vst.msk [vmem:[#allocation3] sm:$0xff] %vm2064_vm9, %v1969_v55 }
  0xb0   : > { %1873 = vst.msk [vmem:[#allocation3 + $0x8] sm:$0xff] %vm1871_vm8, %v1778_v57  ;;  %1022 = vrot.lane.b32.xlu1 %v2103_v41, %s11002_s28 }
  0xb1   : > { %831 = vrot.lane.b32.xlu0 %v1911_v42, %s7727_s29  ;;  %v8157_v10 = vld [vmem:[#allocation2 + $0xf0] sm:$0xff] }
  0xb2   : > { %v1393_v58 = vpop.permute.xlu1 %1392  ;;  %733 = vst.msk [vmem:[#allocation3 + $0xa0] sm:$0xff] %vm570_vm0, %v8157_v10 }
  0xb3   : > { %v1202_v61 = vpop.permute.xlu0 %1201  ;;  %1487 = vst.msk [vmem:[#allocation3 + $0x10] sm:$0xff] %vm1484_vm6, %v1393_v58 }
  0xb4   : > { %1295 = vst.msk [vmem:[#allocation3 + $0x18] sm:$0xff] %vm1291_vm5, %v1202_v61  ;;  %1791 = vrot.lane.b32.xlu1 %v7965_v46, %s11013_s23  ;;  %v619_v40 = vld [vmem:[#allocation2 + $0x10a] sm:$0x1]  ;;  %v8228_v55 = vld [vmem:[#allocation2 + $0x110] sm:$0xff] }
  0xb5   : > { %1599 = vrot.lane.b32.xlu0 %v2104_v51, %s7730_s17  ;;  %638 = vst.msk [vmem:[#allocation2 + $0x108] sm:$0x1] %vm626_vm1, %v619_v40  ;;  %v2107_v61 = vld [vmem:[#allocation2 + $0xaa] sm:$0xff]  ;;  %v1916_v40 = vld [vmem:[#allocation2 + $0xc1] sm:$0xff] }
  0xb6   : > { %v2162_v11 = vpop.permute.xlu1 %2161  ;;  %736 = vst.msk [vmem:[#allocation3 + $0xb8] sm:$0xff] %vm570_vm0, %v8228_v55 }
  0xb7   : > { %v1971_v13 = vpop.permute.xlu0 %1970  ;;  %2258 = vst.msk [vmem:[#allocation3] sm:$0xff] %vm2257_vm10, %v2162_v11  ;;  %v1915_v11 = vld [vmem:[#allocation2 + $0xb1] sm:$0xff] }
  0xb8   : > { %2066 = vst.msk [vmem:[#allocation3 + $0x8] sm:$0xff] %vm2064_vm9, %v1971_v13  ;;  %1215 = vrot.lane.b32.xlu1 %v7965_v46, %s11014_s30 }
  0xb9   : > { %1024 = vrot.lane.b32.xlu0 %v2104_v51, %s11002_s28 }
  0xba   : > { %v1395_v17 = vpop.permute.xlu1 %1394 }
  0xbb   : > { %v818_v19 = vpop.permute.xlu0 %817  ;;  %1488 = vst.msk [vmem:[#allocation3 + $0x18] sm:$0xff] %vm1484_vm6, %v1395_v17  ;;  %v656_v17 = vld [vmem:[#allocation2 + $0x117] sm:$0x1] }
  0xbc   : > { %910 = vst.msk [vmem:[#allocation3 + $0x20] sm:$0xff] %vm905_vm3, %v818_v19  ;;  %1984 = vrot.lane.b32.xlu1 %v1912_v14, %s7732_s19  ;;  %v8215_v49 = vld [vmem:[#allocation2 + $0x108] sm:$0xff]  ;;  %v8247_v19 = vld [vmem:[%s7837_s27 + $0xb0] sm:$0xff] }
  0xbd   : > { %1793 = vrot.lane.b32.xlu0 %v7969_v47, %s11013_s23  ;;  %735 = vst.msk [vmem:[#allocation3 + $0xb0] sm:$0xff] %vm570_vm0, %v8215_v49  ;;  %11023 = vst [vmem:[#allocation18_spill] sm:$0xff] %v8247_v19 }
  0xbe   : > { %v2164_v46 = vpop.permute.xlu1 %2163  ;;  %v2290_v23 = vld [vmem:[#allocation3] sm:$0xff]  ;;  %674 = vst.msk [vmem:[#allocation2 + $0x119] sm:$0x1] %vm626_vm1, %v656_v17 }
  0xbf   : > { %v1586_v21 = vpop.permute.xlu0 %1585  ;;  %2259 = vst.msk [vmem:[#allocation3 + $0x8] sm:$0xff] %vm2257_vm10, %v2164_v46  ;;  %7379 = vmatprep.mubr.msk.f32.mxu0 %vm2334_vm11, %v2290_v23  ;;  %v2108_v23 = vld [vmem:[#allocation2 + $0xb2] sm:$0xff] }
  0xc0   : > { %1680 = vst.msk [vmem:[#allocation3 + $0x10] sm:$0xff] %vm1677_vm7, %v1586_v21  ;;  %1408 = vrot.lane.b32.xlu1 %v1912_v14, %s7729_s0 }
  0xc1   : > { %1217 = vrot.lane.b32.xlu0 %v7969_v47, %s11014_s30  ;;  %593 = vst.msk [vmem:[#allocation2 + $0x121] sm:$0xff] %vm570_vm0, %v8247_v19 }
  0xc2   : > { %v1011_v26 = vpop.permute.xlu1 %1010 }
  0xc3   : > { %v820_v27 = vpop.permute.xlu0 %819  ;;  %1103 = vst.msk [vmem:[#allocation3 + $0x20] sm:$0xff] %vm1098_vm4, %v1011_v26 }
  0xc4   : > { %911 = vst.msk [vmem:[#allocation3 + $0x28] sm:$0xff] %vm905_vm3, %v820_v27  ;;  %2177 = vrot.lane.b32.xlu1 %v2105_v24, %s11000_s25 }
  0xc5   : > { %1986 = vrot.lane.b32.xlu0 %v1913_v25, %s7732_s19 }
  0xc6   : > { %v1780_v47 = vpop.permute.xlu1 %1779  ;;  %v2291_v33 = vld [vmem:[#allocation3 + $0x8] sm:$0xff] }
  0xc7   : > { %v1588_v32 = vpop.permute.xlu0 %1587  ;;  %1874 = vst.msk [vmem:[#allocation3 + $0x10] sm:$0xff] %vm1871_vm8, %v1780_v47  ;;  %7380 = vmatmul.mubr.msk.f32.vlgmr.msra.gmra.mxu0 %vm2334_vm11, %v2291_v33  ;;  %v8268_v33 = vld [vmem:[%s7837_s27 + $0xb8] sm:$0xff] }
  0xc8   : > { %1681 = vst.msk [vmem:[#allocation3 + $0x18] sm:$0xff] %vm1677_vm7, %v1588_v32  ;;  %1410 = vrot.lane.b32.xlu1 %v1913_v25, %s7729_s0  ;;  %v620_v26 = vld [vmem:[#allocation2 + $0x122] sm:$0x1]  ;;  %11024 = vst [vmem:[#allocation19_spill] sm:$0xff] %v8268_v33 }
  0xc9   : > { %833 = vrot.lane.b32.xlu0 %v1912_v14, %s7727_s29  ;;  %639 = vst.msk [vmem:[#allocation2 + $0x120] sm:$0x1] %vm626_vm1, %v620_v26 }
  0xca   : > { %v1204_v36 = vpop.permute.xlu1 %1203  ;;  %594 = vst.msk [vmem:[#allocation2 + $0x129] sm:$0xff] %vm570_vm0, %v8268_v33 }
  0xcb   : > { %v1013_v39 = vpop.permute.xlu0 %1012  ;;  %1296 = vst.msk [vmem:[#allocation3 + $0x20] sm:$0xff] %vm1291_vm5, %v1204_v36 }
  0xcc   : > { %1104 = vst.msk [vmem:[#allocation3 + $0x28] sm:$0xff] %vm1098_vm4, %v1013_v39  ;;  %2179 = vrot.lane.b32.xlu1 %v2106_v35, %s11000_s25 }
  0xcd   : > { %1601 = vrot.lane.b32.xlu0 %v2105_v24, %s7730_s17 }
  0xce   : > { %v1973_v41 = vpop.permute.xlu1 %1972 }
  0xcf   : > { %v1782_v42 = vpop.permute.xlu0 %1781  ;;  %2067 = vst.msk [vmem:[#allocation3 + $0x10] sm:$0xff] %vm2064_vm9, %v1973_v41 }
  0xd0   : > { %1875 = vst.msk [vmem:[#allocation3 + $0x18] sm:$0xff] %vm1871_vm8, %v1782_v42  ;;  %1026 = vrot.lane.b32.xlu1 %v2105_v24, %s11002_s28 }
  0xd1   : > { %835 = vrot.lane.b32.xlu0 %v1913_v25, %s7727_s29 }
  0xd2   : > { %v1397_v43 = vpop.permute.xlu1 %1396 }
  0xd3   : > { %v1206_v45 = vpop.permute.xlu0 %1205  ;;  %1489 = vst.msk [vmem:[#allocation3 + $0x20] sm:$0xff] %vm1484_vm6, %v1397_v43  ;;  %v8286_v43 = vld [vmem:[#allocation2 + $0x128] sm:$0xff] }
  0xd4   : > { %1297 = vst.msk [vmem:[#allocation3 + $0x28] sm:$0xff] %vm1291_vm5, %v1206_v45  ;;  %1795 = vrot.lane.b32.xlu1 %v8017_v60, %s11013_s23 }
  0xd5   : > { %1603 = vrot.lane.b32.xlu0 %v2106_v35, %s7730_s17  ;;  %738 = vst.msk [vmem:[#allocation3 + $0xc8] sm:$0xff] %vm570_vm0, %v8286_v43 }
  0xd6   : > { %v2166_v50 = vpop.permute.xlu1 %2165 }
  0xd7   : > { %v1975_v51 = vpop.permute.xlu0 %1974  ;;  %2260 = vst.msk [vmem:[#allocation3 + $0x10] sm:$0xff] %vm2257_vm10, %v2166_v50 }
  0xd8   : > { %2068 = vst.msk [vmem:[#allocation3 + $0x18] sm:$0xff] %vm2064_vm9, %v1975_v51  ;;  %1219 = vrot.lane.b32.xlu1 %v8017_v60, %s11014_s30  ;;  %v2109_v51 = vld [vmem:[#allocation2 + $0xc2] sm:$0xff] }
  0xd9   : > { %1028 = vrot.lane.b32.xlu0 %v2106_v35, %s11002_s28  ;;  %v8273_v35 = vld [vmem:[#allocation2 + $0x120] sm:$0xff] }
  0xda   : > { %v1399_v53 = vpop.permute.xlu1 %1398  ;;  %737 = vst.msk [vmem:[#allocation3 + $0xc0] sm:$0xff] %vm570_vm0, %v8273_v35 }
  0xdb   : > { %v822_v54 = vpop.permute.xlu0 %821  ;;  %1490 = vst.msk [vmem:[#allocation3 + $0x28] sm:$0xff] %vm1484_vm6, %v1399_v53 }
  0xdc   : > { %912 = vst.msk [vmem:[#allocation3 + $0x30] sm:$0xff] %vm905_vm3, %v822_v54  ;;  %1988 = vrot.lane.b32.xlu1 %v1914_v52, %s7732_s19 }
  0xdd   : > { %1797 = vrot.lane.b32.xlu0 %v8026_v62, %s11013_s23 }
  0xde   : > { %v2168_v60 = vpop.permute.xlu1 %2167  ;;  %v2292_v58 = vld [vmem:[#allocation3 + $0x10] sm:$0xff] }
  0xdf   : > { %v1590_v57 = vpop.permute.xlu0 %1589  ;;  %2261 = vst.msk [vmem:[#allocation3 + $0x18] sm:$0xff] %vm2257_vm10, %v2168_v60  ;;  %7382 = vmatprep.mubr.msk.f32.mxu0 %vm2334_vm11, %v2292_v58  ;;  %v657_v60 = vld [vmem:[#allocation2 + $0x12f] sm:$0x1] }
  0xe0   : > { %1682 = vst.msk [vmem:[#allocation3 + $0x20] sm:$0xff] %vm1677_vm7, %v1590_v57  ;;  %1412 = vrot.lane.b32.xlu1 %v1914_v52, %s7729_s0  ;;  %v8305_v57 = vld [vmem:[%s7837_s27 + $0xc0] sm:$0xff] }
  0xe1   : > { %1221 = vrot.lane.b32.xlu0 %v8026_v62, %s11014_s30  ;;  %675 = vst.msk [vmem:[#allocation2 + $0x131] sm:$0x1] %vm626_vm1, %v657_v60  ;;  %11025 = vst [vmem:[#allocation20_spill] sm:$0xff] %v8305_v57 }
  0xe2   : > { %v1015_v13 = vpop.permute.xlu1 %1014  ;;  %595 = vst.msk [vmem:[#allocation2 + $0x139] sm:$0xff] %vm570_vm0, %v8305_v57 }
  0xe3   : > { %v824_v14 = vpop.permute.xlu0 %823  ;;  %1105 = vst.msk [vmem:[#allocation3 + $0x30] sm:$0xff] %vm1098_vm4, %v1015_v13 }
  0xe4   : > { %913 = vst.msk [vmem:[#allocation3 + $0x38] sm:$0xff] %vm905_vm3, %v824_v14  ;;  %2181 = vrot.lane.b32.xlu1 %v2107_v61, %s11000_s25 }
  0xe5   : > { %1990 = vrot.lane.b32.xlu0 %v1915_v11, %s7732_s19 }
  0xe6   : > { %v1784_v62 = vpop.permute.xlu1 %1783  ;;  %v2293_v21 = vld [vmem:[#allocation3 + $0x18] sm:$0xff] }
  0xe7   : > { %v1592_v46 = vpop.permute.xlu0 %1591  ;;  %1876 = vst.msk [vmem:[#allocation3 + $0x20] sm:$0xff] %vm1871_vm8, %v1784_v62  ;;  %7383 = vmatmul.mubr.msk.f32.gmra.mxu0 %vm2334_vm11, %v2293_v21 }
  0xe8   : > { %1683 = vst.msk [vmem:[#allocation3 + $0x28] sm:$0xff] %vm1677_vm7, %v1592_v46  ;;  %1414 = vrot.lane.b32.xlu1 %v1915_v11, %s7729_s0 }
  0xe9   : > { %837 = vrot.lane.b32.xlu0 %v1914_v52, %s7727_s29  ;;  %v1917_v52 = vld [vmem:[#allocation2 + $0xc9] sm:$0xff]  ;;  %v621_v17 = vld [vmem:[#allocation2 + $0x13a] sm:$0x1] }
  0xea   : > { %v1208_v24 = vpop.permute.xlu1 %1207  ;;  %640 = vst.msk [vmem:[#allocation2 + $0x138] sm:$0x1] %vm626_vm1, %v621_v17  ;;  %v8384_v17 = vld [vmem:[%s7837_s27 + $0xd8] sm:$0xff] }
  0xeb   : > { %v1017_v25 = vpop.permute.xlu0 %1016  ;;  %1298 = vst.msk [vmem:[#allocation3 + $0x30] sm:$0xff] %vm1291_vm5, %v1208_v24  ;;  %v8326_v24 = vld [vmem:[%s7837_s27 + $0xc8] sm:$0xff]  ;;  %11028 = vst [vmem:[#allocation23_spill] sm:$0xff] %v8384_v17 }
  0xec   : > { %1106 = vst.msk [vmem:[#allocation3 + $0x38] sm:$0xff] %vm1098_vm4, %v1017_v25  ;;  %2183 = vrot.lane.b32.xlu1 %v2108_v23, %s11000_s25  ;;  %11026 = vst [vmem:[#allocation21_spill] sm:$0xff] %v8326_v24 }
  0xed   : > { %1605 = vrot.lane.b32.xlu0 %v2107_v61, %s7730_s17  ;;  %596 = vst.msk [vmem:[#allocation2 + $0x141] sm:$0xff] %vm570_vm0, %v8326_v24  ;;  %598 = vst.msk [vmem:[#allocation2 + $0x159] sm:$0xff] %vm570_vm0, %v8384_v17 }
  0xee   : > { %v1977_v27 = vpop.permute.xlu1 %1976 }
  0xef   : > { %v1786_v28 = vpop.permute.xlu0 %1785  ;;  %2069 = vst.msk [vmem:[#allocation3 + $0x20] sm:$0xff] %vm2064_vm9, %v1977_v27 }
  0xf0   : > { %1877 = vst.msk [vmem:[#allocation3 + $0x28] sm:$0xff] %vm1871_vm8, %v1786_v28  ;;  %1030 = vrot.lane.b32.xlu1 %v2107_v61, %s11002_s28  ;;  %v1918_v28 = vld [vmem:[#allocation2 + $0xd9] sm:$0xff] }
  0xf1   : > { %839 = vrot.lane.b32.xlu0 %v1915_v11, %s7727_s29  ;;  %v2110_v11 = vld [vmem:[#allocation2 + $0xca] sm:$0xff]  ;;  %v8331_v25 = vld [vmem:[#allocation2 + $0x138] sm:$0xff] }
  0xf2   : > { %v1401_v47 = vpop.permute.xlu1 %1400  ;;  %739 = vst.msk [vmem:[#allocation3 + $0xd0] sm:$0xff] %vm570_vm0, %v8331_v25 }
  0xf3   : > { %v1210_v32 = vpop.permute.xlu0 %1209  ;;  %1491 = vst.msk [vmem:[#allocation3 + $0x30] sm:$0xff] %vm1484_vm6, %v1401_v47 }
  0xf4   : > { %1299 = vst.msk [vmem:[#allocation3 + $0x38] sm:$0xff] %vm1291_vm5, %v1210_v32  ;;  %1799 = vrot.lane.b32.xlu1 %v8057_v16, %s11013_s23 }
  0xf5   : > { %1607 = vrot.lane.b32.xlu0 %v2108_v23, %s7730_s17 }
  0xf6   : > { %v2170_v36 = vpop.permute.xlu1 %2169 }
  0xf7   : > { %v1979_v39 = vpop.permute.xlu0 %1978  ;;  %2262 = vst.msk [vmem:[#allocation3 + $0x20] sm:$0xff] %vm2257_vm10, %v2170_v36  ;;  %v8344_v36 = vld [vmem:[#allocation2 + $0x140] sm:$0xff] }
  0xf8   : > { %2070 = vst.msk [vmem:[#allocation3 + $0x28] sm:$0xff] %vm2064_vm9, %v1979_v39  ;;  %1223 = vrot.lane.b32.xlu1 %v8057_v16, %s11014_s30 }
  0xf9   : > { %1032 = vrot.lane.b32.xlu0 %v2108_v23, %s11002_s28  ;;  %740 = vst.msk [vmem:[#allocation3 + $0xd8] sm:$0xff] %vm570_vm0, %v8344_v36 }
  0xfa   : > { %v1403_v41 = vpop.permute.xlu1 %1402 }
  0xfb   : > { %v826_v42 = vpop.permute.xlu0 %825  ;;  %1492 = vst.msk [vmem:[#allocation3 + $0x38] sm:$0xff] %vm1484_vm6, %v1403_v41  ;;  %v2111_v41 = vld [vmem:[#allocation2 + $0xda] sm:$0xff] }
  0xfc   : > { %914 = vst.msk [vmem:[#allocation3 + $0x40] sm:$0xff] %vm905_vm3, %v826_v42  ;;  %1992 = vrot.lane.b32.xlu1 %v1916_v40, %s7732_s19  ;;  %v1919_v42 = vld [vmem:[#allocation2 + $0xe1] sm:$0xff] }
  0xfd   : > { %1801 = vrot.lane.b32.xlu0 %v8066_v18, %s11013_s23 }
  0xfe   : > { %v2172_v16 = vpop.permute.xlu1 %2171  ;;  %v2294_v50 = vld [vmem:[#allocation3 + $0x20] sm:$0xff] }
  0xff   : > { %v1594_v45 = vpop.permute.xlu0 %1593  ;;  %2263 = vst.msk [vmem:[#allocation3 + $0x28] sm:$0xff] %vm2257_vm10, %v2172_v16  ;;  %7385 = vmatprep.mubr.msk.f32.mxu0 %vm2334_vm11, %v2294_v50  ;;  %v658_v50 = vld [vmem:[#allocation2 + $0x147] sm:$0x1] }
 0x100   : > { %1684 = vst.msk [vmem:[#allocation3 + $0x30] sm:$0xff] %vm1677_vm7, %v1594_v45  ;;  %1416 = vrot.lane.b32.xlu1 %v1916_v40, %s7729_s0 }
 0x101   : > { %1225 = vrot.lane.b32.xlu0 %v8066_v18, %s11014_s30  ;;  %676 = vst.msk [vmem:[#allocation2 + $0x149] sm:$0x1] %vm626_vm1, %v658_v50 }
 0x102   : > { %v1019_v53 = vpop.permute.xlu1 %1018 }
 0x103   : > { %v828_v54 = vpop.permute.xlu0 %827  ;;  %1107 = vst.msk [vmem:[#allocation3 + $0x40] sm:$0xff] %vm1098_vm4, %v1019_v53 }
 0x104   : > { %915 = vst.msk [vmem:[#allocation3 + $0x48] sm:$0xff] %vm905_vm3, %v828_v54  ;;  %2185 = vrot.lane.b32.xlu1 %v2109_v51, %s11000_s25  ;;  %v2112_v54 = vld [vmem:[#allocation2 + $0xe2] sm:$0xff] }
 0x105   : > { %1994 = vrot.lane.b32.xlu0 %v1917_v52, %s7732_s19 }
 0x106   : > { %v1788_v18 = vpop.permute.xlu1 %1787  ;;  %v2295_v61 = vld [vmem:[#allocation3 + $0x28] sm:$0xff] }
 0x107   : > { %v1596_v58 = vpop.permute.xlu0 %1595  ;;  %1878 = vst.msk [vmem:[#allocation3 + $0x30] sm:$0xff] %vm1871_vm8, %v1788_v18  ;;  %7386 = vmatmul.mubr.msk.f32.gmra.mxu0 %vm2334_vm11, %v2295_v61 }
 0x108   : > { %1685 = vst.msk [vmem:[#allocation3 + $0x38] sm:$0xff] %vm1677_vm7, %v1596_v58  ;;  %1418 = vrot.lane.b32.xlu1 %v1917_v52, %s7729_s0 }
 0x109   : > { %841 = vrot.lane.b32.xlu0 %v1916_v40, %s7727_s29 }
 0x10a   : > { %v1212_v13 = vpop.permute.xlu1 %1211 }
 0x10b   : > { %v1021_v14 = vpop.permute.xlu0 %1020  ;;  %1300 = vst.msk [vmem:[#allocation3 + $0x40] sm:$0xff] %vm1291_vm5, %v1212_v13 }
 0x10c   : > { %1108 = vst.msk [vmem:[#allocation3 + $0x48] sm:$0xff] %vm1098_vm4, %v1021_v14  ;;  %2187 = vrot.lane.b32.xlu1 %v2110_v11, %s11000_s25 }
 0x10d   : > { %1609 = vrot.lane.b32.xlu0 %v2109_v51, %s7730_s17 }
 0x10e   : > { %v1981_v62 = vpop.permute.xlu1 %1980 }
 0x10f   : > { %v1790_v46 = vpop.permute.xlu0 %1789  ;;  %2071 = vst.msk [vmem:[#allocation3 + $0x30] sm:$0xff] %vm2064_vm9, %v1981_v62 }
 0x110   : > { %1879 = vst.msk [vmem:[#allocation3 + $0x38] sm:$0xff] %vm1871_vm8, %v1790_v46  ;;  %1034 = vrot.lane.b32.xlu1 %v2109_v51, %s11002_s28  ;;  %v8363_v51 = vld [vmem:[%s7837_s27 + $0xd0] sm:$0xff] }
 0x111   : > { %843 = vrot.lane.b32.xlu0 %v1917_v52, %s7727_s29  ;;  %11027 = vst [vmem:[#allocation22_spill] sm:$0xff] %v8363_v51  ;;  %597 = vst.msk [vmem:[#allocation2 + $0x151] sm:$0xff] %vm570_vm0, %v8363_v51 }
 0x112   : > { %v1405_v21 = vpop.permute.xlu1 %1404 }
 0x113   : > { %v1214_v23 = vpop.permute.xlu0 %1213  ;;  %1493 = vst.msk [vmem:[#allocation3 + $0x40] sm:$0xff] %vm1484_vm6, %v1405_v21 }
 0x114   : > { %1301 = vst.msk [vmem:[#allocation3 + $0x48] sm:$0xff] %vm1291_vm5, %v1214_v23  ;;  %1803 = vrot.lane.b32.xlu1 %v8100_v30, %s11013_s23  ;;  %v1920_v23 = vld [vmem:[#allocation2 + $0xf1] sm:$0xff] }
 0x115   : > { %1611 = vrot.lane.b32.xlu0 %v2110_v11, %s7730_s17 }
 0x116   : > { %v2174_v26 = vpop.permute.xlu1 %2173 }
 0x117   : > { %v1983_v27 = vpop.permute.xlu0 %1982  ;;  %2264 = vst.msk [vmem:[#allocation3 + $0x30] sm:$0xff] %vm2257_vm10, %v2174_v26 }
 0x118   : > { %2072 = vst.msk [vmem:[#allocation3 + $0x38] sm:$0xff] %vm2064_vm9, %v1983_v27  ;;  %1227 = vrot.lane.b32.xlu1 %v8100_v30, %s11014_s30  ;;  %v622_v58 = vld [vmem:[#allocation2 + $0x152] sm:$0x1] }
 0x119   : > { %1036 = vrot.lane.b32.xlu0 %v2110_v11, %s11002_s28  ;;  %641 = vst.msk [vmem:[#allocation2 + $0x150] sm:$0x1] %vm626_vm1, %v622_v58 }
 0x11a   : > { %v1407_v47 = vpop.permute.xlu1 %1406 }
 0x11b   : > { %v830_v32 = vpop.permute.xlu0 %829  ;;  %1494 = vst.msk [vmem:[#allocation3 + $0x48] sm:$0xff] %vm1484_vm6, %v1407_v47 }
 0x11c   : > { %916 = vst.msk [vmem:[#allocation3 + $0x50] sm:$0xff] %vm905_vm3, %v830_v32  ;;  %1996 = vrot.lane.b32.xlu1 %v1918_v28, %s7732_s19 }
 0x11d   : > { %1805 = vrot.lane.b32.xlu0 %v8110_v38, %s11013_s23 }
 0x11e   : > { %v2176_v30 = vpop.permute.xlu1 %2175  ;;  %v2296_v40 = vld [vmem:[#allocation3 + $0x30] sm:$0xff] }
 0x11f   : > { %v1598_v39 = vpop.permute.xlu0 %1597  ;;  %2265 = vst.msk [vmem:[#allocation3 + $0x38] sm:$0xff] %vm2257_vm10, %v2176_v30  ;;  %7388 = vmatprep.mubr.msk.f32.mxu0 %vm2334_vm11, %v2296_v40  ;;  %v2113_v30 = vld [vmem:[#allocation2 + $0xf2] sm:$0xff] }
 0x120   : > { %1686 = vst.msk [vmem:[#allocation3 + $0x40] sm:$0xff] %vm1677_vm7, %v1598_v39  ;;  %1420 = vrot.lane.b32.xlu1 %v1918_v28, %s7729_s0  ;;  %v8389_v62 = vld [vmem:[#allocation2 + $0x150] sm:$0xff]  ;;  %v1921_v39 = vld [vmem:[#allocation2 + $0xf9] sm:$0xff] }
 0x121   : > { %1229 = vrot.lane.b32.xlu0 %v8110_v38, %s11014_s30  ;;  %741 = vst.msk [vmem:[#allocation3 + $0xe0] sm:$0xff] %vm570_vm0, %v8389_v62 }
 0x122   : > { %v1023_v16 = vpop.permute.xlu1 %1022 }
 0x123   : > { %v832_v45 = vpop.permute.xlu0 %831  ;;  %1109 = vst.msk [vmem:[#allocation3 + $0x50] sm:$0xff] %vm1098_vm4, %v1023_v16  ;;  %v8421_v16 = vld [vmem:[%s7837_s27 + $0xe0] sm:$0xff] }
 0x124   : > { %917 = vst.msk [vmem:[#allocation3 + $0x58] sm:$0xff] %vm905_vm3, %v832_v45  ;;  %2189 = vrot.lane.b32.xlu1 %v2111_v41, %s11000_s25  ;;  %11029 = vst [vmem:[#allocation24_spill] sm:$0xff] %v8421_v16 }
 0x125   : > { %1998 = vrot.lane.b32.xlu0 %v1919_v42, %s7732_s19  ;;  %599 = vst.msk [vmem:[#allocation2 + $0x169] sm:$0xff] %vm570_vm0, %v8421_v16  ;;  %606 = vst.msk [vmem:[#allocation2 + $0x199] sm:$0xff] %vm570_vm0, %v8421_v16 }
 0x126   : > { %v1792_v38 = vpop.permute.xlu1 %1791  ;;  %v2297_v53 = vld [vmem:[#allocation3 + $0x38] sm:$0xff] }
 0x127   : > { %v1600_v52 = vpop.permute.xlu0 %1599  ;;  %1880 = vst.msk [vmem:[#allocation3 + $0x40] sm:$0xff] %vm1871_vm8, %v1792_v38  ;;  %7389 = vmatmul.mubr.msk.f32.gmra.mxu0 %vm2334_vm11, %v2297_v53  ;;  %v2114_v38 = vld [vmem:[#allocation2 + $0xfa] sm:$0xff] }
 0x128   : > { %1687 = vst.msk [vmem:[#allocation3 + $0x48] sm:$0xff] %vm1677_vm7, %v1600_v52  ;;  %1422 = vrot.lane.b32.xlu1 %v1919_v42, %s7729_s0 }
 0x129   : > { %845 = vrot.lane.b32.xlu0 %v1918_v28, %s7727_s29  ;;  %v8402_v28 = vld [vmem:[#allocation2 + $0x158] sm:$0xff] }
 0x12a   : > { %v1216_v60 = vpop.permute.xlu1 %1215  ;;  %742 = vst.msk [vmem:[#allocation3 + $0xe8] sm:$0xff] %vm570_vm0, %v8402_v28 }
 0x12b   : > { %v1025_v18 = vpop.permute.xlu0 %1024  ;;  %1302 = vst.msk [vmem:[#allocation3 + $0x50] sm:$0xff] %vm1291_vm5, %v1216_v60 }
 0x12c   : > { %1110 = vst.msk [vmem:[#allocation3 + $0x58] sm:$0xff] %vm1098_vm4, %v1025_v18  ;;  %2191 = vrot.lane.b32.xlu1 %v2112_v54, %s11000_s25 }
 0x12d   : > { %1613 = vrot.lane.b32.xlu0 %v2111_v41, %s7730_s17 }
 0x12e   : > { %v1985_v61 = vpop.permute.xlu1 %1984 }
 0x12f   : > { %v1794_v11 = vpop.permute.xlu0 %1793  ;;  %2073 = vst.msk [vmem:[#allocation3 + $0x40] sm:$0xff] %vm2064_vm9, %v1985_v61 }
 0x130   : > { %1881 = vst.msk [vmem:[#allocation3 + $0x48] sm:$0xff] %vm1871_vm8, %v1794_v11  ;;  %1038 = vrot.lane.b32.xlu1 %v2111_v41, %s11002_s28  ;;  %v8444_v11 = vld [vmem:[%s7837_s27 + $0xe8] sm:$0xff] }
 0x131   : > { %847 = vrot.lane.b32.xlu0 %v1919_v42, %s7727_s29  ;;  %v659_v42 = vld [vmem:[#allocation2 + $0x15f] sm:$0x1]  ;;  %11030 = vst [vmem:[#allocation25_spill] sm:$0xff] %v8444_v11  ;;  %600 = vst.msk [vmem:[#allocation2 + $0x171] sm:$0xff] %vm570_vm0, %v8444_v11 }
 0x132   : > { %v1409_v13 = vpop.permute.xlu1 %1408  ;;  %677 = vst.msk [vmem:[#allocation2 + $0x161] sm:$0x1] %vm626_vm1, %v659_v42  ;;  %v8483_v42 = vld [vmem:[%s7837_s27 + $0xf0] sm:$0xff] }
 0x133   : > { %v1218_v14 = vpop.permute.xlu0 %1217  ;;  %1495 = vst.msk [vmem:[#allocation3 + $0x50] sm:$0xff] %vm1484_vm6, %v1409_v13  ;;  %11031 = vst [vmem:[#allocation26_spill] sm:$0xff] %v8483_v42 }
 0x134   : > { %1303 = vst.msk [vmem:[#allocation3 + $0x58] sm:$0xff] %vm1291_vm5, %v1218_v14  ;;  %1807 = vrot.lane.b32.xlu1 %v8157_v10, %s11013_s23 }
 0x135   : > { %1615 = vrot.lane.b32.xlu0 %v2112_v54, %s7730_s17  ;;  %607 = vst.msk [vmem:[#allocation2 + $0x1a1] sm:$0xff] %vm570_vm0, %v8444_v11  ;;  %601 = vst.msk [vmem:[#allocation2 + $0x181] sm:$0xff] %vm570_vm0, %v8483_v42 }
 0x136   : > { %v2178_v46 = vpop.permute.xlu1 %2177 }
 0x137   : > { %v1987_v21 = vpop.permute.xlu0 %1986  ;;  %2266 = vst.msk [vmem:[#allocation3 + $0x40] sm:$0xff] %vm2257_vm10, %v2178_v46 }
 0x138   : > { %2074 = vst.msk [vmem:[#allocation3 + $0x48] sm:$0xff] %vm2064_vm9, %v1987_v21  ;;  %1231 = vrot.lane.b32.xlu1 %v8157_v10, %s11014_s30  ;;  %v1922_v21 = vld [vmem:[#allocation2 + $0x109] sm:$0xff] }
 0x139   : > { %1040 = vrot.lane.b32.xlu0 %v2112_v54, %s11002_s28  ;;  %v623_v54 = vld [vmem:[#allocation2 + $0x16a] sm:$0x1] }
 0x13a   : > { %v1411_v26 = vpop.permute.xlu1 %1410  ;;  %642 = vst.msk [vmem:[#allocation2 + $0x168] sm:$0x1] %vm626_vm1, %v623_v54 }
 0x13b   : > { %v834_v27 = vpop.permute.xlu0 %833  ;;  %1496 = vst.msk [vmem:[#allocation3 + $0x58] sm:$0xff] %vm1484_vm6, %v1411_v26 }
 0x13c   : > { %918 = vst.msk [vmem:[#allocation3 + $0x60] sm:$0xff] %vm905_vm3, %v834_v27  ;;  %2000 = vrot.lane.b32.xlu1 %v1920_v23, %s7732_s19  ;;  %v8464_v27 = vld [vmem:[#allocation2 + $0x170] sm:$0xff] }
 0x13d   : > { %1809 = vrot.lane.b32.xlu0 %v8170_v20, %s11013_s23  ;;  %744 = vst.msk [vmem:[#allocation3 + $0xf8] sm:$0xff] %vm570_vm0, %v8464_v27 }
 0x13e   : > { %v2180_v10 = vpop.permute.xlu1 %2179  ;;  %v2298_v32 = vld [vmem:[#allocation3 + $0x40] sm:$0xff] }
 0x13f   : > { %v1602_v47 = vpop.permute.xlu0 %1601  ;;  %2267 = vst.msk [vmem:[#allocation3 + $0x48] sm:$0xff] %vm2257_vm10, %v2180_v10  ;;  %7391 = vmatprep.mubr.msk.f32.mxu0 %vm2334_vm11, %v2298_v32  ;;  %v2115_v32 = vld [vmem:[#allocation2 + $0x10a] sm:$0xff] }
 0x140   : > { %1688 = vst.msk [vmem:[#allocation3 + $0x50] sm:$0xff] %vm1677_vm7, %v1602_v47  ;;  %1424 = vrot.lane.b32.xlu1 %v1920_v23, %s7729_s0 }
 0x141   : > { %1233 = vrot.lane.b32.xlu0 %v8170_v20, %s11014_s30  ;;  %v8449_v13 = vld [vmem:[#allocation2 + $0x168] sm:$0xff] }
 0x142   : > { %v1027_v40 = vpop.permute.xlu1 %1026  ;;  %743 = vst.msk [vmem:[#allocation3 + $0xf0] sm:$0xff] %vm570_vm0, %v8449_v13 }
 0x143   : > { %v836_v41 = vpop.permute.xlu0 %835  ;;  %1111 = vst.msk [vmem:[#allocation3 + $0x60] sm:$0xff] %vm1098_vm4, %v1027_v40 }
 0x144   : > { %919 = vst.msk [vmem:[#allocation3 + $0x68] sm:$0xff] %vm905_vm3, %v836_v41  ;;  %2193 = vrot.lane.b32.xlu1 %v2113_v30, %s11000_s25  ;;  %v660_v41 = vld [vmem:[#allocation2 + $0x177] sm:$0x1] }
 0x145   : > { %2002 = vrot.lane.b32.xlu0 %v1921_v39, %s7732_s19  ;;  %678 = vst.msk [vmem:[#allocation2 + $0x179] sm:$0x1] %vm626_vm1, %v660_v41 }
 0x146   : > { %v1796_v20 = vpop.permute.xlu1 %1795  ;;  %v2299_v50 = vld [vmem:[#allocation3 + $0x48] sm:$0xff] }
 0x147   : > { %v1604_v45 = vpop.permute.xlu0 %1603  ;;  %1882 = vst.msk [vmem:[#allocation3 + $0x50] sm:$0xff] %vm1871_vm8, %v1796_v20  ;;  %7392 = vmatmul.mubr.msk.f32.gmra.mxu0 %vm2334_vm11, %v2299_v50  ;;  %v2116_v50 = vld [vmem:[#allocation2 + $0x112] sm:$0xff] }
 0x148   : > { %1689 = vst.msk [vmem:[#allocation3 + $0x58] sm:$0xff] %vm1677_vm7, %v1604_v45  ;;  %1426 = vrot.lane.b32.xlu1 %v1921_v39, %s7729_s0 }
 0x149   : > { %849 = vrot.lane.b32.xlu0 %v1920_v23, %s7727_s29 }
 0x14a   : > { %v1220_v52 = vpop.permute.xlu1 %1219 }
 0x14b   : > { %v1029_v53 = vpop.permute.xlu0 %1028  ;;  %1304 = vst.msk [vmem:[#allocation3 + $0x60] sm:$0xff] %vm1291_vm5, %v1220_v52 }
 0x14c   : > { %1112 = vst.msk [vmem:[#allocation3 + $0x68] sm:$0xff] %vm1098_vm4, %v1029_v53  ;;  %2195 = vrot.lane.b32.xlu1 %v2114_v38, %s11000_s25  ;;  %v624_v53 = vld [vmem:[#allocation2 + $0x182] sm:$0x1] }
 0x14d   : > { %1617 = vrot.lane.b32.xlu0 %v2113_v30, %s7730_s17  ;;  %643 = vst.msk [vmem:[#allocation2 + $0x180] sm:$0x1] %vm626_vm1, %v624_v53 }
 0x14e   : > { %v1989_v60 = vpop.permute.xlu1 %1988 }
 0x14f   : > { %v1798_v18 = vpop.permute.xlu0 %1797  ;;  %2075 = vst.msk [vmem:[#allocation3 + $0x50] sm:$0xff] %vm2064_vm9, %v1989_v60 }
 0x150   : > { %1883 = vst.msk [vmem:[#allocation3 + $0x58] sm:$0xff] %vm1871_vm8, %v1798_v18  ;;  %1042 = vrot.lane.b32.xlu1 %v2113_v30, %s11002_s28  ;;  %v1923_v30 = vld [vmem:[#allocation2 + $0x111] sm:$0xff] }
 0x151   : > { %851 = vrot.lane.b32.xlu0 %v1921_v39, %s7727_s29 }
 0x152   : > { %v1413_v58 = vpop.permute.xlu1 %1412 }
 0x153   : > { %v1222_v61 = vpop.permute.xlu0 %1221  ;;  %1497 = vst.msk [vmem:[#allocation3 + $0x60] sm:$0xff] %vm1484_vm6, %v1413_v58 }
 0x154   : > { %1305 = vst.msk [vmem:[#allocation3 + $0x68] sm:$0xff] %vm1291_vm5, %v1222_v61  ;;  %1811 = vrot.lane.b32.xlu1 %v8215_v49, %s11013_s23  ;;  %v8504_v61 = vld [vmem:[%s7837_s27 + $0xf8] sm:$0xff] }
 0x155   : > { %1619 = vrot.lane.b32.xlu0 %v2114_v38, %s7730_s17  ;;  %11032 = vst [vmem:[#allocation27_spill] sm:$0xff] %v8504_v61  ;;  %602 = vst.msk [vmem:[#allocation2 + $0x189] sm:$0xff] %vm570_vm0, %v8504_v61 }
 0x156   : > { %v2182_v14 = vpop.permute.xlu1 %2181 }
 0x157   : > { %v1991_v46 = vpop.permute.xlu0 %1990  ;;  %2268 = vst.msk [vmem:[#allocation3 + $0x50] sm:$0xff] %vm2257_vm10, %v2182_v14 }
 0x158   : > { %2076 = vst.msk [vmem:[#allocation3 + $0x58] sm:$0xff] %vm2064_vm9, %v1991_v46  ;;  %1235 = vrot.lane.b32.xlu1 %v8215_v49, %s11014_s30 }
 0x159   : > { %1044 = vrot.lane.b32.xlu0 %v2114_v38, %s11002_s28 }
 0x15a   : > { %v1415_v23 = vpop.permute.xlu1 %1414 }
 0x15b   : > { %v838_v26 = vpop.permute.xlu0 %837  ;;  %1498 = vst.msk [vmem:[#allocation3 + $0x68] sm:$0xff] %vm1484_vm6, %v1415_v23 }
 0x15c   : > { %920 = vst.msk [vmem:[#allocation3 + $0x70] sm:$0xff] %vm905_vm3, %v838_v26  ;;  %2004 = vrot.lane.b32.xlu1 %v1922_v21, %s7732_s19 }
 0x15d   : > { %1813 = vrot.lane.b32.xlu0 %v8228_v55, %s11013_s23 }
 0x15e   : > { %v2184_v49 = vpop.permute.xlu1 %2183  ;;  %v2300_v47 = vld [vmem:[#allocation3 + $0x50] sm:$0xff] }
 0x15f   : > { %v1606_v10 = vpop.permute.xlu0 %1605  ;;  %2269 = vst.msk [vmem:[#allocation3 + $0x58] sm:$0xff] %vm2257_vm10, %v2184_v49  ;;  %7394 = vmatprep.mubr.msk.f32.mxu0 %vm2334_vm11, %v2300_v47 }
 0x160   : > { %1690 = vst.msk [vmem:[#allocation3 + $0x60] sm:$0xff] %vm1677_vm7, %v1606_v10  ;;  %1428 = vrot.lane.b32.xlu1 %v1922_v21, %s7729_s0 }
 0x161   : > { %1237 = vrot.lane.b32.xlu0 %v8228_v55, %s11014_s30 }
 0x162   : > { %v1031_v39 = vpop.permute.xlu1 %1030 }
 0x163   : > { %v840_v40 = vpop.permute.xlu0 %839  ;;  %1113 = vst.msk [vmem:[#allocation3 + $0x70] sm:$0xff] %vm1098_vm4, %v1031_v39 }
 0x164   : > { %921 = vst.msk [vmem:[#allocation3 + $0x78] sm:$0xff] %vm905_vm3, %v840_v40  ;;  %2197 = vrot.lane.b32.xlu1 %v2115_v32, %s11000_s25  ;;  %v661_v40 = vld [vmem:[#allocation2 + $0x18f] sm:$0x1] }
 0x165   : > { %2006 = vrot.lane.b32.xlu0 %v1923_v30, %s7732_s19  ;;  %679 = vst.msk [vmem:[#allocation2 + $0x191] sm:$0x1] %vm626_vm1, %v661_v40 }
 0x166   : > { %v1800_v55 = vpop.permute.xlu1 %1799  ;;  %v2301_v45 = vld [vmem:[#allocation3 + $0x58] sm:$0xff] }
 0x167   : > { %v1608_v20 = vpop.permute.xlu0 %1607  ;;  %1884 = vst.msk [vmem:[#allocation3 + $0x60] sm:$0xff] %vm1871_vm8, %v1800_v55  ;;  %7395 = vmatmul.mubr.msk.f32.gmra.mxu0 %vm2334_vm11, %v2301_v45  ;;  %v2118_v45 = vld [vmem:[#allocation2 + $0x12a] sm:$0xff] }
 0x168   : > { %1691 = vst.msk [vmem:[#allocation3 + $0x68] sm:$0xff] %vm1677_vm7, %v1608_v20  ;;  %1430 = vrot.lane.b32.xlu1 %v1923_v30, %s7729_s0 }
 0x169   : > { %853 = vrot.lane.b32.xlu0 %v1922_v21, %s7727_s29  ;;  %v1924_v21 = vld [vmem:[#allocation2 + $0x121] sm:$0xff] }
 0x16a   : > { %v1224_v38 = vpop.permute.xlu1 %1223 }
 0x16b   : > { %v1033_v52 = vpop.permute.xlu0 %1032  ;;  %1306 = vst.msk [vmem:[#allocation3 + $0x70] sm:$0xff] %vm1291_vm5, %v1224_v38 }
 0x16c   : > { %1114 = vst.msk [vmem:[#allocation3 + $0x78] sm:$0xff] %vm1098_vm4, %v1033_v52  ;;  %2199 = vrot.lane.b32.xlu1 %v2116_v50, %s11000_s25 }
 0x16d   : > { %1621 = vrot.lane.b32.xlu0 %v2115_v32, %s7730_s17 }
 0x16e   : > { %v1993_v54 = vpop.permute.xlu1 %1992 }
 0x16f   : > { %v1802_v60 = vpop.permute.xlu0 %1801  ;;  %2077 = vst.msk [vmem:[#allocation3 + $0x60] sm:$0xff] %vm2064_vm9, %v1993_v54  ;;  %v662_v54 = vld [vmem:[#allocation2 + $0x1a7] sm:$0x1] }
 0x170   : > { %1885 = vst.msk [vmem:[#allocation3 + $0x68] sm:$0xff] %vm1871_vm8, %v1802_v60  ;;  %1046 = vrot.lane.b32.xlu1 %v2115_v32, %s11002_s28  ;;  %v1925_v32 = vld [vmem:[#allocation2 + $0x129] sm:$0xff] }
 0x171   : > { %855 = vrot.lane.b32.xlu0 %v1923_v30, %s7727_s29  ;;  %680 = vst.msk [vmem:[#allocation2 + $0x1a9] sm:$0x1] %vm626_vm1, %v662_v54 }
 0x172   : > { %v1417_v18 = vpop.permute.xlu1 %1416 }
 0x173   : > { %v1226_v58 = vpop.permute.xlu0 %1225  ;;  %1499 = vst.msk [vmem:[#allocation3 + $0x70] sm:$0xff] %vm1484_vm6, %v1417_v18 }
 0x174   : > { %1307 = vst.msk [vmem:[#allocation3 + $0x78] sm:$0xff] %vm1291_vm5, %v1226_v58  ;;  %1815 = vrot.lane.b32.xlu1 %v8273_v35, %s11013_s23 }
 0x175   : > { %1623 = vrot.lane.b32.xlu0 %v2116_v50, %s7730_s17 }
 0x176   : > { %v2186_v14 = vpop.permute.xlu1 %2185 }
 0x177   : > { %v1995_v46 = vpop.permute.xlu0 %1994  ;;  %2270 = vst.msk [vmem:[#allocation3 + $0x60] sm:$0xff] %vm2257_vm10, %v2186_v14 }
 0x178   : > { %2078 = vst.msk [vmem:[#allocation3 + $0x68] sm:$0xff] %vm2064_vm9, %v1995_v46  ;;  %1239 = vrot.lane.b32.xlu1 %v8273_v35, %s11014_s30  ;;  %v2117_v35 = vld [vmem:[#allocation2 + $0x122] sm:$0xff]  ;;  %v1926_v46 = vld [vmem:[#allocation2 + $0x139] sm:$0xff] }
 0x179   : > { %1048 = vrot.lane.b32.xlu0 %v2116_v50, %s11002_s28 }
 0x17a   : > { %v1419_v23 = vpop.permute.xlu1 %1418 }
 0x17b   : > { %v842_v26 = vpop.permute.xlu0 %841  ;;  %1500 = vst.msk [vmem:[#allocation3 + $0x78] sm:$0xff] %vm1484_vm6, %v1419_v23 }
 0x17c   : > { %922 = vst.msk [vmem:[#allocation3 + $0x80] sm:$0xff] %vm905_vm3, %v842_v26  ;;  %2008 = vrot.lane.b32.xlu1 %v1924_v21, %s7732_s19 }
 0x17d   : > { %1817 = vrot.lane.b32.xlu0 %v8286_v43, %s11013_s23 }
 0x17e   : > { %v2188_v49 = vpop.permute.xlu1 %2187  ;;  %v2302_v47 = vld [vmem:[#allocation3 + $0x60] sm:$0xff] }
 0x17f   : > { %v1610_v10 = vpop.permute.xlu0 %1609  ;;  %2271 = vst.msk [vmem:[#allocation3 + $0x68] sm:$0xff] %vm2257_vm10, %v2188_v49  ;;  %7397 = vmatprep.mubr.msk.f32.mxu0 %vm2334_vm11, %v2302_v47  ;;  %v1927_v47 = vld [vmem:[#allocation2 + $0x141] sm:$0xff] }
 0x180   : > { %1692 = vst.msk [vmem:[#allocation3 + $0x70] sm:$0xff] %vm1677_vm7, %v1610_v10  ;;  %1432 = vrot.lane.b32.xlu1 %v1924_v21, %s7729_s0 }
 0x181   : > { %1241 = vrot.lane.b32.xlu0 %v8286_v43, %s11014_s30  ;;  %v625_v43 = vld [vmem:[#allocation2 + $0x19a] sm:$0x1] }
 0x182   : > { %v1035_v30 = vpop.permute.xlu1 %1034  ;;  %644 = vst.msk [vmem:[#allocation2 + $0x198] sm:$0x1] %vm626_vm1, %v625_v43 }
 0x183   : > { %v844_v39 = vpop.permute.xlu0 %843  ;;  %1115 = vst.msk [vmem:[#allocation3 + $0x80] sm:$0xff] %vm1098_vm4, %v1035_v30 }
 0x184   : > { %923 = vst.msk [vmem:[#allocation3 + $0x88] sm:$0xff] %vm905_vm3, %v844_v39  ;;  %2201 = vrot.lane.b32.xlu1 %v2117_v35, %s11000_s25 }
 0x185   : > { %2010 = vrot.lane.b32.xlu0 %v1925_v32, %s7732_s19 }
 0x186   : > { %v1804_v41 = vpop.permute.xlu1 %1803  ;;  %v2303_v20 = vld [vmem:[#allocation3 + $0x68] sm:$0xff] }
 0x187   : > { %v1612_v55 = vpop.permute.xlu0 %1611  ;;  %1886 = vst.msk [vmem:[#allocation3 + $0x70] sm:$0xff] %vm1871_vm8, %v1804_v41  ;;  %7398 = vmatmul.mubr.msk.f32.gmra.mxu0 %vm2334_vm11, %v2303_v20 }
 0x188   : > { %1693 = vst.msk [vmem:[#allocation3 + $0x78] sm:$0xff] %vm1677_vm7, %v1612_v55  ;;  %1434 = vrot.lane.b32.xlu1 %v1925_v32, %s7729_s0 }
 0x189   : > { %857 = vrot.lane.b32.xlu0 %v1924_v21, %s7727_s29 }
 0x18a   : > { %v1228_v50 = vpop.permute.xlu1 %1227 }
 0x18b   : > { %v1037_v38 = vpop.permute.xlu0 %1036  ;;  %1308 = vst.msk [vmem:[#allocation3 + $0x80] sm:$0xff] %vm1291_vm5, %v1228_v50 }
 0x18c   : > { %1116 = vst.msk [vmem:[#allocation3 + $0x88] sm:$0xff] %vm1098_vm4, %v1037_v38  ;;  %2203 = vrot.lane.b32.xlu1 %v2118_v45, %s11000_s25 }
 0x18d   : > { %1625 = vrot.lane.b32.xlu0 %v2117_v35, %s7730_s17 }
 0x18e   : > { %v1997_v52 = vpop.permute.xlu1 %1996 }
 0x18f   : > { %v1806_v53 = vpop.permute.xlu0 %1805  ;;  %2079 = vst.msk [vmem:[#allocation3 + $0x70] sm:$0xff] %vm2064_vm9, %v1997_v52 }
 0x190   : > { %1887 = vst.msk [vmem:[#allocation3 + $0x78] sm:$0xff] %vm1871_vm8, %v1806_v53  ;;  %1050 = vrot.lane.b32.xlu1 %v2117_v35, %s11002_s28  ;;  %v1928_v53 = vld [vmem:[#allocation2 + $0x151] sm:$0xff] }
 0x191   : > { %859 = vrot.lane.b32.xlu0 %v1925_v32, %s7727_s29 }
 0x192   : > { %v1421_v60 = vpop.permute.xlu1 %1420 }
 0x193   : > { %v1230_v18 = vpop.permute.xlu0 %1229  ;;  %1501 = vst.msk [vmem:[#allocation3 + $0x80] sm:$0xff] %vm1484_vm6, %v1421_v60 }
 0x194   : > { %1309 = vst.msk [vmem:[#allocation3 + $0x88] sm:$0xff] %vm1291_vm5, %v1230_v18  ;;  %1819 = vrot.lane.b32.xlu1 %v8331_v25, %s11013_s23 }
 0x195   : > { %1627 = vrot.lane.b32.xlu0 %v2118_v45, %s7730_s17 }
 0x196   : > { %v2190_v58 = vpop.permute.xlu1 %2189 }
 0x197   : > { %v1999_v14 = vpop.permute.xlu0 %1998  ;;  %2272 = vst.msk [vmem:[#allocation3 + $0x70] sm:$0xff] %vm2257_vm10, %v2190_v58 }
 0x198   : > { %2080 = vst.msk [vmem:[#allocation3 + $0x78] sm:$0xff] %vm2064_vm9, %v1999_v14  ;;  %1243 = vrot.lane.b32.xlu1 %v8331_v25, %s11014_s30  ;;  %v2119_v25 = vld [vmem:[#allocation2 + $0x13a] sm:$0xff] }
 0x199   : > { %1052 = vrot.lane.b32.xlu0 %v2118_v45, %s11002_s28 }
 0x19a   : > { %v1423_v21 = vpop.permute.xlu1 %1422 }
 0x19b   : > { %v846_v23 = vpop.permute.xlu0 %845  ;;  %1502 = vst.msk [vmem:[#allocation3 + $0x88] sm:$0xff] %vm1484_vm6, %v1423_v21 }
 0x19c   : > { %924 = vst.msk [vmem:[#allocation3 + $0x90] sm:$0xff] %vm905_vm3, %v846_v23  ;;  %2012 = vrot.lane.b32.xlu1 %v1926_v46, %s7732_s19 }
 0x19d   : > { %1821 = vrot.lane.b32.xlu0 %v8344_v36, %s11013_s23 }
 0x19e   : > { %v2192_v26 = vpop.permute.xlu1 %2191  ;;  %v2304_v10 = vld [vmem:[#allocation3 + $0x70] sm:$0xff] }
 0x19f   : > { %v1614_v49 = vpop.permute.xlu0 %1613  ;;  %2273 = vst.msk [vmem:[#allocation3 + $0x78] sm:$0xff] %vm2257_vm10, %v2192_v26  ;;  %7400 = vmatprep.mubr.msk.f32.mxu0 %vm2334_vm11, %v2304_v10 }
 0x1a0   : > { %1694 = vst.msk [vmem:[#allocation3 + $0x80] sm:$0xff] %vm1677_vm7, %v1614_v49  ;;  %1436 = vrot.lane.b32.xlu1 %v1926_v46, %s7729_s0 }
 0x1a1   : > { %1245 = vrot.lane.b32.xlu0 %v8344_v36, %s11014_s30  ;;  %v2120_v36 = vld [vmem:[#allocation2 + $0x142] sm:$0xff] }
 0x1a2   : > { %v1039_v35 = vpop.permute.xlu1 %1038 }
 0x1a3   : > { %v848_v32 = vpop.permute.xlu0 %847  ;;  %1117 = vst.msk [vmem:[#allocation3 + $0x90] sm:$0xff] %vm1098_vm4, %v1039_v35 }
 0x1a4   : > { %925 = vst.msk [vmem:[#allocation3 + $0x98] sm:$0xff] %vm905_vm3, %v848_v32  ;;  %2205 = vrot.lane.b32.xlu1 %v2119_v25, %s11000_s25 }
 0x1a5   : > { %2014 = vrot.lane.b32.xlu0 %v1927_v47, %s7732_s19 }
 0x1a6   : > { %v1808_v30 = vpop.permute.xlu1 %1807  ;;  %v2305_v40 = vld [vmem:[#allocation3 + $0x78] sm:$0xff] }
 0x1a7   : > { %v1616_v39 = vpop.permute.xlu0 %1615  ;;  %1888 = vst.msk [vmem:[#allocation3 + $0x80] sm:$0xff] %vm1871_vm8, %v1808_v30  ;;  %7401 = vmatmul.mubr.msk.f32.gmra.mxu0 %vm2334_vm11, %v2305_v40 }
 0x1a8   : > { %1695 = vst.msk [vmem:[#allocation3 + $0x88] sm:$0xff] %vm1677_vm7, %v1616_v39  ;;  %1438 = vrot.lane.b32.xlu1 %v1927_v47, %s7729_s0 }
 0x1a9   : > { %861 = vrot.lane.b32.xlu0 %v1926_v46, %s7727_s29  ;;  %v1929_v46 = vld [vmem:[#allocation2 + $0x159] sm:$0xff] }
 0x1aa   : > { %v1232_v41 = vpop.permute.xlu1 %1231 }
 0x1ab   : > { %v1041_v55 = vpop.permute.xlu0 %1040  ;;  %1310 = vst.msk [vmem:[#allocation3 + $0x90] sm:$0xff] %vm1291_vm5, %v1232_v41  ;;  %v1930_v41 = vld [vmem:[#allocation2 + $0x169] sm:$0xff] }
 0x1ac   : > { %1118 = vst.msk [vmem:[#allocation3 + $0x98] sm:$0xff] %vm1098_vm4, %v1041_v55  ;;  %2207 = vrot.lane.b32.xlu1 %v2120_v36, %s11000_s25 }
 0x1ad   : > { %1629 = vrot.lane.b32.xlu0 %v2119_v25, %s7730_s17 }
 0x1ae   : > { %v2001_v20 = vpop.permute.xlu1 %2000 }
 0x1af   : > { %v1810_v43 = vpop.permute.xlu0 %1809  ;;  %2081 = vst.msk [vmem:[#allocation3 + $0x80] sm:$0xff] %vm2064_vm9, %v2001_v20 }
 0x1b0   : > { %1889 = vst.msk [vmem:[#allocation3 + $0x88] sm:$0xff] %vm1871_vm8, %v1810_v43  ;;  %1054 = vrot.lane.b32.xlu1 %v2119_v25, %s11002_s28 }
 0x1b1   : > { %863 = vrot.lane.b32.xlu0 %v1927_v47, %s7727_s29 }
 0x1b2   : > { %v1425_v45 = vpop.permute.xlu1 %1424 }
 0x1b3   : > { %v1234_v50 = vpop.permute.xlu0 %1233  ;;  %1503 = vst.msk [vmem:[#allocation3 + $0x90] sm:$0xff] %vm1484_vm6, %v1425_v45 }
 0x1b4   : > { %1311 = vst.msk [vmem:[#allocation3 + $0x98] sm:$0xff] %vm1291_vm5, %v1234_v50  ;;  %1823 = vrot.lane.b32.xlu1 %v8389_v62, %s11013_s23 }
 0x1b5   : > { %1631 = vrot.lane.b32.xlu0 %v2120_v36, %s7730_s17 }
 0x1b6   : > { %v2194_v38 = vpop.permute.xlu1 %2193 }
 0x1b7   : > { %v2003_v52 = vpop.permute.xlu0 %2002  ;;  %2274 = vst.msk [vmem:[#allocation3 + $0x80] sm:$0xff] %vm2257_vm10, %v2194_v38  ;;  %v1931_v38 = vld [vmem:[#allocation2 + $0x171] sm:$0xff] }
 0x1b8   : > { %2082 = vst.msk [vmem:[#allocation3 + $0x88] sm:$0xff] %vm2064_vm9, %v2003_v52  ;;  %1247 = vrot.lane.b32.xlu1 %v8389_v62, %s11014_s30  ;;  %v2121_v62 = vld [vmem:[#allocation2 + $0x152] sm:$0xff] }
 0x1b9   : > { %1056 = vrot.lane.b32.xlu0 %v2120_v36, %s11002_s28 }
 0x1ba   : > { %v1427_v54 = vpop.permute.xlu1 %1426 }
 0x1bb   : > { %v850_v60 = vpop.permute.xlu0 %849  ;;  %1504 = vst.msk [vmem:[#allocation3 + $0x98] sm:$0xff] %vm1484_vm6, %v1427_v54 }
 0x1bc   : > { %926 = vst.msk [vmem:[#allocation3 + $0xa0] sm:$0xff] %vm905_vm3, %v850_v60  ;;  %2016 = vrot.lane.b32.xlu1 %v1928_v53, %s7732_s19 }
 0x1bd   : > { %1825 = vrot.lane.b32.xlu0 %v8402_v28, %s11013_s23 }
 0x1be   : > { %v2196_v18 = vpop.permute.xlu1 %2195  ;;  %v2306_v14 = vld [vmem:[#allocation3 + $0x80] sm:$0xff] }
 0x1bf   : > { %v1618_v58 = vpop.permute.xlu0 %1617  ;;  %2275 = vst.msk [vmem:[#allocation3 + $0x88] sm:$0xff] %vm2257_vm10, %v2196_v18  ;;  %7403 = vmatprep.mubr.msk.f32.mxu0 %vm2334_vm11, %v2306_v14 }
 0x1c0   : > { %1696 = vst.msk [vmem:[#allocation3 + $0x90] sm:$0xff] %vm1677_vm7, %v1618_v58  ;;  %1440 = vrot.lane.b32.xlu1 %v1928_v53, %s7729_s0 }
 0x1c1   : > { %1249 = vrot.lane.b32.xlu0 %v8402_v28, %s11014_s30  ;;  %v2122_v28 = vld [vmem:[#allocation2 + $0x15a] sm:$0xff] }
 0x1c2   : > { %v1043_v21 = vpop.permute.xlu1 %1042 }
 0x1c3   : > { %v852_v23 = vpop.permute.xlu0 %851  ;;  %1119 = vst.msk [vmem:[#allocation3 + $0xa0] sm:$0xff] %vm1098_vm4, %v1043_v21  ;;  %v1739_v21 = vld [vmem:[#allocation2 + $0x180] sm:$0xff] }
 0x1c4   : > { %927 = vst.msk [vmem:[#allocation3 + $0xa8] sm:$0xff] %vm905_vm3, %v852_v23  ;;  %2209 = vrot.lane.b32.xlu1 %v2121_v62, %s11000_s25 }
 0x1c5   : > { %2018 = vrot.lane.b32.xlu0 %v1929_v46, %s7732_s19 }
 0x1c6   : > { %v1812_v26 = vpop.permute.xlu1 %1811  ;;  %v2307_v10 = vld [vmem:[#allocation3 + $0x88] sm:$0xff] }
 0x1c7   : > { %v1620_v49 = vpop.permute.xlu0 %1619  ;;  %1890 = vst.msk [vmem:[#allocation3 + $0x90] sm:$0xff] %vm1871_vm8, %v1812_v26  ;;  %7404 = vmatmul.mubr.msk.f32.gmra.mxu0 %vm2334_vm11, %v2307_v10 }
 0x1c8   : > { %1697 = vst.msk [vmem:[#allocation3 + $0x98] sm:$0xff] %vm1677_vm7, %v1620_v49  ;;  %1442 = vrot.lane.b32.xlu1 %v1929_v46, %s7729_s0 }
 0x1c9   : > { %865 = vrot.lane.b32.xlu0 %v1928_v53, %s7727_s29 }
 0x1ca   : > { %v1236_v25 = vpop.permute.xlu1 %1235 }
 0x1cb   : > { %v1045_v47 = vpop.permute.xlu0 %1044  ;;  %1312 = vst.msk [vmem:[#allocation3 + $0xa0] sm:$0xff] %vm1291_vm5, %v1236_v25  ;;  %v1932_v25 = vld [vmem:[#allocation2 + $0x181] sm:$0xff] }
 0x1cc   : > { %1120 = vst.msk [vmem:[#allocation3 + $0xa8] sm:$0xff] %vm1098_vm4, %v1045_v47  ;;  %2211 = vrot.lane.b32.xlu1 %v2122_v28, %s11000_s25 }
 0x1cd   : > { %1633 = vrot.lane.b32.xlu0 %v2121_v62, %s7730_s17 }
 0x1ce   : > { %v2005_v35 = vpop.permute.xlu1 %2004 }
 0x1cf   : > { %v1814_v32 = vpop.permute.xlu0 %1813  ;;  %2083 = vst.msk [vmem:[#allocation3 + $0x90] sm:$0xff] %vm2064_vm9, %v2005_v35 }
 0x1d0   : > { %1891 = vst.msk [vmem:[#allocation3 + $0x98] sm:$0xff] %vm1871_vm8, %v1814_v32  ;;  %1058 = vrot.lane.b32.xlu1 %v2121_v62, %s11002_s28 }
 0x1d1   : > { %867 = vrot.lane.b32.xlu0 %v1929_v46, %s7727_s29 }
 0x1d2   : > { %v1429_v30 = vpop.permute.xlu1 %1428 }
 0x1d3   : > { %v1238_v39 = vpop.permute.xlu0 %1237  ;;  %1505 = vst.msk [vmem:[#allocation3 + $0xa0] sm:$0xff] %vm1484_vm6, %v1429_v30 }
 0x1d4   : > { %1313 = vst.msk [vmem:[#allocation3 + $0xa8] sm:$0xff] %vm1291_vm5, %v1238_v39  ;;  %1827 = vrot.lane.b32.xlu1 %v8449_v13, %s11013_s23 }
 0x1d5   : > { %1635 = vrot.lane.b32.xlu0 %v2122_v28, %s7730_s17 }
 0x1d6   : > { %v2198_v40 = vpop.permute.xlu1 %2197 }
 0x1d7   : > { %v2007_v36 = vpop.permute.xlu0 %2006  ;;  %2276 = vst.msk [vmem:[#allocation3 + $0x90] sm:$0xff] %vm2257_vm10, %v2198_v40  ;;  %v1933_v40 = vld [vmem:[#allocation2 + $0x189] sm:$0xff] }
 0x1d8   : > { %2084 = vst.msk [vmem:[#allocation3 + $0x98] sm:$0xff] %vm2064_vm9, %v2007_v36  ;;  %1251 = vrot.lane.b32.xlu1 %v8449_v13, %s11014_s30  ;;  %v2123_v13 = vld [vmem:[#allocation2 + $0x16a] sm:$0xff]  ;;  %v2125_v36 = vld [vmem:[#allocation2 + $0x182] sm:$0xff] }
 0x1d9   : > { %1060 = vrot.lane.b32.xlu0 %v2122_v28, %s11002_s28  ;;  %v1740_v28 = vld [vmem:[#allocation2 + $0x188] sm:$0xff] }
 0x1da   : > { %v1431_v55 = vpop.permute.xlu1 %1430 }
 0x1db   : > { %v854_v20 = vpop.permute.xlu0 %853  ;;  %1506 = vst.msk [vmem:[#allocation3 + $0xa8] sm:$0xff] %vm1484_vm6, %v1431_v55 }
 0x1dc   : > { %928 = vst.msk [vmem:[#allocation3 + $0xb0] sm:$0xff] %vm905_vm3, %v854_v20  ;;  %2020 = vrot.lane.b32.xlu1 %v1930_v41, %s7732_s19 }
 0x1dd   : > { %1829 = vrot.lane.b32.xlu0 %v8464_v27, %s11013_s23 }
 0x1de   : > { %v2200_v43 = vpop.permute.xlu1 %2199  ;;  %v2308_v50 = vld [vmem:[#allocation3 + $0x90] sm:$0xff] }
 0x1df   : > { %v1622_v45 = vpop.permute.xlu0 %1621  ;;  %2277 = vst.msk [vmem:[#allocation3 + $0x98] sm:$0xff] %vm2257_vm10, %v2200_v43  ;;  %7406 = vmatprep.mubr.msk.f32.mxu0 %vm2334_vm11, %v2308_v50  ;;  %v2126_v50 = vld [vmem:[#allocation2 + $0x18a] sm:$0xff] }
 0x1e0   : > { %1698 = vst.msk [vmem:[#allocation3 + $0xa0] sm:$0xff] %vm1677_vm7, %v1622_v45  ;;  %1444 = vrot.lane.b32.xlu1 %v1930_v41, %s7729_s0 }
 0x1e1   : > { %1253 = vrot.lane.b32.xlu0 %v8464_v27, %s11014_s30  ;;  %v2124_v27 = vld [vmem:[#allocation2 + $0x172] sm:$0xff] }
 0x1e2   : > { %v1047_v52 = vpop.permute.xlu1 %1046 }
 0x1e3   : > { %v856_v53 = vpop.permute.xlu0 %855  ;;  %1121 = vst.msk [vmem:[#allocation3 + $0xb0] sm:$0xff] %vm1098_vm4, %v1047_v52  ;;  %v1741_v52 = vld [vmem:[#allocation2 + $0x198] sm:$0xff] }
 0x1e4   : > { %929 = vst.msk [vmem:[#allocation3 + $0xb8] sm:$0xff] %vm905_vm3, %v856_v53  ;;  %2213 = vrot.lane.b32.xlu1 %v2123_v13, %s11000_s25  ;;  %v1742_v53 = vld [vmem:[#allocation2 + $0x1a0] sm:$0xff] }
 0x1e5   : > { %2022 = vrot.lane.b32.xlu0 %v1931_v38, %s7732_s19 }
 0x1e6   : > { %v1816_v54 = vpop.permute.xlu1 %1815  ;;  %v2309_v18 = vld [vmem:[#allocation3 + $0x98] sm:$0xff] }
 0x1e7   : > { %v1624_v60 = vpop.permute.xlu0 %1623  ;;  %1892 = vst.msk [vmem:[#allocation3 + $0xa0] sm:$0xff] %vm1871_vm8, %v1816_v54  ;;  %7407 = vmatmul.mubr.msk.f32.gmra.mxu0 %vm2334_vm11, %v2309_v18  ;;  %v1934_v18 = vld [vmem:[#allocation2 + $0x199] sm:$0xff] }
 0x1e8   : > { %1699 = vst.msk [vmem:[#allocation3 + $0xa8] sm:$0xff] %vm1677_vm7, %v1624_v60  ;;  %1446 = vrot.lane.b32.xlu1 %v1931_v38, %s7729_s0 }
 0x1e9   : > { %869 = vrot.lane.b32.xlu0 %v1930_v41, %s7727_s29 }
 0x1ea   : > { %v1240_v58 = vpop.permute.xlu1 %1239 }
 0x1eb   : > { %v1049_v14 = vpop.permute.xlu0 %1048  ;;  %1314 = vst.msk [vmem:[#allocation3 + $0xb0] sm:$0xff] %vm1291_vm5, %v1240_v58 }
 0x1ec   : > { %1122 = vst.msk [vmem:[#allocation3 + $0xb8] sm:$0xff] %vm1098_vm4, %v1049_v14  ;;  %2215 = vrot.lane.b32.xlu1 %v2124_v27, %s11000_s25 }
 0x1ed   : > { %1637 = vrot.lane.b32.xlu0 %v2123_v13, %s7730_s17 }
 0x1ee   : > { %v2009_v62 = vpop.permute.xlu1 %2008 }
 0x1ef   : > { %v1818_v46 = vpop.permute.xlu0 %1817  ;;  %2085 = vst.msk [vmem:[#allocation3 + $0xa0] sm:$0xff] %vm2064_vm9, %v2009_v62  ;;  %v2127_v62 = vld [vmem:[#allocation2 + $0x19a] sm:$0xff] }
 0x1f0   : > { %1893 = vst.msk [vmem:[#allocation3 + $0xa8] sm:$0xff] %vm1871_vm8, %v1818_v46  ;;  %1062 = vrot.lane.b32.xlu1 %v2123_v13, %s11002_s28  ;;  %v2128_v46 = vld [vmem:[#allocation2 + $0x1a2] sm:$0xff] }
 0x1f1   : > { %871 = vrot.lane.b32.xlu0 %v1931_v38, %s7727_s29 }
 0x1f2   : > { %v1433_v23 = vpop.permute.xlu1 %1432 }
 0x1f3   : > { %v1242_v26 = vpop.permute.xlu0 %1241  ;;  %1507 = vst.msk [vmem:[#allocation3 + $0xb0] sm:$0xff] %vm1484_vm6, %v1433_v23 }
 0x1f4   : > { %1315 = vst.msk [vmem:[#allocation3 + $0xb8] sm:$0xff] %vm1291_vm5, %v1242_v26  ;;  %1831 = vrot.lane.b32.xlu1 %v1739_v21, %s11013_s23 }
 0x1f5   : > { %1639 = vrot.lane.b32.xlu0 %v2124_v27, %s7730_s17 }
 0x1f6   : > { %v2202_v49 = vpop.permute.xlu1 %2201 }
 0x1f7   : > { %v2011_v10 = vpop.permute.xlu0 %2010  ;;  %2278 = vst.msk [vmem:[#allocation3 + $0xa0] sm:$0xff] %vm2257_vm10, %v2202_v49 }
 0x1f8   : > { %2086 = vst.msk [vmem:[#allocation3 + $0xa8] sm:$0xff] %vm2064_vm9, %v2011_v10  ;;  %1255 = vrot.lane.b32.xlu1 %v1739_v21, %s11014_s30 }
 0x1f9   : > { %1064 = vrot.lane.b32.xlu0 %v2124_v27, %s11002_s28  ;;  %v1935_v27 = vld [vmem:[#allocation2 + $0x1a1] sm:$0xff] }
 0x1fa   : > { %v1435_v47 = vpop.permute.xlu1 %1434 }
 0x1fb   : > { %v858_v35 = vpop.permute.xlu0 %857  ;;  %1508 = vst.msk [vmem:[#allocation3 + $0xb8] sm:$0xff] %vm1484_vm6, %v1435_v47 }
 0x1fc   : > { %930 = vst.msk [vmem:[#allocation3 + $0xc0] sm:$0xff] %vm905_vm3, %v858_v35  ;;  %2024 = vrot.lane.b32.xlu1 %v1932_v25, %s7732_s19 }
 0x1fd   : > { %1833 = vrot.lane.b32.xlu0 %v1740_v28, %s11013_s23 }
 0x1fe   : > { %v2204_v32 = vpop.permute.xlu1 %2203  ;;  %v2310_v39 = vld [vmem:[#allocation3 + $0xa0] sm:$0xff] }
 0x1ff   : > { %v1626_v30 = vpop.permute.xlu0 %1625  ;;  %2279 = vst.msk [vmem:[#allocation3 + $0xa8] sm:$0xff] %vm2257_vm10, %v2204_v32  ;;  %7409 = vmatprep.mubr.msk.f32.mxu0 %vm2334_vm11, %v2310_v39 }
 0x200   : > { %1700 = vst.msk [vmem:[#allocation3 + $0xb0] sm:$0xff] %vm1677_vm7, %v1626_v30  ;;  %1448 = vrot.lane.b32.xlu1 %v1932_v25, %s7729_s0 }
 0x201   : > { %1257 = vrot.lane.b32.xlu0 %v1740_v28, %s11014_s30 }
 0x202   : > { %v1051_v41 = vpop.permute.xlu1 %1050 }
 0x203   : > { %v860_v55 = vpop.permute.xlu0 %859  ;;  %1123 = vst.msk [vmem:[#allocation3 + $0xc0] sm:$0xff] %vm1098_vm4, %v1051_v41 }
 0x204   : > { %931 = vst.msk [vmem:[#allocation3 + $0xc8] sm:$0xff] %vm905_vm3, %v860_v55  ;;  %2217 = vrot.lane.b32.xlu1 %v2125_v36, %s11000_s25 }
 0x205   : > { %2026 = vrot.lane.b32.xlu0 %v1933_v40, %s7732_s19 }
 0x206   : > { %v1820_v20 = vpop.permute.xlu1 %1819  ;;  %v2311_v45 = vld [vmem:[#allocation3 + $0xa8] sm:$0xff] }
 0x207   : > { %v1628_v43 = vpop.permute.xlu0 %1627  ;;  %1894 = vst.msk [vmem:[#allocation3 + $0xb0] sm:$0xff] %vm1871_vm8, %v1820_v20  ;;  %7410 = vmatmul.mubr.msk.f32.gmra.mxu0 %vm2334_vm11, %v2311_v45 }
 0x208   : > { %1701 = vst.msk [vmem:[#allocation3 + $0xb8] sm:$0xff] %vm1677_vm7, %v1628_v43  ;;  %1641 = vrot.lane.b32.xlu1 %v2125_v36, %s7730_s17 }
 0x209   : > { %1450 = vrot.lane.b32.xlu0 %v1933_v40, %s7729_s0 }
 0x20a   : > { %v1244_v13 = vpop.permute.xlu1 %1243 }
 0x20b   : > { %v1053_v38 = vpop.permute.xlu0 %1052  ;;  %1316 = vst.msk [vmem:[#allocation3 + $0xc0] sm:$0xff] %vm1291_vm5, %v1244_v13 }
 0x20c   : > { %1124 = vst.msk [vmem:[#allocation3 + $0xc8] sm:$0xff] %vm1098_vm4, %v1053_v38  ;;  %1643 = vrot.lane.b32.xlu1 %v2126_v50, %s7730_s17 }
 0x20d   : > { %2219 = vrot.lane.b32.xlu0 %v2126_v50, %s11000_s25 }
 0x20e   : > { %v2013_v54 = vpop.permute.xlu1 %2012 }
 0x20f   : > { %v1822_v60 = vpop.permute.xlu0 %1821  ;;  %2087 = vst.msk [vmem:[#allocation3 + $0xb0] sm:$0xff] %vm2064_vm9, %v2013_v54 }
 0x210   : > { %1895 = vst.msk [vmem:[#allocation3 + $0xb8] sm:$0xff] %vm1871_vm8, %v1822_v60  ;;  %1837 = vrot.lane.b32.xlu1 %v1742_v53, %s11013_s23 }
 0x211   : > { %1835 = vrot.lane.b32.xlu0 %v1741_v52, %s11013_s23 }
 0x212   : > { %v1437_v58 = vpop.permute.xlu1 %1436 }
 0x213   : > { %v1246_v14 = vpop.permute.xlu0 %1245  ;;  %1509 = vst.msk [vmem:[#allocation3 + $0xc0] sm:$0xff] %vm1484_vm6, %v1437_v58 }
 0x214   : > { %1317 = vst.msk [vmem:[#allocation3 + $0xc8] sm:$0xff] %vm1291_vm5, %v1246_v14  ;;  %2030 = vrot.lane.b32.xlu1 %v1935_v27, %s7732_s19 }
 0x215   : > { %2028 = vrot.lane.b32.xlu0 %v1934_v18, %s7732_s19 }
 0x216   : > { %v2206_v21 = vpop.permute.xlu1 %2205 }
 0x217   : > { %v2015_v23 = vpop.permute.xlu0 %2014  ;;  %2280 = vst.msk [vmem:[#allocation3 + $0xb0] sm:$0xff] %vm2257_vm10, %v2206_v21 }
 0x218   : > { %2088 = vst.msk [vmem:[#allocation3 + $0xb8] sm:$0xff] %vm2064_vm9, %v2015_v23  ;;  %2223 = vrot.lane.b32.xlu1 %v2128_v46, %s11000_s25 }
 0x219   : > { %2221 = vrot.lane.b32.xlu0 %v2127_v62, %s11000_s25 }
 0x21a   : > { %v1439_v26 = vpop.permute.xlu1 %1438 }
 0x21b   : > { %v862_v49 = vpop.permute.xlu0 %861  ;;  %1510 = vst.msk [vmem:[#allocation3 + $0xc8] sm:$0xff] %vm1484_vm6, %v1439_v26 }
 0x21c   : > { %932 = vst.msk [vmem:[#allocation3 + $0xd0] sm:$0xff] %vm905_vm3, %v862_v49 }
 0x21e   : > { %v2208_v10 = vpop.permute.xlu1 %2207  ;;  %v2312_v25 = vld [vmem:[#allocation3 + $0xb0] sm:$0xff] }
 0x21f   : > { %v1630_v28 = vpop.permute.xlu0 %1629  ;;  %2281 = vst.msk [vmem:[#allocation3 + $0xb8] sm:$0xff] %vm2257_vm10, %v2208_v10  ;;  %7412 = vmatprep.mubr.msk.f32.mxu0 %vm2334_vm11, %v2312_v25 }
 0x220   : > { %1702 = vst.msk [vmem:[#allocation3 + $0xc0] sm:$0xff] %vm1677_vm7, %v1630_v28 }
 0x222   : > { %v1055_v47 = vpop.permute.xlu1 %1054 }
 0x223   : > { %v864_v35 = vpop.permute.xlu0 %863  ;;  %1125 = vst.msk [vmem:[#allocation3 + $0xd0] sm:$0xff] %vm1098_vm4, %v1055_v47 }
 0x224   : > { %933 = vst.msk [vmem:[#allocation3 + $0xd8] sm:$0xff] %vm905_vm3, %v864_v35 }
 0x226   : > { %v1824_v32 = vpop.permute.xlu1 %1823  ;;  %v2313_v39 = vld [vmem:[#allocation3 + $0xb8] sm:$0xff] }
 0x227   : > { %v1632_v30 = vpop.permute.xlu0 %1631  ;;  %1896 = vst.msk [vmem:[#allocation3 + $0xc0] sm:$0xff] %vm1871_vm8, %v1824_v32  ;;  %7413 = vmatmul.mubr.msk.f32.gmra.mxu0 %vm2334_vm11, %v2313_v39 }
 0x228   : > { %1703 = vst.msk [vmem:[#allocation3 + $0xc8] sm:$0xff] %vm1677_vm7, %v1632_v30 }
 0x22a   : > { %v1248_v40 = vpop.permute.xlu1 %1247 }
 0x22b   : > { %v1057_v36 = vpop.permute.xlu0 %1056  ;;  %1318 = vst.msk [vmem:[#allocation3 + $0xd0] sm:$0xff] %vm1291_vm5, %v1248_v40 }
 0x22c   : > { %1126 = vst.msk [vmem:[#allocation3 + $0xd8] sm:$0xff] %vm1098_vm4, %v1057_v36 }
 0x22e   : > { %v2017_v41 = vpop.permute.xlu1 %2016 }
 0x22f   : > { %v1826_v55 = vpop.permute.xlu0 %1825  ;;  %2089 = vst.msk [vmem:[#allocation3 + $0xc0] sm:$0xff] %vm2064_vm9, %v2017_v41 }
 0x230   : > { %1897 = vst.msk [vmem:[#allocation3 + $0xc8] sm:$0xff] %vm1871_vm8, %v1826_v55 }
 0x232   : > { %v1441_v20 = vpop.permute.xlu1 %1440 }
 0x233   : > { %v1250_v43 = vpop.permute.xlu0 %1249  ;;  %1511 = vst.msk [vmem:[#allocation3 + $0xd0] sm:$0xff] %vm1484_vm6, %v1441_v20 }
 0x234   : > { %1319 = vst.msk [vmem:[#allocation3 + $0xd8] sm:$0xff] %vm1291_vm5, %v1250_v43 }
 0x236   : > { %v2210_v45 = vpop.permute.xlu1 %2209 }
 0x237   : > { %v2019_v50 = vpop.permute.xlu0 %2018  ;;  %2282 = vst.msk [vmem:[#allocation3 + $0xc0] sm:$0xff] %vm2257_vm10, %v2210_v45 }
 0x238   : > { %2090 = vst.msk [vmem:[#allocation3 + $0xc8] sm:$0xff] %vm2064_vm9, %v2019_v50 }
 0x23a   : > { %v1443_v13 = vpop.permute.xlu1 %1442 }
 0x23b   : > { %v866_v38 = vpop.permute.xlu0 %865  ;;  %1512 = vst.msk [vmem:[#allocation3 + $0xd8] sm:$0xff] %vm1484_vm6, %v1443_v13 }
 0x23c   : > { %934 = vst.msk [vmem:[#allocation3 + $0xe0] sm:$0xff] %vm905_vm3, %v866_v38 }
 0x23e   : > { %v2212_v52 = vpop.permute.xlu1 %2211  ;;  %v2314_v54 = vld [vmem:[#allocation3 + $0xc0] sm:$0xff] }
 0x23f   : > { %v1634_v53 = vpop.permute.xlu0 %1633  ;;  %2283 = vst.msk [vmem:[#allocation3 + $0xc8] sm:$0xff] %vm2257_vm10, %v2212_v52  ;;  %7415 = vmatprep.mubr.msk.f32.mxu0 %vm2334_vm11, %v2314_v54 }
 0x240   : > { %1704 = vst.msk [vmem:[#allocation3 + $0xd0] sm:$0xff] %vm1677_vm7, %v1634_v53 }
 0x242   : > { %v1059_v60 = vpop.permute.xlu1 %1058 }
 0x243   : > { %v868_v18 = vpop.permute.xlu0 %867  ;;  %1127 = vst.msk [vmem:[#allocation3 + $0xe0] sm:$0xff] %vm1098_vm4, %v1059_v60 }
 0x244   : > { %935 = vst.msk [vmem:[#allocation3 + $0xe8] sm:$0xff] %vm905_vm3, %v868_v18 }
 0x246   : > { %v1828_v27 = vpop.permute.xlu1 %1827  ;;  %v2315_v14 = vld [vmem:[#allocation3 + $0xc8] sm:$0xff] }
 0x247   : > { %v1636_v58 = vpop.permute.xlu0 %1635  ;;  %1898 = vst.msk [vmem:[#allocation3 + $0xd0] sm:$0xff] %vm1871_vm8, %v1828_v27  ;;  %7416 = vmatmul.mubr.msk.f32.gmra.mxu0 %vm2334_vm11, %v2315_v14 }
 0x248   : > { %1705 = vst.msk [vmem:[#allocation3 + $0xd8] sm:$0xff] %vm1677_vm7, %v1636_v58 }
 0x24a   : > { %v1252_v62 = vpop.permute.xlu1 %1251 }
 0x24b   : > { %v1061_v46 = vpop.permute.xlu0 %1060  ;;  %1320 = vst.msk [vmem:[#allocation3 + $0xe0] sm:$0xff] %vm1291_vm5, %v1252_v62 }
 0x24c   : > { %1128 = vst.msk [vmem:[#allocation3 + $0xe8] sm:$0xff] %vm1098_vm4, %v1061_v46 }
 0x24e   : > { %v2021_v21 = vpop.permute.xlu1 %2020 }
 0x24f   : > { %v1830_v23 = vpop.permute.xlu0 %1829  ;;  %2091 = vst.msk [vmem:[#allocation3 + $0xd0] sm:$0xff] %vm2064_vm9, %v2021_v21 }
 0x250   : > { %1899 = vst.msk [vmem:[#allocation3 + $0xd8] sm:$0xff] %vm1871_vm8, %v1830_v23 }
 0x252   : > { %v1445_v26 = vpop.permute.xlu1 %1444 }
 0x253   : > { %v1254_v49 = vpop.permute.xlu0 %1253  ;;  %1513 = vst.msk [vmem:[#allocation3 + $0xe0] sm:$0xff] %vm1484_vm6, %v1445_v26 }
 0x254   : > { %1321 = vst.msk [vmem:[#allocation3 + $0xe8] sm:$0xff] %vm1291_vm5, %v1254_v49 }
 0x256   : > { %v2214_v10 = vpop.permute.xlu1 %2213 }
 0x257   : > { %v2023_v28 = vpop.permute.xlu0 %2022  ;;  %2284 = vst.msk [vmem:[#allocation3 + $0xd0] sm:$0xff] %vm2257_vm10, %v2214_v10 }
 0x258   : > { %2092 = vst.msk [vmem:[#allocation3 + $0xd8] sm:$0xff] %vm2064_vm9, %v2023_v28 }
 0x25a   : > { %v1447_v25 = vpop.permute.xlu1 %1446 }
 0x25b   : > { %v870_v47 = vpop.permute.xlu0 %869  ;;  %1514 = vst.msk [vmem:[#allocation3 + $0xe8] sm:$0xff] %vm1484_vm6, %v1447_v25  ;;  %v7381_v25 = vpop.f32.mrf.mxu0 }
 0x25c   : > { %936 = vst.msk [vmem:[#allocation3 + $0xf0] sm:$0xff] %vm905_vm3, %v870_v47 }
 0x25d   : > { %v2501_v47 = vpop.f32.mrf.mxu0 }
 0x25e   : > { %v2216_v35 = vpop.permute.xlu1 %2215  ;;  %v2316_v30 = vld [vmem:[#allocation3 + $0xd0] sm:$0xff] }
 0x25f   : > { %v1638_v32 = vpop.permute.xlu0 %1637  ;;  %2285 = vst.msk [vmem:[#allocation3 + $0xd8] sm:$0xff] %vm2257_vm10, %v2216_v35  ;;  %7418 = vmatprep.mubr.msk.f32.mxu0 %vm2334_vm11, %v2316_v30  ;;  %v7384_v35 = vpop.f32.mrf.mxu0 }
 0x260   : > { %1706 = vst.msk [vmem:[#allocation3 + $0xe0] sm:$0xff] %vm1677_vm7, %v1638_v32  ;;  %v8774_v32 = vld [vmem:[%s10955_s3] ss:$0 sm:$0xff] }
 0x261   : > { %v8777_v30 = vadd.f32 %v7381_v25, %v8774_v32 }
 0x262   : > { %v1063_v40 = vpop.permute.xlu1 %1062 }
 0x263   : > { %v872_v39 = vpop.permute.xlu0 %871  ;;  %1129 = vst.msk [vmem:[#allocation3 + $0xf0] sm:$0xff] %vm1098_vm4, %v1063_v40  ;;  %v2511_v40 = vpop.f32.mrf.mxu0 }
 0x264   : > { %937 = vst.msk [vmem:[#allocation3 + $0xf8] sm:$0xff] %vm905_vm3, %v872_v39  ;;  %v8780_v39 = vadd.f32 %v8774_v32, %v2501_v47 }
 0x266   : > { %v1832_v41 = vpop.permute.xlu1 %1831  ;;  %v2317_v55 = vld [vmem:[#allocation3 + $0xd8] sm:$0xff] }
 0x267   : > { %v1640_v36 = vpop.permute.xlu0 %1639  ;;  %1900 = vst.msk [vmem:[#allocation3 + $0xe0] sm:$0xff] %vm1871_vm8, %v1832_v41  ;;  %7419 = vmatmul.mubr.msk.f32.gmra.mxu0 %vm2334_vm11, %v2317_v55  ;;  %v8783_v41 = vadd.f32 %v8774_v32, %v2511_v40  ;;  %v2730_v55 = vmul.f32 %v8777_v30, %v8777_v30 }
 0x268   : > { %1707 = vst.msk [vmem:[#allocation3 + $0xe8] sm:$0xff] %vm1677_vm7, %v1640_v36  ;;  %v7387_v36 = vpop.f32.mrf.mxu0 }
 0x269   : > { %v8832_v40 = vadd.f32 %v7387_v36, %v8774_v32 }
 0x26a   : > { %v1256_v43 = vpop.permute.xlu1 %1255 }
 0x26b   : > { %v1065_v20 = vpop.permute.xlu0 %1064  ;;  %1322 = vst.msk [vmem:[#allocation3 + $0xf0] sm:$0xff] %vm1291_vm5, %v1256_v43  ;;  %v2521_v43 = vpop.f32.mrf.mxu0  ;;  %v2734_v36 = vmul.f32 %v8832_v40, %v8832_v40 }
 0x26c   : > { %1130 = vst.msk [vmem:[#allocation3 + $0xf8] sm:$0xff] %vm1098_vm4, %v1065_v20  ;;  %v2729_v20 = vmul.f32 %v8780_v39, %v8780_v39 }
 0x26e   : > { %v2025_v50 = vpop.permute.xlu1 %2024 }
 0x26f   : > { %v1834_v45 = vpop.permute.xlu0 %1833  ;;  %2093 = vst.msk [vmem:[#allocation3 + $0xe0] sm:$0xff] %vm2064_vm9, %v2025_v50  ;;  %v2660_v50 = vsel %vm570_vm0, %v8780_v39, 0.0 }
 0x270   : > { %1901 = vst.msk [vmem:[#allocation3 + $0xe8] sm:$0xff] %vm1871_vm8, %v1834_v45  ;;  %v2661_v45 = vsel %vm570_vm0, %v8777_v30, 0.0 }
 0x272   : > { %v1449_v38 = vpop.permute.xlu1 %1448 }
 0x273   : > { %v1258_v13 = vpop.permute.xlu0 %1257  ;;  %1515 = vst.msk [vmem:[#allocation3 + $0xf0] sm:$0xff] %vm1484_vm6, %v1449_v38  ;;  %v2762_v38 = vsel %vm570_vm0, %v2730_v55, 0.0 }
 0x274   : > { %1323 = vst.msk [vmem:[#allocation3 + $0xf8] sm:$0xff] %vm1291_vm5, %v1258_v13  ;;  %v2731_v13 = vmul.f32 %v8783_v41, %v8783_v41 }
 0x276   : > { %v2218_v53 = vpop.permute.xlu1 %2217 }
 0x277   : > { %v2027_v52 = vpop.permute.xlu0 %2026  ;;  %2286 = vst.msk [vmem:[#allocation3 + $0xe0] sm:$0xff] %vm2257_vm10, %v2218_v53  ;;  %v7390_v53 = vpop.f32.mrf.mxu0 }
 0x278   : > { %2094 = vst.msk [vmem:[#allocation3 + $0xe8] sm:$0xff] %vm2064_vm9, %v2027_v52  ;;  %v2761_v52 = vsel %vm570_vm0, %v2729_v20, 0.0 }
 0x27a   : > { %v1642_v60 = vpop.permute.xlu1 %1641 }
 0x27b   : > { %v1451_v54 = vpop.permute.xlu0 %1450  ;;  %1708 = vst.msk [vmem:[#allocation3 + $0xf0] sm:$0xff] %vm1677_vm7, %v1642_v60  ;;  %v2663_v60 = vsel %vm570_vm0, %v8783_v41, 0.0 }
 0x27c   : > { %1516 = vst.msk [vmem:[#allocation3 + $0xf8] sm:$0xff] %vm1484_vm6, %v1451_v54  ;;  %v8798_v54 = vadd.f32 %v7384_v35, %v8774_v32 }
 0x27e   : > { %v1644_v27 = vpop.permute.xlu1 %1643  ;;  %v2318_v58 = vld [vmem:[#allocation3 + $0xe0] sm:$0xff]  ;;  %v2665_v35 = vsel %vm570_vm0, %v8798_v54, 0.0 }
 0x27f   : > { %v2220_v18 = vpop.permute.xlu0 %2219  ;;  %1709 = vst.msk [vmem:[#allocation3 + $0xf8] sm:$0xff] %vm1677_vm7, %v1644_v27  ;;  %7421 = vmatprep.mubr.msk.f32.mxu0 %vm2334_vm11, %v2318_v58  ;;  %v2662_v27 = vadd.f32 %v2661_v45, %v2660_v50  ;;  %v10974_v58 = vmov 0.0  }
 0x280   : > { %2287 = vst.msk [vmem:[#allocation3 + $0xe8] sm:$0xff] %vm2257_vm10, %v2220_v18  ;;  %v8803_v18 = vadd.f32 %v8774_v32, %v2521_v43  ;;  %7427 = vmatprep.subr.mxu1 %v10974_v58  ;;  %7429 = vmatprep.mubr.msk.f32.mxu1 %vm7735_vm12, %v10974_v58 }
 0x282   : > { %v1838_v62 = vpop.permute.xlu1 %1837  ;;  %v2667_v55 = vsel %vm570_vm0, %v8803_v18, 0.0 }
 0x283   : > { %v1836_v14 = vpop.permute.xlu0 %1835  ;;  %1903 = vst.msk [vmem:[#allocation3 + $0xf8] sm:$0xff] %vm1871_vm8, %v1838_v62  ;;  %v2764_v62 = vsel %vm570_vm0, %v2731_v13, 0.0 }
 0x284   : > { %1902 = vst.msk [vmem:[#allocation3 + $0xf0] sm:$0xff] %vm1871_vm8, %v1836_v14  ;;  %v2900_v14 = vld [vmem:[%s10959_s7] sm:$0xf] }
 0x285   : > { %7428 = vmatpush3.msk.msra.mxu1 %vm2431_vm2, %v2900_v14 }
 0x286   : > { %v2031_v21 = vpop.permute.xlu1 %2030 }
 0x287   : > { %v2029_v46 = vpop.permute.xlu0 %2028  ;;  %v2319_v23 = vld [vmem:[#allocation3 + $0xe8] sm:$0xff]  ;;  %2096 = vst.msk [vmem:[#allocation3 + $0xf8] sm:$0xff] %vm2064_vm9, %v2031_v21  ;;  %v2763_v21 = vadd.f32 %v2762_v38, %v2761_v52 }
 0x288   : > { %2095 = vst.msk [vmem:[#allocation3 + $0xf0] sm:$0xff] %vm2064_vm9, %v2029_v46  ;;  %7422 = vmatmul.mubr.msk.f32.gmra.mxu0 %vm2334_vm11, %v2319_v23  ;;  %v568_v46 = vld [vmem:[%s8813_s18] sm:$0x1]  ;;  %v2664_v23 = vadd.f32 %v2663_v60, %v2662_v27 }
 0x289   : > { %7430 = vmatmul.mubr.msk.f32.vlgmr.msra.gmra.mxu1 %vm570_vm0, %v568_v46  ;;  %v2765_v25 = vadd.f32 %v2764_v62, %v2763_v21  ;;  %v2669_v62 = vsel %vm570_vm0, %v8832_v40, 0.0  ;;  %v8849_v46 = vadd.f32 %v7390_v53, %v8774_v32 }
 0x28a   : > { %v2224_v49 = vpop.permute.xlu1 %2223  ;;  %v2666_v43 = vadd.f32 %v2665_v35, %v2664_v23 }
 0x28b   : > { %v2222_v26 = vpop.permute.xlu0 %2221  ;;  %2289 = vst.msk [vmem:[#allocation3 + $0xf8] sm:$0xff] %vm2257_vm10, %v2224_v49  ;;  %v2732_v49 = vmul.f32 %v8798_v54, %v8798_v54 }
 0x28c   : > { %2288 = vst.msk [vmem:[#allocation3 + $0xf0] sm:$0xff] %vm2257_vm10, %v2222_v26  ;;  %v2531_v26 = vpop.f32.mrf.mxu0  ;;  %v2668_v13 = vadd.f32 %v2667_v55, %v2666_v43  ;;  %v2736_v55 = vmul.f32 %v8849_v46, %v8849_v46 }
 0x28d   : > { %v8837_v20 = vadd.f32 %v8774_v32, %v2531_v26  ;;  %v2766_v45 = vsel %vm570_vm0, %v2732_v49, 0.0  ;;  %v2770_v49 = vsel %vm570_vm0, %v2734_v36, 0.0 }
 0x28e   : > { %v7393_v47 = vpop.f32.mrf.mxu0  ;;  %v2767_v38 = vadd.f32 %v2766_v45, %v2765_v25  ;;  %v2670_v26 = vadd.f32 %v2669_v62, %v2668_v13 }
 0x28f   : > { %v2735_v60 = vmul.f32 %v8837_v20, %v8837_v20  ;;  %v2671_v21 = vsel %vm570_vm0, %v8837_v20, 0.0  ;;  %v8865_v13 = vadd.f32 %v7393_v47, %v8774_v32 }
 0x290   : > { %v2541_v52 = vpop.f32.mrf.mxu0 }
 0x291   : > { %v8854_v23 = vadd.f32 %v8774_v32, %v2541_v52 }
 0x292   : > { %v2321_v28 = vld [vmem:[#allocation3 + $0xf8] sm:$0xff]  ;;  %v7396_v14 = vpop.f32.mrf.mxu0 }
 0x293   : > { %v2320_v10 = vld [vmem:[#allocation3 + $0xf0] sm:$0xff]  ;;  %v2737_v53 = vmul.f32 %v8854_v23, %v8854_v23 }
 0x294   : > { %7424 = vmatprep.mubr.msk.f32.mxu0 %vm2334_vm11, %v2320_v10  ;;  %v2733_v10 = vmul.f32 %v8803_v18, %v8803_v18  ;;  %v2551_v35 = vpop.f32.mrf.mxu0 }
 0x295   : > { %7425 = vmatmul.mubr.msk.f32.gmra.mxu0 %vm2334_vm11, %v2321_v28  ;;  %v2978_v28 = vld [vmem:[%s10958_s6] sm:$0xf]  ;;  %v8870_v52 = vadd.f32 %v8774_v32, %v2551_v35  ;;  %v2677_v35 = vsel %vm570_vm0, %v8865_v13, 0.0 }
 0x296   : > { %7432 = vmatprep.subr.msk.mxu1 %vm2431_vm2, %v2978_v28  ;;  %v2768_v50 = vsel %vm570_vm0, %v2733_v10, 0.0  ;;  %v2772_v10 = vsel %vm570_vm0, %v2735_v60, 0.0  ;;  %v7399_v45 = vpop.f32.mrf.mxu0  ;;  %v2774_v60 = vsel %vm570_vm0, %v2736_v55, 0.0 }
 0x297   : > { %7433 = vmatpush3.msk.msra.mxu1 %vm2431_vm2, %v2978_v28  ;;  %v2769_v27 = vadd.f32 %v2768_v50, %v2767_v38  ;;  %v2672_v28 = vadd.f32 %v2671_v21, %v2670_v26  ;;  %v2673_v50 = vsel %vm570_vm0, %v8849_v46, 0.0  ;;  %v2675_v38 = vsel %vm570_vm0, %v8854_v23, 0.0 }
 0x298   : > { %v2561_v26 = vpop.f32.mrf.mxu0  ;;  %v2739_v47 = vmul.f32 %v8870_v52, %v8870_v52  ;;  %v2679_v55 = vsel %vm570_vm0, %v8870_v52, 0.0 }
 0x299   : > { %v2771_v25 = vadd.f32 %v2770_v49, %v2769_v27  ;;  %v2674_v36 = vadd.f32 %v2673_v50, %v2672_v28  ;;  %v2776_v27 = vsel %vm570_vm0, %v2737_v53, 0.0  ;;  %v2738_v49 = vmul.f32 %v8865_v13, %v8865_v13 }
 0x29a   : > { %v8881_v28 = vadd.f32 %v7396_v14, %v8774_v32  ;;  %v8886_v53 = vadd.f32 %v8774_v32, %v2561_v26 }
 0x29b   : > { %v2773_v43 = vadd.f32 %v2772_v10, %v2771_v25  ;;  %v2676_v62 = vadd.f32 %v2675_v38, %v2674_v36  ;;  %v7402_v25 = vpop.f32.mrf.mxu0  ;;  %v2778_v50 = vsel %vm570_vm0, %v2738_v49, 0.0  ;;  %v2780_v38 = vsel %vm570_vm0, %v2739_v47, 0.0 }
 0x29c   : > { %v2741_v14 = vmul.f32 %v8886_v53, %v8886_v53  ;;  %v2681_v26 = vsel %vm570_vm0, %v8881_v28, 0.0  ;;  %v2683_v49 = vsel %vm570_vm0, %v8886_v53, 0.0 }
 0x29d   : > { %v2775_v21 = vadd.f32 %v2774_v60, %v2773_v43  ;;  %v2678_v43 = vadd.f32 %v2677_v35, %v2676_v62  ;;  %v8897_v62 = vadd.f32 %v7399_v45, %v8774_v32 }
 0x29f   : > { %v2777_v10 = vadd.f32 %v2776_v27, %v2775_v21  ;;  %v2680_v36 = vadd.f32 %v2679_v55, %v2678_v43  ;;  %v2571_v27 = vpop.f32.mrf.mxu0  ;;  %v2740_v21 = vmul.f32 %v8881_v28, %v8881_v28  ;;  %v2784_v55 = vsel %vm570_vm0, %v2741_v14, 0.0 }
 0x2a0   : > { %v8902_v47 = vadd.f32 %v8774_v32, %v2571_v27  ;;  %v2685_v27 = vsel %vm570_vm0, %v8897_v62, 0.0 }
 0x2a1   : > { %v2779_v60 = vadd.f32 %v2778_v50, %v2777_v10  ;;  %v7405_v42 = vpop.f32.mrf.mxu0  ;;  %v2682_v10 = vadd.f32 %v2681_v26, %v2680_v36  ;;  %v2782_v35 = vsel %vm570_vm0, %v2740_v21, 0.0  ;;  %v8913_v36 = vadd.f32 %v7402_v25, %v8774_v32 }
 0x2a2   : > { %v2743_v45 = vmul.f32 %v8902_v47, %v8902_v47  ;;  %v2687_v21 = vsel %vm570_vm0, %v8902_v47, 0.0 }
 0x2a3   : > { %v2781_v58 = vadd.f32 %v2780_v38, %v2779_v60  ;;  %v2684_v43 = vadd.f32 %v2683_v49, %v2682_v10  ;;  %v2581_v38 = vpop.f32.mrf.mxu0  ;;  %v2742_v60 = vmul.f32 %v8897_v62, %v8897_v62 }
 0x2a4   : > { %v2788_v49 = vsel %vm570_vm0, %v2743_v45, 0.0 }
 0x2a5   : > { %v2783_v50 = vadd.f32 %v2782_v35, %v2781_v58  ;;  %v8918_v58 = vadd.f32 %v8774_v32, %v2581_v38  ;;  %v2686_v14 = vadd.f32 %v2685_v27, %v2684_v43  ;;  %v2786_v26 = vsel %vm570_vm0, %v2742_v60, 0.0 }
 0x2a6   : > { %v2689_v38 = vsel %vm570_vm0, %v8913_v36, 0.0  ;;  %v8929_v43 = vadd.f32 %v7405_v42, %v8774_v32 }
 0x2a7   : > { %v2785_v61 = vadd.f32 %v2784_v55, %v2783_v50  ;;  %v7408_v16 = vpop.f32.mrf.mxu0  ;;  %v2688_v10 = vadd.f32 %v2687_v21, %v2686_v14  ;;  %v2744_v50 = vmul.f32 %v8913_v36, %v8913_v36  ;;  %v2745_v25 = vmul.f32 %v8918_v58, %v8918_v58 }
 0x2a8   : > { %v2691_v60 = vsel %vm570_vm0, %v8918_v58, 0.0 }
 0x2a9   : > { %v2787_v35 = vadd.f32 %v2786_v26, %v2785_v61  ;;  %v2591_v55 = vpop.f32.mrf.mxu0  ;;  %v2690_v45 = vadd.f32 %v2689_v38, %v2688_v10  ;;  %v2790_v27 = vsel %vm570_vm0, %v2744_v50, 0.0  ;;  %v2792_v21 = vsel %vm570_vm0, %v2745_v25, 0.0 }
 0x2aa   : > { %v8934_v61 = vadd.f32 %v8774_v32, %v2591_v55  ;;  %v2693_v55 = vsel %vm570_vm0, %v8929_v43, 0.0  ;;  %v8945_v10 = vadd.f32 %v7408_v16, %v8774_v32 }
 0x2ab   : > { %v2789_v11 = vadd.f32 %v2788_v49, %v2787_v35  ;;  %v2692_v14 = vadd.f32 %v2691_v60, %v2690_v45  ;;  %v2746_v35 = vmul.f32 %v8929_v43, %v8929_v43 }
 0x2ac   : > { %v2747_v42 = vmul.f32 %v8934_v61, %v8934_v61  ;;  %v2695_v50 = vsel %vm570_vm0, %v8934_v61, 0.0 }
 0x2ad   : > { %v2791_v26 = vadd.f32 %v2790_v27, %v2789_v11  ;;  %v2694_v25 = vadd.f32 %v2693_v55, %v2692_v14  ;;  %v2794_v38 = vsel %vm570_vm0, %v2746_v35, 0.0 }
 0x2ae   : > { %v2796_v60 = vsel %vm570_vm0, %v2747_v42, 0.0 }
 0x2af   : > { %v2793_v17 = vadd.f32 %v2792_v21, %v2791_v26  ;;  %v2696_v45 = vadd.f32 %v2695_v50, %v2694_v25  ;;  %v2748_v26 = vmul.f32 %v8945_v10, %v8945_v10 }
 0x2b1   : > { %v2795_v27 = vadd.f32 %v2794_v38, %v2793_v17  ;;  %v2798_v55 = vsel %vm570_vm0, %v2748_v26, 0.0 }
 0x2b3   : > { %v2797_v24 = vadd.f32 %v2796_v60, %v2795_v27 }
 0x2b5   : > { %v2799_v38 = vadd.f32 %v2798_v55, %v2797_v24 }
 0x2c7   : > { %v7411_v51 = vpop.f32.mrf.mxu0 }
 0x2c8   : > { %v8961_v14 = vadd.f32 %v7411_v51, %v8774_v32 }
 0x2c9   : > { %v2601_v49 = vpop.f32.mrf.mxu0 }
 0x2ca   : > { %v8950_v11 = vadd.f32 %v8774_v32, %v2601_v49  ;;  %v2697_v49 = vsel %vm570_vm0, %v8945_v10, 0.0  ;;  %v2750_v27 = vmul.f32 %v8961_v14, %v8961_v14 }
 0x2cb   : > { %v2698_v42 = vadd.f32 %v2697_v49, %v2696_v45 }
 0x2cc   : > { %v2749_v16 = vmul.f32 %v8950_v11, %v8950_v11  ;;  %v2699_v35 = vsel %vm570_vm0, %v8950_v11, 0.0 }
 0x2cd   : > { %v2700_v25 = vadd.f32 %v2699_v35, %v2698_v42  ;;  %v2802_v35 = vsel %vm570_vm0, %v2750_v27, 0.0 }
 0x2ce   : > { %v2800_v50 = vsel %vm570_vm0, %v2749_v16, 0.0  ;;  %v8987_v16 = vld [vmem:[%s10961_s9] sm:$0xff] }
 0x2cf   : > { %v2801_v33 = vadd.f32 %v2800_v50, %v2799_v38  ;;  %7482 = vmatprep.subr.mxu1 %v8987_v16 }
 0x2d1   : > { %v2803_v55 = vadd.f32 %v2802_v35, %v2801_v33 }
 0x2e7   : > { %v7414_v57 = vpop.f32.mrf.mxu0 }
 0x2e8   : > { %v8977_v45 = vadd.f32 %v7414_v57, %v8774_v32 }
 0x2e9   : > { %v2611_v21 = vpop.f32.mrf.mxu0 }
 0x2ea   : > { %v8966_v17 = vadd.f32 %v8774_v32, %v2611_v21  ;;  %v2701_v21 = vsel %vm570_vm0, %v8961_v14, 0.0  ;;  %v2752_v38 = vmul.f32 %v8977_v45, %v8977_v45  ;;  %v2705_v34 = vsel %vm570_vm0, %v8977_v45, 0.0 }
 0x2eb   : > { %v2702_v49 = vadd.f32 %v2701_v21, %v2700_v25 }
 0x2ec   : > { %v2751_v51 = vmul.f32 %v8966_v17, %v8966_v17  ;;  %v2703_v26 = vsel %vm570_vm0, %v8966_v17, 0.0  ;;  %v2806_v21 = vsel %vm570_vm0, %v2752_v38, 0.0 }
 0x2ed   : > { %v2704_v57 = vadd.f32 %v2703_v26, %v2702_v49 }
 0x2ee   : > { %v2804_v42 = vsel %vm570_vm0, %v2751_v51, 0.0 }
 0x2ef   : > { %v2805_v48 = vadd.f32 %v2804_v42, %v2803_v55  ;;  %v2706_v33 = vadd.f32 %v2705_v34, %v2704_v57 }
 0x2f1   : > { %v2807_v42 = vadd.f32 %v2806_v21, %v2805_v48 }
 0x307   : > { %v7417_v19 = vpop.f32.mrf.mxu0 }
 0x308   : > { %v8999_v25 = vadd.f32 %v7417_v19, %v8774_v32 }
 0x309   : > { %v2621_v60 = vpop.f32.mrf.mxu0 }
 0x30a   : > { %v8982_v24 = vadd.f32 %v8774_v32, %v2621_v60  ;;  %v2754_v55 = vmul.f32 %v8999_v25, %v8999_v25 }
 0x30c   : > { %v2753_v60 = vmul.f32 %v8982_v24, %v8982_v24  ;;  %v2707_v27 = vsel %vm570_vm0, %v8982_v24, 0.0 }
 0x30d   : > { %v2708_v35 = vadd.f32 %v2707_v27, %v2706_v33 }
 0x30e   : > { %v2808_v26 = vsel %vm570_vm0, %v2753_v60, 0.0  ;;  %v2810_v60 = vsel %vm570_vm0, %v2754_v55, 0.0 }
 0x30f   : > { %v2809_v22 = vadd.f32 %v2808_v26, %v2807_v42 }
 0x311   : > { %v2811_v21 = vadd.f32 %v2810_v60, %v2809_v22 }
 0x327   : > { %v7420_v31 = vpop.f32.mrf.mxu0 }
 0x328   : > { %v9015_v34 = vadd.f32 %v7420_v31, %v8774_v32 }
 0x329   : > { %v2631_v50 = vpop.f32.mrf.mxu0 }
 0x32a   : > { %v9004_v51 = vadd.f32 %v8774_v32, %v2631_v50  ;;  %v2709_v50 = vsel %vm570_vm0, %v8999_v25, 0.0  ;;  %v2756_v26 = vmul.f32 %v9015_v34, %v9015_v34  ;;  %v2713_v29 = vsel %vm570_vm0, %v9015_v34, 0.0 }
 0x32b   : > { %v2710_v48 = vadd.f32 %v2709_v50, %v2708_v35 }
 0x32c   : > { %v2755_v19 = vmul.f32 %v9004_v51, %v9004_v51  ;;  %v2711_v57 = vsel %vm570_vm0, %v9004_v51, 0.0 }
 0x32d   : > { %v2712_v33 = vadd.f32 %v2711_v57, %v2710_v48 }
 0x32e   : > { %v2812_v27 = vsel %vm570_vm0, %v2755_v19, 0.0  ;;  %v2814_v19 = vsel %vm570_vm0, %v2756_v26, 0.0 }
 0x32f   : > { %v2813_v42 = vadd.f32 %v2812_v27, %v2811_v21  ;;  %v2714_v55 = vadd.f32 %v2713_v29, %v2712_v33 }
 0x331   : > { %v2815_v57 = vadd.f32 %v2814_v19, %v2813_v42 }
 0x348   : > { %v7423_v49 = vpop.f32.mrf.mxu0 }
 0x34a   : > { %v2641_v63 = vpop.f32.mrf.mxu0 }
 0x34b   : > { %v9020_v38 = vadd.f32 %v8774_v32, %v2641_v63  ;;  %v9031_v63 = vadd.f32 %v7423_v49, %v8774_v32 }
 0x34d   : > { %v2757_v31 = vmul.f32 %v9020_v38, %v9020_v38  ;;  %v2715_v35 = vsel %vm570_vm0, %v9020_v38, 0.0  ;;  %v2758_v60 = vmul.f32 %v9031_v63, %v9031_v63  ;;  %v2717_v12 = vsel %vm570_vm0, %v9031_v63, 0.0 }
 0x34e   : > { %v2716_v50 = vadd.f32 %v2715_v35, %v2714_v55 }
 0x34f   : > { %v2816_v22 = vsel %vm570_vm0, %v2757_v31, 0.0  ;;  %v2818_v26 = vsel %vm570_vm0, %v2758_v60, 0.0 }
 0x350   : > { %v2817_v21 = vadd.f32 %v2816_v22, %v2815_v57  ;;  %v2718_v33 = vadd.f32 %v2717_v12, %v2716_v50 }
 0x352   : > { %v2819_v19 = vadd.f32 %v2818_v26, %v2817_v21 }
 0x355   : > { %v7426_v48 = vpop.f32.mrf.mxu0 }
 0x356   : > { %v9040_v27 = vadd.f32 %v7426_v48, %v8774_v32 }
 0x357   : > { %v2651_v49 = vpop.f32.mrf.mxu0 }
 0x358   : > { %v2652_v29 = vadd.f32 %v8774_v32, %v2651_v49  ;;  %v2760_v31 = vmul.f32 %v9040_v27, %v9040_v27  ;;  %v2721_v22 = vsel %vm570_vm0, %v9040_v27, 0.0 }
 0x35a   : > { %v2719_v42 = vsel %vm570_vm0, %v2652_v29, 0.0  ;;  %v2759_v35 = vmul.f32 %v2652_v29, %v2652_v29  ;;  %v2822_v32 = vsel %vm570_vm0, %v2760_v31, 0.0 }
 0x35b   : > { %v2720_v55 = vadd.f32 %v2719_v42, %v2718_v33 }
 0x35c   : > { %v2820_v57 = vsel %vm570_vm0, %v2759_v35, 0.0 }
 0x35d   : > { %v2722_v48 = vadd.f32 %v2721_v22, %v2720_v55  ;;  %v2821_v15 = vadd.f32 %v2820_v57, %v2819_v19 }
 0x35f   : > { %v2723_v12 = vrot.slane %v2722_v48, 4  ;;  %v2823_v50 = vadd.f32 %v2822_v32, %v2821_v15 }
 0x361   : > { %v2724_v60 = vadd.f32 %v2723_v12, %v2722_v48  ;;  %v2824_v49 = vrot.slane %v2823_v50, 4 }
 0x363   : > { %v2725_v56 = vrot.slane %v2724_v60, 2  ;;  %v2825_v59 = vadd.f32 %v2824_v49, %v2823_v50 }
 0x365   : > { %v2726_v37 = vadd.f32 %v2725_v56, %v2724_v60  ;;  %v2826_v44 = vrot.slane %v2825_v59, 2 }
 0x367   : > { %v2727_v8 = vrot.slane %v2726_v37, 1  ;;  %v2827_v33 = vadd.f32 %v2826_v44, %v2825_v59 }
 0x369   : > { %v2728_v21 = vadd.f32 %v2727_v8, %v2726_v37  ;;  %v2828_v26 = vrot.slane %v2827_v33, 1 }
 0x36b   : > { %v2829_v42 = vadd.f32 %v2828_v26, %v2827_v33  ;;  %v9053_v9 = vmul.f32 0.00390625, %v2728_v21 }
 0x36d   : > { %v2831_v35 = vmul.f32 0.00390625, %v2829_v42  ;;  %v2832_v55 = vmul.f32 %v9053_v9, %v9053_v9  ;;  %v2864_v31 = vsub.f32 %v2652_v29, %v9053_v9  ;;  %v2862_v56 = vsub.f32 %v9020_v38, %v9053_v9 }
 0x36e   : > { %v2863_v44 = vsub.f32 %v9031_v63, %v9053_v9  ;;  %v2865_v8 = vsub.f32 %v9040_v27, %v9053_v9  ;;  %v2834_v37 = vsub.f32 %v8780_v39, %v9053_v9  ;;  %v2835_v59 = vsub.f32 %v8777_v30, %v9053_v9 }
 0x36f   : > { %v2833_v15 = vsub.f32 %v2831_v35, %v2832_v55  ;;  %v2836_v38 = vsub.f32 %v8783_v41, %v9053_v9  ;;  %v2837_v39 = vsub.f32 %v8798_v54, %v9053_v9  ;;  %v2838_v30 = vsub.f32 %v8803_v18, %v9053_v9 }
 0x370   : > { %v2861_v41 = vsub.f32 %v9015_v34, %v9053_v9  ;;  %v2839_v32 = vsub.f32 %v8832_v40, %v9053_v9  ;;  %v11033_v54 = vmov 0.0   ;;  %v2840_v40 = vsub.f32 %v8837_v20, %v9053_v9 }
 0x371   : > { %v2866_v19 = vadd.f32 1e-05, %v2833_v15  ;;  %v2841_v33 = vsub.f32 %v8849_v46, %v9053_v9  ;;  %v2842_v21 = vsub.f32 %v8854_v23, %v9053_v9  ;;  %v2843_v42 = vsub.f32 %v8865_v13, %v9053_v9 }
 0x372   : > { %v2844_v35 = vsub.f32 %v8870_v52, %v9053_v9  ;;  %v2845_v55 = vsub.f32 %v8881_v28, %v9053_v9  ;;  %v2847_v15 = vsub.f32 %v8897_v62, %v9053_v9 }
 0x373   : > { %7713 = vrsqrt.f32 %v2866_v19  ;;  %v2848_v19 = vsub.f32 %v8902_v47, %v9053_v9 }
 0x380   : > { %v9068_v22 = vpop.eup %7713 }
 0x381   : > { %v9071_v29 = vmul.f32 %v9068_v22, %v2864_v31  ;;  %v2868_v57 = vmul.f32 %v9068_v22, %v2834_v37  ;;  %v2869_v63 = vmul.f32 %v9068_v22, %v2835_v59  ;;  %v2870_v27 = vmul.f32 %v9068_v22, %v2836_v38 }
 0x382   : > { %v2871_v48 = vmul.f32 %v9068_v22, %v2837_v39  ;;  %v2872_v12 = vmul.f32 %v9068_v22, %v2838_v30  ;;  %v9094_v50 = vmul.f32 %v9068_v22, %v2861_v41  ;;  %v9097_v18 = vmul.f32 %v9068_v22, %v2862_v56 }
 0x383   : > { %7434 = vmatprep.mubr.msk.f32.mxu1 %vm570_vm0, %v2868_v57  ;;  %v9100_v60 = vmul.f32 %v9068_v22, %v2863_v44  ;;  %v9103_v34 = vmul.f32 %v9068_v22, %v2865_v8  ;;  %v2874_v49 = vmul.f32 %v9068_v22, %v2840_v40  ;;  %v2875_v26 = vmul.f32 %v9068_v22, %v2841_v33 }
 0x384   : > { %7435 = vmatmul.mubr.msk.f32.vlgmr.msra.gmra.mxu1 %vm570_vm0, %v2869_v63  ;;  %v2876_v20 = vmul.f32 %v9068_v22, %v2842_v21  ;;  %v2877_v46 = vmul.f32 %v9068_v22, %v2843_v42  ;;  %v2878_v23 = vmul.f32 %v9068_v22, %v2844_v35  ;;  %v2846_v31 = vsub.f32 %v8886_v53, %v9053_v9 }
 0x385   : > { %7437 = vmatprep.mubr.msk.f32.mxu1 %vm570_vm0, %v2870_v27  ;;  %7483 = vmatpush3.msra.mxu1 %v8987_v16  ;;  %v2873_v16 = vmul.f32 %v9068_v22, %v2839_v32  ;;  %v2879_v13 = vmul.f32 %v9068_v22, %v2845_v55  ;;  %v2881_v28 = vmul.f32 %v9068_v22, %v2847_v15 }
 0x386   : > { %7590 = vmatprep.subr.mxu1 %v11033_v54  ;;  %v2880_v52 = vmul.f32 %v9068_v22, %v2846_v31  ;;  %v2882_v53 = vmul.f32 %v9068_v22, %v2848_v19  ;;  %v2849_v56 = vsub.f32 %v8913_v36, %v9053_v9  ;;  %v2850_v44 = vsub.f32 %v8918_v58, %v9053_v9 }
 0x387   : > { %v2851_v8 = vsub.f32 %v8929_v43, %v9053_v9  ;;  %v2852_v37 = vsub.f32 %v8934_v61, %v9053_v9  ;;  %v2853_v59 = vsub.f32 %v8945_v10, %v9053_v9  ;;  %v2854_v38 = vsub.f32 %v8950_v11, %v9053_v9 }
 0x388   : > { %7438 = vmatmul.mubr.msk.f32.gmra.mxu1 %vm570_vm0, %v2871_v48  ;;  %v2883_v62 = vmul.f32 %v9068_v22, %v2849_v56  ;;  %v2884_v47 = vmul.f32 %v9068_v22, %v2850_v44  ;;  %v2855_v57 = vsub.f32 %v8961_v14, %v9053_v9  ;;  %v2856_v63 = vsub.f32 %v8966_v17, %v9053_v9  ;;  %v2901_v48 = vld [vmem:[%s10960_s8] sm:$0x1] }
 0x389   : > { %7440 = vmatprep.mubr.msk.f32.mxu1 %vm570_vm0, %v2872_v12  ;;  %v2885_v36 = vmul.f32 %v9068_v22, %v2851_v8  ;;  %v2886_v58 = vmul.f32 %v9068_v22, %v2852_v37  ;;  %v2887_v43 = vmul.f32 %v9068_v22, %v2853_v59  ;;  %v2888_v61 = vmul.f32 %v9068_v22, %v2854_v38 }
 0x38a   : > { %v2889_v10 = vmul.f32 %v9068_v22, %v2855_v57  ;;  %v2890_v11 = vmul.f32 %v9068_v22, %v2856_v63  ;;  %v2857_v27 = vsub.f32 %v8977_v45, %v9053_v9  ;;  %v2858_v39 = vsub.f32 %v8982_v24, %v9053_v9 }
 0x38b   : > { %v2859_v30 = vsub.f32 %v8999_v25, %v9053_v9  ;;  %v2860_v41 = vsub.f32 %v9004_v51, %v9053_v9  ;;  %v2974_v9 = vpop.f32.mrf.mxu1  ;;  %v2979_v51 = vlaneseq }
 0x38c   : > { %7441 = vmatmul.mubr.msk.f32.gmra.mxu1 %vm570_vm0, %v2873_v16  ;;  %v2891_v14 = vmul.f32 %v9068_v22, %v2857_v27  ;;  %v2892_v17 = vmul.f32 %v9068_v22, %v2858_v39  ;;  %v2975_v32 = vadd.f32 %v2974_v9, %v2901_v48 }
 0x38d   : > { %7443 = vmatprep.mubr.msk.f32.mxu1 %vm570_vm0, %v2874_v49  ;;  %v2893_v45 = vmul.f32 %v9068_v22, %v2859_v30  ;;  %v2894_v24 = vmul.f32 %v9068_v22, %v2860_v41  ;;  %v7431_v25 = vpop.f32.mrf.mxu1  ;;  %v9203_v22 = vshrl.u32 %v2979_v51, 7 }
 0x38f   : > { %v11004_v12 = vsub.s32 0, %v9203_v22 }
 0x390   : > { %7444 = vmatmul.mubr.msk.f32.gmra.mxu1 %vm570_vm0, %v2875_v26 }
 0x391   : > { %7446 = vmatprep.mubr.msk.f32.mxu1 %vm570_vm0, %v2876_v20 }
 0x394   : > { %7447 = vmatmul.mubr.msk.f32.gmra.mxu1 %vm570_vm0, %v2877_v46 }
 0x395   : > { %7449 = vmatprep.mubr.msk.f32.mxu1 %vm570_vm0, %v2878_v23 }
 0x398   : > { %7450 = vmatmul.mubr.msk.f32.gmra.mxu1 %vm570_vm0, %v2879_v13 }
 0x399   : > { %7452 = vmatprep.mubr.msk.f32.mxu1 %vm570_vm0, %v2880_v52 }
 0x39c   : > { %7453 = vmatmul.mubr.msk.f32.gmra.mxu1 %vm570_vm0, %v2881_v28 }
 0x39d   : > { %7455 = vmatprep.mubr.msk.f32.mxu1 %vm570_vm0, %v2882_v53 }
 0x3a0   : > { %7456 = vmatmul.mubr.msk.f32.gmra.mxu1 %vm570_vm0, %v2883_v62 }
 0x3a1   : > { %7458 = vmatprep.mubr.msk.f32.mxu1 %vm570_vm0, %v2884_v47 }
 0x3a4   : > { %7459 = vmatmul.mubr.msk.f32.gmra.mxu1 %vm570_vm0, %v2885_v36 }
 0x3a5   : > { %7461 = vmatprep.mubr.msk.f32.mxu1 %vm570_vm0, %v2886_v58 }
 0x3a8   : > { %7462 = vmatmul.mubr.msk.f32.gmra.mxu1 %vm570_vm0, %v2887_v43 }
 0x3a9   : > { %7464 = vmatprep.mubr.msk.f32.mxu1 %vm570_vm0, %v2888_v61 }
 0x3ac   : > { %7465 = vmatmul.mubr.msk.f32.gmra.mxu1 %vm570_vm0, %v2889_v10 }
 0x3ad   : > { %7467 = vmatprep.mubr.msk.f32.mxu1 %vm570_vm0, %v2890_v11 }
 0x3b0   : > { %7468 = vmatmul.mubr.msk.f32.gmra.mxu1 %vm570_vm0, %v2891_v14 }
 0x3b1   : > { %7470 = vmatprep.mubr.msk.f32.mxu1 %vm570_vm0, %v2892_v17 }
 0x3b4   : > { %7471 = vmatmul.mubr.msk.f32.gmra.mxu1 %vm570_vm0, %v2893_v45 }
 0x3b5   : > { %7473 = vmatprep.mubr.msk.f32.mxu1 %vm570_vm0, %v2894_v24 }
 0x3b8   : > { %7474 = vmatmul.mubr.msk.f32.gmra.mxu1 %vm570_vm0, %v9094_v50  ;;  %v9211_v50 = vrot.slane %v2975_v32, %v11004_v12 }
 0x3b9   : > { %7476 = vmatprep.mubr.msk.f32.mxu1 %vm570_vm0, %v9097_v18 }
 0x3bc   : > { %7477 = vmatmul.mubr.msk.f32.gmra.mxu1 %vm570_vm0, %v9100_v60 }
 0x3bd   : > { %7479 = vmatprep.mubr.msk.f32.mxu1 %vm570_vm0, %v9071_v29 }
 0x3c0   : > { %7480 = vmatmul.mubr.msk.f32.gmra.mxu1 %vm570_vm0, %v9103_v34 }
 0x444   : > { %v7436_v29 = vpop.f32.mrf.mxu1 }
 0x445   : > { %v3154_v18 = vadd.f32 %v7436_v29, %v9211_v50 }
 0x446   : > { %v3148_v60 = vpop.f32.mrf.mxu1 }
 0x447   : > { %v3149_v34 = vadd.f32 %v3148_v60, %v9211_v50  ;;  %v3308_v49 = vmax.f32 %v3154_v18, 0.0 }
 0x448   : > { %v7439_v40 = vpop.f32.mrf.mxu1 }
 0x449   : > { %v3307_v16 = vmax.f32 %v3149_v34, 0.0  ;;  %v3164_v33 = vadd.f32 %v7439_v40, %v9211_v50 }
 0x44a   : > { %v3158_v21 = vpop.f32.mrf.mxu1 }
 0x44b   : > { %v3159_v26 = vadd.f32 %v3158_v21, %v9211_v50  ;;  %7484 = vmatprep.mubr.msk.f32.mxu1 %vm3347_vm13, %v3307_v16  ;;  %v3310_v35 = vmax.f32 %v3164_v33, 0.0 }
 0x44c   : > { %v7442_v20 = vpop.f32.mrf.mxu1  ;;  %7485 = vmatmul.mubr.msk.f32.vlgmr.msra.gmra.mxu1 %vm3347_vm13, %v3308_v49 }
 0x44d   : > { %v3309_v42 = vmax.f32 %v3159_v26, 0.0  ;;  %v3174_v46 = vadd.f32 %v7442_v20, %v9211_v50 }
 0x44e   : > { %v3168_v23 = vpop.f32.mrf.mxu1 }
 0x44f   : > { %v3169_v55 = vadd.f32 %v3168_v23, %v9211_v50  ;;  %7487 = vmatprep.mubr.msk.f32.mxu1 %vm3347_vm13, %v3309_v42  ;;  %v3312_v52 = vmax.f32 %v3174_v46, 0.0 }
 0x450   : > { %v7445_v31 = vpop.f32.mrf.mxu1  ;;  %7488 = vmatmul.mubr.msk.f32.gmra.mxu1 %vm3347_vm13, %v3310_v35 }
 0x451   : > { %v3311_v13 = vmax.f32 %v3169_v55, 0.0  ;;  %v3184_v15 = vadd.f32 %v7445_v31, %v9211_v50 }
 0x452   : > { %v3178_v19 = vpop.f32.mrf.mxu1 }
 0x453   : > { %v3179_v28 = vadd.f32 %v3178_v19, %v9211_v50  ;;  %7490 = vmatprep.mubr.msk.f32.mxu1 %vm3347_vm13, %v3311_v13  ;;  %v3314_v44 = vmax.f32 %v3184_v15, 0.0 }
 0x454   : > { %v7448_v53 = vpop.f32.mrf.mxu1  ;;  %7491 = vmatmul.mubr.msk.f32.gmra.mxu1 %vm3347_vm13, %v3312_v52 }
 0x455   : > { %v3313_v56 = vmax.f32 %v3179_v28, 0.0  ;;  %v3194_v62 = vadd.f32 %v7448_v53, %v9211_v50 }
 0x456   : > { %v3188_v47 = vpop.f32.mrf.mxu1 }
 0x457   : > { %v3189_v8 = vadd.f32 %v3188_v47, %v9211_v50  ;;  %7493 = vmatprep.mubr.msk.f32.mxu1 %vm3347_vm13, %v3313_v56  ;;  %v3316_v58 = vmax.f32 %v3194_v62, 0.0 }
 0x458   : > { %v7451_v37 = vpop.f32.mrf.mxu1  ;;  %7494 = vmatmul.mubr.msk.f32.gmra.mxu1 %vm3347_vm13, %v3314_v44 }
 0x459   : > { %v3315_v36 = vmax.f32 %v3189_v8, 0.0  ;;  %v3204_v59 = vadd.f32 %v7451_v37, %v9211_v50 }
 0x45a   : > { %v3198_v38 = vpop.f32.mrf.mxu1 }
 0x45b   : > { %v3199_v43 = vadd.f32 %v3198_v38, %v9211_v50  ;;  %7496 = vmatprep.mubr.msk.f32.mxu1 %vm3347_vm13, %v3315_v36  ;;  %v3318_v63 = vmax.f32 %v3204_v59, 0.0 }
 0x45c   : > { %v7454_v61 = vpop.f32.mrf.mxu1  ;;  %7497 = vmatmul.mubr.msk.f32.gmra.mxu1 %vm3347_vm13, %v3316_v58 }
 0x45d   : > { %v3317_v57 = vmax.f32 %v3199_v43, 0.0  ;;  %v3214_v10 = vadd.f32 %v7454_v61, %v9211_v50 }
 0x45e   : > { %v3208_v11 = vpop.f32.mrf.mxu1 }
 0x45f   : > { %v3209_v27 = vadd.f32 %v3208_v11, %v9211_v50  ;;  %7499 = vmatprep.mubr.msk.f32.mxu1 %vm3347_vm13, %v3317_v57  ;;  %v3320_v17 = vmax.f32 %v3214_v10, 0.0 }
 0x460   : > { %v7457_v39 = vpop.f32.mrf.mxu1  ;;  %7500 = vmatmul.mubr.msk.f32.gmra.mxu1 %vm3347_vm13, %v3318_v63 }
 0x461   : > { %v3319_v14 = vmax.f32 %v3209_v27, 0.0  ;;  %v3224_v30 = vadd.f32 %v7457_v39, %v9211_v50 }
 0x462   : > { %v3218_v41 = vpop.f32.mrf.mxu1 }
 0x463   : > { %v3219_v45 = vadd.f32 %v3218_v41, %v9211_v50  ;;  %7502 = vmatprep.mubr.msk.f32.mxu1 %vm3347_vm13, %v3319_v14  ;;  %v3322_v25 = vmax.f32 %v3224_v30, 0.0  ;;  %v9282_v41 = vld [vmem:[%s10962_s10] ss:$0 sm:$0xff] }
 0x464   : > { %v7460_v24 = vpop.f32.mrf.mxu1  ;;  %7503 = vmatmul.mubr.msk.f32.gmra.mxu1 %vm3347_vm13, %v3320_v17 }
 0x465   : > { %v3321_v9 = vmax.f32 %v3219_v45, 0.0  ;;  %v3234_v51 = vadd.f32 %v7460_v24, %v9211_v50 }
 0x466   : > { %v3228_v48 = vpop.f32.mrf.mxu1 }
 0x467   : > { %v3229_v32 = vadd.f32 %v3228_v48, %v9211_v50  ;;  %7505 = vmatprep.mubr.msk.f32.mxu1 %vm3347_vm13, %v3321_v9  ;;  %v3324_v60 = vmax.f32 %v3234_v51, 0.0 }
 0x468   : > { %v7463_v29 = vpop.f32.mrf.mxu1  ;;  %7506 = vmatmul.mubr.msk.f32.gmra.mxu1 %vm3347_vm13, %v3322_v25 }
 0x469   : > { %v3323_v18 = vmax.f32 %v3229_v32, 0.0  ;;  %v3244_v34 = vadd.f32 %v7463_v29, %v9211_v50 }
 0x46a   : > { %v3238_v40 = vpop.f32.mrf.mxu1 }
 0x46b   : > { %v3239_v16 = vadd.f32 %v3238_v40, %v9211_v50  ;;  %7508 = vmatprep.mubr.msk.f32.mxu1 %vm3347_vm13, %v3323_v18  ;;  %v3326_v21 = vmax.f32 %v3244_v34, 0.0 }
 0x46c   : > { %v7466_v49 = vpop.f32.mrf.mxu1  ;;  %7509 = vmatmul.mubr.msk.f32.gmra.mxu1 %vm3347_vm13, %v3324_v60 }
 0x46d   : > { %v3325_v33 = vmax.f32 %v3239_v16, 0.0  ;;  %v3254_v26 = vadd.f32 %v7466_v49, %v9211_v50 }
 0x46e   : > { %v3248_v20 = vpop.f32.mrf.mxu1 }
 0x46f   : > { %v3249_v42 = vadd.f32 %v3248_v20, %v9211_v50  ;;  %7511 = vmatprep.mubr.msk.f32.mxu1 %vm3347_vm13, %v3325_v33  ;;  %v3328_v23 = vmax.f32 %v3254_v26, 0.0 }
 0x470   : > { %v7469_v35 = vpop.f32.mrf.mxu1  ;;  %7512 = vmatmul.mubr.msk.f32.gmra.mxu1 %vm3347_vm13, %v3326_v21 }
 0x471   : > { %v3327_v46 = vmax.f32 %v3249_v42, 0.0  ;;  %v3264_v55 = vadd.f32 %v7469_v35, %v9211_v50 }
 0x472   : > { %v3258_v31 = vpop.f32.mrf.mxu1 }
 0x473   : > { %v3259_v13 = vadd.f32 %v3258_v31, %v9211_v50  ;;  %7514 = vmatprep.mubr.msk.f32.mxu1 %vm3347_vm13, %v3327_v46  ;;  %v3330_v19 = vmax.f32 %v3264_v55, 0.0 }
 0x474   : > { %v7472_v52 = vpop.f32.mrf.mxu1  ;;  %7515 = vmatmul.mubr.msk.f32.gmra.mxu1 %vm3347_vm13, %v3328_v23 }
 0x475   : > { %v3329_v15 = vmax.f32 %v3259_v13, 0.0  ;;  %v3274_v28 = vadd.f32 %v7472_v52, %v9211_v50 }
 0x476   : > { %v3268_v53 = vpop.f32.mrf.mxu1 }
 0x477   : > { %v3269_v56 = vadd.f32 %v3268_v53, %v9211_v50  ;;  %7517 = vmatprep.mubr.msk.f32.mxu1 %vm3347_vm13, %v3329_v15  ;;  %v3332_v47 = vmax.f32 %v3274_v28, 0.0 }
 0x478   : > { %v7475_v44 = vpop.f32.mrf.mxu1  ;;  %7518 = vmatmul.mubr.msk.f32.gmra.mxu1 %vm3347_vm13, %v3330_v19 }
 0x479   : > { %v3331_v62 = vmax.f32 %v3269_v56, 0.0  ;;  %v3284_v8 = vadd.f32 %v7475_v44, %v9211_v50 }
 0x47a   : > { %v3278_v37 = vpop.f32.mrf.mxu1 }
 0x47b   : > { %v3279_v36 = vadd.f32 %v3278_v37, %v9211_v50  ;;  %7520 = vmatprep.mubr.msk.f32.mxu1 %vm3347_vm13, %v3331_v62  ;;  %v3334_v38 = vmax.f32 %v3284_v8, 0.0 }
 0x47c   : > { %v7478_v58 = vpop.f32.mrf.mxu1  ;;  %7521 = vmatmul.mubr.msk.f32.gmra.mxu1 %vm3347_vm13, %v3332_v47 }
 0x47d   : > { %v3333_v59 = vmax.f32 %v3279_v36, 0.0  ;;  %v3294_v43 = vadd.f32 %v7478_v58, %v9211_v50 }
 0x47e   : > { %v3288_v61 = vpop.f32.mrf.mxu1 }
 0x47f   : > { %v3289_v57 = vadd.f32 %v3288_v61, %v9211_v50  ;;  %7523 = vmatprep.mubr.msk.f32.mxu1 %vm3347_vm13, %v3333_v59  ;;  %v3336_v11 = vmax.f32 %v3294_v43, 0.0 }
 0x480   : > { %v7481_v63 = vpop.f32.mrf.mxu1  ;;  %7524 = vmatmul.mubr.msk.f32.gmra.mxu1 %vm3347_vm13, %v3334_v38 }
 0x481   : > { %v3335_v10 = vmax.f32 %v3289_v57, 0.0  ;;  %v3304_v27 = vadd.f32 %v7481_v63, %v9211_v50 }
 0x482   : > { %v3298_v39 = vpop.f32.mrf.mxu1 }
 0x483   : > { %v3299_v14 = vadd.f32 %v3298_v39, %v9211_v50  ;;  %7526 = vmatprep.mubr.msk.f32.mxu1 %vm3347_vm13, %v3335_v10  ;;  %v3338_v30 = vmax.f32 %v3304_v27, 0.0 }
 0x484   : > { %7527 = vmatmul.mubr.msk.f32.gmra.mxu1 %vm3347_vm13, %v3336_v11 }
 0x485   : > { %v3337_v17 = vmax.f32 %v3299_v14, 0.0 }
 0x487   : > { %7529 = vmatprep.mubr.msk.f32.mxu1 %vm3347_vm13, %v3337_v17 }
 0x488   : > { %7530 = vmatmul.mubr.msk.f32.gmra.mxu1 %vm3347_vm13, %v3338_v30 }
 0x489   : > { %7592 = vmatprep.mubr.msk.f32.mxu1 %vm7735_vm12, %v11033_v54 }
 0x50c   : > { %v7486_v45 = vpop.f32.mrf.mxu1 }
 0x50d   : > { %v3516_v50 = vadd.f32 %v7486_v45, %v9282_v41 }
 0x50e   : > { %v3510_v24 = vpop.f32.mrf.mxu1 }
 0x50f   : > { %v3670_v9 = vmax.f32 %v3516_v50, 0.0  ;;  %v3511_v25 = vadd.f32 %v9282_v41, %v3510_v24 }
 0x510   : > { %v7489_v51 = vpop.f32.mrf.mxu1 }
 0x511   : > { %3702 = vst.msk [vmem:[#allocation2 + $0x21] sm:$0xff] %vm570_vm0, %v3670_v9  ;;  %v3669_v48 = vmax.f32 %v3511_v25, 0.0  ;;  %v3526_v32 = vadd.f32 %v7489_v51, %v9282_v41 }
 0x512   : > { %v3520_v29 = vpop.f32.mrf.mxu1 }
 0x513   : > { %3701 = vst.msk [vmem:[#allocation2 + $0x19] sm:$0xff] %vm570_vm0, %v3669_v48  ;;  %v3672_v54 = vmax.f32 %v3526_v32, 0.0  ;;  %v3521_v18 = vadd.f32 %v9282_v41, %v3520_v29 }
 0x514   : > { %v7492_v60 = vpop.f32.mrf.mxu1 }
 0x515   : > { %3734 = vst.msk [vmem:[#allocation2 + $0x9] sm:$0xff] %vm570_vm0, %v3672_v54  ;;  %3704 = vst.msk [vmem:[#allocation2 + $0x39] sm:$0xff] %vm570_vm0, %v3672_v54  ;;  %v3671_v34 = vmax.f32 %v3521_v18, 0.0  ;;  %v3536_v40 = vadd.f32 %v7492_v60, %v9282_v41 }
 0x516   : > { %v3530_v16 = vpop.f32.mrf.mxu1 }
 0x517   : > { %3733 = vst.msk [vmem:[#allocation2 + $0x1] sm:$0xff] %vm570_vm0, %v3671_v34  ;;  %3703 = vst.msk [vmem:[#allocation2 + $0x31] sm:$0xff] %vm570_vm0, %v3671_v34  ;;  %v3674_v49 = vmax.f32 %v3536_v40, 0.0  ;;  %v3531_v33 = vadd.f32 %v9282_v41, %v3530_v16 }
 0x518   : > { %v7495_v21 = vpop.f32.mrf.mxu1  ;;  %v4450_v26 = vld [vmem:[#allocation2 + $0x21] sm:$0xff] }
 0x519   : > { %v3774_v20 = vld [vmem:[#allocation2 + $0x27] sm:$0x1]  ;;  %3706 = vst.msk [vmem:[#allocation2 + $0x51] sm:$0xff] %vm570_vm0, %v3674_v49  ;;  %v3673_v42 = vmax.f32 %v3531_v33, 0.0  ;;  %v3546_v35 = vadd.f32 %v7495_v21, %v9282_v41  ;;  %4515 = vrot.lane.b32.xlu0 %v4450_v26, %s7729_s0 }
 0x51a   : > { %3792 = vst.msk [vmem:[#allocation2 + $0x29] sm:$0x1] %vm626_vm1, %v3774_v20  ;;  %v3540_v46 = vpop.f32.mrf.mxu1  ;;  %v4258_v23 = vld [vmem:[#allocation2 + $0x20] sm:$0xff]  ;;  %v3738_v13 = vld [vmem:[#allocation2 + $0x1a] sm:$0x1] }
 0x51b   : > { %3705 = vst.msk [vmem:[#allocation2 + $0x49] sm:$0xff] %vm570_vm0, %v3673_v42  ;;  %v3676_v55 = vmax.f32 %v3546_v35, 0.0  ;;  %v3541_v31 = vadd.f32 %v9282_v41, %v3540_v46  ;;  %4323 = vrot.lane.b32.xlu1 %v4258_v23, %s11014_s30  ;;  %3844 = vst.msk [vmem:[#allocation3 + $0x18] sm:$0xff] %vm570_vm0, %v4258_v23  ;;  %v3875_v44 = vld [vmem:[#allocation2 + $0x19] sm:$0xff] }
 0x51c   : > { %v7498_v52 = vpop.f32.mrf.mxu1  ;;  %3756 = vst.msk [vmem:[#allocation2 + $0x18] sm:$0x1] %vm626_vm1, %v3738_v13  ;;  %v3773_v15 = vld [vmem:[#allocation2 + $0xf] sm:$0x1]  ;;  %v3775_v53 = vld [vmem:[#allocation2 + $0x3f] sm:$0x1] }
 0x51d   : > { %3708 = vst.msk [vmem:[#allocation2 + $0x69] sm:$0xff] %vm570_vm0, %v3676_v55  ;;  %v3675_v19 = vmax.f32 %v3541_v31, 0.0  ;;  %v3556_v28 = vadd.f32 %v7498_v52, %v9282_v41  ;;  %3943 = vrot.lane.b32.xlu0 %v4450_v26, %s7727_s29  ;;  %v4641_v63 = vld [vmem:[#allocation2 + $0x1a] sm:$0xff]  ;;  %v3874_v49 = vld [vmem:[#allocation2 + $0x9] sm:$0xff] }
 0x51e   : > { %3791 = vst.msk [vmem:[#allocation2 + $0x11] sm:$0x1] %vm626_vm1, %v3773_v15  ;;  %v3550_v56 = vpop.f32.mrf.mxu1  ;;  %3793 = vst.msk [vmem:[#allocation2 + $0x41] sm:$0x1] %vm626_vm1, %v3775_v53  ;;  %v9313_v8 = vld [vmem:[#allocation2 + $0x38] sm:$0xff]  ;;  %v3810_v43 = vld [vmem:[#allocation2 + $0x8] sm:$0xff] }
 0x51f   : > { %3707 = vst.msk [vmem:[#allocation2 + $0x61] sm:$0xff] %vm570_vm0, %v3675_v19  ;;  %v3678_v62 = vmax.f32 %v3556_v28, 0.0  ;;  %v3551_v47 = vadd.f32 %v9282_v41, %v3550_v56  ;;  %3941 = vrot.lane.b32.xlu1 %v3875_v44, %s7727_s29  ;;  %v3739_v37 = vld [vmem:[#allocation2 + $0x32] sm:$0x1]  ;;  %3846 = vst.msk [vmem:[#allocation3 + $0x28] sm:$0xff] %vm570_vm0, %v9313_v8  ;;  %v5026_v30 = vld [vmem:[#allocation2 + $0x39] sm:$0xff] }
 0x520   : > { %v7501_v36 = vpop.f32.mrf.mxu1  ;;  %3757 = vst.msk [vmem:[#allocation2 + $0x30] sm:$0x1] %vm626_vm1, %v3739_v37  ;;  %v3776_v58 = vld [vmem:[#allocation2 + $0x57] sm:$0x1]  ;;  %v3737_v61 = vld [vmem:[#allocation2 + $0x2] sm:$0x1] }
 0x521   : > { %3710 = vst.msk [vmem:[#allocation2 + $0x81] sm:$0xff] %vm570_vm0, %v3678_v62  ;;  %v3677_v59 = vmax.f32 %v3551_v47, 0.0  ;;  %v3566_v38 = vadd.f32 %v7501_v36, %v9282_v41  ;;  %4513 = vrot.lane.b32.xlu0 %v3875_v44, %s7729_s0  ;;  %3842 = vst.msk [vmem:[#allocation3 + $0x8] sm:$0xff] %vm570_vm0, %v3810_v43  ;;  %v3873_v46 = vld [vmem:[#allocation2 + $0x1] sm:$0xff] }
 0x522   : > { %3794 = vst.msk [vmem:[#allocation2 + $0x59] sm:$0x1] %vm626_vm1, %v3776_v58  ;;  %v3560_v57 = vpop.f32.mrf.mxu1  ;;  %v9322_v10 = vld [vmem:[#allocation2 + $0x50] sm:$0xff]  ;;  %3755 = vst.msk [vmem:[#allocation2] sm:$0x1] %vm626_vm1, %v3737_v61  ;;  %v4065_v44 = vld [vmem:[#allocation2 + $0x2] sm:$0xff] }
 0x523   : > { %3709 = vst.msk [vmem:[#allocation2 + $0x79] sm:$0xff] %vm570_vm0, %v3677_v59  ;;  %v3680_v11 = vmax.f32 %v3566_v38, 0.0  ;;  %v3561_v27 = vadd.f32 %v9282_v41, %v3560_v57  ;;  %4705 = vrot.lane.b32.xlu1 %v4641_v63, %s7730_s17  ;;  %v9329_v39 = vld [vmem:[#allocation2 + $0x18] sm:$0xff]  ;;  %v3740_v14 = vld [vmem:[#allocation2 + $0x4a] sm:$0x1]  ;;  %3848 = vst.msk [vmem:[#allocation3 + $0x38] sm:$0xff] %vm570_vm0, %v9322_v10 }
 0x524   : > { %v7504_v17 = vpop.f32.mrf.mxu1  ;;  %3758 = vst.msk [vmem:[#allocation2 + $0x48] sm:$0x1] %vm626_vm1, %v3740_v14  ;;  %v3777_v45 = vld [vmem:[#allocation2 + $0x6f] sm:$0x1]  ;;  %v5025_v58 = vld [vmem:[#allocation2 + $0x31] sm:$0xff] }
 0x525   : > { %3843 = vst.msk [vmem:[#allocation3 + $0x10] sm:$0xff] %vm570_vm0, %v9329_v39  ;;  %3712 = vst.msk [vmem:[#allocation2 + $0x99] sm:$0xff] %vm570_vm0, %v3680_v11  ;;  %v3679_v50 = vmax.f32 %v3561_v27, 0.0  ;;  %v3576_v24 = vadd.f32 %v7504_v17, %v9282_v41  ;;  %5091 = vrot.lane.b32.xlu0 %v5026_v30, %s7732_s19 }
 0x526   : > { %3795 = vst.msk [vmem:[#allocation2 + $0x71] sm:$0x1] %vm626_vm1, %v3777_v45  ;;  %v3570_v9 = vpop.f32.mrf.mxu1  ;;  %v9340_v25 = vld [vmem:[#allocation2 + $0x68] sm:$0xff]  ;;  %v3741_v29 = vld [vmem:[#allocation2 + $0x62] sm:$0x1] }
 0x527   : > { %3711 = vst.msk [vmem:[#allocation2 + $0x91] sm:$0xff] %vm570_vm0, %v3679_v50  ;;  %v3682_v51 = vmax.f32 %v3576_v24, 0.0  ;;  %v3571_v48 = vadd.f32 %v9282_v41, %v3570_v9  ;;  %4133 = vrot.lane.b32.xlu1 %v4641_v63, %s11002_s28  ;;  %v9345_v32 = vld [vmem:[#allocation2 + $0x30] sm:$0xff]  ;;  %3850 = vst.msk [vmem:[#allocation3 + $0x48] sm:$0xff] %vm570_vm0, %v9340_v25 }
 0x528   : > { %v7507_v54 = vpop.f32.mrf.mxu1  ;;  %3759 = vst.msk [vmem:[#allocation2 + $0x60] sm:$0x1] %vm626_vm1, %v3741_v29  ;;  %v3778_v18 = vld [vmem:[#allocation2 + $0x87] sm:$0x1] }
 0x529   : > { %3845 = vst.msk [vmem:[#allocation3 + $0x20] sm:$0xff] %vm570_vm0, %v9345_v32  ;;  %3714 = vst.msk [vmem:[#allocation2 + $0xb1] sm:$0xff] %vm570_vm0, %v3682_v51  ;;  %v3681_v60 = vmax.f32 %v3571_v48, 0.0  ;;  %v3586_v34 = vadd.f32 %v7507_v54, %v9282_v41  ;;  %3947 = vrot.lane.b32.xlu0 %v5026_v30, %s7727_s29  ;;  %v3809_v40 = vld [vmem:[#allocation2] sm:$0xff] }
 0x52a   : > { %3796 = vst.msk [vmem:[#allocation2 + $0x89] sm:$0x1] %vm626_vm1, %v3778_v18  ;;  %v3580_v16 = vpop.f32.mrf.mxu1  ;;  %v9356_v33 = vld [vmem:[#allocation2 + $0x80] sm:$0xff]  ;;  %v3742_v42 = vld [vmem:[#allocation2 + $0x7a] sm:$0x1] }
 0x52b   : > { %3841 = vst.msk [vmem:[#allocation3] sm:$0xff] %vm570_vm0, %v3809_v40  ;;  %3713 = vst.msk [vmem:[#allocation2 + $0xa9] sm:$0xff] %vm570_vm0, %v3681_v60  ;;  %v3684_v21 = vmax.f32 %v3586_v34, 0.0  ;;  %v3581_v26 = vadd.f32 %v9282_v41, %v3580_v16  ;;  %3939 = vrot.lane.b32.xlu1 %v3874_v49, %s7727_s29  ;;  %v9362_v20 = vld [vmem:[#allocation2 + $0x48] sm:$0xff]  ;;  %v5217_v60 = vld [vmem:[#allocation2 + $0x32] sm:$0xff] }
 0x52c   : > { %3852 = vst.msk [vmem:[#allocation3 + $0x58] sm:$0xff] %vm570_vm0, %v9356_v33  ;;  %v7510_v35 = vpop.f32.mrf.mxu1  ;;  %3847 = vst.msk [vmem:[#allocation3 + $0x30] sm:$0xff] %vm570_vm0, %v9362_v20  ;;  %v3779_v23 = vld [vmem:[#allocation2 + $0x9f] sm:$0x1] }
 0x52d   : > { %3760 = vst.msk [vmem:[#allocation2 + $0x78] sm:$0x1] %vm626_vm1, %v3742_v42  ;;  %v3683_v55 = vmax.f32 %v3581_v26, 0.0  ;;  %v3596_v31 = vadd.f32 %v7510_v35, %v9282_v41  ;;  %3937 = vrot.lane.b32.xlu0 %v3873_v46, %s7727_s29  ;;  %3797 = vst.msk [vmem:[#allocation2 + $0xa1] sm:$0x1] %vm626_vm1, %v3779_v23 }
 0x52e   : > { %3716 = vst.msk [vmem:[#allocation2 + $0xc9] sm:$0xff] %vm570_vm0, %v3684_v21  ;;  %v3590_v13 = vpop.f32.mrf.mxu1  ;;  %v9373_v52 = vld [vmem:[#allocation2 + $0x98] sm:$0xff]  ;;  %v3743_v53 = vld [vmem:[#allocation2 + $0x92] sm:$0x1] }
 0x52f   : > { %3715 = vst.msk [vmem:[#allocation2 + $0xc1] sm:$0xff] %vm570_vm0, %v3683_v55  ;;  %v3686_v15 = vmax.f32 %v3596_v31, 0.0  ;;  %v3591_v19 = vadd.f32 %v9282_v41, %v3590_v13  ;;  %4519 = vrot.lane.b32.xlu1 %v5026_v30, %s7729_s0  ;;  %v9378_v28 = vld [vmem:[#allocation2 + $0x60] sm:$0xff]  ;;  %3854 = vst.msk [vmem:[#allocation3 + $0x68] sm:$0xff] %vm570_vm0, %v9373_v52 }
 0x530   : > { %v7513_v56 = vpop.f32.mrf.mxu1  ;;  %3761 = vst.msk [vmem:[#allocation2 + $0x90] sm:$0x1] %vm626_vm1, %v3743_v53  ;;  %v3780_v62 = vld [vmem:[#allocation2 + $0xb7] sm:$0x1] }
 0x531   : > { %3849 = vst.msk [vmem:[#allocation3 + $0x40] sm:$0xff] %vm570_vm0, %v9378_v28  ;;  %3718 = vst.msk [vmem:[#allocation2 + $0xe1] sm:$0xff] %vm570_vm0, %v3686_v15  ;;  %v3685_v47 = vmax.f32 %v3591_v19, 0.0  ;;  %v3606_v37 = vadd.f32 %v7513_v56, %v9282_v41  ;;  %4129 = vrot.lane.b32.xlu0 %v4065_v44, %s11002_s28 }
 0x532   : > { %3798 = vst.msk [vmem:[#allocation2 + $0xb9] sm:$0x1] %vm626_vm1, %v3780_v62  ;;  %v3600_v36 = vpop.f32.mrf.mxu1  ;;  %v9389_v59 = vld [vmem:[#allocation2 + $0xb0] sm:$0xff]  ;;  %v3744_v57 = vld [vmem:[#allocation2 + $0xaa] sm:$0x1] }
 0x533   : > { %3717 = vst.msk [vmem:[#allocation2 + $0xd9] sm:$0xff] %vm570_vm0, %v3685_v47  ;;  %v3688_v38 = vmax.f32 %v3606_v37, 0.0  ;;  %v3601_v43 = vadd.f32 %v9282_v41, %v3600_v36  ;;  %5089 = vrot.lane.b32.xlu1 %v5025_v58, %s7732_s19  ;;  %3856 = vst.msk [vmem:[#allocation3 + $0x78] sm:$0xff] %vm570_vm0, %v9389_v59  ;;  %v9455_v47 = vld [vmem:[#allocation2 + $0x51] sm:$0xff] }
 0x534   : > { %v9394_v61 = vld [vmem:[#allocation2 + $0x78] sm:$0xff]  ;;  %v7516_v63 = vpop.f32.mrf.mxu1  ;;  %3762 = vst.msk [vmem:[#allocation2 + $0xa8] sm:$0x1] %vm626_vm1, %v3744_v57 }
 0x535   : > { %3851 = vst.msk [vmem:[#allocation3 + $0x50] sm:$0xff] %vm570_vm0, %v9394_v61  ;;  %v3781_v11 = vld [vmem:[#allocation2 + $0xcf] sm:$0x1]  ;;  %3720 = vst.msk [vmem:[#allocation2 + $0xf9] sm:$0xff] %vm570_vm0, %v3688_v38  ;;  %v3687_v27 = vmax.f32 %v3601_v43, 0.0  ;;  %v3616_v14 = vadd.f32 %v7516_v63, %v9282_v41  ;;  %4899 = vrot.lane.b32.xlu0 %v9313_v8, %s11013_s23  ;;  %v4642_v63 = vld [vmem:[#allocation2 + $0x22] sm:$0xff] }
 0x536   : > { %3799 = vst.msk [vmem:[#allocation2 + $0xd1] sm:$0x1] %vm626_vm1, %v3781_v11  ;;  %v3610_v17 = vpop.f32.mrf.mxu1  ;;  %v9406_v30 = vld [vmem:[#allocation2 + $0xc8] sm:$0xff]  ;;  %v3745_v9 = vld [vmem:[#allocation2 + $0xc2] sm:$0x1] }
 0x537   : > { %3719 = vst.msk [vmem:[#allocation2 + $0xf1] sm:$0xff] %vm570_vm0, %v3687_v27  ;;  %v3690_v45 = vmax.f32 %v3616_v14, 0.0  ;;  %v3611_v50 = vadd.f32 %v9282_v41, %v3610_v17  ;;  %4517 = vrot.lane.b32.xlu1 %v5025_v58, %s7729_s0  ;;  %v9411_v24 = vld [vmem:[#allocation2 + $0x90] sm:$0xff]  ;;  %3858 = vst.msk [vmem:[#allocation3 + $0x88] sm:$0xff] %vm570_vm0, %v9406_v30 }
 0x538   : > { %v7519_v51 = vpop.f32.mrf.mxu1  ;;  %3763 = vst.msk [vmem:[#allocation2 + $0xc0] sm:$0x1] %vm626_vm1, %v3745_v9  ;;  %v3782_v48 = vld [vmem:[#allocation2 + $0xe7] sm:$0x1] }
 0x539   : > { %3853 = vst.msk [vmem:[#allocation3 + $0x60] sm:$0xff] %vm570_vm0, %v9411_v24  ;;  %3722 = vst.msk [vmem:[#allocation2 + $0x111] sm:$0xff] %vm570_vm0, %v3690_v45  ;;  %v3689_v29 = vmax.f32 %v3611_v50, 0.0  ;;  %v3626_v54 = vadd.f32 %v7519_v51, %v9282_v41  ;;  %4327 = vrot.lane.b32.xlu0 %v9313_v8, %s11014_s30  ;;  %v9474_v45 = vld [vmem:[#allocation2 + $0x49] sm:$0xff] }
 0x53a   : > { %3800 = vst.msk [vmem:[#allocation2 + $0xe9] sm:$0x1] %vm626_vm1, %v3782_v48  ;;  %v3620_v18 = vpop.f32.mrf.mxu1  ;;  %v9423_v34 = vld [vmem:[#allocation2 + $0xe0] sm:$0xff]  ;;  %v3746_v21 = vld [vmem:[#allocation2 + $0xda] sm:$0x1] }
 0x53b   : > { %3721 = vst.msk [vmem:[#allocation2 + $0x109] sm:$0xff] %vm570_vm0, %v3689_v29  ;;  %v3692_v40 = vmax.f32 %v3626_v54, 0.0  ;;  %v3621_v16 = vadd.f32 %v9282_v41, %v3620_v18  ;;  %5281 = vrot.lane.b32.xlu1 %v5217_v60, %s11000_s25  ;;  %v9428_v49 = vld [vmem:[#allocation2 + $0xa8] sm:$0xff]  ;;  %3860 = vst.msk [vmem:[#allocation3 + $0x98] sm:$0xff] %vm570_vm0, %v9423_v34 }
 0x53c   : > { %v7522_v8 = vpop.f32.mrf.mxu1  ;;  %3764 = vst.msk [vmem:[#allocation2 + $0xd8] sm:$0x1] %vm626_vm1, %v3746_v21  ;;  %v3783_v26 = vld [vmem:[#allocation2 + $0xff] sm:$0x1] }
 0x53d   : > { %3855 = vst.msk [vmem:[#allocation3 + $0x70] sm:$0xff] %vm570_vm0, %v9428_v49  ;;  %3724 = vst.msk [vmem:[#allocation2 + $0x129] sm:$0xff] %vm570_vm0, %v3692_v40  ;;  %v3691_v42 = vmax.f32 %v3621_v16, 0.0  ;;  %v3636_v35 = vadd.f32 %v7522_v8, %v9282_v41  ;;  %3945 = vrot.lane.b32.xlu0 %v5025_v58, %s7727_s29 }
 0x53e   : > { %3801 = vst.msk [vmem:[#allocation2 + $0x101] sm:$0x1] %vm626_vm1, %v3783_v26  ;;  %v3630_v46 = vpop.f32.mrf.mxu1  ;;  %v9439_v23 = vld [vmem:[#allocation2 + $0xf8] sm:$0xff]  ;;  %v3747_v15 = vld [vmem:[#allocation2 + $0xf2] sm:$0x1] }
 0x53f   : > { %3723 = vst.msk [vmem:[#allocation2 + $0x121] sm:$0xff] %vm570_vm0, %v3691_v42  ;;  %v3694_v55 = vmax.f32 %v3636_v35, 0.0  ;;  %v3631_v31 = vadd.f32 %v9282_v41, %v3630_v46  ;;  %4137 = vrot.lane.b32.xlu1 %v5217_v60, %s11002_s28  ;;  %v9444_v13 = vld [vmem:[#allocation2 + $0xc0] sm:$0xff]  ;;  %3862 = vst.msk [vmem:[#allocation3 + $0xa8] sm:$0xff] %vm570_vm0, %v9439_v23 }
 0x540   : > { %v7525_v19 = vpop.f32.mrf.mxu1  ;;  %3765 = vst.msk [vmem:[#allocation2 + $0xf0] sm:$0x1] %vm626_vm1, %v3747_v15  ;;  %v3784_v53 = vld [vmem:[#allocation2 + $0x117] sm:$0x1] }
 0x541   : > { %3857 = vst.msk [vmem:[#allocation3 + $0x80] sm:$0xff] %vm570_vm0, %v9444_v13  ;;  %3726 = vst.msk [vmem:[#allocation2 + $0x141] sm:$0xff] %vm570_vm0, %v3694_v55  ;;  %v3693_v56 = vmax.f32 %v3631_v31, 0.0  ;;  %v3646_v44 = vadd.f32 %v7525_v19, %v9282_v41  ;;  %4709 = vrot.lane.b32.xlu0 %v5217_v60, %s7730_s17 }
 0x542   : > { %3802 = vst.msk [vmem:[#allocation2 + $0x119] sm:$0x1] %vm626_vm1, %v3784_v53  ;;  %v3640_v62 = vpop.f32.mrf.mxu1  ;;  %v9457_v37 = vld [vmem:[#allocation2 + $0x110] sm:$0xff]  ;;  %v3748_v43 = vld [vmem:[#allocation2 + $0x10a] sm:$0x1] }
 0x543   : > { %3725 = vst.msk [vmem:[#allocation2 + $0x139] sm:$0xff] %vm570_vm0, %v3693_v56  ;;  %v3696_v36 = vmax.f32 %v3646_v44, 0.0  ;;  %v3641_v58 = vadd.f32 %v9282_v41, %v3640_v62  ;;  %4523 = vrot.lane.b32.xlu1 %v9455_v47, %s7729_s0  ;;  %v9463_v38 = vld [vmem:[#allocation2 + $0xd8] sm:$0xff]  ;;  %3864 = vst.msk [vmem:[#allocation3 + $0xb8] sm:$0xff] %vm570_vm0, %v9457_v37 }
 0x544   : > { %v7528_v57 = vpop.f32.mrf.mxu1  ;;  %3766 = vst.msk [vmem:[#allocation2 + $0x108] sm:$0x1] %vm626_vm1, %v3748_v43  ;;  %v3785_v11 = vld [vmem:[#allocation2 + $0x12f] sm:$0x1] }
 0x545   : > { %3859 = vst.msk [vmem:[#allocation3 + $0x90] sm:$0xff] %vm570_vm0, %v9463_v38  ;;  %3728 = vst.msk [vmem:[#allocation2 + $0x159] sm:$0xff] %vm570_vm0, %v3696_v36  ;;  %v3695_v27 = vmax.f32 %v3641_v58, 0.0  ;;  %v3656_v14 = vadd.f32 %v7528_v57, %v9282_v41  ;;  %4707 = vrot.lane.b32.xlu0 %v4642_v63, %s7730_s17 }
 0x546   : > { %3803 = vst.msk [vmem:[#allocation2 + $0x131] sm:$0x1] %vm626_vm1, %v3785_v11  ;;  %v3650_v17 = vpop.f32.mrf.mxu1  ;;  %v9476_v50 = vld [vmem:[#allocation2 + $0x128] sm:$0xff]  ;;  %v3749_v29 = vld [vmem:[#allocation2 + $0x122] sm:$0x1] }
 0x547   : > { %3727 = vst.msk [vmem:[#allocation2 + $0x151] sm:$0xff] %vm570_vm0, %v3695_v27  ;;  %v3698_v9 = vmax.f32 %v3656_v14, 0.0  ;;  %v3651_v51 = vadd.f32 %v9282_v41, %v3650_v17  ;;  %5093 = vrot.lane.b32.xlu1 %v9474_v45, %s7732_s19  ;;  %v9482_v48 = vld [vmem:[#allocation2 + $0xf0] sm:$0xff]  ;;  %3866 = vst.msk [vmem:[#allocation3 + $0xc8] sm:$0xff] %vm570_vm0, %v9476_v50  ;;  %v5445_v11 = vld [vmem:[%s10956_s4 + $0x20] sm:$0xf] }
 0x548   : > { %v7531_v54 = vpop.f32.mrf.mxu1  ;;  %3767 = vst.msk [vmem:[#allocation2 + $0x120] sm:$0x1] %vm626_vm1, %v3749_v29  ;;  %v3786_v18 = vld [vmem:[#allocation2 + $0x147] sm:$0x1]  ;;  %7532 = vmatprep.subr.msk.mxu0 %vm2431_vm2, %v5445_v11  ;;  %v5218_v27 = vld [vmem:[#allocation2 + $0x3a] sm:$0xff]  ;;  %v5443_v17 = vld [vmem:[%s10956_s4 + $0x10] sm:$0xff] }
 0x549   : > { %3861 = vst.msk [vmem:[#allocation3 + $0xa0] sm:$0xff] %vm570_vm0, %v9482_v48  ;;  %3736 = vst.msk [vmem:[#allocation2 + $0x1a1] sm:$0xff] %vm570_vm0, %v3698_v9  ;;  %v3697_v60 = vmax.f32 %v3651_v51, 0.0  ;;  %v3666_v40 = vadd.f32 %v7531_v54, %v9282_v41  ;;  %4135 = vrot.lane.b32.xlu0 %v4642_v63, %s11002_s28  ;;  %7533 = vmatpush3.msk.msra.mxu0 %vm2431_vm2, %v5445_v11  ;;  %v5442_v51 = vld [vmem:[%s10956_s4 + $0x8] sm:$0xff]  ;;  %v5441_v29 = vld [vmem:[%s10956_s4] sm:$0xff] }
 0x54a   : > { %3730 = vst.msk [vmem:[#allocation2 + $0x171] sm:$0xff] %vm570_vm0, %v3698_v9  ;;  %v3660_v16 = vpop.f32.mrf.mxu1  ;;  %v9494_v21 = vld [vmem:[#allocation2 + $0x140] sm:$0xff]  ;;  %v3750_v35 = vld [vmem:[#allocation2 + $0x13a] sm:$0x1]  ;;  %v4456_v9 = vld [vmem:[#allocation2 + $0x69] sm:$0xff] }
 0x54b   : > { %3804 = vst.msk [vmem:[#allocation2 + $0x149] sm:$0x1] %vm626_vm1, %v3786_v18  ;;  %v3700_v8 = vmax.f32 %v3666_v40, 0.0  ;;  %v3661_v26 = vadd.f32 %v9282_v41, %v3660_v16  ;;  %4521 = vrot.lane.b32.xlu1 %v9474_v45, %s7729_s0  ;;  %v9501_v42 = vld [vmem:[#allocation2 + $0x108] sm:$0xff]  ;;  %3768 = vst.msk [vmem:[#allocation2 + $0x138] sm:$0x1] %vm626_vm1, %v3750_v35 }
 0x54c   : > { %3735 = vst.msk [vmem:[#allocation2 + $0x199] sm:$0xff] %vm570_vm0, %v3697_v60  ;;  %3729 = vst.msk [vmem:[#allocation2 + $0x169] sm:$0xff] %vm570_vm0, %v3697_v60  ;;  %v3787_v46 = vld [vmem:[#allocation2 + $0x15f] sm:$0x1]  ;;  %v5219_v41 = vld [vmem:[#allocation2 + $0x4a] sm:$0xff] }
 0x54d   : > { %3868 = vst.msk [vmem:[#allocation3 + $0xd8] sm:$0xff] %vm570_vm0, %v9494_v21  ;;  %3863 = vst.msk [vmem:[#allocation3 + $0xb0] sm:$0xff] %vm570_vm0, %v9501_v42  ;;  %v3699_v55 = vmax.f32 %v3661_v26, 0.0  ;;  %5095 = vrot.lane.b32.xlu0 %v9455_v47, %s7732_s19  ;;  %v4458_v54 = vld [vmem:[#allocation2 + $0x81] sm:$0xff]  ;;  %v5031_v18 = vld [vmem:[#allocation2 + $0x79] sm:$0xff] }
 0x54e   : > { %3732 = vst.msk [vmem:[#allocation2 + $0x189] sm:$0xff] %vm570_vm0, %v3700_v8  ;;  %v3751_v31 = vld [vmem:[#allocation2 + $0x152] sm:$0x1]  ;;  %v9512_v15 = vld [vmem:[#allocation2 + $0x158] sm:$0xff] }
 0x54f   : > { %3805 = vst.msk [vmem:[#allocation2 + $0x161] sm:$0x1] %vm626_vm1, %v3787_v46  ;;  %5285 = vrot.lane.b32.xlu1 %v5219_v41, %s11000_s25  ;;  %v9516_v19 = vld [vmem:[#allocation2 + $0x120] sm:$0xff]  ;;  %3769 = vst.msk [vmem:[#allocation2 + $0x150] sm:$0x1] %vm626_vm1, %v3751_v31 }
 0x550   : > { %3731 = vst.msk [vmem:[#allocation2 + $0x181] sm:$0xff] %vm570_vm0, %v3699_v55  ;;  %3870 = vst.msk [vmem:[#allocation3 + $0xe8] sm:$0xff] %vm570_vm0, %v9512_v15  ;;  %v3790_v56 = vld [vmem:[#allocation2 + $0x1a7] sm:$0x1]  ;;  %v5222_v55 = vld [vmem:[#allocation2 + $0x6a] sm:$0xff] }
 0x551   : > { %v3788_v53 = vld [vmem:[#allocation2 + $0x177] sm:$0x1]  ;;  %3865 = vst.msk [vmem:[#allocation3 + $0xc0] sm:$0xff] %vm570_vm0, %v9516_v19  ;;  %3951 = vrot.lane.b32.xlu0 %v9455_v47, %s7727_s29  ;;  %v4066_v47 = vld [vmem:[#allocation2 + $0xa] sm:$0xff] }
 0x552   : > { %3806 = vst.msk [vmem:[#allocation2 + $0x179] sm:$0x1] %vm626_vm1, %v3788_v53  ;;  %3808 = vst.msk [vmem:[#allocation2 + $0x1a9] sm:$0x1] %vm626_vm1, %v3790_v56  ;;  %v9530_v36 = vld [vmem:[#allocation2 + $0x138] sm:$0xff] }
 0x553   : > { %v3752_v44 = vld [vmem:[#allocation2 + $0x16a] sm:$0x1]  ;;  %v9526_v62 = vld [vmem:[#allocation2 + $0x170] sm:$0xff]  ;;  %4141 = vrot.lane.b32.xlu1 %v5219_v41, %s11002_s28  ;;  %v3754_v58 = vld [vmem:[#allocation2 + $0x19a] sm:$0x1]  ;;  %3867 = vst.msk [vmem:[#allocation3 + $0xd0] sm:$0xff] %vm570_vm0, %v9530_v36 }
 0x554   : > { %3770 = vst.msk [vmem:[#allocation2 + $0x168] sm:$0x1] %vm626_vm1, %v3752_v44  ;;  %3772 = vst.msk [vmem:[#allocation2 + $0x198] sm:$0x1] %vm626_vm1, %v3754_v58  ;;  %v4460_v53 = vld [vmem:[#allocation2 + $0x99] sm:$0xff] }
 0x555   : > { %3872 = vst.msk [vmem:[#allocation3 + $0xf8] sm:$0xff] %vm570_vm0, %v9526_v62  ;;  %v3789_v43 = vld [vmem:[#allocation2 + $0x18f] sm:$0x1]  ;;  %4321 = vrot.lane.b32.xlu0 %v9329_v39, %s11014_s30  ;;  %v5444_v39 = vld [vmem:[%s10956_s4 + $0x18] sm:$0xff] }
 0x556   : > { %3807 = vst.msk [vmem:[#allocation2 + $0x191] sm:$0x1] %vm626_vm1, %v3789_v43  ;;  %v9541_v57 = vld [vmem:[#allocation2 + $0x150] sm:$0xff]  ;;  %7534 = vmatprep.subr.mxu0 %v5444_v39 }
 0x557   : > { %v3753_v63 = vld [vmem:[#allocation2 + $0x182] sm:$0x1]  ;;  %4131 = vrot.lane.b32.xlu1 %v4066_v47, %s11002_s28  ;;  %3869 = vst.msk [vmem:[#allocation3 + $0xe0] sm:$0xff] %vm570_vm0, %v9541_v57  ;;  %7535 = vmatpush3.msra.mxu0 %v5444_v39  ;;  %s11034_s28 = smov 8  }
 0x558   : > { %3771 = vst.msk [vmem:[#allocation2 + $0x180] sm:$0x1] %vm626_vm1, %v3753_v63  ;;  %7536 = vmatprep.subr.mxu0 %v5443_v17  ;;  %v5033_v63 = vld [vmem:[#allocation2 + $0x91] sm:$0xff] }
 0x559   : > { %4903 = vrot.lane.b32.xlu0 %v9322_v10, %s11013_s23  ;;  %7537 = vmatpush3.msra.mxu0 %v5443_v17 }
 0x55a   : > { %7538 = vmatprep.subr.mxu0 %v5442_v51 }
 0x55b   : > { %v9557_v14 = vld [vmem:[#allocation2 + $0x168] sm:$0xff]  ;;  %5283 = vrot.lane.b32.xlu1 %v5218_v27, %s11000_s25  ;;  %7539 = vmatpush3.msra.mxu0 %v5442_v51  ;;  %s11035_s25 = smov 32  }
 0x55c   : > { %3871 = vst.msk [vmem:[#allocation3 + $0xf0] sm:$0xff] %vm570_vm0, %v9557_v14  ;;  %7540 = vmatprep.subr.mxu0 %v5441_v29 }
 0x55d   : > { %4331 = vrot.lane.b32.xlu0 %v9322_v10, %s11014_s30  ;;  %7541 = vmatpush3.msra.mxu0 %v5441_v29  ;;  %v5029_v10 = vld [vmem:[#allocation2 + $0x61] sm:$0xff] }
 0x55f   : > { %4527 = vrot.lane.b32.xlu1 %v4456_v9, %s7729_s0 }
 0x561   : > { %3949 = vrot.lane.b32.xlu0 %v9474_v45, %s7727_s29  ;;  %v5221_v45 = vld [vmem:[#allocation2 + $0x62] sm:$0xff] }
 0x563   : > { %4897 = vrot.lane.b32.xlu1 %v9345_v32, %s11013_s23 }
 0x565   : > { %4713 = vrot.lane.b32.xlu0 %v5219_v41, %s7730_s17 }
 0x567   : > { %4325 = vrot.lane.b32.xlu1 %v9345_v32, %s11014_s30  ;;  %v5220_v32 = vld [vmem:[#allocation2 + $0x52] sm:$0xff] }
 0x569   : > { %4711 = vrot.lane.b32.xlu0 %v5218_v27, %s7730_s17 }
 0x56b   : > { %5097 = vrot.lane.b32.xlu1 %v5029_v10, %s7732_s19 }
 0x56d   : > { %4139 = vrot.lane.b32.xlu0 %v5218_v27, %s11034_s28 }
 0x56f   : > { %4525 = vrot.lane.b32.xlu1 %v5029_v10, %s7729_s0 }
 0x571   : > { %5099 = vrot.lane.b32.xlu0 %v4456_v9, %s7732_s19 }
 0x573   : > { %5289 = vrot.lane.b32.xlu1 %v5221_v45, %s11035_s25 }
 0x575   : > { %3955 = vrot.lane.b32.xlu0 %v4456_v9, %s7727_s29 }
 0x577   : > { %4145 = vrot.lane.b32.xlu1 %v5221_v45, %s11034_s28 }
 0x579   : > { %4907 = vrot.lane.b32.xlu0 %v9340_v25, %s11013_s23 }
 0x57b   : > { %5287 = vrot.lane.b32.xlu1 %v5220_v32, %s11035_s25 }
 0x57d   : > { %4335 = vrot.lane.b32.xlu0 %v9340_v25, %s11014_s30 }
 0x57f   : > { %4531 = vrot.lane.b32.xlu1 %v4458_v54, %s7729_s0 }
 0x581   : > { %3953 = vrot.lane.b32.xlu0 %v5029_v10, %s7727_s29 }
 0x583   : > { %4901 = vrot.lane.b32.xlu1 %v9362_v20, %s11013_s23 }
 0x585   : > { %4717 = vrot.lane.b32.xlu0 %v5221_v45, %s7730_s17  ;;  %v5224_v45 = vld [vmem:[#allocation2 + $0x82] sm:$0xff] }
 0x587   : > { %4329 = vrot.lane.b32.xlu1 %v9362_v20, %s11014_s30  ;;  %v5223_v20 = vld [vmem:[#allocation2 + $0x7a] sm:$0xff] }
 0x589   : > { %4715 = vrot.lane.b32.xlu0 %v5220_v32, %s7730_s17 }
 0x58b   : > { %v9602_v60 = vpop.permute.xlu0 %4515  ;;  %5101 = vrot.lane.b32.xlu1 %v5031_v18, %s7732_s19 }
 0x58d   : > { %v9605_v25 = vpop.permute.xlu1 %4323  ;;  %4143 = vrot.lane.b32.xlu0 %v5220_v32, %s11034_s28 }
 0x58f   : > { %v3944_v40 = vpop.permute.xlu0 %3943  ;;  %4529 = vrot.lane.b32.xlu1 %v5031_v18, %s7729_s0 }
 0x590   : > { %4036 = vst.msk [vmem:[#allocation3 + $0x18] sm:$0xff] %vm905_vm3, %v3944_v40 }
 0x591   : > { %v3942_v16 = vpop.permute.xlu1 %3941  ;;  %5103 = vrot.lane.b32.xlu0 %v4458_v54, %s7732_s19 }
 0x592   : > { %4035 = vst.msk [vmem:[#allocation3 + $0x10] sm:$0xff] %vm905_vm3, %v3942_v16 }
 0x593   : > { %v9612_v8 = vpop.permute.xlu0 %4513  ;;  %5293 = vrot.lane.b32.xlu1 %v5223_v20, %s11035_s25 }
 0x595   : > { %v9615_v26 = vpop.permute.xlu1 %4705  ;;  %3959 = vrot.lane.b32.xlu0 %v4458_v54, %s7727_s29 }
 0x597   : > { %v9618_v35 = vpop.permute.xlu0 %5091  ;;  %4149 = vrot.lane.b32.xlu1 %v5223_v20, %s11034_s28 }
 0x599   : > { %v4134_v46 = vpop.permute.xlu1 %4133  ;;  %4911 = vrot.lane.b32.xlu0 %v9356_v33, %s11013_s23 }
 0x59a   : > { %4227 = vst.msk [vmem:[#allocation3 + $0x10] sm:$0xff] %vm1098_vm4, %v4134_v46 }
 0x59b   : > { %v3948_v41 = vpop.permute.xlu0 %3947  ;;  %5291 = vrot.lane.b32.xlu1 %v5222_v55, %s11035_s25 }
 0x59c   : > { %4038 = vst.msk [vmem:[#allocation3 + $0x28] sm:$0xff] %vm905_vm3, %v3948_v41  ;;  %v5035_v41 = vld [vmem:[#allocation2 + $0xa9] sm:$0xff] }
 0x59d   : > { %v3940_v31 = vpop.permute.xlu1 %3939  ;;  %4339 = vrot.lane.b32.xlu0 %v9356_v33, %s11014_s30 }
 0x59e   : > { %4034 = vst.msk [vmem:[#allocation3 + $0x8] sm:$0xff] %vm905_vm3, %v3940_v31 }
 0x59f   : > { %v3938_v56 = vpop.permute.xlu0 %3937  ;;  %4535 = vrot.lane.b32.xlu1 %v4460_v53, %s7729_s0 }
 0x5a0   : > { %4033 = vst.msk [vmem:[#allocation3] sm:$0xff] %vm905_vm3, %v3938_v56 }
 0x5a1   : > { %v4520_v44 = vpop.permute.xlu1 %4519  ;;  %3957 = vrot.lane.b32.xlu0 %v5031_v18, %s7727_s29  ;;  %v4462_v18 = vld [vmem:[#allocation2 + $0xb1] sm:$0xff] }
 0x5a3   : > { %v4130_v58 = vpop.permute.xlu0 %4129  ;;  %4905 = vrot.lane.b32.xlu1 %v9378_v28, %s11013_s23 }
 0x5a4   : > { %4225 = vst.msk [vmem:[#allocation3] sm:$0xff] %vm1098_vm4, %v4130_v58 }
 0x5a5   : > { %v9635_v43 = vpop.permute.xlu1 %5089  ;;  %4721 = vrot.lane.b32.xlu0 %v5223_v20, %s7730_s17 }
 0x5a7   : > { %v4900_v33 = vpop.permute.xlu0 %4899  ;;  %4333 = vrot.lane.b32.xlu1 %v9378_v28, %s11014_s30  ;;  %v5225_v28 = vld [vmem:[#allocation2 + $0x92] sm:$0xff] }
 0x5a9   : > { %v9640_v47 = vpop.permute.xlu1 %4517  ;;  %4719 = vrot.lane.b32.xlu0 %v5222_v55, %s7730_s17 }
 0x5ab   : > { %v4328_v11 = vpop.permute.xlu0 %4327  ;;  %5105 = vrot.lane.b32.xlu1 %v5033_v63, %s7732_s19 }
 0x5ad   : > { %v9644_v39 = vpop.permute.xlu1 %5281  ;;  %4147 = vrot.lane.b32.xlu0 %v5222_v55, %s11034_s28 }
 0x5af   : > { %v3946_v27 = vpop.permute.xlu0 %3945  ;;  %4533 = vrot.lane.b32.xlu1 %v5033_v63, %s7729_s0 }
 0x5b0   : > { %4037 = vst.msk [vmem:[#allocation3 + $0x20] sm:$0xff] %vm905_vm3, %v3946_v27 }
 0x5b1   : > { %v4138_v17 = vpop.permute.xlu1 %4137  ;;  %5107 = vrot.lane.b32.xlu0 %v4460_v53, %s7732_s19 }
 0x5b2   : > { %4229 = vst.msk [vmem:[#allocation3 + $0x20] sm:$0xff] %vm1098_vm4, %v4138_v17 }
 0x5b3   : > { %v9651_v9 = vpop.permute.xlu0 %4709  ;;  %5297 = vrot.lane.b32.xlu1 %v5225_v28, %s11035_s25 }
 0x5b5   : > { %v9654_v51 = vpop.permute.xlu1 %4523  ;;  %3963 = vrot.lane.b32.xlu0 %v4460_v53, %s7727_s29 }
 0x5b7   : > { %v4708_v29 = vpop.permute.xlu0 %4707  ;;  %4153 = vrot.lane.b32.xlu1 %v5225_v28, %s11034_s28 }
 0x5b9   : > { %v9658_v10 = vpop.permute.xlu1 %5093  ;;  %4915 = vrot.lane.b32.xlu0 %v9373_v52, %s11013_s23 }
 0x5bb   : > { %v4136_v32 = vpop.permute.xlu0 %4135  ;;  %5295 = vrot.lane.b32.xlu1 %v5224_v45, %s11035_s25 }
 0x5bc   : > { %4228 = vst.msk [vmem:[#allocation3 + $0x18] sm:$0xff] %vm1098_vm4, %v4136_v32 }
 0x5bd   : > { %4420 = vst.msk [vmem:[#allocation3 + $0x18] sm:$0xff] %vm1291_vm5, %v4328_v11  ;;  %v9665_v54 = vpop.permute.xlu1 %4521  ;;  %4343 = vrot.lane.b32.xlu0 %v9373_v52, %s11014_s30 }
 0x5be   : > { %4612 = vst.msk [vmem:[#allocation3 + $0x18] sm:$0xff] %vm1484_vm6, %v4520_v44  ;;  %v5226_v44 = vld [vmem:[#allocation2 + $0x9a] sm:$0xff] }
 0x5bf   : > { %v5096_v40 = vpop.permute.xlu0 %5095  ;;  %4539 = vrot.lane.b32.xlu1 %v4462_v18, %s7729_s0 }
 0x5c1   : > { %v9671_v16 = vpop.permute.xlu1 %5285  ;;  %3961 = vrot.lane.b32.xlu0 %v5033_v63, %s7727_s29 }
 0x5c3   : > { %v3952_v20 = vpop.permute.xlu0 %3951  ;;  %4909 = vrot.lane.b32.xlu1 %v9394_v61, %s11013_s23 }
 0x5c4   : > { %4040 = vst.msk [vmem:[#allocation3 + $0x38] sm:$0xff] %vm905_vm3, %v3952_v20 }
 0x5c5   : > { %v4142_v46 = vpop.permute.xlu1 %4141  ;;  %4725 = vrot.lane.b32.xlu0 %v5225_v28, %s7730_s17 }
 0x5c7   : > { %4337 = vrot.lane.b32.xlu1 %v9394_v61, %s11014_s30  ;;  %v4322_v52 = vpop.permute.xlu0 %4321 }
 0x5c8   : > { %4417 = vst.msk [vmem:[#allocation3] sm:$0xff] %vm1291_vm5, %v4322_v52  ;;  %v5228_v52 = vld [vmem:[#allocation2 + $0xb2] sm:$0xff] }
 0x5c9   : > { %4609 = vst.msk [vmem:[#allocation3] sm:$0xff] %vm1484_vm6, %v9612_v8  ;;  %v4132_v55 = vpop.permute.xlu1 %4131  ;;  %4723 = vrot.lane.b32.xlu0 %v5224_v45, %s7730_s17 }
 0x5ca   : > { %4801 = vst.msk [vmem:[#allocation3] sm:$0xff] %vm1677_vm7, %v9615_v26 }
 0x5cb   : > { %4226 = vst.msk [vmem:[#allocation3 + $0x8] sm:$0xff] %vm1098_vm4, %v4132_v55  ;;  %5109 = vrot.lane.b32.xlu1 %v5035_v41, %s7732_s19  ;;  %v4904_v61 = vpop.permute.xlu0 %4903  ;;  %v4466_v55 = vld [vmem:[#allocation2 + $0xe1] sm:$0xff] }
 0x5cc   : > { %4418 = vst.msk [vmem:[#allocation3 + $0x8] sm:$0xff] %vm1291_vm5, %v9605_v25 }
 0x5cd   : > { %4610 = vst.msk [vmem:[#allocation3 + $0x8] sm:$0xff] %vm1484_vm6, %v9602_v60  ;;  %v5284_v8 = vpop.permute.xlu1 %5283  ;;  %4151 = vrot.lane.b32.xlu0 %v5224_v45, %s11034_s28  ;;  %v5227_v60 = vld [vmem:[#allocation2 + $0xaa] sm:$0xff] }
 0x5ce   : > { %4802 = vst.msk [vmem:[#allocation3 + $0x8] sm:$0xff] %vm1677_vm7, %v4708_v29 }
 0x5cf   : > { %4994 = vst.msk [vmem:[#allocation3 + $0x8] sm:$0xff] %vm1871_vm8, %v4900_v33  ;;  %4537 = vrot.lane.b32.xlu1 %v5035_v41, %s7729_s0  ;;  %v4332_v26 = vpop.permute.xlu0 %4331  ;;  %v4464_v33 = vld [vmem:[#allocation2 + $0xc9] sm:$0xff] }
 0x5d0   : > { %5186 = vst.msk [vmem:[#allocation3 + $0x8] sm:$0xff] %vm2064_vm9, %v9618_v35 }
 0x5d1   : > { %5378 = vst.msk [vmem:[#allocation3 + $0x8] sm:$0xff] %vm2257_vm10, %v5284_v8  ;;  %v9699_v25 = vpop.permute.xlu1 %4527  ;;  %5111 = vrot.lane.b32.xlu0 %v4462_v18, %s7732_s19 }
 0x5d3   : > { %5301 = vrot.lane.b32.xlu1 %v5227_v60, %s11035_s25  ;;  %v3950_v31 = vpop.permute.xlu0 %3949 }
 0x5d4   : > { %4039 = vst.msk [vmem:[#allocation3 + $0x30] sm:$0xff] %vm905_vm3, %v3950_v31 }
 0x5d5   : > { %4231 = vst.msk [vmem:[#allocation3 + $0x30] sm:$0xff] %vm1098_vm4, %v4142_v46  ;;  %v4898_v53 = vpop.permute.xlu1 %4897  ;;  %3967 = vrot.lane.b32.xlu0 %v4462_v18, %s7727_s29 }
 0x5d6   : > { %4993 = vst.msk [vmem:[#allocation3] sm:$0xff] %vm1871_vm8, %v4898_v53  ;;  %v5039_v53 = vld [vmem:[#allocation2 + $0xd9] sm:$0xff] }
 0x5d7   : > { %5185 = vst.msk [vmem:[#allocation3] sm:$0xff] %vm2064_vm9, %v9635_v43  ;;  %4157 = vrot.lane.b32.xlu1 %v5227_v60, %s11034_s28  ;;  %v9710_v35 = vpop.permute.xlu0 %4713 }
 0x5d8   : > { %5377 = vst.msk [vmem:[#allocation3] sm:$0xff] %vm2257_vm10, %v9644_v39  ;;  %v5410_v11 = vld [vmem:[#allocation3 + $0x8] sm:$0xff] }
 0x5d9   : > { %v4326_v56 = vpop.permute.xlu1 %4325  ;;  %4919 = vrot.lane.b32.xlu0 %v9389_v59, %s11013_s23 }
 0x5da   : > { %4419 = vst.msk [vmem:[#allocation3 + $0x10] sm:$0xff] %vm1291_vm5, %v4326_v56 }
 0x5db   : > { %4611 = vst.msk [vmem:[#allocation3 + $0x10] sm:$0xff] %vm1484_vm6, %v9640_v47  ;;  %5299 = vrot.lane.b32.xlu1 %v5226_v44, %s11035_s25  ;;  %v4712_v58 = vpop.permute.xlu0 %4711 }
 0x5dc   : > { %4803 = vst.msk [vmem:[#allocation3 + $0x10] sm:$0xff] %vm1677_vm7, %v9651_v9  ;;  %4804 = vst.msk [vmem:[#allocation3 + $0x18] sm:$0xff] %vm1677_vm7, %v4712_v58  ;;  %v5037_v9 = vld [vmem:[#allocation2 + $0xc1] sm:$0xff] }
 0x5dd   : > { %4996 = vst.msk [vmem:[#allocation3 + $0x18] sm:$0xff] %vm1871_vm8, %v4904_v61  ;;  %v9724_v43 = vpop.permute.xlu1 %5097  ;;  %4347 = vrot.lane.b32.xlu0 %v9389_v59, %s11014_s30 }
 0x5de   : > { %5188 = vst.msk [vmem:[#allocation3 + $0x18] sm:$0xff] %vm2064_vm9, %v5096_v40 }
 0x5df   : > { %4543 = vrot.lane.b32.xlu1 %v4464_v33, %s7729_s0  ;;  %v4140_v47 = vpop.permute.xlu0 %4139  ;;  %v5409_v63 = vld [vmem:[#allocation3] sm:$0xff] }
 0x5e0   : > { %4230 = vst.msk [vmem:[#allocation3 + $0x28] sm:$0xff] %vm1098_vm4, %v4140_v47  ;;  %7542 = vmatprep.mubr.msk.f32.mxu0 %vm2334_vm11, %v5409_v63 }
 0x5e1   : > { %4422 = vst.msk [vmem:[#allocation3 + $0x28] sm:$0xff] %vm1291_vm5, %v4332_v26  ;;  %v9733_v39 = vpop.permute.xlu1 %4525  ;;  %3965 = vrot.lane.b32.xlu0 %v5035_v41, %s7727_s29  ;;  %7543 = vmatmul.mubr.msk.f32.vlgmr.msra.gmra.mxu0 %vm2334_vm11, %v5410_v11  ;;  %v5230_v11 = vld [vmem:[#allocation2 + $0xca] sm:$0xff] }
 0x5e2   : > { %4614 = vst.msk [vmem:[#allocation3 + $0x28] sm:$0xff] %vm1484_vm6, %v9654_v51 }
 0x5e3   : > { %4913 = vrot.lane.b32.xlu1 %v9411_v24, %s11013_s23  ;;  %v5100_v59 = vpop.permute.xlu0 %5099 }
 0x5e5   : > { %v9741_v27 = vpop.permute.xlu1 %5289  ;;  %4729 = vrot.lane.b32.xlu0 %v5227_v60, %s7730_s17 }
 0x5e7   : > { %4341 = vrot.lane.b32.xlu1 %v9411_v24, %s11014_s30  ;;  %v3956_v17 = vpop.permute.xlu0 %3955  ;;  %v5229_v24 = vld [vmem:[#allocation2 + $0xc2] sm:$0xff] }
 0x5e8   : > { %4042 = vst.msk [vmem:[#allocation3 + $0x48] sm:$0xff] %vm905_vm3, %v3956_v17 }
 0x5e9   : > { %v4146_v28 = vpop.permute.xlu1 %4145  ;;  %4727 = vrot.lane.b32.xlu0 %v5226_v44, %s7730_s17 }
 0x5eb   : > { %5113 = vrot.lane.b32.xlu1 %v5037_v9, %s7732_s19  ;;  %v4908_v51 = vpop.permute.xlu0 %4907 }
 0x5ed   : > { %v5288_v29 = vpop.permute.xlu1 %5287  ;;  %4155 = vrot.lane.b32.xlu0 %v5226_v44, %s11034_s28 }
 0x5ee   : > { %5380 = vst.msk [vmem:[#allocation3 + $0x18] sm:$0xff] %vm2257_vm10, %v5288_v29 }
 0x5ef   : > { %4541 = vrot.lane.b32.xlu1 %v5037_v9, %s7729_s0  ;;  %v4336_v45 = vpop.permute.xlu0 %4335 }
 0x5f1   : > { %v9752_v32 = vpop.permute.xlu1 %4531  ;;  %5115 = vrot.lane.b32.xlu0 %v4464_v33, %s7732_s19 }
 0x5f3   : > { %5305 = vrot.lane.b32.xlu1 %v5229_v24, %s11035_s25  ;;  %v3954_v18 = vpop.permute.xlu0 %3953 }
 0x5f4   : > { %4041 = vst.msk [vmem:[#allocation3 + $0x40] sm:$0xff] %vm905_vm3, %v3954_v18 }
 0x5f5   : > { %4233 = vst.msk [vmem:[#allocation3 + $0x40] sm:$0xff] %vm1098_vm4, %v4146_v28  ;;  %v4902_v40 = vpop.permute.xlu1 %4901  ;;  %3971 = vrot.lane.b32.xlu0 %v4464_v33, %s7727_s29  ;;  %v5412_v61 = vld [vmem:[#allocation3 + $0x18] sm:$0xff] }
 0x5f6   : > { %4995 = vst.msk [vmem:[#allocation3 + $0x10] sm:$0xff] %vm1871_vm8, %v4902_v40 }
 0x5f7   : > { %5187 = vst.msk [vmem:[#allocation3 + $0x10] sm:$0xff] %vm2064_vm9, %v9658_v10  ;;  %4161 = vrot.lane.b32.xlu1 %v5229_v24, %s11034_s28  ;;  %v9763_v20 = vpop.permute.xlu0 %4717 }
 0x5f8   : > { %5379 = vst.msk [vmem:[#allocation3 + $0x10] sm:$0xff] %vm2257_vm10, %v9671_v16 }
 0x5f9   : > { %v4330_v46 = vpop.permute.xlu1 %4329  ;;  %4923 = vrot.lane.b32.xlu0 %v9406_v30, %s11013_s23 }
 0x5fa   : > { %4421 = vst.msk [vmem:[#allocation3 + $0x20] sm:$0xff] %vm1291_vm5, %v4330_v46 }
 0x5fb   : > { %4613 = vst.msk [vmem:[#allocation3 + $0x20] sm:$0xff] %vm1484_vm6, %v9665_v54  ;;  %5303 = vrot.lane.b32.xlu1 %v5228_v52, %s11035_s25  ;;  %v4716_v10 = vpop.permute.xlu0 %4715 }
 0x5fc   : > { %4805 = vst.msk [vmem:[#allocation3 + $0x20] sm:$0xff] %vm1677_vm7, %v9710_v35  ;;  %4806 = vst.msk [vmem:[#allocation3 + $0x28] sm:$0xff] %vm1677_vm7, %v4716_v10 }
 0x5fd   : > { %4998 = vst.msk [vmem:[#allocation3 + $0x28] sm:$0xff] %vm1871_vm8, %v4908_v51  ;;  %v9777_v16 = vpop.permute.xlu1 %5101  ;;  %4351 = vrot.lane.b32.xlu0 %v9406_v30, %s11014_s30 }
 0x5fe   : > { %5190 = vst.msk [vmem:[#allocation3 + $0x28] sm:$0xff] %vm2064_vm9, %v5100_v59 }
 0x5ff   : > { %4547 = vrot.lane.b32.xlu1 %v4466_v55, %s7729_s0  ;;  %v4144_v54 = vpop.permute.xlu0 %4143  ;;  %v5411_v41 = vld [vmem:[#allocation3 + $0x10] sm:$0xff] }
 0x600   : > { %4232 = vst.msk [vmem:[#allocation3 + $0x38] sm:$0xff] %vm1098_vm4, %v4144_v54  ;;  %7545 = vmatprep.mubr.msk.f32.mxu0 %vm2334_vm11, %v5411_v41  ;;  %v5232_v54 = vld [vmem:[#allocation2 + $0xe2] sm:$0xff] }
 0x601   : > { %4424 = vst.msk [vmem:[#allocation3 + $0x38] sm:$0xff] %vm1291_vm5, %v4336_v45  ;;  %v9786_v8 = vpop.permute.xlu1 %4529  ;;  %3969 = vrot.lane.b32.xlu0 %v5037_v9, %s7727_s29  ;;  %7546 = vmatmul.mubr.msk.f32.gmra.mxu0 %vm2334_vm11, %v5412_v61  ;;  %v4470_v61 = vld [vmem:[#allocation2 + $0x111] sm:$0xff] }
 0x602   : > { %4616 = vst.msk [vmem:[#allocation3 + $0x38] sm:$0xff] %vm1484_vm6, %v9699_v25 }
 0x603   : > { %4917 = vrot.lane.b32.xlu1 %v9428_v49, %s11013_s23  ;;  %v5104_v30 = vpop.permute.xlu0 %5103 }
 0x605   : > { %v9794_v26 = vpop.permute.xlu1 %5293  ;;  %4733 = vrot.lane.b32.xlu0 %v5229_v24, %s7730_s17  ;;  %v5041_v24 = vld [vmem:[#allocation2 + $0xf1] sm:$0xff] }
 0x607   : > { %4345 = vrot.lane.b32.xlu1 %v9428_v49, %s11014_s30  ;;  %v3960_v60 = vpop.permute.xlu0 %3959  ;;  %v5231_v49 = vld [vmem:[#allocation2 + $0xda] sm:$0xff] }
 0x608   : > { %4044 = vst.msk [vmem:[#allocation3 + $0x58] sm:$0xff] %vm905_vm3, %v3960_v60 }
 0x609   : > { %v4150_v31 = vpop.permute.xlu1 %4149  ;;  %4731 = vrot.lane.b32.xlu0 %v5228_v52, %s7730_s17 }
 0x60b   : > { %5117 = vrot.lane.b32.xlu1 %v5039_v53, %s7732_s19  ;;  %v4912_v25 = vpop.permute.xlu0 %4911 }
 0x60d   : > { %v5292_v35 = vpop.permute.xlu1 %5291  ;;  %4159 = vrot.lane.b32.xlu0 %v5228_v52, %s11034_s28 }
 0x60e   : > { %5382 = vst.msk [vmem:[#allocation3 + $0x28] sm:$0xff] %vm2257_vm10, %v5292_v35  ;;  %v5043_v35 = vld [vmem:[#allocation2 + $0x109] sm:$0xff] }
 0x60f   : > { %4545 = vrot.lane.b32.xlu1 %v5039_v53, %s7729_s0  ;;  %v4340_v56 = vpop.permute.xlu0 %4339 }
 0x611   : > { %v9805_v44 = vpop.permute.xlu1 %4535  ;;  %5119 = vrot.lane.b32.xlu0 %v4466_v55, %s7732_s19 }
 0x613   : > { %5309 = vrot.lane.b32.xlu1 %v5231_v49, %s11035_s25  ;;  %v3958_v58 = vpop.permute.xlu0 %3957 }
 0x614   : > { %4043 = vst.msk [vmem:[#allocation3 + $0x50] sm:$0xff] %vm905_vm3, %v3958_v58 }
 0x615   : > { %4235 = vst.msk [vmem:[#allocation3 + $0x50] sm:$0xff] %vm1098_vm4, %v4150_v31  ;;  %v4906_v33 = vpop.permute.xlu1 %4905  ;;  %3975 = vrot.lane.b32.xlu0 %v4466_v55, %s7727_s29  ;;  %v5414_v28 = vld [vmem:[#allocation3 + $0x28] sm:$0xff] }
 0x616   : > { %4997 = vst.msk [vmem:[#allocation3 + $0x20] sm:$0xff] %vm1871_vm8, %v4906_v33 }
 0x617   : > { %5189 = vst.msk [vmem:[#allocation3 + $0x20] sm:$0xff] %vm2064_vm9, %v9724_v43  ;;  %4165 = vrot.lane.b32.xlu1 %v5231_v49, %s11034_s28  ;;  %v9816_v47 = vpop.permute.xlu0 %4721 }
 0x618   : > { %5381 = vst.msk [vmem:[#allocation3 + $0x20] sm:$0xff] %vm2257_vm10, %v9741_v27  ;;  %v4468_v27 = vld [vmem:[#allocation2 + $0xf9] sm:$0xff] }
 0x619   : > { %v4334_v63 = vpop.permute.xlu1 %4333  ;;  %4927 = vrot.lane.b32.xlu0 %v9423_v34, %s11013_s23 }
 0x61a   : > { %4423 = vst.msk [vmem:[#allocation3 + $0x30] sm:$0xff] %vm1291_vm5, %v4334_v63 }
 0x61b   : > { %4615 = vst.msk [vmem:[#allocation3 + $0x30] sm:$0xff] %vm1484_vm6, %v9733_v39  ;;  %5307 = vrot.lane.b32.xlu1 %v5230_v11, %s11035_s25  ;;  %v4720_v43 = vpop.permute.xlu0 %4719 }
 0x61c   : > { %4807 = vst.msk [vmem:[#allocation3 + $0x30] sm:$0xff] %vm1677_vm7, %v9763_v20  ;;  %4808 = vst.msk [vmem:[#allocation3 + $0x38] sm:$0xff] %vm1677_vm7, %v4720_v43  ;;  %v5234_v43 = vld [vmem:[#allocation2 + $0xfa] sm:$0xff] }
 0x61d   : > { %5000 = vst.msk [vmem:[#allocation3 + $0x38] sm:$0xff] %vm1871_vm8, %v4912_v25  ;;  %v9830_v59 = vpop.permute.xlu1 %5105  ;;  %4355 = vrot.lane.b32.xlu0 %v9423_v34, %s11014_s30 }
 0x61e   : > { %5192 = vst.msk [vmem:[#allocation3 + $0x38] sm:$0xff] %vm2064_vm9, %v5104_v30 }
 0x61f   : > { %4551 = vrot.lane.b32.xlu1 %v4468_v27, %s7729_s0  ;;  %v4148_v39 = vpop.permute.xlu0 %4147  ;;  %v5413_v17 = vld [vmem:[#allocation3 + $0x20] sm:$0xff] }
 0x620   : > { %4234 = vst.msk [vmem:[#allocation3 + $0x48] sm:$0xff] %vm1098_vm4, %v4148_v39  ;;  %7548 = vmatprep.mubr.msk.f32.mxu0 %vm2334_vm11, %v5413_v17  ;;  %v4472_v39 = vld [vmem:[#allocation2 + $0x129] sm:$0xff] }
 0x621   : > { %4426 = vst.msk [vmem:[#allocation3 + $0x48] sm:$0xff] %vm1291_vm5, %v4340_v56  ;;  %v9839_v9 = vpop.permute.xlu1 %4533  ;;  %3973 = vrot.lane.b32.xlu0 %v5039_v53, %s7727_s29  ;;  %7549 = vmatmul.mubr.msk.f32.gmra.mxu0 %vm2334_vm11, %v5414_v28 }
 0x622   : > { %4618 = vst.msk [vmem:[#allocation3 + $0x48] sm:$0xff] %vm1484_vm6, %v9752_v32 }
 0x623   : > { %4921 = vrot.lane.b32.xlu1 %v9444_v13, %s11013_s23  ;;  %v5108_v34 = vpop.permute.xlu0 %5107 }
 0x625   : > { %v9847_v51 = vpop.permute.xlu1 %5297  ;;  %4737 = vrot.lane.b32.xlu0 %v5231_v49, %s7730_s17 }
 0x627   : > { %4349 = vrot.lane.b32.xlu1 %v9444_v13, %s11014_s30  ;;  %v3964_v29 = vpop.permute.xlu0 %3963  ;;  %v5233_v13 = vld [vmem:[#allocation2 + $0xf2] sm:$0xff] }
 0x628   : > { %4046 = vst.msk [vmem:[#allocation3 + $0x68] sm:$0xff] %vm905_vm3, %v3964_v29 }
 0x629   : > { %v4154_v45 = vpop.permute.xlu1 %4153  ;;  %4735 = vrot.lane.b32.xlu0 %v5230_v11, %s7730_s17 }
 0x62b   : > { %5121 = vrot.lane.b32.xlu1 %v5041_v24, %s7732_s19  ;;  %v4916_v32 = vpop.permute.xlu0 %4915 }
 0x62d   : > { %v5296_v18 = vpop.permute.xlu1 %5295  ;;  %4163 = vrot.lane.b32.xlu0 %v5230_v11, %s11034_s28 }
 0x62e   : > { %5384 = vst.msk [vmem:[#allocation3 + $0x38] sm:$0xff] %vm2257_vm10, %v5296_v18 }
 0x62f   : > { %4549 = vrot.lane.b32.xlu1 %v5041_v24, %s7729_s0  ;;  %v4344_v40 = vpop.permute.xlu0 %4343 }
 0x631   : > { %v9858_v20 = vpop.permute.xlu1 %4539  ;;  %5123 = vrot.lane.b32.xlu0 %v4468_v27, %s7732_s19 }
 0x633   : > { %5313 = vrot.lane.b32.xlu1 %v5233_v13, %s11035_s25  ;;  %v3962_v46 = vpop.permute.xlu0 %3961 }
 0x634   : > { %4045 = vst.msk [vmem:[#allocation3 + $0x60] sm:$0xff] %vm905_vm3, %v3962_v46 }
 0x635   : > { %4237 = vst.msk [vmem:[#allocation3 + $0x60] sm:$0xff] %vm1098_vm4, %v4154_v45  ;;  %v4910_v52 = vpop.permute.xlu1 %4909  ;;  %3979 = vrot.lane.b32.xlu0 %v4468_v27, %s7727_s29 }
 0x636   : > { %4999 = vst.msk [vmem:[#allocation3 + $0x30] sm:$0xff] %vm1871_vm8, %v4910_v52 }
 0x637   : > { %5191 = vst.msk [vmem:[#allocation3 + $0x30] sm:$0xff] %vm2064_vm9, %v9777_v16  ;;  %4169 = vrot.lane.b32.xlu1 %v5233_v13, %s11034_s28  ;;  %v9869_v10 = vpop.permute.xlu0 %4725 }
 0x638   : > { %5383 = vst.msk [vmem:[#allocation3 + $0x30] sm:$0xff] %vm2257_vm10, %v9794_v26  ;;  %v5416_v26 = vld [vmem:[#allocation3 + $0x38] sm:$0xff] }
 0x639   : > { %v4338_v55 = vpop.permute.xlu1 %4337  ;;  %4931 = vrot.lane.b32.xlu0 %v9439_v23, %s11013_s23 }
 0x63a   : > { %4425 = vst.msk [vmem:[#allocation3 + $0x40] sm:$0xff] %vm1291_vm5, %v4338_v55  ;;  %v5236_v55 = vld [vmem:[#allocation2 + $0x112] sm:$0xff] }
 0x63b   : > { %4617 = vst.msk [vmem:[#allocation3 + $0x40] sm:$0xff] %vm1484_vm6, %v9786_v8  ;;  %5311 = vrot.lane.b32.xlu1 %v5232_v54, %s11035_s25  ;;  %v4724_v16 = vpop.permute.xlu0 %4723 }
 0x63c   : > { %4809 = vst.msk [vmem:[#allocation3 + $0x40] sm:$0xff] %vm1677_vm7, %v9816_v47  ;;  %4810 = vst.msk [vmem:[#allocation3 + $0x48] sm:$0xff] %vm1677_vm7, %v4724_v16 }
 0x63d   : > { %5002 = vst.msk [vmem:[#allocation3 + $0x48] sm:$0xff] %vm1871_vm8, %v4916_v32  ;;  %v9883_v41 = vpop.permute.xlu1 %5109  ;;  %4359 = vrot.lane.b32.xlu0 %v9439_v23, %s11014_s30 }
 0x63e   : > { %5194 = vst.msk [vmem:[#allocation3 + $0x48] sm:$0xff] %vm2064_vm9, %v5108_v34 }
 0x63f   : > { %4555 = vrot.lane.b32.xlu1 %v4470_v61, %s7729_s0  ;;  %v4152_v8 = vpop.permute.xlu0 %4151  ;;  %v5415_v30 = vld [vmem:[#allocation3 + $0x30] sm:$0xff] }
 0x640   : > { %4236 = vst.msk [vmem:[#allocation3 + $0x58] sm:$0xff] %vm1098_vm4, %v4152_v8  ;;  %7551 = vmatprep.mubr.msk.f32.mxu0 %vm2334_vm11, %v5415_v30 }
 0x641   : > { %4428 = vst.msk [vmem:[#allocation3 + $0x58] sm:$0xff] %vm1291_vm5, %v4344_v40  ;;  %v9892_v60 = vpop.permute.xlu1 %4537  ;;  %3977 = vrot.lane.b32.xlu0 %v5041_v24, %s7727_s29  ;;  %7552 = vmatmul.mubr.msk.f32.gmra.mxu0 %vm2334_vm11, %v5416_v26  ;;  %v5045_v24 = vld [vmem:[#allocation2 + $0x121] sm:$0xff] }
 0x642   : > { %4620 = vst.msk [vmem:[#allocation3 + $0x58] sm:$0xff] %vm1484_vm6, %v9805_v44 }
 0x643   : > { %4925 = vrot.lane.b32.xlu1 %v9463_v38, %s11013_s23  ;;  %v5112_v23 = vpop.permute.xlu0 %5111 }
 0x645   : > { %v9900_v31 = vpop.permute.xlu1 %5301  ;;  %4741 = vrot.lane.b32.xlu0 %v5233_v13, %s7730_s17 }
 0x647   : > { %4353 = vrot.lane.b32.xlu1 %v9463_v38, %s11014_s30  ;;  %v3968_v53 = vpop.permute.xlu0 %3967  ;;  %v5235_v38 = vld [vmem:[#allocation2 + $0x10a] sm:$0xff] }
 0x648   : > { %4048 = vst.msk [vmem:[#allocation3 + $0x78] sm:$0xff] %vm905_vm3, %v3968_v53  ;;  %v5047_v53 = vld [vmem:[#allocation2 + $0x139] sm:$0xff] }
 0x649   : > { %v4158_v25 = vpop.permute.xlu1 %4157  ;;  %4739 = vrot.lane.b32.xlu0 %v5232_v54, %s7730_s17 }
 0x64b   : > { %5125 = vrot.lane.b32.xlu1 %v5043_v35, %s7732_s19  ;;  %v4920_v56 = vpop.permute.xlu0 %4919 }
 0x64d   : > { %v5300_v44 = vpop.permute.xlu1 %5299  ;;  %4167 = vrot.lane.b32.xlu0 %v5232_v54, %s11034_s28 }
 0x64e   : > { %5386 = vst.msk [vmem:[#allocation3 + $0x48] sm:$0xff] %vm2257_vm10, %v5300_v44 }
 0x64f   : > { %4553 = vrot.lane.b32.xlu1 %v5043_v35, %s7729_s0  ;;  %v4348_v49 = vpop.permute.xlu0 %4347 }
 0x651   : > { %v9911_v58 = vpop.permute.xlu1 %4543  ;;  %5127 = vrot.lane.b32.xlu0 %v4470_v61, %s7732_s19 }
 0x653   : > { %5317 = vrot.lane.b32.xlu1 %v5235_v38, %s11035_s25  ;;  %v3966_v33 = vpop.permute.xlu0 %3965 }
 0x654   : > { %4047 = vst.msk [vmem:[#allocation3 + $0x70] sm:$0xff] %vm905_vm3, %v3966_v33 }
 0x655   : > { %4239 = vst.msk [vmem:[#allocation3 + $0x70] sm:$0xff] %vm1098_vm4, %v4158_v25  ;;  %v4914_v47 = vpop.permute.xlu1 %4913  ;;  %3983 = vrot.lane.b32.xlu0 %v4470_v61, %s7727_s29 }
 0x656   : > { %5001 = vst.msk [vmem:[#allocation3 + $0x40] sm:$0xff] %vm1871_vm8, %v4914_v47 }
 0x657   : > { %5193 = vst.msk [vmem:[#allocation3 + $0x40] sm:$0xff] %vm2064_vm9, %v9830_v59  ;;  %4173 = vrot.lane.b32.xlu1 %v5235_v38, %s11034_s28  ;;  %v9922_v63 = vpop.permute.xlu0 %4729 }
 0x658   : > { %5385 = vst.msk [vmem:[#allocation3 + $0x40] sm:$0xff] %vm2257_vm10, %v9847_v51 }
 0x659   : > { %v4342_v11 = vpop.permute.xlu1 %4341  ;;  %4935 = vrot.lane.b32.xlu0 %v9457_v37, %s11013_s23 }
 0x65a   : > { %4427 = vst.msk [vmem:[#allocation3 + $0x50] sm:$0xff] %vm1291_vm5, %v4342_v11 }
 0x65b   : > { %4619 = vst.msk [vmem:[#allocation3 + $0x50] sm:$0xff] %vm1484_vm6, %v9839_v9  ;;  %5315 = vrot.lane.b32.xlu1 %v5234_v43, %s11035_s25  ;;  %v4728_v59 = vpop.permute.xlu0 %4727  ;;  %v5418_v9 = vld [vmem:[#allocation3 + $0x48] sm:$0xff] }
 0x65c   : > { %4811 = vst.msk [vmem:[#allocation3 + $0x50] sm:$0xff] %vm1677_vm7, %v9869_v10  ;;  %4812 = vst.msk [vmem:[#allocation3 + $0x58] sm:$0xff] %vm1677_vm7, %v4728_v59 }
 0x65d   : > { %5004 = vst.msk [vmem:[#allocation3 + $0x58] sm:$0xff] %vm1871_vm8, %v4920_v56  ;;  %v9936_v27 = vpop.permute.xlu1 %5113  ;;  %4363 = vrot.lane.b32.xlu0 %v9457_v37, %s11014_s30 }
 0x65e   : > { %5196 = vst.msk [vmem:[#allocation3 + $0x58] sm:$0xff] %vm2064_vm9, %v5112_v23 }
 0x65f   : > { %4559 = vrot.lane.b32.xlu1 %v4472_v39, %s7729_s0  ;;  %v4156_v17 = vpop.permute.xlu0 %4155  ;;  %v5417_v28 = vld [vmem:[#allocation3 + $0x40] sm:$0xff] }
 0x660   : > { %4238 = vst.msk [vmem:[#allocation3 + $0x68] sm:$0xff] %vm1098_vm4, %v4156_v17  ;;  %7554 = vmatprep.mubr.msk.f32.mxu0 %vm2334_vm11, %v5417_v28 }
 0x661   : > { %4430 = vst.msk [vmem:[#allocation3 + $0x68] sm:$0xff] %vm1291_vm5, %v4348_v49  ;;  %v9945_v34 = vpop.permute.xlu1 %4541  ;;  %3981 = vrot.lane.b32.xlu0 %v5043_v35, %s7727_s29  ;;  %7555 = vmatmul.mubr.msk.f32.gmra.mxu0 %vm2334_vm11, %v5418_v9 }
 0x662   : > { %4622 = vst.msk [vmem:[#allocation3 + $0x68] sm:$0xff] %vm1484_vm6, %v9858_v20 }
 0x663   : > { %4929 = vrot.lane.b32.xlu1 %v9482_v48, %s11013_s23  ;;  %v5116_v37 = vpop.permute.xlu0 %5115 }
 0x665   : > { %v9953_v51 = vpop.permute.xlu1 %5305  ;;  %4745 = vrot.lane.b32.xlu0 %v5235_v38, %s7730_s17  ;;  %v5238_v38 = vld [vmem:[#allocation2 + $0x12a] sm:$0xff] }
 0x667   : > { %4357 = vrot.lane.b32.xlu1 %v9482_v48, %s11014_s30  ;;  %v3972_v29 = vpop.permute.xlu0 %3971  ;;  %v5237_v48 = vld [vmem:[#allocation2 + $0x122] sm:$0xff] }
 0x668   : > { %4050 = vst.msk [vmem:[#allocation3 + $0x88] sm:$0xff] %vm905_vm3, %v3972_v29 }
 0x669   : > { %v4162_v45 = vpop.permute.xlu1 %4161  ;;  %4743 = vrot.lane.b32.xlu0 %v5234_v43, %s7730_s17 }
 0x66b   : > { %5129 = vrot.lane.b32.xlu1 %v5045_v24, %s7732_s19  ;;  %v4924_v32 = vpop.permute.xlu0 %4923 }
 0x66d   : > { %v5304_v18 = vpop.permute.xlu1 %5303  ;;  %4171 = vrot.lane.b32.xlu0 %v5234_v43, %s11034_s28 }
 0x66e   : > { %5388 = vst.msk [vmem:[#allocation3 + $0x58] sm:$0xff] %vm2257_vm10, %v5304_v18  ;;  %v5049_v18 = vld [vmem:[#allocation2 + $0x151] sm:$0xff] }
 0x66f   : > { %4557 = vrot.lane.b32.xlu1 %v5045_v24, %s7729_s0  ;;  %v4352_v40 = vpop.permute.xlu0 %4351 }
 0x671   : > { %v9964_v20 = vpop.permute.xlu1 %4547  ;;  %5131 = vrot.lane.b32.xlu0 %v4472_v39, %s7732_s19 }
 0x673   : > { %5321 = vrot.lane.b32.xlu1 %v5237_v48, %s11035_s25  ;;  %v3970_v13 = vpop.permute.xlu0 %3969 }
 0x674   : > { %4049 = vst.msk [vmem:[#allocation3 + $0x80] sm:$0xff] %vm905_vm3, %v3970_v13  ;;  %v5050_v13 = vld [vmem:[#allocation2 + $0x159] sm:$0xff] }
 0x675   : > { %4241 = vst.msk [vmem:[#allocation3 + $0x80] sm:$0xff] %vm1098_vm4, %v4162_v45  ;;  %v4918_v46 = vpop.permute.xlu1 %4917  ;;  %3987 = vrot.lane.b32.xlu0 %v4472_v39, %s7727_s29  ;;  %v5420_v30 = vld [vmem:[#allocation3 + $0x58] sm:$0xff] }
 0x676   : > { %5003 = vst.msk [vmem:[#allocation3 + $0x50] sm:$0xff] %vm1871_vm8, %v4918_v46  ;;  %v5240_v39 = vld [vmem:[#allocation2 + $0x142] sm:$0xff] }
 0x677   : > { %5195 = vst.msk [vmem:[#allocation3 + $0x50] sm:$0xff] %vm2064_vm9, %v9883_v41  ;;  %4177 = vrot.lane.b32.xlu1 %v5237_v48, %s11034_s28  ;;  %v9975_v52 = vpop.permute.xlu0 %4733  ;;  %v9994_v41 = vld [vmem:[#allocation2 + $0x141] sm:$0xff] }
 0x678   : > { %5387 = vst.msk [vmem:[#allocation3 + $0x50] sm:$0xff] %vm2257_vm10, %v9900_v31 }
 0x679   : > { %v4346_v10 = vpop.permute.xlu1 %4345  ;;  %4939 = vrot.lane.b32.xlu0 %v9476_v50, %s11013_s23 }
 0x67a   : > { %4429 = vst.msk [vmem:[#allocation3 + $0x60] sm:$0xff] %vm1291_vm5, %v4346_v10 }
 0x67b   : > { %4621 = vst.msk [vmem:[#allocation3 + $0x60] sm:$0xff] %vm1484_vm6, %v9892_v60  ;;  %5319 = vrot.lane.b32.xlu1 %v5236_v55, %s11035_s25  ;;  %v4732_v54 = vpop.permute.xlu0 %4731 }
 0x67c   : > { %4813 = vst.msk [vmem:[#allocation3 + $0x60] sm:$0xff] %vm1677_vm7, %v9922_v63  ;;  %4814 = vst.msk [vmem:[#allocation3 + $0x68] sm:$0xff] %vm1677_vm7, %v4732_v54 }
 0x67d   : > { %5006 = vst.msk [vmem:[#allocation3 + $0x68] sm:$0xff] %vm1871_vm8, %v4924_v32  ;;  %v9989_v16 = vpop.permute.xlu1 %5117  ;;  %4367 = vrot.lane.b32.xlu0 %v9476_v50, %s11014_s30 }
 0x67e   : > { %5198 = vst.msk [vmem:[#allocation3 + $0x68] sm:$0xff] %vm2064_vm9, %v5116_v37 }
 0x67f   : > { %4563 = vrot.lane.b32.xlu1 %v9994_v41, %s7729_s0  ;;  %v4160_v61 = vpop.permute.xlu0 %4159  ;;  %v5419_v8 = vld [vmem:[#allocation3 + $0x50] sm:$0xff] }
 0x680   : > { %4240 = vst.msk [vmem:[#allocation3 + $0x78] sm:$0xff] %vm1098_vm4, %v4160_v61  ;;  %7557 = vmatprep.mubr.msk.f32.mxu0 %vm2334_vm11, %v5419_v8 }
 0x681   : > { %4432 = vst.msk [vmem:[#allocation3 + $0x78] sm:$0xff] %vm1291_vm5, %v4352_v40  ;;  %v10001_v26 = vpop.permute.xlu1 %4545  ;;  %3985 = vrot.lane.b32.xlu0 %v5045_v24, %s7727_s29  ;;  %7558 = vmatmul.mubr.msk.f32.gmra.mxu0 %vm2334_vm11, %v5420_v30 }
 0x682   : > { %4624 = vst.msk [vmem:[#allocation3 + $0x78] sm:$0xff] %vm1484_vm6, %v9911_v58 }
 0x683   : > { %4933 = vrot.lane.b32.xlu1 %v9501_v42, %s11013_s23  ;;  %v5120_v50 = vpop.permute.xlu0 %5119 }
 0x685   : > { %v10009_v60 = vpop.permute.xlu1 %5309  ;;  %4749 = vrot.lane.b32.xlu0 %v5237_v48, %s7730_s17 }
 0x687   : > { %4361 = vrot.lane.b32.xlu1 %v9501_v42, %s11014_s30  ;;  %v3976_v23 = vpop.permute.xlu0 %3975  ;;  %v5239_v42 = vld [vmem:[#allocation2 + $0x13a] sm:$0xff] }
 0x688   : > { %4052 = vst.msk [vmem:[#allocation3 + $0x98] sm:$0xff] %vm905_vm3, %v3976_v23 }
 0x689   : > { %v4166_v31 = vpop.permute.xlu1 %4165  ;;  %4747 = vrot.lane.b32.xlu0 %v5236_v55, %s7730_s17 }
 0x68b   : > { %5133 = vrot.lane.b32.xlu1 %v5047_v53, %s7732_s19  ;;  %v4928_v25 = vpop.permute.xlu0 %4927 }
 0x68d   : > { %v5308_v35 = vpop.permute.xlu1 %5307  ;;  %4175 = vrot.lane.b32.xlu0 %v5236_v55, %s11034_s28 }
 0x68e   : > { %5390 = vst.msk [vmem:[#allocation3 + $0x68] sm:$0xff] %vm2257_vm10, %v5308_v35 }
 0x68f   : > { %4561 = vrot.lane.b32.xlu1 %v5047_v53, %s7729_s0  ;;  %v4356_v56 = vpop.permute.xlu0 %4355 }
 0x691   : > { %v10020_v44 = vpop.permute.xlu1 %4551  ;;  %5135 = vrot.lane.b32.xlu0 %v9994_v41, %s7732_s19 }
 0x693   : > { %5325 = vrot.lane.b32.xlu1 %v5239_v42, %s11035_s25  ;;  %v3974_v49 = vpop.permute.xlu0 %3973 }
 0x694   : > { %4051 = vst.msk [vmem:[#allocation3 + $0x90] sm:$0xff] %vm905_vm3, %v3974_v49 }
 0x695   : > { %4243 = vst.msk [vmem:[#allocation3 + $0x90] sm:$0xff] %vm1098_vm4, %v4166_v31  ;;  %v4922_v58 = vpop.permute.xlu1 %4921  ;;  %4943 = vrot.lane.b32.xlu0 %v9494_v21, %s11013_s23  ;;  %v5422_v59 = vld [vmem:[#allocation3 + $0x68] sm:$0xff] }
 0x696   : > { %5005 = vst.msk [vmem:[#allocation3 + $0x60] sm:$0xff] %vm1871_vm8, %v4922_v58 }
 0x697   : > { %5197 = vst.msk [vmem:[#allocation3 + $0x60] sm:$0xff] %vm2064_vm9, %v9936_v27  ;;  %5323 = vrot.lane.b32.xlu1 %v5238_v38, %s11035_s25  ;;  %v4738_v33 = vpop.permute.xlu0 %4737 }
 0x698   : > { %5389 = vst.msk [vmem:[#allocation3 + $0x60] sm:$0xff] %vm2257_vm10, %v9953_v51 }
 0x699   : > { %v4350_v47 = vpop.permute.xlu1 %4349  ;;  %4371 = vrot.lane.b32.xlu0 %v9494_v21, %s11014_s30 }
 0x69a   : > { %4431 = vst.msk [vmem:[#allocation3 + $0x70] sm:$0xff] %vm1291_vm5, %v4350_v47 }
 0x69b   : > { %4623 = vst.msk [vmem:[#allocation3 + $0x70] sm:$0xff] %vm1484_vm6, %v9945_v34  ;;  %4937 = vrot.lane.b32.xlu1 %v9516_v19, %s11013_s23  ;;  %v4736_v63 = vpop.permute.xlu0 %4735 }
 0x69c   : > { %4815 = vst.msk [vmem:[#allocation3 + $0x70] sm:$0xff] %vm1677_vm7, %v9975_v52  ;;  %4816 = vst.msk [vmem:[#allocation3 + $0x78] sm:$0xff] %vm1677_vm7, %v4736_v63  ;;  %v5244_v63 = vld [vmem:[#allocation2 + $0x172] sm:$0xff] }
 0x69d   : > { %5008 = vst.msk [vmem:[#allocation3 + $0x78] sm:$0xff] %vm1871_vm8, %v4928_v25  ;;  %v10046_v11 = vpop.permute.xlu1 %5121  ;;  %3989 = vrot.lane.b32.xlu0 %v5047_v53, %s7727_s29  ;;  %v5051_v53 = vld [vmem:[#allocation2 + $0x169] sm:$0xff] }
 0x69e   : > { %5200 = vst.msk [vmem:[#allocation3 + $0x78] sm:$0xff] %vm2064_vm9, %v5120_v50 }
 0x69f   : > { %4365 = vrot.lane.b32.xlu1 %v9516_v19, %s11014_s30  ;;  %v4164_v21 = vpop.permute.xlu0 %4163  ;;  %v5421_v43 = vld [vmem:[#allocation3 + $0x60] sm:$0xff] }
 0x6a0   : > { %4242 = vst.msk [vmem:[#allocation3 + $0x88] sm:$0xff] %vm1098_vm4, %v4164_v21  ;;  %7560 = vmatprep.mubr.msk.f32.mxu0 %vm2334_vm11, %v5421_v43 }
 0x6a1   : > { %4434 = vst.msk [vmem:[#allocation3 + $0x88] sm:$0xff] %vm1291_vm5, %v4356_v56  ;;  %v10055_v27 = vpop.permute.xlu1 %4549  ;;  %4751 = vrot.lane.b32.xlu0 %v5238_v38, %s7730_s17  ;;  %7561 = vmatmul.mubr.msk.f32.gmra.mxu0 %vm2334_vm11, %v5422_v59 }
 0x6a2   : > { %4626 = vst.msk [vmem:[#allocation3 + $0x88] sm:$0xff] %vm1484_vm6, %v9964_v20 }
 0x6a3   : > { %5327 = vrot.lane.b32.xlu1 %v5240_v39, %s11035_s25  ;;  %v5124_v19 = vpop.permute.xlu0 %5123 }
 0x6a5   : > { %v10062_v17 = vpop.permute.xlu1 %5313  ;;  %4179 = vrot.lane.b32.xlu0 %v5238_v38, %s11034_s28 }
 0x6a7   : > { %4941 = vrot.lane.b32.xlu1 %v9530_v36, %s11013_s23  ;;  %v3980_v28 = vpop.permute.xlu0 %3979 }
 0x6a8   : > { %4054 = vst.msk [vmem:[#allocation3 + $0xa8] sm:$0xff] %vm905_vm3, %v3980_v28  ;;  %v4862_v28 = vld [vmem:[#allocation2 + $0x188] sm:$0xff] }
 0x6a9   : > { %v4170_v9 = vpop.permute.xlu1 %4169  ;;  %4753 = vrot.lane.b32.xlu0 %v5239_v42, %s7730_s17 }
 0x6ab   : > { %4369 = vrot.lane.b32.xlu1 %v9530_v36, %s11014_s30  ;;  %v4932_v34 = vpop.permute.xlu0 %4931 }
 0x6ad   : > { %v5312_v37 = vpop.permute.xlu1 %5311  ;;  %3991 = vrot.lane.b32.xlu0 %v9994_v41, %s7727_s29  ;;  %v5242_v41 = vld [vmem:[#allocation2 + $0x15a] sm:$0xff] }
 0x6ae   : > { %5392 = vst.msk [vmem:[#allocation3 + $0x78] sm:$0xff] %vm2257_vm10, %v5312_v37 }
 0x6af   : > { %4181 = vrot.lane.b32.xlu1 %v5239_v42, %s11034_s28  ;;  %v4360_v51 = vpop.permute.xlu0 %4359 }
 0x6b1   : > { %v10075_v29 = vpop.permute.xlu1 %4555  ;;  %4755 = vrot.lane.b32.xlu0 %v5240_v39, %s7730_s17 }
 0x6b3   : > { %4945 = vrot.lane.b32.xlu1 %v9541_v57, %s11013_s23  ;;  %v3978_v45 = vpop.permute.xlu0 %3977 }
 0x6b4   : > { %4053 = vst.msk [vmem:[#allocation3 + $0xa0] sm:$0xff] %vm905_vm3, %v3978_v45 }
 0x6b5   : > { %4245 = vst.msk [vmem:[#allocation3 + $0xa0] sm:$0xff] %vm1098_vm4, %v4170_v9  ;;  %v4926_v36 = vpop.permute.xlu1 %4925  ;;  %4183 = vrot.lane.b32.xlu0 %v5240_v39, %s11034_s28  ;;  %v5424_v46 = vld [vmem:[#allocation3 + $0x78] sm:$0xff] }
 0x6b6   : > { %5007 = vst.msk [vmem:[#allocation3 + $0x70] sm:$0xff] %vm1871_vm8, %v4926_v36  ;;  %v5054_v36 = vld [vmem:[#allocation2 + $0x189] sm:$0xff] }
 0x6b7   : > { %5199 = vst.msk [vmem:[#allocation3 + $0x70] sm:$0xff] %vm2064_vm9, %v9989_v16  ;;  %4373 = vrot.lane.b32.xlu1 %v9541_v57, %s11014_s30  ;;  %v10088_v24 = vpop.permute.xlu0 %4741 }
 0x6b8   : > { %5391 = vst.msk [vmem:[#allocation3 + $0x70] sm:$0xff] %vm2257_vm10, %v10009_v60 }
 0x6b9   : > { %v4354_v32 = vpop.permute.xlu1 %4353  ;;  %4947 = vrot.lane.b32.xlu0 %v9512_v15, %s11013_s23 }
 0x6ba   : > { %4433 = vst.msk [vmem:[#allocation3 + $0x80] sm:$0xff] %vm1291_vm5, %v4354_v32 }
 0x6bb   : > { %4625 = vst.msk [vmem:[#allocation3 + $0x80] sm:$0xff] %vm1484_vm6, %v10001_v26  ;;  %5137 = vrot.lane.b32.xlu1 %v5049_v18, %s7732_s19  ;;  %v4740_v40 = vpop.permute.xlu0 %4739 }
 0x6bc   : > { %4817 = vst.msk [vmem:[#allocation3 + $0x80] sm:$0xff] %vm1677_vm7, %v4738_v33  ;;  %4818 = vst.msk [vmem:[#allocation3 + $0x88] sm:$0xff] %vm1677_vm7, %v4740_v40 }
 0x6bd   : > { %5010 = vst.msk [vmem:[#allocation3 + $0x88] sm:$0xff] %vm1871_vm8, %v4932_v34  ;;  %v10101_v57 = vpop.permute.xlu1 %5125  ;;  %4375 = vrot.lane.b32.xlu0 %v9512_v15, %s11014_s30  ;;  %v5241_v15 = vld [vmem:[#allocation2 + $0x152] sm:$0xff]  ;;  %v5053_v34 = vld [vmem:[#allocation2 + $0x181] sm:$0xff] }
 0x6be   : > { %5202 = vst.msk [vmem:[#allocation3 + $0x88] sm:$0xff] %vm2064_vm9, %v5124_v19 }
 0x6bf   : > { %4565 = vrot.lane.b32.xlu1 %v5049_v18, %s7729_s0  ;;  %v4168_v20 = vpop.permute.xlu0 %4167  ;;  %v5423_v48 = vld [vmem:[#allocation3 + $0x70] sm:$0xff] }
 0x6c0   : > { %4244 = vst.msk [vmem:[#allocation3 + $0x98] sm:$0xff] %vm1098_vm4, %v4168_v20  ;;  %7563 = vmatprep.mubr.msk.f32.mxu0 %vm2334_vm11, %v5423_v48  ;;  %v5246_v48 = vld [vmem:[#allocation2 + $0x18a] sm:$0xff] }
 0x6c1   : > { %4436 = vst.msk [vmem:[#allocation3 + $0x98] sm:$0xff] %vm1291_vm5, %v4360_v51  ;;  %v10110_v52 = vpop.permute.xlu1 %4553  ;;  %5139 = vrot.lane.b32.xlu0 %v5050_v13, %s7732_s19  ;;  %7564 = vmatmul.mubr.msk.f32.gmra.mxu0 %vm2334_vm11, %v5424_v46 }
 0x6c2   : > { %4628 = vst.msk [vmem:[#allocation3 + $0x98] sm:$0xff] %vm1484_vm6, %v10020_v44  ;;  %v5052_v44 = vld [vmem:[#allocation2 + $0x171] sm:$0xff] }
 0x6c3   : > { %5329 = vrot.lane.b32.xlu1 %v5241_v15, %s11035_s25  ;;  %v5128_v10 = vpop.permute.xlu0 %5127 }
 0x6c5   : > { %v10117_v55 = vpop.permute.xlu1 %5317  ;;  %3993 = vrot.lane.b32.xlu0 %v5049_v18, %s7727_s29  ;;  %v5245_v18 = vld [vmem:[#allocation2 + $0x182] sm:$0xff] }
 0x6c7   : > { %4567 = vrot.lane.b32.xlu1 %v5050_v13, %s7729_s0  ;;  %v3984_v54 = vpop.permute.xlu0 %3983 }
 0x6c8   : > { %4056 = vst.msk [vmem:[#allocation3 + $0xb8] sm:$0xff] %vm905_vm3, %v3984_v54  ;;  %v5055_v54 = vld [vmem:[#allocation2 + $0x199] sm:$0xff] }
 0x6c9   : > { %v4174_v16 = vpop.permute.xlu1 %4173  ;;  %4757 = vrot.lane.b32.xlu0 %v5241_v15, %s7730_s17 }
 0x6cb   : > { %5331 = vrot.lane.b32.xlu1 %v5242_v41, %s11035_s25  ;;  %v4936_v61 = vpop.permute.xlu0 %4935 }
 0x6cd   : > { %v5316_v8 = vpop.permute.xlu1 %5315  ;;  %3995 = vrot.lane.b32.xlu0 %v5050_v13, %s7727_s29 }
 0x6ce   : > { %5394 = vst.msk [vmem:[#allocation3 + $0x88] sm:$0xff] %vm2257_vm10, %v5316_v8  ;;  %v5247_v8 = vld [vmem:[#allocation2 + $0x19a] sm:$0xff] }
 0x6cf   : > { %4185 = vrot.lane.b32.xlu1 %v5241_v15, %s11034_s28  ;;  %v4364_v30 = vpop.permute.xlu0 %4363 }
 0x6d1   : > { %v10127_v26 = vpop.permute.xlu1 %4559  ;;  %4759 = vrot.lane.b32.xlu0 %v5242_v41, %s7730_s17 }
 0x6d3   : > { %4949 = vrot.lane.b32.xlu1 %v9557_v14, %s11013_s23  ;;  %v3982_v50 = vpop.permute.xlu0 %3981 }
 0x6d4   : > { %4055 = vst.msk [vmem:[#allocation3 + $0xb0] sm:$0xff] %vm905_vm3, %v3982_v50 }
 0x6d5   : > { %4247 = vst.msk [vmem:[#allocation3 + $0xb0] sm:$0xff] %vm1098_vm4, %v4174_v16  ;;  %v4930_v60 = vpop.permute.xlu1 %4929  ;;  %4187 = vrot.lane.b32.xlu0 %v5242_v41, %s11034_s28  ;;  %v5426_v42 = vld [vmem:[#allocation3 + $0x88] sm:$0xff]  ;;  %v5056_v41 = vld [vmem:[#allocation2 + $0x1a1] sm:$0xff] }
 0x6d6   : > { %5009 = vst.msk [vmem:[#allocation3 + $0x80] sm:$0xff] %vm1871_vm8, %v4930_v60 }
 0x6d7   : > { %5201 = vst.msk [vmem:[#allocation3 + $0x80] sm:$0xff] %vm2064_vm9, %v10046_v11  ;;  %4377 = vrot.lane.b32.xlu1 %v9557_v14, %s11014_s30  ;;  %v10140_v23 = vpop.permute.xlu0 %4745 }
 0x6d8   : > { %5393 = vst.msk [vmem:[#allocation3 + $0x80] sm:$0xff] %vm2257_vm10, %v10062_v17 }
 0x6d9   : > { %v4358_v31 = vpop.permute.xlu1 %4357  ;;  %4951 = vrot.lane.b32.xlu0 %v9526_v62, %s11013_s23 }
 0x6da   : > { %4435 = vst.msk [vmem:[#allocation3 + $0x90] sm:$0xff] %vm1291_vm5, %v4358_v31 }
 0x6db   : > { %4627 = vst.msk [vmem:[#allocation3 + $0x90] sm:$0xff] %vm1484_vm6, %v10055_v27  ;;  %5141 = vrot.lane.b32.xlu1 %v5051_v53, %s7732_s19  ;;  %v4744_v25 = vpop.permute.xlu0 %4743  ;;  %v4861_v27 = vld [vmem:[#allocation2 + $0x180] sm:$0xff] }
 0x6dc   : > { %4819 = vst.msk [vmem:[#allocation3 + $0x90] sm:$0xff] %vm1677_vm7, %v10088_v24  ;;  %4820 = vst.msk [vmem:[#allocation3 + $0x98] sm:$0xff] %vm1677_vm7, %v4744_v25 }
 0x6dd   : > { %5012 = vst.msk [vmem:[#allocation3 + $0x98] sm:$0xff] %vm1871_vm8, %v4936_v61  ;;  %v10154_v14 = vpop.permute.xlu1 %5129  ;;  %4379 = vrot.lane.b32.xlu0 %v9526_v62, %s11014_s30  ;;  %v5243_v62 = vld [vmem:[#allocation2 + $0x16a] sm:$0xff] }
 0x6de   : > { %5204 = vst.msk [vmem:[#allocation3 + $0x98] sm:$0xff] %vm2064_vm9, %v5128_v10  ;;  %v4864_v10 = vld [vmem:[#allocation2 + $0x1a0] sm:$0xff] }
 0x6df   : > { %4569 = vrot.lane.b32.xlu1 %v5051_v53, %s7729_s0  ;;  %v4172_v35 = vpop.permute.xlu0 %4171  ;;  %v5425_v56 = vld [vmem:[#allocation3 + $0x80] sm:$0xff] }
 0x6e0   : > { %4246 = vst.msk [vmem:[#allocation3 + $0xa8] sm:$0xff] %vm1098_vm4, %v4172_v35  ;;  %7566 = vmatprep.mubr.msk.f32.mxu0 %vm2334_vm11, %v5425_v56 }
 0x6e1   : > { %4438 = vst.msk [vmem:[#allocation3 + $0xa8] sm:$0xff] %vm1291_vm5, %v4364_v30  ;;  %v10163_v49 = vpop.permute.xlu1 %4557  ;;  %5143 = vrot.lane.b32.xlu0 %v5052_v44, %s7732_s19  ;;  %7567 = vmatmul.mubr.msk.f32.gmra.mxu0 %vm2334_vm11, %v5426_v42 }
 0x6e2   : > { %4630 = vst.msk [vmem:[#allocation3 + $0xa8] sm:$0xff] %vm1484_vm6, %v10075_v29 }
 0x6e3   : > { %5333 = vrot.lane.b32.xlu1 %v5243_v62, %s11035_s25  ;;  %v5132_v58 = vpop.permute.xlu0 %5131 }
 0x6e5   : > { %v10170_v38 = vpop.permute.xlu1 %5321  ;;  %3997 = vrot.lane.b32.xlu0 %v5051_v53, %s7727_s29 }
 0x6e7   : > { %4571 = vrot.lane.b32.xlu1 %v5052_v44, %s7729_s0  ;;  %v3988_v33 = vpop.permute.xlu0 %3987 }
 0x6e8   : > { %4058 = vst.msk [vmem:[#allocation3 + $0xc8] sm:$0xff] %vm905_vm3, %v3988_v33 }
 0x6e9   : > { %v4178_v47 = vpop.permute.xlu1 %4177  ;;  %4761 = vrot.lane.b32.xlu0 %v5243_v62, %s7730_s17 }
 0x6eb   : > { %5335 = vrot.lane.b32.xlu1 %v5244_v63, %s11035_s25  ;;  %v4940_v11 = vpop.permute.xlu0 %4939 }
 0x6ed   : > { %v5320_v21 = vpop.permute.xlu1 %5319  ;;  %3999 = vrot.lane.b32.xlu0 %v5052_v44, %s7727_s29 }
 0x6ee   : > { %5396 = vst.msk [vmem:[#allocation3 + $0x98] sm:$0xff] %vm2257_vm10, %v5320_v21 }
 0x6ef   : > { %4189 = vrot.lane.b32.xlu1 %v5243_v62, %s11034_s28  ;;  %v4368_v43 = vpop.permute.xlu0 %4367 }
 0x6f1   : > { %v10180_v59 = vpop.permute.xlu1 %4563  ;;  %4763 = vrot.lane.b32.xlu0 %v5244_v63, %s7730_s17 }
 0x6f3   : > { %4953 = vrot.lane.b32.xlu1 %v4861_v27, %s11013_s23  ;;  %v3986_v39 = vpop.permute.xlu0 %3985 }
 0x6f4   : > { %4057 = vst.msk [vmem:[#allocation3 + $0xc0] sm:$0xff] %vm905_vm3, %v3986_v39 }
 0x6f5   : > { %4249 = vst.msk [vmem:[#allocation3 + $0xc0] sm:$0xff] %vm1098_vm4, %v4178_v47  ;;  %v4934_v19 = vpop.permute.xlu1 %4933  ;;  %4191 = vrot.lane.b32.xlu0 %v5244_v63, %s11034_s28  ;;  %v5428_v24 = vld [vmem:[#allocation3 + $0x98] sm:$0xff] }
 0x6f6   : > { %5011 = vst.msk [vmem:[#allocation3 + $0x90] sm:$0xff] %vm1871_vm8, %v4934_v19 }
 0x6f7   : > { %5203 = vst.msk [vmem:[#allocation3 + $0x90] sm:$0xff] %vm2064_vm9, %v10101_v57  ;;  %4381 = vrot.lane.b32.xlu1 %v4861_v27, %s11014_s30  ;;  %v4750_v17 = vpop.permute.xlu0 %4749 }
 0x6f8   : > { %5395 = vst.msk [vmem:[#allocation3 + $0x90] sm:$0xff] %vm2257_vm10, %v10117_v55 }
 0x6f9   : > { %v4362_v9 = vpop.permute.xlu1 %4361  ;;  %4955 = vrot.lane.b32.xlu0 %v4862_v28, %s11013_s23 }
 0x6fa   : > { %4437 = vst.msk [vmem:[#allocation3 + $0xa0] sm:$0xff] %vm1291_vm5, %v4362_v9 }
 0x6fb   : > { %4629 = vst.msk [vmem:[#allocation3 + $0xa0] sm:$0xff] %vm1484_vm6, %v10110_v52  ;;  %5145 = vrot.lane.b32.xlu1 %v5053_v34, %s7732_s19  ;;  %v4748_v37 = vpop.permute.xlu0 %4747  ;;  %v4863_v52 = vld [vmem:[#allocation2 + $0x198] sm:$0xff] }
 0x6fc   : > { %4821 = vst.msk [vmem:[#allocation3 + $0xa0] sm:$0xff] %vm1677_vm7, %v10140_v23  ;;  %4822 = vst.msk [vmem:[#allocation3 + $0xa8] sm:$0xff] %vm1677_vm7, %v4748_v37 }
 0x6fd   : > { %5014 = vst.msk [vmem:[#allocation3 + $0xa8] sm:$0xff] %vm1871_vm8, %v4940_v11  ;;  %v10202_v51 = vpop.permute.xlu1 %5133  ;;  %4383 = vrot.lane.b32.xlu0 %v4862_v28, %s11014_s30 }
 0x6fe   : > { %5206 = vst.msk [vmem:[#allocation3 + $0xa8] sm:$0xff] %vm2064_vm9, %v5132_v58 }
 0x6ff   : > { %4573 = vrot.lane.b32.xlu1 %v5053_v34, %s7729_s0  ;;  %v4176_v29 = vpop.permute.xlu0 %4175  ;;  %v5427_v45 = vld [vmem:[#allocation3 + $0x90] sm:$0xff] }
 0x700   : > { %4248 = vst.msk [vmem:[#allocation3 + $0xb8] sm:$0xff] %vm1098_vm4, %v4176_v29  ;;  %7569 = vmatprep.mubr.msk.f32.mxu0 %vm2334_vm11, %v5427_v45 }
 0x701   : > { %4440 = vst.msk [vmem:[#allocation3 + $0xb8] sm:$0xff] %vm1291_vm5, %v4368_v43  ;;  %v4562_v32 = vpop.permute.xlu1 %4561  ;;  %5147 = vrot.lane.b32.xlu0 %v5054_v36, %s7732_s19  ;;  %7570 = vmatmul.mubr.msk.f32.gmra.mxu0 %vm2334_vm11, %v5428_v24 }
 0x702   : > { %4632 = vst.msk [vmem:[#allocation3 + $0xb8] sm:$0xff] %vm1484_vm6, %v10127_v26  ;;  %v5248_v26 = vld [vmem:[#allocation2 + $0x1a2] sm:$0xff] }
 0x703   : > { %5337 = vrot.lane.b32.xlu1 %v5245_v18, %s11035_s25  ;;  %v5136_v40 = vpop.permute.xlu0 %5135 }
 0x705   : > { %v5326_v57 = vpop.permute.xlu1 %5325  ;;  %4575 = vrot.lane.b32.xlu0 %v5054_v36, %s7729_s0 }
 0x707   : > { %4765 = vrot.lane.b32.xlu1 %v5245_v18, %s7730_s17  ;;  %v4944_v20 = vpop.permute.xlu0 %4943 }
 0x709   : > { %v5324_v13 = vpop.permute.xlu1 %5323  ;;  %5339 = vrot.lane.b32.xlu0 %v5246_v48, %s11035_s25 }
 0x70a   : > { %5398 = vst.msk [vmem:[#allocation3 + $0xa8] sm:$0xff] %vm2257_vm10, %v5324_v13 }
 0x70b   : > { %4767 = vrot.lane.b32.xlu1 %v5246_v48, %s7730_s17  ;;  %v4372_v46 = vpop.permute.xlu0 %4371 }
 0x70d   : > { %v4938_v15 = vpop.permute.xlu1 %4937  ;;  %4957 = vrot.lane.b32.xlu0 %v4863_v52, %s11013_s23 }
 0x70e   : > { %5013 = vst.msk [vmem:[#allocation3 + $0xa0] sm:$0xff] %vm1871_vm8, %v4938_v15 }
 0x70f   : > { %5205 = vst.msk [vmem:[#allocation3 + $0xa0] sm:$0xff] %vm2064_vm9, %v10154_v14  ;;  %4959 = vrot.lane.b32.xlu1 %v4864_v10, %s11013_s23  ;;  %v3990_v55 = vpop.permute.xlu0 %3989 }
 0x710   : > { %5397 = vst.msk [vmem:[#allocation3 + $0xa0] sm:$0xff] %vm2257_vm10, %v10170_v38 }
 0x711   : > { %4059 = vst.msk [vmem:[#allocation3 + $0xd0] sm:$0xff] %vm905_vm3, %v3990_v55  ;;  %v4366_v16 = vpop.permute.xlu1 %4365  ;;  %5149 = vrot.lane.b32.xlu0 %v5055_v54, %s7732_s19  ;;  %v5430_v23 = vld [vmem:[#allocation3 + $0xa8] sm:$0xff] }
 0x712   : > { %4439 = vst.msk [vmem:[#allocation3 + $0xb0] sm:$0xff] %vm1291_vm5, %v4366_v16 }
 0x713   : > { %4631 = vst.msk [vmem:[#allocation3 + $0xb0] sm:$0xff] %vm1484_vm6, %v10163_v49  ;;  %5151 = vrot.lane.b32.xlu1 %v5056_v41, %s7732_s19  ;;  %v4752_v61 = vpop.permute.xlu0 %4751 }
 0x714   : > { %4823 = vst.msk [vmem:[#allocation3 + $0xb0] sm:$0xff] %vm1677_vm7, %v4750_v17  ;;  %4824 = vst.msk [vmem:[#allocation3 + $0xb8] sm:$0xff] %vm1677_vm7, %v4752_v61 }
 0x715   : > { %5016 = vst.msk [vmem:[#allocation3 + $0xb8] sm:$0xff] %vm1871_vm8, %v4944_v20  ;;  %v5328_v30 = vpop.permute.xlu1 %5327  ;;  %5341 = vrot.lane.b32.xlu0 %v5247_v8, %s11035_s25 }
 0x716   : > { %5208 = vst.msk [vmem:[#allocation3 + $0xb8] sm:$0xff] %vm2064_vm9, %v5136_v40 }
 0x717   : > { %5400 = vst.msk [vmem:[#allocation3 + $0xb8] sm:$0xff] %vm2257_vm10, %v5328_v30  ;;  %5343 = vrot.lane.b32.xlu1 %v5248_v26, %s11035_s25  ;;  %v4180_v50 = vpop.permute.xlu0 %4179  ;;  %v5429_v60 = vld [vmem:[#allocation3 + $0xa0] sm:$0xff]  ;;  %s11037_s25 = sshll.u32 %s11063_s22, 8 }
 0x718   : > { %4250 = vst.msk [vmem:[#allocation3 + $0xc8] sm:$0xff] %vm1098_vm4, %v4180_v50  ;;  %7572 = vmatprep.mubr.msk.f32.mxu0 %vm2334_vm11, %v5429_v60  ;;  %s10821_s17 = scalar_lea.vmem %s10968_s16, %s11037_s25 }
 0x719   : > { %4442 = vst.msk [vmem:[#allocation3 + $0xc8] sm:$0xff] %vm1291_vm5, %v4372_v46  ;;  %v4942_v31 = vpop.permute.xlu1 %4941  ;;  %7573 = vmatmul.mubr.msk.f32.gmra.mxu0 %vm2334_vm11, %v5430_v23 }
 0x71a   : > { %4634 = vst.msk [vmem:[#allocation3 + $0xc8] sm:$0xff] %vm1484_vm6, %v10180_v59 }
 0x71b   : > { %5015 = vst.msk [vmem:[#allocation3 + $0xb0] sm:$0xff] %vm1871_vm8, %v4942_v31  ;;  %v4754_v53 = vpop.permute.xlu0 %4753 }
 0x71c   : > { %5207 = vst.msk [vmem:[#allocation3 + $0xb0] sm:$0xff] %vm2064_vm9, %v10202_v51 }
 0x71d   : > { %5399 = vst.msk [vmem:[#allocation3 + $0xb0] sm:$0xff] %vm2257_vm10, %v5326_v57  ;;  %v4370_v25 = vpop.permute.xlu1 %4369 }
 0x71e   : > { %4441 = vst.msk [vmem:[#allocation3 + $0xc0] sm:$0xff] %vm1291_vm5, %v4370_v25  ;;  %v5432_v42 = vld [vmem:[#allocation3 + $0xb8] sm:$0xff] }
 0x71f   : > { %4633 = vst.msk [vmem:[#allocation3 + $0xc0] sm:$0xff] %vm1484_vm6, %v4562_v32  ;;  %v3992_v14 = vpop.permute.xlu0 %3991 }
 0x720   : > { %4825 = vst.msk [vmem:[#allocation3 + $0xc0] sm:$0xff] %vm1677_vm7, %v4754_v53 }
 0x721   : > { %4060 = vst.msk [vmem:[#allocation3 + $0xd8] sm:$0xff] %vm905_vm3, %v3992_v14  ;;  %v4182_v35 = vpop.permute.xlu1 %4181 }
 0x722   : > { %4251 = vst.msk [vmem:[#allocation3 + $0xd0] sm:$0xff] %vm1098_vm4, %v4182_v35 }
 0x723   : > { %v4756_v56 = vpop.permute.xlu0 %4755 }
 0x724   : > { %v5431_v44 = vld [vmem:[#allocation3 + $0xb0] sm:$0xff]  ;;  %4826 = vst.msk [vmem:[#allocation3 + $0xc8] sm:$0xff] %vm1677_vm7, %v4756_v56 }
 0x725   : > { %7575 = vmatprep.mubr.msk.f32.mxu0 %vm2334_vm11, %v5431_v44  ;;  %v4946_v49 = vpop.permute.xlu1 %4945 }
 0x726   : > { %7576 = vmatmul.mubr.msk.f32.gmra.mxu0 %vm2334_vm11, %v5432_v42  ;;  %5017 = vst.msk [vmem:[#allocation3 + $0xc0] sm:$0xff] %vm1871_vm8, %v4946_v49 }
 0x727   : > { %v4184_v62 = vpop.permute.xlu0 %4183 }
 0x728   : > { %4252 = vst.msk [vmem:[#allocation3 + $0xd8] sm:$0xff] %vm1098_vm4, %v4184_v62 }
 0x729   : > { %v4374_v58 = vpop.permute.xlu1 %4373 }
 0x72a   : > { %4443 = vst.msk [vmem:[#allocation3 + $0xd0] sm:$0xff] %vm1291_vm5, %v4374_v58 }
 0x72b   : > { %v4948_v38 = vpop.permute.xlu0 %4947 }
 0x72c   : > { %5018 = vst.msk [vmem:[#allocation3 + $0xc8] sm:$0xff] %vm1871_vm8, %v4948_v38 }
 0x72d   : > { %v5138_v33 = vpop.permute.xlu1 %5137 }
 0x72e   : > { %5209 = vst.msk [vmem:[#allocation3 + $0xc0] sm:$0xff] %vm2064_vm9, %v5138_v33 }
 0x72f   : > { %v4376_v47 = vpop.permute.xlu0 %4375 }
 0x730   : > { %4444 = vst.msk [vmem:[#allocation3 + $0xd8] sm:$0xff] %vm1291_vm5, %v4376_v47  ;;  %v6017_v47 = vld [vmem:[%s10964_s12] sm:$0xf] }
 0x731   : > { %v4566_v63 = vpop.permute.xlu1 %4565  ;;  %7591 = vmatpush3.msk.msra.mxu1 %vm2431_vm2, %v6017_v47 }
 0x732   : > { %4635 = vst.msk [vmem:[#allocation3 + $0xd0] sm:$0xff] %vm1484_vm6, %v4566_v63  ;;  %v6092_v63 = vld [vmem:[%s10963_s11] sm:$0xf] }
 0x733   : > { %v5140_v11 = vpop.permute.xlu0 %5139  ;;  %7595 = vmatprep.subr.msk.mxu0 %vm2431_vm2, %v6092_v63 }
 0x734   : > { %5210 = vst.msk [vmem:[#allocation3 + $0xc8] sm:$0xff] %vm2064_vm9, %v5140_v11  ;;  %7596 = vmatpush3.msk.msra.mxu0 %vm2431_vm2, %v6092_v63  ;;  %v7717_v11 = vld [vmem:[%s8813_s18] sm:$0x1] }
 0x735   : > { %v5330_v21 = vpop.permute.xlu1 %5329  ;;  %7593 = vmatmul.mubr.msk.f32.vlgmr.msra.gmra.mxu1 %vm570_vm0, %v7717_v11 }
 0x736   : > { %5401 = vst.msk [vmem:[#allocation3 + $0xc0] sm:$0xff] %vm2257_vm10, %v5330_v21  ;;  %v7544_v21 = vpop.f32.mrf.mxu0 }
 0x737   : > { %v3994_v43 = vpop.permute.xlu0 %3993 }
 0x738   : > { %4061 = vst.msk [vmem:[#allocation3 + $0xe0] sm:$0xff] %vm905_vm3, %v3994_v43  ;;  %v5618_v43 = vpop.f32.mrf.mxu0 }
 0x739   : > { %v4568_v59 = vpop.permute.xlu1 %4567 }
 0x73a   : > { %4636 = vst.msk [vmem:[#allocation3 + $0xd8] sm:$0xff] %vm1484_vm6, %v4568_v59  ;;  %v7547_v59 = vpop.f32.mrf.mxu0 }
 0x73b   : > { %v4758_v27 = vpop.permute.xlu0 %4757 }
 0x73c   : > { %4827 = vst.msk [vmem:[#allocation3 + $0xd0] sm:$0xff] %vm1677_vm7, %v4758_v27  ;;  %v10331_v27 = vld [vmem:[%s10957_s5] ss:$0 sm:$0xff] }
 0x73d   : > { %v5332_v39 = vpop.permute.xlu1 %5331  ;;  %v5433_v19 = vld [vmem:[#allocation3 + $0xc0] sm:$0xff] }
 0x73e   : > { %5402 = vst.msk [vmem:[#allocation3 + $0xc8] sm:$0xff] %vm2257_vm10, %v5332_v39  ;;  %7578 = vmatprep.mubr.msk.f32.mxu0 %vm2334_vm11, %v5433_v19  ;;  %v5628_v39 = vpop.f32.mrf.mxu0  ;;  %v10334_v19 = vadd.f32 %v10331_v27, %v5618_v43 }
 0x73f   : > { %v3996_v17 = vpop.permute.xlu0 %3995 }
 0x740   : > { %4062 = vst.msk [vmem:[#allocation3 + $0xe8] sm:$0xff] %vm905_vm3, %v3996_v17  ;;  %v7550_v17 = vpop.f32.mrf.mxu0 }
 0x741   : > { %v4186_v28 = vpop.permute.xlu1 %4185 }
 0x742   : > { %4253 = vst.msk [vmem:[#allocation3 + $0xe0] sm:$0xff] %vm1098_vm4, %v4186_v28  ;;  %v10337_v28 = vadd.f32 %v7544_v21, %v10331_v27 }
 0x743   : > { %v4760_v9 = vpop.permute.xlu0 %4759 }
 0x744   : > { %4828 = vst.msk [vmem:[#allocation3 + $0xd8] sm:$0xff] %vm1677_vm7, %v4760_v9  ;;  %v10340_v9 = vadd.f32 %v10331_v27, %v5628_v39 }
 0x745   : > { %v4950_v34 = vpop.permute.xlu1 %4949  ;;  %v5434_v37 = vld [vmem:[#allocation3 + $0xc8] sm:$0xff] }
 0x746   : > { %5019 = vst.msk [vmem:[#allocation3 + $0xd0] sm:$0xff] %vm1871_vm8, %v4950_v34  ;;  %7579 = vmatmul.mubr.msk.f32.gmra.mxu0 %vm2334_vm11, %v5434_v37  ;;  %v5846_v34 = vmul.f32 %v10334_v19, %v10334_v19  ;;  %v5638_v37 = vpop.f32.mrf.mxu0 }
 0x747   : > { %v4188_v51 = vpop.permute.xlu0 %4187 }
 0x748   : > { %4254 = vst.msk [vmem:[#allocation3 + $0xe8] sm:$0xff] %vm1098_vm4, %v4188_v51  ;;  %v5847_v51 = vmul.f32 %v10337_v28, %v10337_v28 }
 0x749   : > { %v4378_v29 = vpop.permute.xlu1 %4377 }
 0x74a   : > { %4445 = vst.msk [vmem:[#allocation3 + $0xe0] sm:$0xff] %vm1291_vm5, %v4378_v29  ;;  %v5777_v29 = vsel %vm570_vm0, %v10334_v19, 0.0 }
 0x74b   : > { %v4952_v45 = vpop.permute.xlu0 %4951 }
 0x74c   : > { %5020 = vst.msk [vmem:[#allocation3 + $0xd8] sm:$0xff] %vm1871_vm8, %v4952_v45  ;;  %v5848_v45 = vmul.f32 %v10340_v9, %v10340_v9 }
 0x74d   : > { %v5142_v36 = vpop.permute.xlu1 %5141 }
 0x74e   : > { %5211 = vst.msk [vmem:[#allocation3 + $0xd0] sm:$0xff] %vm2064_vm9, %v5142_v36  ;;  %v5778_v36 = vsel %vm570_vm0, %v10337_v28, 0.0 }
 0x74f   : > { %v4380_v24 = vpop.permute.xlu0 %4379 }
 0x750   : > { %4446 = vst.msk [vmem:[#allocation3 + $0xe8] sm:$0xff] %vm1291_vm5, %v4380_v24  ;;  %v7553_v24 = vpop.f32.mrf.mxu0 }
 0x751   : > { %v4570_v32 = vpop.permute.xlu1 %4569 }
 0x752   : > { %4637 = vst.msk [vmem:[#allocation3 + $0xe0] sm:$0xff] %vm1484_vm6, %v4570_v32  ;;  %v5878_v32 = vsel %vm570_vm0, %v5846_v34, 0.0 }
 0x753   : > { %v5144_v18 = vpop.permute.xlu0 %5143 }
 0x754   : > { %5212 = vst.msk [vmem:[#allocation3 + $0xd8] sm:$0xff] %vm2064_vm9, %v5144_v18  ;;  %v10354_v18 = vadd.f32 %v7547_v59, %v10331_v27 }
 0x755   : > { %v5334_v40 = vpop.permute.xlu1 %5333 }
 0x756   : > { %5403 = vst.msk [vmem:[#allocation3 + $0xd0] sm:$0xff] %vm2257_vm10, %v5334_v40  ;;  %v5780_v40 = vsel %vm570_vm0, %v10340_v9, 0.0 }
 0x757   : > { %v3998_v57 = vpop.permute.xlu0 %3997 }
 0x758   : > { %4063 = vst.msk [vmem:[#allocation3 + $0xf0] sm:$0xff] %vm905_vm3, %v3998_v57  ;;  %v10359_v57 = vadd.f32 %v10331_v27, %v5638_v37 }
 0x759   : > { %v4572_v20 = vpop.permute.xlu1 %4571 }
 0x75a   : > { %4638 = vst.msk [vmem:[#allocation3 + $0xe8] sm:$0xff] %vm1484_vm6, %v4572_v20  ;;  %v5779_v20 = vadd.f32 %v5778_v36, %v5777_v29 }
 0x75b   : > { %v4762_v48 = vpop.permute.xlu0 %4761 }
 0x75c   : > { %4829 = vst.msk [vmem:[#allocation3 + $0xe0] sm:$0xff] %vm1677_vm7, %v4762_v48  ;;  %v5879_v48 = vsel %vm570_vm0, %v5847_v51, 0.0 }
 0x75d   : > { %v5336_v13 = vpop.permute.xlu1 %5335  ;;  %v5435_v46 = vld [vmem:[#allocation3 + $0xd0] sm:$0xff] }
 0x75e   : > { %5404 = vst.msk [vmem:[#allocation3 + $0xd8] sm:$0xff] %vm2257_vm10, %v5336_v13  ;;  %7581 = vmatprep.mubr.msk.f32.mxu0 %vm2334_vm11, %v5435_v46  ;;  %v5881_v13 = vsel %vm570_vm0, %v5848_v45, 0.0  ;;  %v5880_v46 = vadd.f32 %v5879_v48, %v5878_v32 }
 0x75f   : > { %v4000_v52 = vpop.permute.xlu0 %3999 }
 0x760   : > { %4064 = vst.msk [vmem:[#allocation3 + $0xf8] sm:$0xff] %vm905_vm3, %v4000_v52  ;;  %v5781_v52 = vadd.f32 %v5780_v40, %v5779_v20 }
 0x761   : > { %v4190_v15 = vpop.permute.xlu1 %4189 }
 0x762   : > { %4255 = vst.msk [vmem:[#allocation3 + $0xf0] sm:$0xff] %vm1098_vm4, %v4190_v15  ;;  %v5648_v15 = vpop.f32.mrf.mxu0 }
 0x763   : > { %v4764_v10 = vpop.permute.xlu0 %4763 }
 0x764   : > { %4830 = vst.msk [vmem:[#allocation3 + $0xe8] sm:$0xff] %vm1677_vm7, %v4764_v10  ;;  %v5849_v10 = vmul.f32 %v10354_v18, %v10354_v18 }
 0x765   : > { %v4954_v55 = vpop.permute.xlu1 %4953  ;;  %v5436_v54 = vld [vmem:[#allocation3 + $0xd8] sm:$0xff] }
 0x766   : > { %5021 = vst.msk [vmem:[#allocation3 + $0xe0] sm:$0xff] %vm1871_vm8, %v4954_v55  ;;  %7582 = vmatmul.mubr.msk.f32.gmra.mxu0 %vm2334_vm11, %v5436_v54  ;;  %v5850_v55 = vmul.f32 %v10359_v57, %v10359_v57  ;;  %v5882_v54 = vadd.f32 %v5881_v13, %v5880_v46 }
 0x767   : > { %v4192_v16 = vpop.permute.xlu0 %4191 }
 0x768   : > { %4256 = vst.msk [vmem:[#allocation3 + $0xf8] sm:$0xff] %vm1098_vm4, %v4192_v16  ;;  %v7556_v16 = vpop.f32.mrf.mxu0 }
 0x769   : > { %v4382_v41 = vpop.permute.xlu1 %4381  ;;  %v10402_v34 = vadd.f32 %v7556_v16, %v10331_v27 }
 0x76a   : > { %4447 = vst.msk [vmem:[#allocation3 + $0xf0] sm:$0xff] %vm1291_vm5, %v4382_v41  ;;  %v5782_v41 = vsel %vm570_vm0, %v10354_v18, 0.0 }
 0x76b   : > { %v4956_v61 = vpop.permute.xlu0 %4955  ;;  %v5855_v20 = vmul.f32 %v10402_v34, %v10402_v34 }
 0x76c   : > { %5022 = vst.msk [vmem:[#allocation3 + $0xe8] sm:$0xff] %vm1871_vm8, %v4956_v61  ;;  %v10370_v61 = vadd.f32 %v7550_v17, %v10331_v27 }
 0x76d   : > { %v5146_v8 = vpop.permute.xlu1 %5145  ;;  %v5895_v16 = vsel %vm570_vm0, %v5855_v20, 0.0 }
 0x76e   : > { %5213 = vst.msk [vmem:[#allocation3 + $0xe0] sm:$0xff] %vm2064_vm9, %v5146_v8  ;;  %v5784_v8 = vsel %vm570_vm0, %v10359_v57, 0.0 }
 0x76f   : > { %v4384_v30 = vpop.permute.xlu0 %4383 }
 0x770   : > { %4448 = vst.msk [vmem:[#allocation3 + $0xf8] sm:$0xff] %vm1291_vm5, %v4384_v30  ;;  %v10375_v30 = vadd.f32 %v10331_v27, %v5648_v15 }
 0x771   : > { %v4574_v26 = vpop.permute.xlu1 %4573 }
 0x772   : > { %4639 = vst.msk [vmem:[#allocation3 + $0xf0] sm:$0xff] %vm1484_vm6, %v4574_v26  ;;  %v5783_v26 = vadd.f32 %v5782_v41, %v5781_v52  ;;  %v5794_v52 = vsel %vm570_vm0, %v10402_v34, 0.0 }
 0x773   : > { %v5148_v50 = vpop.permute.xlu0 %5147 }
 0x774   : > { %5214 = vst.msk [vmem:[#allocation3 + $0xe8] sm:$0xff] %vm2064_vm9, %v5148_v50  ;;  %v5883_v50 = vsel %vm570_vm0, %v5849_v10, 0.0 }
 0x775   : > { %v5338_v60 = vpop.permute.xlu1 %5337 }
 0x776   : > { %5405 = vst.msk [vmem:[#allocation3 + $0xe0] sm:$0xff] %vm2257_vm10, %v5338_v60  ;;  %v5885_v60 = vsel %vm570_vm0, %v5850_v55, 0.0 }
 0x777   : > { %v4576_v23 = vpop.permute.xlu0 %4575 }
 0x778   : > { %4640 = vst.msk [vmem:[#allocation3 + $0xf8] sm:$0xff] %vm1484_vm6, %v4576_v23  ;;  %v5785_v23 = vadd.f32 %v5784_v8, %v5783_v26 }
 0x779   : > { %v4766_v31 = vpop.permute.xlu1 %4765 }
 0x77a   : > { %4831 = vst.msk [vmem:[#allocation3 + $0xf0] sm:$0xff] %vm1677_vm7, %v4766_v31  ;;  %v5884_v31 = vadd.f32 %v5883_v50, %v5882_v54 }
 0x77b   : > { %v5340_v53 = vpop.permute.xlu0 %5339 }
 0x77c   : > { %5406 = vst.msk [vmem:[#allocation3 + $0xe8] sm:$0xff] %vm2257_vm10, %v5340_v53  ;;  %v5658_v53 = vpop.f32.mrf.mxu0 }
 0x77d   : > { %v4768_v25 = vpop.permute.xlu1 %4767  ;;  %v5437_v14 = vld [vmem:[#allocation3 + $0xe0] sm:$0xff] }
 0x77e   : > { %4832 = vst.msk [vmem:[#allocation3 + $0xf8] sm:$0xff] %vm1677_vm7, %v4768_v25  ;;  %7584 = vmatprep.mubr.msk.f32.mxu0 %vm2334_vm11, %v5437_v14  ;;  %v5851_v25 = vmul.f32 %v10370_v61, %v10370_v61  ;;  %v5852_v14 = vmul.f32 %v10375_v30, %v10375_v30 }
 0x77f   : > { %v4958_v35 = vpop.permute.xlu0 %4957 }
 0x780   : > { %5023 = vst.msk [vmem:[#allocation3 + $0xf0] sm:$0xff] %vm1871_vm8, %v4958_v35  ;;  %v5886_v35 = vadd.f32 %v5885_v60, %v5884_v31 }
 0x781   : > { %v4960_v56 = vpop.permute.xlu1 %4959 }
 0x782   : > { %5024 = vst.msk [vmem:[#allocation3 + $0xf8] sm:$0xff] %vm1871_vm8, %v4960_v56  ;;  %v7559_v56 = vpop.f32.mrf.mxu0 }
 0x783   : > { %v5150_v44 = vpop.permute.xlu0 %5149  ;;  %v5438_v42 = vld [vmem:[#allocation3 + $0xe8] sm:$0xff]  ;;  %v10418_v15 = vadd.f32 %v7559_v56, %v10331_v27 }
 0x784   : > { %5215 = vst.msk [vmem:[#allocation3 + $0xf0] sm:$0xff] %vm2064_vm9, %v5150_v44  ;;  %7585 = vmatmul.mubr.msk.f32.gmra.mxu0 %vm2334_vm11, %v5438_v42  ;;  %v5786_v44 = vsel %vm570_vm0, %v10370_v61, 0.0  ;;  %v10386_v42 = vadd.f32 %v7553_v24, %v10331_v27  ;;  %v5668_v11 = vpop.f32.mrf.mxu0 }
 0x785   : > { %v5152_v49 = vpop.permute.xlu1 %5151  ;;  %v10407_v51 = vadd.f32 %v10331_v27, %v5668_v11  ;;  %v5857_v60 = vmul.f32 %v10418_v15, %v10418_v15 }
 0x786   : > { %5216 = vst.msk [vmem:[#allocation3 + $0xf8] sm:$0xff] %vm2064_vm9, %v5152_v49  ;;  %v5788_v49 = vsel %vm570_vm0, %v10375_v30, 0.0  ;;  %v5853_v21 = vmul.f32 %v10386_v42, %v10386_v42  ;;  %v7562_v39 = vpop.f32.mrf.mxu0  ;;  %v5790_v17 = vsel %vm570_vm0, %v10386_v42, 0.0 }
 0x787   : > { %v5342_v62 = vpop.permute.xlu0 %5341  ;;  %v5856_v48 = vmul.f32 %v10407_v51, %v10407_v51  ;;  %v5796_v10 = vsel %vm570_vm0, %v10407_v51, 0.0 }
 0x788   : > { %5407 = vst.msk [vmem:[#allocation3 + $0xf0] sm:$0xff] %vm2257_vm10, %v5342_v62  ;;  %v10391_v62 = vadd.f32 %v10331_v27, %v5658_v53  ;;  %v5891_v45 = vsel %vm570_vm0, %v5853_v21, 0.0  ;;  %v5678_v40 = vpop.f32.mrf.mxu0 }
 0x789   : > { %v5344_v58 = vpop.permute.xlu1 %5343  ;;  %v10423_v55 = vadd.f32 %v10331_v27, %v5678_v40  ;;  %v5897_v41 = vsel %vm570_vm0, %v5856_v48, 0.0 }
 0x78a   : > { %5408 = vst.msk [vmem:[#allocation3 + $0xf8] sm:$0xff] %vm2257_vm10, %v5344_v58  ;;  %v5787_v58 = vadd.f32 %v5786_v44, %v5785_v23  ;;  %v5854_v43 = vmul.f32 %v10391_v62, %v10391_v62  ;;  %v5792_v37 = vsel %vm570_vm0, %v10391_v62, 0.0  ;;  %v7565_v46 = vpop.f32.mrf.mxu0 }
 0x78b   : > { %v5858_v23 = vmul.f32 %v10423_v55, %v10423_v55 }
 0x78c   : > { %v5789_v47 = vadd.f32 %v5788_v49, %v5787_v58  ;;  %v5893_v36 = vsel %vm570_vm0, %v5854_v43, 0.0  ;;  %v5688_v50 = vpop.f32.mrf.mxu0  ;;  %v5899_v49 = vsel %vm570_vm0, %v5857_v60, 0.0 }
 0x78d   : > { %v10439_v56 = vadd.f32 %v10331_v27, %v5688_v50  ;;  %v5901_v58 = vsel %vm570_vm0, %v5858_v23, 0.0 }
 0x78e   : > { %v5791_v29 = vadd.f32 %v5790_v17, %v5789_v47 }
 0x78f   : > { %v5439_v38 = vld [vmem:[#allocation3 + $0xf0] sm:$0xff]  ;;  %v5860_v11 = vmul.f32 %v10439_v56, %v10439_v56  ;;  %v5804_v17 = vsel %vm570_vm0, %v10439_v56, 0.0 }
 0x790   : > { %7587 = vmatprep.mubr.msk.f32.mxu0 %vm2334_vm11, %v5439_v38  ;;  %v5887_v38 = vsel %vm570_vm0, %v5851_v25, 0.0  ;;  %v5793_v24 = vadd.f32 %v5792_v37, %v5791_v29  ;;  %v5798_v25 = vsel %vm570_vm0, %v10418_v15, 0.0 }
 0x791   : > { %v5440_v33 = vld [vmem:[#allocation3 + $0xf8] sm:$0xff]  ;;  %v5888_v63 = vadd.f32 %v5887_v38, %v5886_v35  ;;  %v5800_v35 = vsel %vm570_vm0, %v10423_v55, 0.0 }
 0x792   : > { %7588 = vmatmul.mubr.msk.f32.gmra.mxu0 %vm2334_vm11, %v5440_v33  ;;  %v5889_v33 = vsel %vm570_vm0, %v5852_v14, 0.0  ;;  %v5795_v54 = vadd.f32 %v5794_v52, %v5793_v24  ;;  %v10434_v14 = vadd.f32 %v7562_v39, %v10331_v27  ;;  %v10450_v39 = vadd.f32 %v7565_v46, %v10331_v27 }
 0x793   : > { %v5890_v59 = vadd.f32 %v5889_v33, %v5888_v63 }
 0x794   : > { %v5797_v8 = vadd.f32 %v5796_v10, %v5795_v54  ;;  %v5859_v63 = vmul.f32 %v10434_v14, %v10434_v14  ;;  %v5861_v20 = vmul.f32 %v10450_v39, %v10450_v39  ;;  %v5806_v52 = vsel %vm570_vm0, %v10450_v39, 0.0 }
 0x795   : > { %v5892_v32 = vadd.f32 %v5891_v45, %v5890_v59  ;;  %v5802_v59 = vsel %vm570_vm0, %v10434_v14, 0.0 }
 0x796   : > { %v5799_v44 = vadd.f32 %v5798_v25, %v5797_v8  ;;  %v5903_v45 = vsel %vm570_vm0, %v5859_v63, 0.0  ;;  %v5907_v8 = vsel %vm570_vm0, %v5861_v20, 0.0 }
 0x797   : > { %v5894_v13 = vadd.f32 %v5893_v36, %v5892_v32  ;;  %v5905_v36 = vsel %vm570_vm0, %v5860_v11, 0.0 }
 0x798   : > { %v5801_v38 = vadd.f32 %v5800_v35, %v5799_v44 }
 0x799   : > { %v5896_v26 = vadd.f32 %v5895_v16, %v5894_v13 }
 0x79a   : > { %v5803_v29 = vadd.f32 %v5802_v59, %v5801_v38 }
 0x79b   : > { %v5898_v31 = vadd.f32 %v5897_v41, %v5896_v26 }
 0x79c   : > { %v5805_v24 = vadd.f32 %v5804_v17, %v5803_v29 }
 0x79d   : > { %v5900_v33 = vadd.f32 %v5899_v49, %v5898_v31 }
 0x79e   : > { %v5807_v41 = vadd.f32 %v5806_v52, %v5805_v24 }
 0x79f   : > { %v5902_v21 = vadd.f32 %v5901_v58, %v5900_v33 }
 0x7a1   : > { %v7568_v53 = vpop.f32.mrf.mxu0  ;;  %v5904_v32 = vadd.f32 %v5903_v45, %v5902_v21 }
 0x7a2   : > { %v10466_v10 = vadd.f32 %v7568_v53, %v10331_v27 }
 0x7a3   : > { %v5698_v47 = vpop.f32.mrf.mxu0  ;;  %v5906_v13 = vadd.f32 %v5905_v36, %v5904_v32 }
 0x7a4   : > { %v10455_v37 = vadd.f32 %v10331_v27, %v5698_v47  ;;  %v5863_v31 = vmul.f32 %v10466_v10, %v10466_v10  ;;  %v5810_v44 = vsel %vm570_vm0, %v10466_v10, 0.0 }
 0x7a5   : > { %v5908_v60 = vadd.f32 %v5907_v8, %v5906_v13 }
 0x7a6   : > { %v5862_v48 = vmul.f32 %v10455_v37, %v10455_v37  ;;  %v5808_v54 = vsel %vm570_vm0, %v10455_v37, 0.0  ;;  %v5911_v47 = vsel %vm570_vm0, %v5863_v31, 0.0 }
 0x7a7   : > { %v5809_v50 = vadd.f32 %v5808_v54, %v5807_v41 }
 0x7a8   : > { %v5909_v26 = vsel %vm570_vm0, %v5862_v48, 0.0 }
 0x7a9   : > { %v5910_v25 = vadd.f32 %v5909_v26, %v5908_v60  ;;  %v5811_v33 = vadd.f32 %v5810_v44, %v5809_v50 }
 0x7ab   : > { %v5912_v21 = vadd.f32 %v5911_v47, %v5910_v25 }
 0x7c1   : > { %v7571_v43 = vpop.f32.mrf.mxu0 }
 0x7c2   : > { %v10482_v49 = vadd.f32 %v7571_v43, %v10331_v27 }
 0x7c3   : > { %v5708_v40 = vpop.f32.mrf.mxu0 }
 0x7c4   : > { %v10471_v16 = vadd.f32 %v10331_v27, %v5708_v40  ;;  %v5865_v17 = vmul.f32 %v10482_v49, %v10482_v49  ;;  %v5814_v36 = vsel %vm570_vm0, %v10482_v49, 0.0 }
 0x7c6   : > { %v5864_v53 = vmul.f32 %v10471_v16, %v10471_v16  ;;  %v5812_v58 = vsel %vm570_vm0, %v10471_v16, 0.0  ;;  %v5915_v48 = vsel %vm570_vm0, %v5865_v17, 0.0 }
 0x7c7   : > { %v5813_v11 = vadd.f32 %v5812_v58, %v5811_v33 }
 0x7c8   : > { %v5913_v63 = vsel %vm570_vm0, %v5864_v53, 0.0 }
 0x7c9   : > { %v5914_v29 = vadd.f32 %v5913_v63, %v5912_v21  ;;  %v5815_v20 = vadd.f32 %v5814_v36, %v5813_v11 }
 0x7cb   : > { %v5916_v54 = vadd.f32 %v5915_v48, %v5914_v29 }
 0x7d9   : > { %v7574_v46 = vpop.f32.mrf.mxu0 }
 0x7da   : > { %v10498_v24 = vadd.f32 %v7574_v46, %v10331_v27 }
 0x7db   : > { %v5718_v23 = vpop.f32.mrf.mxu0 }
 0x7dc   : > { %v10487_v38 = vadd.f32 %v10331_v27, %v5718_v23  ;;  %v5867_v8 = vmul.f32 %v10498_v24, %v10498_v24  ;;  %v5818_v60 = vsel %vm570_vm0, %v10498_v24, 0.0 }
 0x7de   : > { %v5866_v43 = vmul.f32 %v10487_v38, %v10487_v38  ;;  %v5816_v32 = vsel %vm570_vm0, %v10487_v38, 0.0  ;;  %v5919_v44 = vsel %vm570_vm0, %v5867_v8, 0.0 }
 0x7df   : > { %v5817_v52 = vadd.f32 %v5816_v32, %v5815_v20 }
 0x7e0   : > { %v5917_v13 = vsel %vm570_vm0, %v5866_v43, 0.0 }
 0x7e1   : > { %v5918_v26 = vadd.f32 %v5917_v13, %v5916_v54  ;;  %v5819_v25 = vadd.f32 %v5818_v60, %v5817_v52 }
 0x7e3   : > { %v5920_v47 = vadd.f32 %v5919_v44, %v5918_v26 }
 0x7e6   : > { %v7577_v35 = vpop.f32.mrf.mxu0 }
 0x7e7   : > { %v10514_v23 = vadd.f32 %v7577_v35, %v10331_v27 }
 0x7e8   : > { %v5728_v59 = vpop.f32.mrf.mxu0 }
 0x7e9   : > { %v10503_v40 = vadd.f32 %v10331_v27, %v5728_v59  ;;  %v5869_v11 = vmul.f32 %v10514_v23, %v10514_v23  ;;  %v5822_v59 = vsel %vm570_vm0, %v10514_v23, 0.0 }
 0x7eb   : > { %v5868_v46 = vmul.f32 %v10503_v40, %v10503_v40  ;;  %v5820_v31 = vsel %vm570_vm0, %v10503_v40, 0.0  ;;  %v5923_v20 = vsel %vm570_vm0, %v5869_v11, 0.0 }
 0x7ec   : > { %v5821_v33 = vadd.f32 %v5820_v31, %v5819_v25 }
 0x7ed   : > { %v5921_v58 = vsel %vm570_vm0, %v5868_v46, 0.0 }
 0x7ee   : > { %v5922_v21 = vadd.f32 %v5921_v58, %v5920_v47  ;;  %v5823_v36 = vadd.f32 %v5822_v59, %v5821_v33 }
 0x7f0   : > { %v5924_v52 = vadd.f32 %v5923_v20, %v5922_v21 }
 0x806   : > { %v7580_v45 = vpop.f32.mrf.mxu0 }
 0x807   : > { %v10530_v17 = vadd.f32 %v7580_v45, %v10331_v27 }
 0x808   : > { %v5738_v41 = vpop.f32.mrf.mxu0 }
 0x809   : > { %v10519_v53 = vadd.f32 %v10331_v27, %v5738_v41  ;;  %v5871_v41 = vmul.f32 %v10530_v17, %v10530_v17  ;;  %v5826_v46 = vsel %vm570_vm0, %v10530_v17, 0.0 }
 0x80b   : > { %v5870_v35 = vmul.f32 %v10519_v53, %v10519_v53  ;;  %v5824_v43 = vsel %vm570_vm0, %v10519_v53, 0.0  ;;  %v5927_v44 = vsel %vm570_vm0, %v5871_v41, 0.0 }
 0x80c   : > { %v5825_v13 = vadd.f32 %v5824_v43, %v5823_v36 }
 0x80d   : > { %v5925_v48 = vsel %vm570_vm0, %v5870_v35, 0.0 }
 0x80e   : > { %v5926_v8 = vadd.f32 %v5925_v48, %v5924_v52  ;;  %v5827_v25 = vadd.f32 %v5826_v46, %v5825_v13 }
 0x810   : > { %v5928_v47 = vadd.f32 %v5927_v44, %v5926_v8 }
 0x826   : > { %v7583_v50 = vpop.f32.mrf.mxu0 }
 0x827   : > { %v10546_v26 = vadd.f32 %v7583_v50, %v10331_v27 }
 0x828   : > { %v5748_v63 = vpop.f32.mrf.mxu0 }
 0x829   : > { %v10535_v29 = vadd.f32 %v10331_v27, %v5748_v63  ;;  %v5873_v63 = vmul.f32 %v10546_v26, %v10546_v26  ;;  %v5830_v35 = vsel %vm570_vm0, %v10546_v26, 0.0 }
 0x82b   : > { %v5872_v45 = vmul.f32 %v10535_v29, %v10535_v29  ;;  %v5828_v60 = vsel %vm570_vm0, %v10535_v29, 0.0  ;;  %v5931_v36 = vsel %vm570_vm0, %v5873_v63, 0.0 }
 0x82c   : > { %v5829_v33 = vadd.f32 %v5828_v60, %v5827_v25 }
 0x82d   : > { %v5929_v58 = vsel %vm570_vm0, %v5872_v45, 0.0 }
 0x82e   : > { %v5930_v11 = vadd.f32 %v5929_v58, %v5928_v47  ;;  %v5831_v43 = vadd.f32 %v5830_v35, %v5829_v33 }
 0x830   : > { %v5932_v13 = vadd.f32 %v5931_v36, %v5930_v11 }
 0x844   : > { %v7586_v32 = vpop.f32.mrf.mxu0 }
 0x845   : > { %v10562_v21 = vadd.f32 %v7586_v32, %v10331_v27 }
 0x846   : > { %v5758_v54 = vpop.f32.mrf.mxu0 }
 0x847   : > { %v10551_v31 = vadd.f32 %v10331_v27, %v5758_v54  ;;  %v5875_v54 = vmul.f32 %v10562_v21, %v10562_v21  ;;  %v5834_v8 = vsel %vm570_vm0, %v10562_v21, 0.0 }
 0x849   : > { %v5874_v50 = vmul.f32 %v10551_v31, %v10551_v31  ;;  %v5832_v59 = vsel %vm570_vm0, %v10551_v31, 0.0  ;;  %v5935_v25 = vsel %vm570_vm0, %v5875_v54, 0.0 }
 0x84a   : > { %v5833_v48 = vadd.f32 %v5832_v59, %v5831_v43 }
 0x84b   : > { %v5933_v20 = vsel %vm570_vm0, %v5874_v50, 0.0 }
 0x84c   : > { %v5934_v45 = vadd.f32 %v5933_v20, %v5932_v13  ;;  %v5835_v60 = vadd.f32 %v5834_v8, %v5833_v48 }
 0x84e   : > { %v5936_v63 = vadd.f32 %v5935_v25, %v5934_v45 }
 0x852   : > { %v7589_v52 = vpop.f32.mrf.mxu0 }
 0x853   : > { %v10571_v41 = vadd.f32 %v7589_v52, %v10331_v27 }
 0x854   : > { %v5768_v32 = vpop.f32.mrf.mxu0 }
 0x855   : > { %v5769_v46 = vadd.f32 %v10331_v27, %v5768_v32  ;;  %v5877_v44 = vmul.f32 %v10571_v41, %v10571_v41  ;;  %v5838_v50 = vsel %vm570_vm0, %v10571_v41, 0.0 }
 0x857   : > { %v5836_v58 = vsel %vm570_vm0, %v5769_v46, 0.0  ;;  %v5876_v33 = vmul.f32 %v5769_v46, %v5769_v46  ;;  %v5939_v27 = vsel %vm570_vm0, %v5877_v44, 0.0 }
 0x858   : > { %v5837_v47 = vadd.f32 %v5836_v58, %v5835_v60 }
 0x859   : > { %v5937_v11 = vsel %vm570_vm0, %v5876_v33, 0.0 }
 0x85a   : > { %v5839_v35 = vadd.f32 %v5838_v50, %v5837_v47  ;;  %v5938_v59 = vadd.f32 %v5937_v11, %v5936_v63  ;;  %v10589_v11 = vpop.f32.mrf.mxu1 }
 0x85c   : > { %v5840_v43 = vrot.slane %v5839_v35, 4  ;;  %v5940_v36 = vadd.f32 %v5939_v27, %v5938_v59  ;;  %v7594_v27 = vpop.f32.mrf.mxu1 }
 0x85e   : > { %v5841_v20 = vadd.f32 %v5840_v43, %v5839_v35  ;;  %v5941_v48 = vrot.slane %v5940_v36, 4 }
 0x860   : > { %v5842_v13 = vrot.slane %v5841_v20, 2  ;;  %v5942_v52 = vadd.f32 %v5941_v48, %v5940_v36 }
 0x862   : > { %v5843_v54 = vadd.f32 %v5842_v13, %v5841_v20  ;;  %v5943_v32 = vrot.slane %v5942_v52, 2 }
 0x864   : > { %v5844_v8 = vrot.slane %v5843_v54, 1  ;;  %v5944_v60 = vadd.f32 %v5943_v32, %v5942_v52 }
 0x866   : > { %v5845_v45 = vadd.f32 %v5844_v8, %v5843_v54  ;;  %v5945_v25 = vrot.slane %v5944_v60, 1 }
 0x868   : > { %v5946_v58 = vadd.f32 %v5945_v25, %v5944_v60  ;;  %v10584_v12 = vmul.f32 0.00390625, %v5845_v45 }
 0x86a   : > { %v5948_v33 = vmul.f32 0.00390625, %v5946_v58  ;;  %v5949_v47 = vmul.f32 %v10584_v12, %v10584_v12  ;;  %v5981_v44 = vsub.f32 %v5769_v46, %v10584_v12  ;;  %v5979_v35 = vsub.f32 %v10551_v31, %v10584_v12 }
 0x86b   : > { %v5980_v59 = vsub.f32 %v10562_v21, %v10584_v12  ;;  %v5982_v43 = vsub.f32 %v10571_v41, %v10584_v12  ;;  %v5951_v36 = vsub.f32 %v10334_v19, %v10584_v12  ;;  %v5952_v46 = vsub.f32 %v10337_v28, %v10584_v12 }
 0x86c   : > { %v5950_v63 = vsub.f32 %v5948_v33, %v5949_v47  ;;  %v5953_v31 = vsub.f32 %v10340_v9, %v10584_v12  ;;  %v5954_v19 = vsub.f32 %v10354_v18, %v10584_v12  ;;  %v5955_v28 = vsub.f32 %v10359_v57, %v10584_v12 }
 0x86d   : > { %v5978_v9 = vsub.f32 %v10546_v26, %v10584_v12  ;;  %v5956_v54 = vsub.f32 %v10370_v61, %v10584_v12  ;;  %v5957_v26 = vsub.f32 %v10375_v30, %v10584_v12  ;;  %v5958_v25 = vsub.f32 %v10386_v42, %v10584_v12 }
 0x86e   : > { %v5983_v50 = vadd.f32 1e-05, %v5950_v63  ;;  %v5959_v58 = vsub.f32 %v10391_v62, %v10584_v12  ;;  %v5960_v47 = vsub.f32 %v10402_v34, %v10584_v12  ;;  %v5962_v63 = vsub.f32 %v10418_v15, %v10584_v12 }
 0x86f   : > { %v5966_v27 = vsub.f32 %v10450_v39, %v10584_v12 }
 0x870   : > { %7715 = vrsqrt.f32 %v5983_v50  ;;  %v5963_v50 = vsub.f32 %v10423_v55, %v10584_v12 }
 0x87d   : > { %v10601_v20 = vpop.eup %7715 }
 0x87e   : > { %v10604_v48 = vmul.f32 %v10601_v20, %v5981_v44  ;;  %v5985_v21 = vmul.f32 %v10601_v20, %v5951_v36  ;;  %v5986_v13 = vmul.f32 %v10601_v20, %v5952_v46  ;;  %v5987_v41 = vmul.f32 %v10601_v20, %v5953_v31 }
 0x87f   : > { %v5988_v52 = vmul.f32 %v10601_v20, %v5954_v19  ;;  %v5989_v32 = vmul.f32 %v10601_v20, %v5955_v28  ;;  %v10625_v8 = vmul.f32 %v10601_v20, %v5978_v9  ;;  %v10628_v18 = vmul.f32 %v10601_v20, %v5979_v35 }
 0x880   : > { %7597 = vmatprep.mubr.msk.f32.mxu0 %vm570_vm0, %v5985_v21  ;;  %v10631_v57 = vmul.f32 %v10601_v20, %v5980_v59  ;;  %v10634_v60 = vmul.f32 %v10601_v20, %v5982_v43  ;;  %v5990_v61 = vmul.f32 %v10601_v20, %v5956_v54  ;;  %v5991_v45 = vmul.f32 %v10601_v20, %v5957_v26 }
 0x881   : > { %7598 = vmatmul.mubr.msk.f32.vlgmr.msra.gmra.mxu0 %vm570_vm0, %v5986_v13  ;;  %v5992_v33 = vmul.f32 %v10601_v20, %v5958_v25  ;;  %v5993_v30 = vmul.f32 %v10601_v20, %v5959_v58  ;;  %v5961_v44 = vsub.f32 %v10407_v51, %v10584_v12  ;;  %v5994_v42 = vmul.f32 %v10601_v20, %v5960_v47 }
 0x882   : > { %7600 = vmatprep.mubr.msk.f32.mxu0 %vm570_vm0, %v5987_v41  ;;  %v5996_v34 = vmul.f32 %v10601_v20, %v5962_v63  ;;  %v5997_v51 = vmul.f32 %v10601_v20, %v5963_v50  ;;  %v5964_v35 = vsub.f32 %v10434_v14, %v10584_v12  ;;  %v5965_v59 = vsub.f32 %v10439_v56, %v10584_v12 }
 0x883   : > { %v5995_v62 = vmul.f32 %v10601_v20, %v5961_v44  ;;  %v5967_v43 = vsub.f32 %v10455_v37, %v10584_v12  ;;  %v6000_v14 = vmul.f32 %v10601_v20, %v5966_v27  ;;  %v5968_v36 = vsub.f32 %v10466_v10, %v10584_v12 }
 0x884   : > { %v5998_v15 = vmul.f32 %v10601_v20, %v5964_v35  ;;  %v5999_v55 = vmul.f32 %v10601_v20, %v5965_v59  ;;  %v5969_v46 = vsub.f32 %v10471_v16, %v10584_v12  ;;  %v5970_v31 = vsub.f32 %v10482_v49, %v10584_v12 }
 0x885   : > { %7601 = vmatmul.mubr.msk.f32.gmra.mxu0 %vm570_vm0, %v5988_v52  ;;  %v6001_v56 = vmul.f32 %v10601_v20, %v5967_v43  ;;  %v6002_v39 = vmul.f32 %v10601_v20, %v5968_v36  ;;  %v5971_v21 = vsub.f32 %v10487_v38, %v10584_v12  ;;  %v5972_v13 = vsub.f32 %v10498_v24, %v10584_v12 }
 0x886   : > { %7603 = vmatprep.mubr.msk.f32.mxu0 %vm570_vm0, %v5989_v32  ;;  %v6003_v37 = vmul.f32 %v10601_v20, %v5969_v46  ;;  %v6004_v10 = vmul.f32 %v10601_v20, %v5970_v31  ;;  %v5973_v41 = vsub.f32 %v10503_v40, %v10584_v12  ;;  %v5974_v19 = vsub.f32 %v10514_v23, %v10584_v12 }
 0x887   : > { %v6005_v16 = vmul.f32 %v10601_v20, %v5971_v21  ;;  %v6006_v49 = vmul.f32 %v10601_v20, %v5972_v13  ;;  %v5975_v28 = vsub.f32 %v10519_v53, %v10584_v12  ;;  %v5976_v9 = vsub.f32 %v10530_v17, %v10584_v12  ;;  %v6018_v17 = vld [vmem:[%s10965_s13] sm:$0x1] }
 0x888   : > { %v6007_v38 = vmul.f32 %v10601_v20, %v5973_v41  ;;  %v6008_v24 = vmul.f32 %v10601_v20, %v5974_v19  ;;  %v5977_v52 = vsub.f32 %v10535_v29, %v10584_v12  ;;  %v6453_v12 = vld [vmem:[%s10966_s14] sm:$0xff]  ;;  %v6089_v29 = vadd.f32 %v10589_v11, %v6018_v17 }
 0x889   : > { %7604 = vmatmul.mubr.msk.f32.gmra.mxu0 %vm570_vm0, %v5990_v61  ;;  %v6009_v40 = vmul.f32 %v10601_v20, %v5975_v28  ;;  %v6010_v23 = vmul.f32 %v10601_v20, %v5976_v9  ;;  %7645 = vmatprep.subr.mxu1 %v6453_v12 }
 0x88a   : > { %7606 = vmatprep.mubr.msk.f32.mxu0 %vm570_vm0, %v5991_v45  ;;  %v6011_v53 = vmul.f32 %v10601_v20, %v5977_v52  ;;  %7646 = vmatpush3.msra.mxu1 %v6453_v12  ;;  %v11036_v20 = vsub.s32 0, %v9203_v22 }
 0x88c   : > { %v10743_v54 = vrot.slane %v6089_v29, %v11036_v20 }
 0x88d   : > { %7607 = vmatmul.mubr.msk.f32.gmra.mxu0 %vm570_vm0, %v5992_v33 }
 0x88e   : > { %7609 = vmatprep.mubr.msk.f32.mxu0 %vm570_vm0, %v5993_v30 }
 0x891   : > { %7610 = vmatmul.mubr.msk.f32.gmra.mxu0 %vm570_vm0, %v5994_v42 }
 0x892   : > { %7612 = vmatprep.mubr.msk.f32.mxu0 %vm570_vm0, %v5995_v62 }
 0x895   : > { %7613 = vmatmul.mubr.msk.f32.gmra.mxu0 %vm570_vm0, %v5996_v34 }
 0x896   : > { %7615 = vmatprep.mubr.msk.f32.mxu0 %vm570_vm0, %v5997_v51 }
 0x899   : > { %7616 = vmatmul.mubr.msk.f32.gmra.mxu0 %vm570_vm0, %v5998_v15 }
 0x89a   : > { %7618 = vmatprep.mubr.msk.f32.mxu0 %vm570_vm0, %v5999_v55 }
 0x89d   : > { %7619 = vmatmul.mubr.msk.f32.gmra.mxu0 %vm570_vm0, %v6000_v14 }
 0x89e   : > { %7621 = vmatprep.mubr.msk.f32.mxu0 %vm570_vm0, %v6001_v56 }
 0x8a1   : > { %7622 = vmatmul.mubr.msk.f32.gmra.mxu0 %vm570_vm0, %v6002_v39 }
 0x8a2   : > { %7624 = vmatprep.mubr.msk.f32.mxu0 %vm570_vm0, %v6003_v37 }
 0x8a5   : > { %7625 = vmatmul.mubr.msk.f32.gmra.mxu0 %vm570_vm0, %v6004_v10 }
 0x8a6   : > { %7627 = vmatprep.mubr.msk.f32.mxu0 %vm570_vm0, %v6005_v16 }
 0x8a9   : > { %7628 = vmatmul.mubr.msk.f32.gmra.mxu0 %vm570_vm0, %v6006_v49 }
 0x8aa   : > { %7630 = vmatprep.mubr.msk.f32.mxu0 %vm570_vm0, %v6007_v38 }
 0x8ad   : > { %7631 = vmatmul.mubr.msk.f32.gmra.mxu0 %vm570_vm0, %v6008_v24 }
 0x8ae   : > { %7633 = vmatprep.mubr.msk.f32.mxu0 %vm570_vm0, %v6009_v40 }
 0x8b1   : > { %7634 = vmatmul.mubr.msk.f32.gmra.mxu0 %vm570_vm0, %v6010_v23 }
 0x8b2   : > { %7636 = vmatprep.mubr.msk.f32.mxu0 %vm570_vm0, %v6011_v53 }
 0x8b5   : > { %7637 = vmatmul.mubr.msk.f32.gmra.mxu0 %vm570_vm0, %v10625_v8 }
 0x8b6   : > { %7639 = vmatprep.mubr.msk.f32.mxu0 %vm570_vm0, %v10628_v18 }
 0x8b9   : > { %7640 = vmatmul.mubr.msk.f32.gmra.mxu0 %vm570_vm0, %v10631_v57 }
 0x8ba   : > { %7642 = vmatprep.mubr.msk.f32.mxu0 %vm570_vm0, %v10604_v48 }
 0x8bd   : > { %7643 = vmatmul.mubr.msk.f32.gmra.mxu0 %vm570_vm0, %v10634_v60 }
 0x941   : > { %v7599_v48 = vpop.f32.mrf.mxu0 }
 0x942   : > { %v6268_v32 = vadd.f32 %v7599_v48, %v10743_v54 }
 0x943   : > { %v6262_v8 = vpop.f32.mrf.mxu0 }
 0x944   : > { %v6263_v18 = vadd.f32 %v6262_v8, %v10743_v54  ;;  %v6422_v26 = vmax.f32 %v6268_v32, 0.0 }
 0x945   : > { %v7602_v57 = vpop.f32.mrf.mxu0 }
 0x946   : > { %v6421_v60 = vmax.f32 %v6263_v18, 0.0  ;;  %v6278_v61 = vadd.f32 %v7602_v57, %v10743_v54 }
 0x947   : > { %v6272_v45 = vpop.f32.mrf.mxu0 }
 0x948   : > { %v6273_v25 = vadd.f32 %v6272_v45, %v10743_v54  ;;  %7647 = vmatprep.mubr.msk.f32.mxu1 %vm3347_vm13, %v6421_v60  ;;  %v6424_v58 = vmax.f32 %v6278_v61, 0.0 }
 0x949   : > { %v7605_v11 = vpop.f32.mrf.mxu0  ;;  %7648 = vmatmul.mubr.msk.f32.vlgmr.msra.gmra.mxu1 %vm3347_vm13, %v6422_v26 }
 0x94a   : > { %v6423_v22 = vmax.f32 %v6273_v25, 0.0  ;;  %v6288_v33 = vadd.f32 %v7605_v11, %v10743_v54 }
 0x94b   : > { %v6282_v30 = vpop.f32.mrf.mxu0 }
 0x94c   : > { %v6283_v47 = vadd.f32 %v6282_v30, %v10743_v54  ;;  %7650 = vmatprep.mubr.msk.f32.mxu1 %vm3347_vm13, %v6423_v22  ;;  %v6426_v62 = vmax.f32 %v6288_v33, 0.0 }
 0x94d   : > { %v7608_v44 = vpop.f32.mrf.mxu0  ;;  %7651 = vmatmul.mubr.msk.f32.gmra.mxu1 %vm3347_vm13, %v6424_v58 }
 0x94e   : > { %v6425_v42 = vmax.f32 %v6283_v47, 0.0  ;;  %v6298_v63 = vadd.f32 %v7608_v44, %v10743_v54 }
 0x94f   : > { %v6292_v50 = vpop.f32.mrf.mxu0 }
 0x950   : > { %v6293_v34 = vadd.f32 %v6292_v50, %v10743_v54  ;;  %7653 = vmatprep.mubr.msk.f32.mxu1 %vm3347_vm13, %v6425_v42  ;;  %v6428_v59 = vmax.f32 %v6298_v63, 0.0 }
 0x951   : > { %v7611_v51 = vpop.f32.mrf.mxu0  ;;  %7654 = vmatmul.mubr.msk.f32.gmra.mxu1 %vm3347_vm13, %v6426_v62 }
 0x952   : > { %v6427_v35 = vmax.f32 %v6293_v34, 0.0  ;;  %v6308_v15 = vadd.f32 %v7611_v51, %v10743_v54 }
 0x953   : > { %v6302_v55 = vpop.f32.mrf.mxu0 }
 0x954   : > { %v6303_v27 = vadd.f32 %v6302_v55, %v10743_v54  ;;  %7656 = vmatprep.mubr.msk.f32.mxu1 %vm3347_vm13, %v6427_v35  ;;  %v6430_v56 = vmax.f32 %v6308_v15, 0.0 }
 0x955   : > { %v7614_v43 = vpop.f32.mrf.mxu0  ;;  %7657 = vmatmul.mubr.msk.f32.gmra.mxu1 %vm3347_vm13, %v6428_v59 }
 0x956   : > { %v6429_v14 = vmax.f32 %v6303_v27, 0.0  ;;  %v6318_v36 = vadd.f32 %v7614_v43, %v10743_v54 }
 0x957   : > { %v6312_v46 = vpop.f32.mrf.mxu0 }
 0x958   : > { %v6313_v39 = vadd.f32 %v6312_v46, %v10743_v54  ;;  %7659 = vmatprep.mubr.msk.f32.mxu1 %vm3347_vm13, %v6429_v14  ;;  %v6432_v21 = vmax.f32 %v6318_v36, 0.0 }
 0x959   : > { %v7617_v37 = vpop.f32.mrf.mxu0  ;;  %7660 = vmatmul.mubr.msk.f32.gmra.mxu1 %vm3347_vm13, %v6430_v56 }
 0x95a   : > { %v6431_v31 = vmax.f32 %v6313_v39, 0.0  ;;  %v6328_v10 = vadd.f32 %v7617_v37, %v10743_v54 }
 0x95b   : > { %v6322_v16 = vpop.f32.mrf.mxu0 }
 0x95c   : > { %v6323_v13 = vadd.f32 %v6322_v16, %v10743_v54  ;;  %7662 = vmatprep.mubr.msk.f32.mxu1 %vm3347_vm13, %v6431_v31  ;;  %v6434_v38 = vmax.f32 %v6328_v10, 0.0 }
 0x95d   : > { %v7620_v41 = vpop.f32.mrf.mxu0  ;;  %7663 = vmatmul.mubr.msk.f32.gmra.mxu1 %vm3347_vm13, %v6432_v21 }
 0x95e   : > { %v6433_v49 = vmax.f32 %v6323_v13, 0.0  ;;  %v6338_v19 = vadd.f32 %v7620_v41, %v10743_v54 }
 0x95f   : > { %v6332_v28 = vpop.f32.mrf.mxu0 }
 0x960   : > { %v6333_v24 = vadd.f32 %v6332_v28, %v10743_v54  ;;  %7665 = vmatprep.mubr.msk.f32.mxu1 %vm3347_vm13, %v6433_v49  ;;  %v6436_v52 = vmax.f32 %v6338_v19, 0.0  ;;  %v10812_v49 = vld [vmem:[%s10967_s15] ss:$0 sm:$0xff] }
 0x961   : > { %v7623_v40 = vpop.f32.mrf.mxu0  ;;  %7666 = vmatmul.mubr.msk.f32.gmra.mxu1 %vm3347_vm13, %v6434_v38 }
 0x962   : > { %v6435_v9 = vmax.f32 %v6333_v24, 0.0  ;;  %v6348_v23 = vadd.f32 %v7623_v40, %v10743_v54 }
 0x963   : > { %v6342_v53 = vpop.f32.mrf.mxu0 }
 0x964   : > { %v6343_v12 = vadd.f32 %v6342_v53, %v10743_v54  ;;  %7668 = vmatprep.mubr.msk.f32.mxu1 %vm3347_vm13, %v6435_v9  ;;  %v6438_v20 = vmax.f32 %v6348_v23, 0.0 }
 0x965   : > { %v7626_v17 = vpop.f32.mrf.mxu0  ;;  %7669 = vmatmul.mubr.msk.f32.gmra.mxu1 %vm3347_vm13, %v6436_v52 }
 0x966   : > { %v6437_v29 = vmax.f32 %v6343_v12, 0.0  ;;  %v6358_v48 = vadd.f32 %v7626_v17, %v10743_v54 }
 0x967   : > { %v6352_v32 = vpop.f32.mrf.mxu0 }
 0x968   : > { %v6353_v8 = vadd.f32 %v6352_v32, %v10743_v54  ;;  %7671 = vmatprep.mubr.msk.f32.mxu1 %vm3347_vm13, %v6437_v29  ;;  %v6440_v60 = vmax.f32 %v6358_v48, 0.0 }
 0x969   : > { %v7629_v18 = vpop.f32.mrf.mxu0  ;;  %7672 = vmatmul.mubr.msk.f32.gmra.mxu1 %vm3347_vm13, %v6438_v20 }
 0x96a   : > { %v6439_v57 = vmax.f32 %v6353_v8, 0.0  ;;  %v6368_v26 = vadd.f32 %v7629_v18, %v10743_v54 }
 0x96b   : > { %v6362_v61 = vpop.f32.mrf.mxu0 }
 0x96c   : > { %v6363_v45 = vadd.f32 %v6362_v61, %v10743_v54  ;;  %7674 = vmatprep.mubr.msk.f32.mxu1 %vm3347_vm13, %v6439_v57  ;;  %v6442_v22 = vmax.f32 %v6368_v26, 0.0 }
 0x96d   : > { %v7632_v25 = vpop.f32.mrf.mxu0  ;;  %7675 = vmatmul.mubr.msk.f32.gmra.mxu1 %vm3347_vm13, %v6440_v60 }
 0x96e   : > { %v6441_v11 = vmax.f32 %v6363_v45, 0.0  ;;  %v6378_v58 = vadd.f32 %v7632_v25, %v10743_v54 }
 0x96f   : > { %v6372_v33 = vpop.f32.mrf.mxu0 }
 0x970   : > { %v6373_v30 = vadd.f32 %v6372_v33, %v10743_v54  ;;  %7677 = vmatprep.mubr.msk.f32.mxu1 %vm3347_vm13, %v6441_v11  ;;  %v6444_v42 = vmax.f32 %v6378_v58, 0.0 }
 0x971   : > { %v7635_v47 = vpop.f32.mrf.mxu0  ;;  %7678 = vmatmul.mubr.msk.f32.gmra.mxu1 %vm3347_vm13, %v6442_v22 }
 0x972   : > { %v6443_v44 = vmax.f32 %v6373_v30, 0.0  ;;  %v6388_v62 = vadd.f32 %v7635_v47, %v10743_v54 }
 0x973   : > { %v6382_v63 = vpop.f32.mrf.mxu0 }
 0x974   : > { %v6383_v50 = vadd.f32 %v6382_v63, %v10743_v54  ;;  %7680 = vmatprep.mubr.msk.f32.mxu1 %vm3347_vm13, %v6443_v44  ;;  %v6446_v35 = vmax.f32 %v6388_v62, 0.0  ;;  %v11038_v62 = vld [vmem:[#allocation5_spill] sm:$0xff] }
 0x975   : > { %v7638_v34 = vpop.f32.mrf.mxu0  ;;  %7681 = vmatmul.mubr.msk.f32.gmra.mxu1 %vm3347_vm13, %v6444_v42 }
 0x976   : > { %v6445_v51 = vmax.f32 %v6383_v50, 0.0  ;;  %v6398_v59 = vadd.f32 %v7638_v34, %v10743_v54 }
 0x977   : > { %v6392_v15 = vpop.f32.mrf.mxu0 }
 0x978   : > { %v6393_v55 = vadd.f32 %v6392_v15, %v10743_v54  ;;  %7683 = vmatprep.mubr.msk.f32.mxu1 %vm3347_vm13, %v6445_v51  ;;  %v6448_v14 = vmax.f32 %v6398_v59, 0.0  ;;  %v11039_v51 = vld [vmem:[#allocation4_spill] sm:$0xff] }
 0x979   : > { %v7641_v27 = vpop.f32.mrf.mxu0  ;;  %7684 = vmatmul.mubr.msk.f32.gmra.mxu1 %vm3347_vm13, %v6446_v35 }
 0x97a   : > { %v6447_v43 = vmax.f32 %v6393_v55, 0.0  ;;  %v6408_v56 = vadd.f32 %v7641_v27, %v10743_v54  ;;  %v11040_v55 = vld [vmem:[#allocation7_spill] sm:$0xff] }
 0x97b   : > { %v6402_v36 = vpop.f32.mrf.mxu0 }
 0x97c   : > { %v6403_v46 = vadd.f32 %v6402_v36, %v10743_v54  ;;  %7686 = vmatprep.mubr.msk.f32.mxu1 %vm3347_vm13, %v6447_v43  ;;  %v6450_v31 = vmax.f32 %v6408_v56, 0.0  ;;  %v11041_v36 = vld [vmem:[#allocation6_spill] sm:$0xff] }
 0x97d   : > { %v7644_v39 = vpop.f32.mrf.mxu0  ;;  %7687 = vmatmul.mubr.msk.f32.gmra.mxu1 %vm3347_vm13, %v6448_v14 }
 0x97e   : > { %v6449_v37 = vmax.f32 %v6403_v46, 0.0  ;;  %v6418_v21 = vadd.f32 %v7644_v39, %v10743_v54 }
 0x97f   : > { %v6412_v10 = vpop.f32.mrf.mxu0 }
 0x980   : > { %v6413_v16 = vadd.f32 %v6412_v10, %v10743_v54  ;;  %7689 = vmatprep.mubr.msk.f32.mxu1 %vm3347_vm13, %v6449_v37  ;;  %v6452_v41 = vmax.f32 %v6418_v21, 0.0  ;;  %v11042_v21 = vld [vmem:[#allocation9_spill] sm:$0xff] }
 0x981   : > { %7690 = vmatmul.mubr.msk.f32.gmra.mxu1 %vm3347_vm13, %v6450_v31 }
 0x982   : > { %v6451_v13 = vmax.f32 %v6413_v16, 0.0 }
 0x984   : > { %7692 = vmatprep.mubr.msk.f32.mxu1 %vm3347_vm13, %v6451_v13 }
 0x985   : > { %7693 = vmatmul.mubr.msk.f32.gmra.mxu1 %vm3347_vm13, %v6452_v41 }
 0xa09   : > { %v7649_v38 = vpop.f32.mrf.mxu1 }
 0xa0a   : > { %v6629_v19 = vadd.f32 %v7649_v38, %v10812_v49  ;;  %v11043_v38 = vld [vmem:[#allocation8_spill] sm:$0xff] }
 0xa0b   : > { %v6623_v28 = vpop.f32.mrf.mxu1 }
 0xa0c   : > { %v6783_v54 = vmax.f32 %v6629_v19, 0.0  ;;  %v6624_v24 = vadd.f32 %v10812_v49, %v6623_v28 }
 0xa0d   : > { %v7652_v40 = vpop.f32.mrf.mxu1 }
 0xa0e   : > { %v6815_v9 = vadd.f32 %v6783_v54, %v7857_v3  ;;  %v6782_v52 = vmax.f32 %v6624_v24, 0.0  ;;  %v6639_v23 = vadd.f32 %v7652_v40, %v10812_v49  ;;  %v11044_v40 = vld [vmem:[#allocation11_spill] sm:$0xff] }
 0xa0f   : > { %v6633_v53 = vpop.f32.mrf.mxu1 }
 0xa10   : > { %6847 = vst.msk [vmem:[%s10821_s17 + $0x8] sm:$0xff] %vm570_vm0, %v6815_v9  ;;  %v6814_v12 = vadd.f32 %v6782_v52, %v7846_v2  ;;  %v6785_v17 = vmax.f32 %v6639_v23, 0.0  ;;  %v6634_v29 = vadd.f32 %v10812_v49, %v6633_v53 }
 0xa11   : > { %v7655_v20 = vpop.f32.mrf.mxu1 }
 0xa12   : > { %6846 = vst.msk [vmem:[%s10821_s17] sm:$0xff] %vm570_vm0, %v6814_v12  ;;  %v6817_v48 = vadd.f32 %v6785_v17, %v7843_v1  ;;  %v6784_v32 = vmax.f32 %v6634_v29, 0.0  ;;  %v6649_v3 = vadd.f32 %v7655_v20, %v10812_v49  ;;  %v11045_v12 = vld [vmem:[#allocation10_spill] sm:$0xff] }
 0xa13   : > { %v6643_v8 = vpop.f32.mrf.mxu1 }
 0xa14   : > { %6849 = vst.msk [vmem:[%s10821_s17 + $0x18] sm:$0xff] %vm570_vm0, %v6817_v48  ;;  %v6816_v18 = vadd.f32 %v6784_v32, %v7840_v0  ;;  %v6787_v57 = vmax.f32 %v6649_v3, 0.0  ;;  %v6644_v2 = vadd.f32 %v10812_v49, %v6643_v8  ;;  %v11046_v32 = vld [vmem:[#allocation13_spill] sm:$0xff] }
 0xa15   : > { %v7658_v60 = vpop.f32.mrf.mxu1 }
 0xa16   : > { %6848 = vst.msk [vmem:[%s10821_s17 + $0x10] sm:$0xff] %vm570_vm0, %v6816_v18  ;;  %v6819_v26 = vadd.f32 %v6787_v57, %v7865_v5  ;;  %v6786_v61 = vmax.f32 %v6644_v2, 0.0  ;;  %v6659_v1 = vadd.f32 %v7658_v60, %v10812_v49  ;;  %v11047_v2 = vld [vmem:[#allocation12_spill] sm:$0xff] }
 0xa17   : > { %v6653_v45 = vpop.f32.mrf.mxu1 }
 0xa18   : > { %6851 = vst.msk [vmem:[%s10821_s17 + $0x28] sm:$0xff] %vm570_vm0, %v6819_v26  ;;  %v6818_v25 = vadd.f32 %v6786_v61, %v7862_v4  ;;  %v6789_v11 = vmax.f32 %v6659_v1, 0.0  ;;  %v6654_v0 = vadd.f32 %v10812_v49, %v6653_v45  ;;  %v11048_v45 = vld [vmem:[#allocation15_spill] sm:$0xff] }
 0xa19   : > { %v7661_v22 = vpop.f32.mrf.mxu1 }
 0xa1a   : > { %6850 = vst.msk [vmem:[%s10821_s17 + $0x20] sm:$0xff] %vm570_vm0, %v6818_v25  ;;  %v6821_v58 = vadd.f32 %v6789_v11, %v7877_v7  ;;  %v6788_v33 = vmax.f32 %v6654_v0, 0.0  ;;  %v6669_v5 = vadd.f32 %v7661_v22, %v10812_v49 }
 0xa1b   : > { %v6663_v30 = vpop.f32.mrf.mxu1 }
 0xa1c   : > { %6853 = vst.msk [vmem:[%s10821_s17 + $0x38] sm:$0xff] %vm570_vm0, %v6821_v58  ;;  %v6820_v47 = vadd.f32 %v6788_v33, %v7874_v6  ;;  %v6791_v44 = vmax.f32 %v6669_v5, 0.0  ;;  %v6664_v4 = vadd.f32 %v10812_v49, %v6663_v30  ;;  %v11049_v58 = vld [vmem:[#allocation14_spill] sm:$0xff] }
 0xa1d   : > { %v7664_v42 = vpop.f32.mrf.mxu1 }
 0xa1e   : > { %6852 = vst.msk [vmem:[%s10821_s17 + $0x30] sm:$0xff] %vm570_vm0, %v6820_v47  ;;  %v6823_v63 = vadd.f32 %v6791_v44, %v11038_v62  ;;  %v6790_v50 = vmax.f32 %v6664_v4, 0.0  ;;  %v6679_v7 = vadd.f32 %v7664_v42, %v10812_v49  ;;  %v11050_v44 = vld [vmem:[#allocation17_spill] sm:$0xff] }
 0xa1f   : > { %v6673_v34 = vpop.f32.mrf.mxu1 }
 0xa20   : > { %6855 = vst.msk [vmem:[%s10821_s17 + $0x48] sm:$0xff] %vm570_vm0, %v6823_v63  ;;  %v6822_v35 = vadd.f32 %v6790_v50, %v11039_v51  ;;  %v6793_v59 = vmax.f32 %v6679_v7, 0.0  ;;  %v6674_v6 = vadd.f32 %v10812_v49, %v6673_v34  ;;  %v11051_v50 = vld [vmem:[#allocation16_spill] sm:$0xff] }
 0xa21   : > { %v7667_v15 = vpop.f32.mrf.mxu1 }
 0xa22   : > { %6854 = vst.msk [vmem:[%s10821_s17 + $0x40] sm:$0xff] %vm570_vm0, %v6822_v35  ;;  %v6825_v27 = vadd.f32 %v6793_v59, %v11040_v55  ;;  %v6792_v43 = vmax.f32 %v6674_v6, 0.0  ;;  %v6689_v14 = vadd.f32 %v7667_v15, %v10812_v49  ;;  %v11052_v59 = vld [vmem:[#allocation19_spill] sm:$0xff] }
 0xa23   : > { %v6683_v56 = vpop.f32.mrf.mxu1 }
 0xa24   : > { %6857 = vst.msk [vmem:[%s10821_s17 + $0x58] sm:$0xff] %vm570_vm0, %v6825_v27  ;;  %v6824_v46 = vadd.f32 %v6792_v43, %v11041_v36  ;;  %v6795_v39 = vmax.f32 %v6689_v14, 0.0  ;;  %v6684_v37 = vadd.f32 %v10812_v49, %v6683_v56  ;;  %v11053_v43 = vld [vmem:[#allocation18_spill] sm:$0xff] }
 0xa25   : > { %v7670_v31 = vpop.f32.mrf.mxu1 }
 0xa26   : > { %6856 = vst.msk [vmem:[%s10821_s17 + $0x50] sm:$0xff] %vm570_vm0, %v6824_v46  ;;  %v6827_v10 = vadd.f32 %v6795_v39, %v11042_v21  ;;  %v6794_v16 = vmax.f32 %v6684_v37, 0.0  ;;  %v6699_v13 = vadd.f32 %v7670_v31, %v10812_v49  ;;  %v11054_v39 = vld [vmem:[#allocation21_spill] sm:$0xff] }
 0xa27   : > { %v6693_v41 = vpop.f32.mrf.mxu1 }
 0xa28   : > { %6859 = vst.msk [vmem:[%s10821_s17 + $0x68] sm:$0xff] %vm570_vm0, %v6827_v10  ;;  %v6826_v19 = vadd.f32 %v6794_v16, %v11043_v38  ;;  %v6797_v28 = vmax.f32 %v6699_v13, 0.0  ;;  %v6694_v54 = vadd.f32 %v10812_v49, %v6693_v41  ;;  %v11055_v16 = vld [vmem:[#allocation20_spill] sm:$0xff] }
 0xa29   : > { %v7673_v24 = vpop.f32.mrf.mxu1 }
 0xa2a   : > { %6858 = vst.msk [vmem:[%s10821_s17 + $0x60] sm:$0xff] %vm570_vm0, %v6826_v19  ;;  %v6829_v9 = vadd.f32 %v6797_v28, %v11044_v40  ;;  %v6796_v52 = vmax.f32 %v6694_v54, 0.0  ;;  %v6709_v23 = vadd.f32 %v7673_v24, %v10812_v49  ;;  %v11056_v28 = vld [vmem:[#allocation23_spill] sm:$0xff] }
 0xa2b   : > { %v6703_v53 = vpop.f32.mrf.mxu1 }
 0xa2c   : > { %6861 = vst.msk [vmem:[%s10821_s17 + $0x78] sm:$0xff] %vm570_vm0, %v6829_v9  ;;  %v6828_v17 = vadd.f32 %v6796_v52, %v11045_v12  ;;  %v6799_v29 = vmax.f32 %v6709_v23, 0.0  ;;  %v6704_v20 = vadd.f32 %v10812_v49, %v6703_v53  ;;  %v11057_v52 = vld [vmem:[#allocation22_spill] sm:$0xff] }
 0xa2d   : > { %v7676_v48 = vpop.f32.mrf.mxu1 }
 0xa2e   : > { %6860 = vst.msk [vmem:[%s10821_s17 + $0x70] sm:$0xff] %vm570_vm0, %v6828_v17  ;;  %v6831_v3 = vadd.f32 %v6799_v29, %v11046_v32  ;;  %v6798_v8 = vmax.f32 %v6704_v20, 0.0  ;;  %v6719_v18 = vadd.f32 %v7676_v48, %v10812_v49  ;;  %v11058_v29 = vld [vmem:[#allocation25_spill] sm:$0xff] }
 0xa2f   : > { %v6713_v57 = vpop.f32.mrf.mxu1 }
 0xa30   : > { %6863 = vst.msk [vmem:[%s10821_s17 + $0x88] sm:$0xff] %vm570_vm0, %v6831_v3  ;;  %v6830_v60 = vadd.f32 %v6798_v8, %v11047_v2  ;;  %v6801_v26 = vmax.f32 %v6719_v18, 0.0  ;;  %v6714_v61 = vadd.f32 %v10812_v49, %v6713_v57  ;;  %v11059_v8 = vld [vmem:[#allocation24_spill] sm:$0xff] }
 0xa31   : > { %v7679_v1 = vpop.f32.mrf.mxu1 }
 0xa32   : > { %6862 = vst.msk [vmem:[%s10821_s17 + $0x80] sm:$0xff] %vm570_vm0, %v6830_v60  ;;  %v6833_v25 = vadd.f32 %v6801_v26, %v11048_v45  ;;  %v6800_v11 = vmax.f32 %v6714_v61, 0.0  ;;  %v6729_v0 = vadd.f32 %v7679_v1, %v10812_v49  ;;  %v11060_v60 = vld [vmem:[#allocation27_spill] sm:$0xff]  ;;  %v11061_v1 = vld [vmem:[#allocation26_spill] sm:$0xff] }
 0xa33   : > { %v6723_v22 = vpop.f32.mrf.mxu1 }
 0xa34   : > { %6865 = vst.msk [vmem:[%s10821_s17 + $0x98] sm:$0xff] %vm570_vm0, %v6833_v25  ;;  %v6832_v33 = vadd.f32 %v6800_v11, %v11049_v58  ;;  %v6803_v5 = vmax.f32 %v6729_v0, 0.0  ;;  %v6724_v30 = vadd.f32 %v10812_v49, %v6723_v22 }
 0xa35   : > { %v7682_v47 = vpop.f32.mrf.mxu1 }
 0xa36   : > { %6864 = vst.msk [vmem:[%s10821_s17 + $0x90] sm:$0xff] %vm570_vm0, %v6832_v33  ;;  %v6835_v4 = vadd.f32 %v6803_v5, %v11050_v44  ;;  %v6802_v42 = vmax.f32 %v6724_v30, 0.0  ;;  %v6739_v62 = vadd.f32 %v7682_v47, %v10812_v49 }
 0xa37   : > { %v6733_v63 = vpop.f32.mrf.mxu1 }
 0xa38   : > { %6867 = vst.msk [vmem:[%s10821_s17 + $0xa8] sm:$0xff] %vm570_vm0, %v6835_v4  ;;  %v6834_v7 = vadd.f32 %v6802_v42, %v11051_v50  ;;  %v6805_v34 = vmax.f32 %v6739_v62, 0.0  ;;  %v6734_v51 = vadd.f32 %v10812_v49, %v6733_v63 }
 0xa39   : > { %v7685_v35 = vpop.f32.mrf.mxu1 }
 0xa3a   : > { %6866 = vst.msk [vmem:[%s10821_s17 + $0xa0] sm:$0xff] %vm570_vm0, %v6834_v7  ;;  %v6837_v6 = vadd.f32 %v6805_v34, %v11052_v59  ;;  %v6804_v15 = vmax.f32 %v6734_v51, 0.0  ;;  %v6749_v55 = vadd.f32 %v7685_v35, %v10812_v49 }
 0xa3b   : > { %v6743_v27 = vpop.f32.mrf.mxu1 }
 0xa3c   : > { %6869 = vst.msk [vmem:[%s10821_s17 + $0xb8] sm:$0xff] %vm570_vm0, %v6837_v6  ;;  %v6836_v14 = vadd.f32 %v6804_v15, %v11053_v43  ;;  %v6807_v56 = vmax.f32 %v6749_v55, 0.0  ;;  %v6744_v36 = vadd.f32 %v10812_v49, %v6743_v27 }
 0xa3d   : > { %v7688_v46 = vpop.f32.mrf.mxu1 }
 0xa3e   : > { %6868 = vst.msk [vmem:[%s10821_s17 + $0xb0] sm:$0xff] %vm570_vm0, %v6836_v14  ;;  %v6839_v37 = vadd.f32 %v6807_v56, %v11054_v39  ;;  %v6806_v31 = vmax.f32 %v6744_v36, 0.0  ;;  %v6759_v21 = vadd.f32 %v7688_v46, %v10812_v49 }
 0xa3f   : > { %v6753_v10 = vpop.f32.mrf.mxu1 }
 0xa40   : > { %6871 = vst.msk [vmem:[%s10821_s17 + $0xc8] sm:$0xff] %vm570_vm0, %v6839_v37  ;;  %v6838_v13 = vadd.f32 %v6806_v31, %v11055_v16  ;;  %v6809_v41 = vmax.f32 %v6759_v21, 0.0  ;;  %v6754_v38 = vadd.f32 %v10812_v49, %v6753_v10 }
 0xa41   : > { %v7691_v19 = vpop.f32.mrf.mxu1 }
 0xa42   : > { %6870 = vst.msk [vmem:[%s10821_s17 + $0xc0] sm:$0xff] %vm570_vm0, %v6838_v13  ;;  %v6841_v54 = vadd.f32 %v6809_v41, %v11056_v28  ;;  %v6808_v24 = vmax.f32 %v6754_v38, 0.0  ;;  %v6769_v40 = vadd.f32 %v7691_v19, %v10812_v49 }
 0xa43   : > { %v6763_v9 = vpop.f32.mrf.mxu1 }
 0xa44   : > { %6873 = vst.msk [vmem:[%s10821_s17 + $0xd8] sm:$0xff] %vm570_vm0, %v6841_v54  ;;  %v6840_v23 = vadd.f32 %v6808_v24, %v11057_v52  ;;  %v6811_v53 = vmax.f32 %v6769_v40, 0.0  ;;  %v6764_v12 = vadd.f32 %v10812_v49, %v6763_v9 }
 0xa45   : > { %v7694_v17 = vpop.f32.mrf.mxu1 }
 0xa46   : > { %6872 = vst.msk [vmem:[%s10821_s17 + $0xd0] sm:$0xff] %vm570_vm0, %v6840_v23  ;;  %v6843_v20 = vadd.f32 %v6811_v53, %v11058_v29  ;;  %v6810_v48 = vmax.f32 %v6764_v12, 0.0  ;;  %v6779_v32 = vadd.f32 %v7694_v17, %v10812_v49 }
 0xa47   : > { %v6773_v3 = vpop.f32.mrf.mxu1 }
 0xa48   : > { %6875 = vst.msk [vmem:[%s10821_s17 + $0xe8] sm:$0xff] %vm570_vm0, %v6843_v20  ;;  %v6842_v18 = vadd.f32 %v6810_v48, %v11059_v8  ;;  %v6813_v57 = vmax.f32 %v6779_v32, 0.0  ;;  %v6774_v2 = vadd.f32 %v10812_v49, %v6773_v3 }
 0xa4a   : > { %6874 = vst.msk [vmem:[%s10821_s17 + $0xe0] sm:$0xff] %vm570_vm0, %v6842_v18  ;;  %v6845_v26 = vadd.f32 %v6813_v57, %v11060_v60  ;;  %v6812_v61 = vmax.f32 %v6774_v2, 0.0 }
 0xa4c   : > { %6877 = vst.msk [vmem:[%s10821_s17 + $0xf8] sm:$0xff] %vm570_vm0, %v6845_v26  ;;  %v6844_v45 = vadd.f32 %v6812_v61, %v11061_v1 }
 0xa4e   : > { %6876 = vst.msk [vmem:[%s10821_s17 + $0xf0] sm:$0xff] %vm570_vm0, %v6844_v45 }
 0xa4f PF: > { %s26_s21 = sadd.s32 1, %s7724_s21  }
 0xa50   : > { %p23_p4 = scmp.ge.s32.totalorder %s26_s21, 4  }
 0xa52   :  { %25 = sbr.rel (!%p23_p4) target bundleno = 2 (0x2), region = 120 }

</bundles_post_ra>
